<compile_context>
chip_gen: v7x
topology: tpu7x:2x2x1
jax: 0.10.0
libtpu: 0.0.40
codegen_flags: <defaults>
</compile_context>

<pallas_src>
import functools

import jax
import jax.numpy as jnp
from jax.experimental import pallas as pl
from jax.experimental.pallas import tpu as pltpu


def _round_up(n, m):
    return ((n + m - 1) // m) * m


def _choose_row_tile(batch, requested):
    """Largest 8-aligned row tile <= requested that still leaves >= 2 grid steps
    (so dimension_semantics=("parallel",) can shard across v7x's two TensorCores)."""
    rt = min(_round_up(requested, 8), _round_up(batch, 8))
    if batch > 8 and _round_up(batch, rt) // rt < 2:
        rt = _round_up(-(-batch // 2), 8)
    return rt


# ---------------------------------------------------------------------------
# Kernel
# ---------------------------------------------------------------------------
def vae_kernel(x_ref, eps_ref,
               w1_ref, b1_ref, wml_ref, bml_ref,
               wd1_ref, bd1_ref, wd2_ref, bd2_ref,
               out_ref, ml_ref, *, latent_p):
    cdt = w1_ref.dtype                        # MXU operand dtype (f32 or bf16)

    # ---- encoder ----
    x = x_ref[...].astype(cdt)                                            # [rt, In_p]
    h = jnp.dot(x, w1_ref[...], preferred_element_type=jnp.float32) + b1_ref[...]
    h = jnp.maximum(h, 0.0)                                               # ReLU (f32)

    # fused mean/logvar head: single MXU call, packed [rt, 2*L_p]
    ml = jnp.dot(h.astype(cdt), wml_ref[...],
                 preferred_element_type=jnp.float32) + bml_ref[...]
    ml_ref[...] = ml                                                      # packed (mean | logvar)
    mean = ml[:, :latent_p]                                               # [rt, L_p]
    logvar = ml[:, latent_p:]                                             # [rt, L_p]

    # ---- reparameterization (sample-major eps; broadcast over leading dim, no repeat) ----
    std = jnp.exp(0.5 * logvar)                                           # f32 (v5e-safe)
    eps3 = eps_ref[...]                                                   # [S, rt, L_p]
    S, rt, L_p = eps3.shape
    z = (mean[None, :, :] + std[None, :, :] * eps3).reshape(S * rt, L_p)  # tile-aligned merge

    # ---- decoder ----
    h2 = jnp.dot(z.astype(cdt), wd1_ref[...],
                 preferred_element_type=jnp.float32) + bd1_ref[...]
    h2 = jnp.maximum(h2, 0.0)
    o = jnp.dot(h2.astype(cdt), wd2_ref[...],
                preferred_element_type=jnp.float32) + bd2_ref[...]
    o = jax.nn.sigmoid(o)                                                 # [S*rt, In_p]
    out_ref[...] = o.reshape(S, rt, o.shape[-1])                          # lane-dense store


# ---------------------------------------------------------------------------
# One-time parameter preprocessing (hoisted out of the forward)
# ---------------------------------------------------------------------------
def prepare_params(params, compute_dtype=jnp.float32):
    """Pad weights to lane-dense (multiple-of-128) shapes, fuse mean/logvar head,
    cast matmul weights to the MXU compute dtype.  Call ONCE at init, not per step."""
    (w1, b1, wm, bm, wlv, blv, wd1, bd1, wd2, bd2) = params
    In, Hd = w1.shape
    L = wm.shape[1]
    In_p, Hd_p, L_p = (_round_up(d, 128) for d in (In, Hd, L))

    def padw(a, rows, cols):
        a = a.astype(jnp.float32)
        return jnp.pad(a, ((0, rows - a.shape[0]), (0, cols - a.shape[1])))

    w1_p = padw(w1, In_p, Hd_p).astype(compute_dtype)
    b1_p = padw(b1, 1, Hd_p)                                  # biases stay f32 (added to f32 acc)
    wml = (jnp.zeros((Hd_p, 2 * L_p), jnp.float32)
           .at[:Hd, :L].set(wm)
           .at[:Hd, L_p:L_p + L].set(wlv)).astype(compute_dtype)
    bml = (jnp.zeros((1, 2 * L_p), jnp.float32)
           .at[:, :L].set(bm)
           .at[:, L_p:L_p + L].set(blv))
    wd1_p = padw(wd1, L_p, Hd_p).astype(compute_dtype)
    bd1_p = padw(bd1, 1, Hd_p)
    wd2_p = padw(wd2, Hd_p, In_p).astype(compute_dtype)
    bd2_p = padw(bd2, 1, In_p)

    return dict(
        weights=(w1_p, b1_p, wml, bml, wd1_p, bd1_p, wd2_p, bd2_p),
        dims=(In, Hd, L, In_p, Hd_p, L_p),
        compute_dtype=compute_dtype,
    )


# ---------------------------------------------------------------------------
# Forward wrapper
# ---------------------------------------------------------------------------
def vae_forward(x_nchw, eps, prepared, *, row_tile=128,
                vmem_limit_bytes=48 * 1024 * 1024):
    """x_nchw: [B, C, H, W]; eps: [B, S, latent]; prepared: output of prepare_params."""
    In, Hd, L, In_p, Hd_p, L_p = prepared["dims"]
    w1_p, b1_p, wml, bml, wd1_p, bd1_p, wd2_p, bd2_p = prepared["weights"]

    B = x_nchw.shape[0]
    S = eps.shape[1]

    x = x_nchw.reshape(B, -1).astype(jnp.float32)             # flatten(start_dim=1)
    assert x.shape[1] == In and eps.shape == (B, S, L)

    rt = _choose_row_tile(B, row_tile)
    B_p = _round_up(B, rt)

    x_p = jnp.pad(x, ((0, B_p - B), (0, In_p - In)))
    # sample-major eps layout [S, B_p, L_p]: the kernel broadcasts mean/std over the
    # leading dim instead of repeating rows across sublanes.
    eps_sm = jnp.transpose(eps.astype(jnp.float32), (1, 0, 2))
    eps_p = jnp.pad(eps_sm, ((0, 0), (0, B_p - B), (0, L_p - L)))

    grid = (B_p // rt,)
    kernel = functools.partial(vae_kernel, latent_p=L_p)
    const = lambda i: (0, 0)

    def make_in_specs(single_buffer_weights):
        # Resident weights never change across grid steps -> single buffer frees VMEM.
        wkw = dict(pipeline_mode=pl.Buffered(1)) if single_buffer_weights else {}
        return [
            pl.BlockSpec((rt, In_p), lambda i: (i, 0)),            # x tile
            pl.BlockSpec((S, rt, L_p), lambda i: (0, i, 0)),       # eps tile (sample-major)
            pl.BlockSpec((In_p, Hd_p), const, **wkw),              # w1
            pl.BlockSpec((1, Hd_p), const, **wkw),                 # b1
            pl.BlockSpec((Hd_p, 2 * L_p), const, **wkw),           # wml (fused mean|logvar)
            pl.BlockSpec((1, 2 * L_p), const, **wkw),              # bml
            pl.BlockSpec((L_p, Hd_p), const, **wkw),               # wd1
            pl.BlockSpec((1, Hd_p), const, **wkw),                 # bd1
            pl.BlockSpec((Hd_p, In_p), const, **wkw),              # wd2
            pl.BlockSpec((1, In_p), const, **wkw),                 # bd2
        ]

    out_specs = (
        pl.BlockSpec((S, rt, In_p), lambda i: (0, i, 0)),          # decoder output slab
        pl.BlockSpec((rt, 2 * L_p), lambda i: (i, 0)),             # packed mean|logvar
    )
    out_shapes = (
        jax.ShapeDtypeStruct((S, B_p, In_p), jnp.float32),
        jax.ShapeDtypeStruct((B_p, 2 * L_p), jnp.float32),
    )

    operands = (x_p, eps_p, w1_p, b1_p, wml, bml, wd1_p, bd1_p, wd2_p, bd2_p)
    in_bytes = sum(int(a.size) * a.dtype.itemsize for a in operands)
    out_bytes = (S * B_p * In_p + B_p * 2 * L_p) * 4
    cost = pl.CostEstimate(
        flops=2 * B_p * (In_p * Hd_p + Hd_p * 2 * L_p)
              + 2 * B_p * S * (L_p * Hd_p + Hd_p * In_p),
        transcendentals=B_p * L_p + B_p * S * In_p,
        bytes_accessed=in_bytes + out_bytes,
    )

    def run(single_buffer_weights):
        return pl.pallas_call(
            kernel,
            out_shape=out_shapes,
            grid=grid,
            in_specs=make_in_specs(single_buffer_weights),
            out_specs=out_specs,
            compiler_params=pltpu.CompilerParams(
                dimension_semantics=("parallel",),
                vmem_limit_bytes=vmem_limit_bytes),
            cost_estimate=cost,
        )(*operands)

    try:
        out_p, ml_p = run(True)       # single-buffered resident weights
    except Exception:
        # Fallback for builds where pipeline_mode=pl.Buffered(1) is not supported on
        # the TPU pallas_call path; identical math with default double-buffered weights.
        out_p, ml_p = run(False)

    # unpad / reorder in the wrapper (not in-kernel)
    out = jnp.transpose(out_p[:, :B, :In], (1, 0, 2))          # [B, S, In]
    mean = ml_p[:B, :L]
    logvar = ml_p[:B, L_p:L_p + L]
    return out, mean, logvar


# ---------------------------------------------------------------------------
# Init + pure-JAX reference
# ---------------------------------------------------------------------------
def init_params(key, input_size, hidden_size, latent_size):
    """torch.nn.Linear-style init (uniform +/- 1/sqrt(fan_in)); weights [in, out]."""
    ks = jax.random.split(key, 10)

    def lin(kw, kb, fan_in, fan_out):
        bound = 1.0 / jnp.sqrt(fan_in)
        w = jax.random.uniform(kw, (fan_in, fan_out), jnp.float32, -bound, bound)
        b = jax.random.uniform(kb, (1, fan_out), jnp.float32, -bound, bound)
        return w, b

    w1, b1 = lin(ks[0], ks[1], input_size, hidden_size)       # encoder.fc1
    wm, bm = lin(ks[2], ks[3], hidden_size, latent_size)      # encoder.fc_mean
    wlv, blv = lin(ks[4], ks[5], hidden_size, latent_size)    # encoder.fc_logvar
    wd1, bd1 = lin(ks[6], ks[7], latent_size, hidden_size)    # decoder.fc1
    wd2, bd2 = lin(ks[8], ks[9], hidden_size, input_size)     # decoder.fc2
    return (w1, b1, wm, bm, wlv, blv, wd1, bd1, wd2, bd2)


def vae_reference(x_nchw, eps, params):
    (w1, b1, wm, bm, wlv, blv, wd1, bd1, wd2, bd2) = params
    B = x_nchw.shape[0]
    x = x_nchw.reshape(B, -1)
    hp = jax.lax.Precision.HIGHEST
    h = jnp.maximum(jnp.dot(x, w1, precision=hp) + b1, 0.0)
    mean = jnp.dot(h, wm, precision=hp) + bm
    logvar = jnp.dot(h, wlv, precision=hp) + blv
    z = mean[:, None, :] + jnp.exp(0.5 * logvar)[:, None, :] * eps
    h2 = jnp.maximum(jnp.einsum('bsl,lh->bsh', z, wd1, precision=hp) + bd1, 0.0)
    out = jax.nn.sigmoid(jnp.einsum('bsh,hi->bsi', h2, wd2, precision=hp) + bd2)
    return out, mean, logvar


if __name__ == "__main__":
    # TODO(synk): torch.randn inside VAE.forward is replaced by an explicit eps input
    # (deterministic jax.random draw) — no in-kernel RNG is needed for the forward math.
    B, C, H, W = 16, 4, 16, 16
    input_size = C * H * W          # 1024 after flatten
    hidden_size = 256
    latent_size = 64                # exercises the pad-to-128 path
    num_samples = 4

    key = jax.random.PRNGKey(0)
    k_x, k_eps, k_p = jax.random.split(key, 3)

    x = jax.random.normal(k_x, (B, C, H, W), jnp.float32)
    eps = jax.random.normal(k_eps, (B, num_samples, latent_size), jnp.float32)
    params = init_params(k_p, input_size, hidden_size, latent_size)

    out_r, mean_r, logvar_r = vae_reference(x, eps, params)

    # --- f32 MXU path (bit-faithful to the torch f32 module) ---
    prep_f32 = prepare_params(params, compute_dtype=jnp.float32)
    out, mean, logvar = vae_forward(x, eps, prep_f32)
    jax.block_until_ready((out, mean, logvar))
    assert out.shape == (B, num_samples, input_size)
    assert mean.shape == (B, latent_size) and logvar.shape == (B, latent_size)
    assert jnp.allclose(out, out_r, atol=1e-4, rtol=1e-4)
    assert jnp.allclose(mean, mean_r, atol=1e-4, rtol=1e-4)
    assert jnp.allclose(logvar, logvar_r, atol=1e-4, rtol=1e-4)

    # --- bf16 MXU path (f32 accumulation + f32 elementwise): production default ---
    prep_bf16 = prepare_params(params, compute_dtype=jnp.bfloat16)
    out_b, mean_b, logvar_b = vae_forward(x, eps, prep_bf16)
    jax.block_until_ready((out_b, mean_b, logvar_b))
    assert jnp.allclose(out_b, out_r, atol=5e-2, rtol=5e-2)
    assert jnp.allclose(mean_b, mean_r, atol=5e-2, rtol=5e-2)
    assert jnp.allclose(logvar_b, logvar_r, atol=5e-2, rtol=5e-2)

    print("KERNEL_OK")
</pallas_src>

<mosaic_0001>
module attributes {stable_mosaic.version = 11 : i64} {
  func.func @vae_kernel(%arg0: i32, %arg1: memref<8x1024xf32, #tpu.memory_space<vmem>>, %arg2: memref<4x8x128xf32, #tpu.memory_space<vmem>>, %arg3: memref<1024x256xf32, #tpu.memory_space<vmem>>, %arg4: memref<1x256xf32, #tpu.memory_space<vmem>>, %arg5: memref<256x256xf32, #tpu.memory_space<vmem>>, %arg6: memref<1x256xf32, #tpu.memory_space<vmem>>, %arg7: memref<128x256xf32, #tpu.memory_space<vmem>>, %arg8: memref<1x256xf32, #tpu.memory_space<vmem>>, %arg9: memref<256x1024xf32, #tpu.memory_space<vmem>>, %arg10: memref<1x1024xf32, #tpu.memory_space<vmem>>, %arg11: memref<4x8x1024xf32, #tpu.memory_space<vmem>>, %arg12: memref<8x256xf32, #tpu.memory_space<vmem>>) attributes {dimension_semantics = [#tpu.dimension_semantics<parallel>], iteration_bounds = array<i64: 2>, scalar_prefetch = 0 : i64, scratch_operands = 0 : i64, tpu.core_type = #tpu.core_type<tc>, window_params = [{transform_indices = @transform_0, window_bounds = array<i64: 8, 1024>}, {transform_indices = @transform_1, window_bounds = array<i64: 4, 8, 128>}, {pipeline_mode = #tpu.pipeline_mode<synchronous>, transform_indices = @transform_2, window_bounds = array<i64: 1024, 256>}, {pipeline_mode = #tpu.pipeline_mode<synchronous>, transform_indices = @transform_3, window_bounds = array<i64: 1, 256>}, {pipeline_mode = #tpu.pipeline_mode<synchronous>, transform_indices = @transform_4, window_bounds = array<i64: 256, 256>}, {pipeline_mode = #tpu.pipeline_mode<synchronous>, transform_indices = @transform_5, window_bounds = array<i64: 1, 256>}, {pipeline_mode = #tpu.pipeline_mode<synchronous>, transform_indices = @transform_6, window_bounds = array<i64: 128, 256>}, {pipeline_mode = #tpu.pipeline_mode<synchronous>, transform_indices = @transform_7, window_bounds = array<i64: 1, 256>}, {pipeline_mode = #tpu.pipeline_mode<synchronous>, transform_indices = @transform_8, window_bounds = array<i64: 256, 1024>}, {pipeline_mode = #tpu.pipeline_mode<synchronous>, transform_indices = @transform_9, window_bounds = array<i64: 1, 1024>}, {transform_indices = @transform_10, window_bounds = array<i64: 4, 8, 1024>}, {transform_indices = @transform_11, window_bounds = array<i64: 8, 256>}]} {
    %c0 = arith.constant 0 : index
    %c0_0 = arith.constant 0 : index
    %0 = vector.load %arg1[%c0, %c0_0] : memref<8x1024xf32, #tpu.memory_space<vmem>>, vector<8x1024xf32>
    %c0_1 = arith.constant 0 : index
    %c0_2 = arith.constant 0 : index
    %1 = vector.load %arg3[%c0_1, %c0_2] : memref<1024x256xf32, #tpu.memory_space<vmem>>, vector<1024x256xf32>
    %cst = arith.constant dense<0.000000e+00> : vector<8x256xf32>
    %2 = tpu.matmul %0, %1, %cst {dimension_numbers = #tpu.dot_dimension_numbers<[1], [0], [0], [1], [0, 0, 1, 1], [], []>} : vector<8x1024xf32>, vector<1024x256xf32>, vector<8x256xf32> -> vector<8x256xf32>
    %c0_3 = arith.constant 0 : index
    %c0_4 = arith.constant 0 : index
    %3 = vector.load %arg4[%c0_3, %c0_4] : memref<1x256xf32, #tpu.memory_space<vmem>>, vector<1x256xf32>
    %4 = vector.broadcast %3 : vector<1x256xf32> to vector<8x256xf32>
    %5 = arith.addf %2, %4 : vector<8x256xf32>
    %cst_5 = arith.constant 0.000000e+00 : f32
    %6 = vector.broadcast %cst_5 : f32 to vector<8x256xf32>
    %7 = arith.maximumf %5, %6 : vector<8x256xf32>
    %c0_6 = arith.constant 0 : index
    %c0_7 = arith.constant 0 : index
    %8 = vector.load %arg5[%c0_6, %c0_7] : memref<256x256xf32, #tpu.memory_space<vmem>>, vector<256x256xf32>
    %cst_8 = arith.constant dense<0.000000e+00> : vector<8x256xf32>
    %9 = tpu.matmul %7, %8, %cst_8 {dimension_numbers = #tpu.dot_dimension_numbers<[1], [0], [0], [1], [0, 0, 1, 1], [], []>} : vector<8x256xf32>, vector<256x256xf32>, vector<8x256xf32> -> vector<8x256xf32>
    %c0_9 = arith.constant 0 : index
    %c0_10 = arith.constant 0 : index
    %10 = vector.load %arg6[%c0_9, %c0_10] : memref<1x256xf32, #tpu.memory_space<vmem>>, vector<1x256xf32>
    %11 = vector.broadcast %10 : vector<1x256xf32> to vector<8x256xf32>
    %12 = arith.addf %9, %11 : vector<8x256xf32>
    %c0_11 = arith.constant 0 : index
    %c0_12 = arith.constant 0 : index
    %13 = vector.load %arg12[%c0_11, %c0_12] : memref<8x256xf32, #tpu.memory_space<vmem>>, vector<8x256xf32>
    tpu.vector_store %arg12[%c0_11, %c0_12], %12 {strides = array<i32>} : memref<8x256xf32, #tpu.memory_space<vmem>>, vector<8x256xf32>,
    %14 = vector.extract_strided_slice %12 {offsets = [0, 0], sizes = [8, 128], strides = [1, 1]} : vector<8x256xf32> to vector<8x128xf32>
    %15 = vector.extract_strided_slice %12 {offsets = [0, 128], sizes = [8, 128], strides = [1, 1]} : vector<8x256xf32> to vector<8x128xf32>
    %cst_13 = arith.constant 5.000000e-01 : f32
    %16 = vector.broadcast %cst_13 : f32 to vector<8x128xf32>
    %17 = arith.mulf %16, %15 : vector<8x128xf32>
    %18 = math.exp %17 : vector<8x128xf32>
    %c0_14 = arith.constant 0 : index
    %c0_15 = arith.constant 0 : index
    %c0_16 = arith.constant 0 : index
    %19 = vector.load %arg2[%c0_14, %c0_15, %c0_16] : memref<4x8x128xf32, #tpu.memory_space<vmem>>, vector<4x8x128xf32>
    %20 = vector.shape_cast %14 : vector<8x128xf32> to vector<1x8x128xf32>
    %21 = vector.shape_cast %18 : vector<8x128xf32> to vector<1x8x128xf32>
    %22 = vector.broadcast %21 : vector<1x8x128xf32> to vector<4x8x128xf32>
    %23 = arith.mulf %22, %19 : vector<4x8x128xf32>
    %24 = vector.broadcast %20 : vector<1x8x128xf32> to vector<4x8x128xf32>
    %25 = arith.addf %24, %23 : vector<4x8x128xf32>
    %26 = vector.shape_cast %25 : vector<4x8x128xf32> to vector<32x128xf32>
    %c0_17 = arith.constant 0 : index
    %c0_18 = arith.constant 0 : index
    %27 = vector.load %arg7[%c0_17, %c0_18] : memref<128x256xf32, #tpu.memory_space<vmem>>, vector<128x256xf32>
    %cst_19 = arith.constant dense<0.000000e+00> : vector<32x256xf32>
    %28 = tpu.matmul %26, %27, %cst_19 {dimension_numbers = #tpu.dot_dimension_numbers<[1], [0], [0], [1], [0, 0, 1, 1], [], []>} : vector<32x128xf32>, vector<128x256xf32>, vector<32x256xf32> -> vector<32x256xf32>
    %c0_20 = arith.constant 0 : index
    %c0_21 = arith.constant 0 : index
    %29 = vector.load %arg8[%c0_20, %c0_21] : memref<1x256xf32, #tpu.memory_space<vmem>>, vector<1x256xf32>
    %30 = vector.broadcast %29 : vector<1x256xf32> to vector<32x256xf32>
    %31 = arith.addf %28, %30 : vector<32x256xf32>
    %cst_22 = arith.constant 0.000000e+00 : f32
    %32 = vector.broadcast %cst_22 : f32 to vector<32x256xf32>
    %33 = arith.maximumf %31, %32 : vector<32x256xf32>
    %c0_23 = arith.constant 0 : index
    %c0_24 = arith.constant 0 : index
    %34 = vector.load %arg9[%c0_23, %c0_24] : memref<256x1024xf32, #tpu.memory_space<vmem>>, vector<256x1024xf32>
    %cst_25 = arith.constant dense<0.000000e+00> : vector<32x1024xf32>
    %35 = tpu.matmul %33, %34, %cst_25 {dimension_numbers = #tpu.dot_dimension_numbers<[1], [0], [0], [1], [0, 0, 1, 1], [], []>} : vector<32x256xf32>, vector<256x1024xf32>, vector<32x1024xf32> -> vector<32x1024xf32>
    %c0_26 = arith.constant 0 : index
    %c0_27 = arith.constant 0 : index
    %36 = vector.load %arg10[%c0_26, %c0_27] : memref<1x1024xf32, #tpu.memory_space<vmem>>, vector<1x1024xf32>
    %37 = vector.broadcast %36 : vector<1x1024xf32> to vector<32x1024xf32>
    %38 = arith.addf %35, %37 : vector<32x1024xf32>
    %39 = arith.negf %38 : vector<32x1024xf32>
    %40 = math.exp %39 : vector<32x1024xf32>
    %cst_28 = arith.constant 1.000000e+00 : f32
    %41 = vector.broadcast %cst_28 : f32 to vector<32x1024xf32>
    %42 = arith.addf %41, %40 : vector<32x1024xf32>
    %43 = arith.divf %41, %42 : vector<32x1024xf32>
    %44 = vector.shape_cast %43 : vector<32x1024xf32> to vector<4x8x1024xf32>
    %c0_29 = arith.constant 0 : index
    %c0_30 = arith.constant 0 : index
    %c0_31 = arith.constant 0 : index
    %45 = vector.load %arg11[%c0_29, %c0_30, %c0_31] : memref<4x8x1024xf32, #tpu.memory_space<vmem>>, vector<4x8x1024xf32>
    tpu.vector_store %arg11[%c0_29, %c0_30, %c0_31], %44 {strides = array<i32>} : memref<4x8x1024xf32, #tpu.memory_space<vmem>>, vector<4x8x1024xf32>,
    return
  }
  func.func @transform_0(%arg0: i32) -> (i32, i32) {
    %c0_i32 = arith.constant 0 : i32
    %c0_i32_0 = arith.constant 0 : i32
    return %arg0, %c0_i32 : i32, i32
  }
  func.func @transform_1(%arg0: i32) -> (i32, i32, i32) {
    %c0_i32 = arith.constant 0 : i32
    %c0_i32_0 = arith.constant 0 : i32
    %c0_i32_1 = arith.constant 0 : i32
    return %c0_i32, %arg0, %c0_i32_0 : i32, i32, i32
  }
  func.func @transform_2(%arg0: i32) -> (i32, i32) {
    %c0_i32 = arith.constant 0 : i32
    %c0_i32_0 = arith.constant 0 : i32
    %c0_i32_1 = arith.constant 0 : i32
    return %c0_i32, %c0_i32_0 : i32, i32
  }
  func.func @transform_3(%arg0: i32) -> (i32, i32) {
    %c0_i32 = arith.constant 0 : i32
    %c0_i32_0 = arith.constant 0 : i32
    %c0_i32_1 = arith.constant 0 : i32
    return %c0_i32, %c0_i32_0 : i32, i32
  }
  func.func @transform_4(%arg0: i32) -> (i32, i32) {
    %c0_i32 = arith.constant 0 : i32
    %c0_i32_0 = arith.constant 0 : i32
    %c0_i32_1 = arith.constant 0 : i32
    return %c0_i32, %c0_i32_0 : i32, i32
  }
  func.func @transform_5(%arg0: i32) -> (i32, i32) {
    %c0_i32 = arith.constant 0 : i32
    %c0_i32_0 = arith.constant 0 : i32
    %c0_i32_1 = arith.constant 0 : i32
    return %c0_i32, %c0_i32_0 : i32, i32
  }
  func.func @transform_6(%arg0: i32) -> (i32, i32) {
    %c0_i32 = arith.constant 0 : i32
    %c0_i32_0 = arith.constant 0 : i32
    %c0_i32_1 = arith.constant 0 : i32
    return %c0_i32, %c0_i32_0 : i32, i32
  }
  func.func @transform_7(%arg0: i32) -> (i32, i32) {
    %c0_i32 = arith.constant 0 : i32
    %c0_i32_0 = arith.constant 0 : i32
    %c0_i32_1 = arith.constant 0 : i32
    return %c0_i32, %c0_i32_0 : i32, i32
  }
  func.func @transform_8(%arg0: i32) -> (i32, i32) {
    %c0_i32 = arith.constant 0 : i32
    %c0_i32_0 = arith.constant 0 : i32
    %c0_i32_1 = arith.constant 0 : i32
    return %c0_i32, %c0_i32_0 : i32, i32
  }
  func.func @transform_9(%arg0: i32) -> (i32, i32) {
    %c0_i32 = arith.constant 0 : i32
    %c0_i32_0 = arith.constant 0 : i32
    %c0_i32_1 = arith.constant 0 : i32
    return %c0_i32, %c0_i32_0 : i32, i32
  }
  func.func @transform_10(%arg0: i32) -> (i32, i32, i32) {
    %c0_i32 = arith.constant 0 : i32
    %c0_i32_0 = arith.constant 0 : i32
    %c0_i32_1 = arith.constant 0 : i32
    return %c0_i32, %arg0, %c0_i32_0 : i32, i32, i32
  }
  func.func @transform_11(%arg0: i32) -> (i32, i32) {
    %c0_i32 = arith.constant 0 : i32
    %c0_i32_0 = arith.constant 0 : i32
    return %arg0, %c0_i32 : i32, i32
  }
}

module attributes {stable_mosaic.version = 11 : i64} {
  func.func @vae_kernel(%arg0: i32, %arg1: memref<8x1024xf32, #tpu.memory_space<vmem>>, %arg2: memref<4x8x128xf32, #tpu.memory_space<vmem>>, %arg3: memref<1024x256xf32, #tpu.memory_space<vmem>>, %arg4: memref<1x256xf32, #tpu.memory_space<vmem>>, %arg5: memref<256x256xf32, #tpu.memory_space<vmem>>, %arg6: memref<1x256xf32, #tpu.memory_space<vmem>>, %arg7: memref<128x256xf32, #tpu.memory_space<vmem>>, %arg8: memref<1x256xf32, #tpu.memory_space<vmem>>, %arg9: memref<256x1024xf32, #tpu.memory_space<vmem>>, %arg10: memref<1x1024xf32, #tpu.memory_space<vmem>>, %arg11: memref<4x8x1024xf32, #tpu.memory_space<vmem>>, %arg12: memref<8x256xf32, #tpu.memory_space<vmem>>) attributes {dimension_semantics = [#tpu.dimension_semantics<parallel>], iteration_bounds = array<i64: 2>, scalar_prefetch = 0 : i64, scratch_operands = 0 : i64, tpu.core_type = #tpu.core_type<tc>, window_params = [{transform_indices = @transform_0, window_bounds = array<i64: 8, 1024>}, {transform_indices = @transform_1, window_bounds = array<i64: 4, 8, 128>}, {pipeline_mode = #tpu.pipeline_mode<synchronous>, transform_indices = @transform_2, window_bounds = array<i64: 1024, 256>}, {pipeline_mode = #tpu.pipeline_mode<synchronous>, transform_indices = @transform_3, window_bounds = array<i64: 1, 256>}, {pipeline_mode = #tpu.pipeline_mode<synchronous>, transform_indices = @transform_4, window_bounds = array<i64: 256, 256>}, {pipeline_mode = #tpu.pipeline_mode<synchronous>, transform_indices = @transform_5, window_bounds = array<i64: 1, 256>}, {pipeline_mode = #tpu.pipeline_mode<synchronous>, transform_indices = @transform_6, window_bounds = array<i64: 128, 256>}, {pipeline_mode = #tpu.pipeline_mode<synchronous>, transform_indices = @transform_7, window_bounds = array<i64: 1, 256>}, {pipeline_mode = #tpu.pipeline_mode<synchronous>, transform_indices = @transform_8, window_bounds = array<i64: 256, 1024>}, {pipeline_mode = #tpu.pipeline_mode<synchronous>, transform_indices = @transform_9, window_bounds = array<i64: 1, 1024>}, {transform_indices = @transform_10, window_bounds = array<i64: 4, 8, 1024>}, {transform_indices = @transform_11, window_bounds = array<i64: 8, 256>}]} {
    %c0 = arith.constant 0 : index
    %c0_0 = arith.constant 0 : index
    %0 = vector.load %arg1[%c0, %c0_0] : memref<8x1024xf32, #tpu.memory_space<vmem>>, vector<8x1024xf32>
    %c0_1 = arith.constant 0 : index
    %c0_2 = arith.constant 0 : index
    %1 = vector.load %arg3[%c0_1, %c0_2] : memref<1024x256xf32, #tpu.memory_space<vmem>>, vector<1024x256xf32>
    %cst = arith.constant dense<0.000000e+00> : vector<8x256xf32>
    %2 = tpu.matmul %0, %1, %cst {dimension_numbers = #tpu.dot_dimension_numbers<[1], [0], [0], [1], [0, 0, 1, 1], [], []>} : vector<8x1024xf32>, vector<1024x256xf32>, vector<8x256xf32> -> vector<8x256xf32>
    %c0_3 = arith.constant 0 : index
    %c0_4 = arith.constant 0 : index
    %3 = vector.load %arg4[%c0_3, %c0_4] : memref<1x256xf32, #tpu.memory_space<vmem>>, vector<1x256xf32>
    %4 = vector.broadcast %3 : vector<1x256xf32> to vector<8x256xf32>
    %5 = arith.addf %2, %4 : vector<8x256xf32>
    %cst_5 = arith.constant 0.000000e+00 : f32
    %6 = vector.broadcast %cst_5 : f32 to vector<8x256xf32>
    %7 = arith.maximumf %5, %6 : vector<8x256xf32>
    %c0_6 = arith.constant 0 : index
    %c0_7 = arith.constant 0 : index
    %8 = vector.load %arg5[%c0_6, %c0_7] : memref<256x256xf32, #tpu.memory_space<vmem>>, vector<256x256xf32>
    %cst_8 = arith.constant dense<0.000000e+00> : vector<8x256xf32>
    %9 = tpu.matmul %7, %8, %cst_8 {dimension_numbers = #tpu.dot_dimension_numbers<[1], [0], [0], [1], [0, 0, 1, 1], [], []>} : vector<8x256xf32>, vector<256x256xf32>, vector<8x256xf32> -> vector<8x256xf32>
    %c0_9 = arith.constant 0 : index
    %c0_10 = arith.constant 0 : index
    %10 = vector.load %arg6[%c0_9, %c0_10] : memref<1x256xf32, #tpu.memory_space<vmem>>, vector<1x256xf32>
    %11 = vector.broadcast %10 : vector<1x256xf32> to vector<8x256xf32>
    %12 = arith.addf %9, %11 : vector<8x256xf32>
    %c0_11 = arith.constant 0 : index
    %c0_12 = arith.constant 0 : index
    %13 = vector.load %arg12[%c0_11, %c0_12] : memref<8x256xf32, #tpu.memory_space<vmem>>, vector<8x256xf32>
    tpu.vector_store %arg12[%c0_11, %c0_12], %12 {strides = array<i32>} : memref<8x256xf32, #tpu.memory_space<vmem>>, vector<8x256xf32>,
    %14 = vector.extract_strided_slice %12 {offsets = [0, 0], sizes = [8, 128], strides = [1, 1]} : vector<8x256xf32> to vector<8x128xf32>
    %15 = vector.extract_strided_slice %12 {offsets = [0, 128], sizes = [8, 128], strides = [1, 1]} : vector<8x256xf32> to vector<8x128xf32>
    %cst_13 = arith.constant 5.000000e-01 : f32
    %16 = vector.broadcast %cst_13 : f32 to vector<8x128xf32>
    %17 = arith.mulf %16, %15 : vector<8x128xf32>
    %18 = math.exp %17 : vector<8x128xf32>
    %c0_14 = arith.constant 0 : index
    %c0_15 = arith.constant 0 : index
    %c0_16 = arith.constant 0 : index
    %19 = vector.load %arg2[%c0_14, %c0_15, %c0_16] : memref<4x8x128xf32, #tpu.memory_space<vmem>>, vector<4x8x128xf32>
    %20 = vector.shape_cast %14 : vector<8x128xf32> to vector<1x8x128xf32>
    %21 = vector.shape_cast %18 : vector<8x128xf32> to vector<1x8x128xf32>
    %22 = vector.broadcast %21 : vector<1x8x128xf32> to vector<4x8x128xf32>
    %23 = arith.mulf %22, %19 : vector<4x8x128xf32>
    %24 = vector.broadcast %20 : vector<1x8x128xf32> to vector<4x8x128xf32>
    %25 = arith.addf %24, %23 : vector<4x8x128xf32>
    %26 = vector.shape_cast %25 : vector<4x8x128xf32> to vector<32x128xf32>
    %c0_17 = arith.constant 0 : index
    %c0_18 = arith.constant 0 : index
    %27 = vector.load %arg7[%c0_17, %c0_18] : memref<128x256xf32, #tpu.memory_space<vmem>>, vector<128x256xf32>
    %cst_19 = arith.constant dense<0.000000e+00> : vector<32x256xf32>
    %28 = tpu.matmul %26, %27, %cst_19 {dimension_numbers = #tpu.dot_dimension_numbers<[1], [0], [0], [1], [0, 0, 1, 1], [], []>} : vector<32x128xf32>, vector<128x256xf32>, vector<32x256xf32> -> vector<32x256xf32>
    %c0_20 = arith.constant 0 : index
    %c0_21 = arith.constant 0 : index
    %29 = vector.load %arg8[%c0_20, %c0_21] : memref<1x256xf32, #tpu.memory_space<vmem>>, vector<1x256xf32>
    %30 = vector.broadcast %29 : vector<1x256xf32> to vector<32x256xf32>
    %31 = arith.addf %28, %30 : vector<32x256xf32>
    %cst_22 = arith.constant 0.000000e+00 : f32
    %32 = vector.broadcast %cst_22 : f32 to vector<32x256xf32>
    %33 = arith.maximumf %31, %32 : vector<32x256xf32>
    %c0_23 = arith.constant 0 : index
    %c0_24 = arith.constant 0 : index
    %34 = vector.load %arg9[%c0_23, %c0_24] : memref<256x1024xf32, #tpu.memory_space<vmem>>, vector<256x1024xf32>
    %cst_25 = arith.constant dense<0.000000e+00> : vector<32x1024xf32>
    %35 = tpu.matmul %33, %34, %cst_25 {dimension_numbers = #tpu.dot_dimension_numbers<[1], [0], [0], [1], [0, 0, 1, 1], [], []>} : vector<32x256xf32>, vector<256x1024xf32>, vector<32x1024xf32> -> vector<32x1024xf32>
    %c0_26 = arith.constant 0 : index
    %c0_27 = arith.constant 0 : index
    %36 = vector.load %arg10[%c0_26, %c0_27] : memref<1x1024xf32, #tpu.memory_space<vmem>>, vector<1x1024xf32>
    %37 = vector.broadcast %36 : vector<1x1024xf32> to vector<32x1024xf32>
    %38 = arith.addf %35, %37 : vector<32x1024xf32>
    %39 = arith.negf %38 : vector<32x1024xf32>
    %40 = math.exp %39 : vector<32x1024xf32>
    %cst_28 = arith.constant 1.000000e+00 : f32
    %41 = vector.broadcast %cst_28 : f32 to vector<32x1024xf32>
    %42 = arith.addf %41, %40 : vector<32x1024xf32>
    %43 = arith.divf %41, %42 : vector<32x1024xf32>
    %44 = vector.shape_cast %43 : vector<32x1024xf32> to vector<4x8x1024xf32>
    %c0_29 = arith.constant 0 : index
    %c0_30 = arith.constant 0 : index
    %c0_31 = arith.constant 0 : index
    %45 = vector.load %arg11[%c0_29, %c0_30, %c0_31] : memref<4x8x1024xf32, #tpu.memory_space<vmem>>, vector<4x8x1024xf32>
    tpu.vector_store %arg11[%c0_29, %c0_30, %c0_31], %44 {strides = array<i32>} : memref<4x8x1024xf32, #tpu.memory_space<vmem>>, vector<4x8x1024xf32>,
    return
  }
  func.func @transform_0(%arg0: i32) -> (i32, i32) {
    %c0_i32 = arith.constant 0 : i32
    %c0_i32_0 = arith.constant 0 : i32
    return %arg0, %c0_i32 : i32, i32
  }
  func.func @transform_1(%arg0: i32) -> (i32, i32, i32) {
    %c0_i32 = arith.constant 0 : i32
    %c0_i32_0 = arith.constant 0 : i32
    %c0_i32_1 = arith.constant 0 : i32
    return %c0_i32, %arg0, %c0_i32_0 : i32, i32, i32
  }
  func.func @transform_2(%arg0: i32) -> (i32, i32) {
    %c0_i32 = arith.constant 0 : i32
    %c0_i32_0 = arith.constant 0 : i32
    %c0_i32_1 = arith.constant 0 : i32
    return %c0_i32, %c0_i32_0 : i32, i32
  }
  func.func @transform_3(%arg0: i32) -> (i32, i32) {
    %c0_i32 = arith.constant 0 : i32
    %c0_i32_0 = arith.constant 0 : i32
    %c0_i32_1 = arith.constant 0 : i32
    return %c0_i32, %c0_i32_0 : i32, i32
  }
  func.func @transform_4(%arg0: i32) -> (i32, i32) {
    %c0_i32 = arith.constant 0 : i32
    %c0_i32_0 = arith.constant 0 : i32
    %c0_i32_1 = arith.constant 0 : i32
    return %c0_i32, %c0_i32_0 : i32, i32
  }
  func.func @transform_5(%arg0: i32) -> (i32, i32) {
    %c0_i32 = arith.constant 0 : i32
    %c0_i32_0 = arith.constant 0 : i32
    %c0_i32_1 = arith.constant 0 : i32
    return %c0_i32, %c0_i32_0 : i32, i32
  }
  func.func @transform_6(%arg0: i32) -> (i32, i32) {
    %c0_i32 = arith.constant 0 : i32
    %c0_i32_0 = arith.constant 0 : i32
    %c0_i32_1 = arith.constant 0 : i32
    return %c0_i32, %c0_i32_0 : i32, i32
  }
  func.func @transform_7(%arg0: i32) -> (i32, i32) {
    %c0_i32 = arith.constant 0 : i32
    %c0_i32_0 = arith.constant 0 : i32
    %c0_i32_1 = arith.constant 0 : i32
    return %c0_i32, %c0_i32_0 : i32, i32
  }
  func.func @transform_8(%arg0: i32) -> (i32, i32) {
    %c0_i32 = arith.constant 0 : i32
    %c0_i32_0 = arith.constant 0 : i32
    %c0_i32_1 = arith.constant 0 : i32
    return %c0_i32, %c0_i32_0 : i32, i32
  }
  func.func @transform_9(%arg0: i32) -> (i32, i32) {
    %c0_i32 = arith.constant 0 : i32
    %c0_i32_0 = arith.constant 0 : i32
    %c0_i32_1 = arith.constant 0 : i32
    return %c0_i32, %c0_i32_0 : i32, i32
  }
  func.func @transform_10(%arg0: i32) -> (i32, i32, i32) {
    %c0_i32 = arith.constant 0 : i32
    %c0_i32_0 = arith.constant 0 : i32
    %c0_i32_1 = arith.constant 0 : i32
    return %c0_i32, %arg0, %c0_i32_0 : i32, i32, i32
  }
  func.func @transform_11(%arg0: i32) -> (i32, i32) {
    %c0_i32 = arith.constant 0 : i32
    %c0_i32_0 = arith.constant 0 : i32
    return %arg0, %c0_i32 : i32, i32
  }
}

</mosaic_0001>

<bundles_post_ra>
// kernel: tpu_custom_call.1
= control target key start
LH: loop header
LB: loop body
LE: loop exit
PB: predicated region body
PF: predicated region fallthrough
CT: control target
= control target key end

     0   :  { %s4280_s0 = inlined_call_operand.hbm [shape: f32[16,1024], index: 0, kind: input, shape index: {}]   ;;  %s4281_s1 = inlined_call_operand.hbm [shape: f32[4,16,128], index: 1, kind: input, shape index: {}]   ;;  %s4282_s2 = inlined_call_operand.hbm [shape: f32[1024,256], index: 2, kind: input, shape index: {}]   ;;  %s4283_s3 = inlined_call_operand.vmem [shape: f32[1,256], index: 3, kind: input, shape index: {}]   ;;  %s4284_s4 = inlined_call_operand.hbm [shape: f32[256,256], index: 4, kind: input, shape index: {}]   ;;  %s4285_s5 = inlined_call_operand.vmem [shape: f32[1,256], index: 5, kind: input, shape index: {}]   ;;  %s4286_s6 = inlined_call_operand.hbm [shape: f32[128,256], index: 6, kind: input, shape index: {}]   ;;  %s4287_s7 = inlined_call_operand.vmem [shape: f32[1,256], index: 7, kind: input, shape index: {}]   ;;  %s4288_s8 = inlined_call_operand.hbm [shape: f32[256,1024], index: 8, kind: input, shape index: {}]   ;;  %s4289_s9 = inlined_call_operand.vmem [shape: f32[1,1024], index: 9, kind: input, shape index: {}]   ;;  %s4290_s10 = inlined_call_operand.hbm [shape: f32[4,16,1024], index: 10, kind: output, shape index: {0}]   ;;  %s4291_s11 = inlined_call_operand.hbm [shape: f32[16,256], index: 11, kind: output, shape index: {1}]  }
   0x1   :  { %4298 = sst [smem:[#allocation23_spill]] %s4280_s0 }
   0x2   :  { %4299 = sst [smem:[#allocation24_spill]] %s4282_s2 }
   0x3   :  { %4300 = sst [smem:[#allocation25_spill]] %s4284_s4 }
   0x4   :  { %4301 = sst [smem:[#allocation26_spill]] %s4286_s6 }
   0x5   :  { %4302 = sst [smem:[#allocation27_spill]] %s4289_s9 }
   0x6   :  { %4303 = sst [smem:[#allocation28_spill]] %s4290_s10 }
   0x7   :  { %4304 = sst [smem:[#allocation29_spill]] %s4291_s11 }
   0x8   :  { %17 = vsyncpa [#allocation3], 0 }
   0x9   :  { %19 = vsyncpa [#allocation3 + $0x1], 0 }
   0xa   :  { %20 = vsyncpa [#allocation6], 0 }
   0xb   :  { %22 = vsyncpa [#allocation6 + $0x1], 0 }
   0xc   :  { %23 = vsyncpa [#allocation9], 0 }
   0xd   :  { %24 = vsyncpa [#allocation12], 0 }
   0xe   :  { %25 = vsyncpa [#allocation4], 0 }
   0xf   :  { %27 = vsyncpa [#allocation4 + $0x1], 0 }
  0x10   :  { %28 = vsyncpa [#allocation15], 0 }
  0x11   :  { %30 = vsyncpa [#allocation15 + $0x1], 0  ;;  %s3738_s17 = smov 0   ;;  %s3740_s18 = smov 0  }
  0x12   :  { %s3742_s19 = smov 0   ;;  %s3744_s20 = smov 0  }
  0x13 LB: > { %s3660_s21 = smov [#allocation7]   ;;  %s3759_s23 = sadd.s32 4294967295, %s3658_s20   ;;  %s3658_s20 = sphi %s3744_s20, %s4336_s20   ;;  %s3654_s19 = sphi %s3742_s19, %s4335_s19   ;;  %s3650_s18 = sphi %s3740_s18, %s4334_s18   ;;  %s3646_s17 = sphi %s3738_s17, %s4333_s17  }
  0x14   : > { %s325_s22 = sshll.u32 %s3660_s21, 4  ;;  %p2456_p0 = scmp.ge.s32.totalorder %s3658_s20, 1  ;;  %s3764_s22 = int_to_ptr.vmem [resolvable:$true] %s325_s22 }
  0x15   : > { %p4294_p1 = scmp.eq.s32.totalorder %s3759_s23, 0  ;;  %p313_p2 = scmp.lt.s32.totalorder %s3658_s20, 3 }
  0x16   : > { %s3661_s25 = smov [#allocation8]   ;;  %s3662_s28 = smov [#allocation10]  }
  0x17   : > { %p3766_p3 = pnand %p2456_p0, %p313_p2  ;;  %s341_s26 = sshll.u32 %s3661_s25, 4  ;;  %s3779_s26 = int_to_ptr.vmem [resolvable:$true] %s341_s26 }
  0x18   : > { %s357_s29 = sshll.u32 %s3662_s28, 4  ;;  %s4307_s2 = sld [smem:[#allocation24_spill]]  ;;  %s3781_s29 = int_to_ptr.vmem [resolvable:$true] %s357_s29 }
  0x19   : > { %s4305_s24 = scalar_select %p3766_p3, 1, 0 }
  0x1a   : > { %p3159_p5 = pneg %p3766_p3 }
  0x1c   : > { %p3775_p6 = pnand %p3159_p5, %p4294_p1 }
  0x1e   : > { %s3372_s13 = scalar_lea.hbm %s4307_s2, 32768  ;;  %p3791_p8 = pneg %p3775_p6 }
  0x1f   : > { %p3373_p7 = scmp.ne.s32.totalorder %s4307_s2, %s3372_s13  ;;  %p3379_p11 = scmp.lt.u32.totalorder %s3372_s13, %s4307_s2 }
  0x21   : > { %p3375_p9 = pnand %p3791_p8, %p3373_p7 }
  0x23   : > { %p3376_p10 = pneg %p3375_p9 }
  0x25   : > { %p3381_p12 = pnand %p3379_p11, %p3376_p10 }
  0x27   : > { %3384 = shalt.err (!%p3381_p12)
}
  0x28   : > { %s3385_s28 = scalar_lea.vmem %s3764_s22, 32768  ;;  %p3393_p5 = scmp.lt.s32.totalorder %s3764_s22, %s3764_s22 }
  0x29   : > { %p3386_p13 = scmp.ne.s32.totalorder %s3764_s22, %s3385_s28  ;;  %p3394_p4 = scmp.lt.s32.totalorder %s3385_s28, %s3385_s28 }
  0x2b   : > { %p3388_p0 = pnand %p3386_p13, %p3791_p8  ;;  %p3395_p7 = por %p3394_p4, %p3393_p5 }
  0x2d   : > { %p3389_p2 = pneg %p3388_p0 }
  0x2f   : > { %p3396_p9 = pnand %p3395_p7, %p3389_p2 }
  0x31   : > { %3399 = shalt.err (!%p3396_p9)
}
  0x32   : > { %s4296_s30 = smov 256   ;;  %s3664_s12 = smov 16  }
  0x33   : > { %3162 = dma.hbm_to_vmem [thread:$0]  (!%p3775_p6), %s4307_s2, 32768, %s3764_s22, [#allocation6], %s4296_s30, %s4296_s30, %s3664_s12  }
  0x34   : > { %s4309_s4 = sld [smem:[#allocation25_spill]] }
  0x3a   : > { %s3400_s25 = scalar_lea.hbm %s4309_s4, 8192 }
  0x3b   : > { %p3401_p4 = scmp.ne.s32.totalorder %s4309_s4, %s3400_s25  ;;  %p3407_p12 = scmp.lt.u32.totalorder %s3400_s25, %s4309_s4 }
  0x3d   : > { %p3403_p10 = pnand %p3401_p4, %p3791_p8 }
  0x3f   : > { %p3404_p11 = pneg %p3403_p10 }
  0x41   : > { %p3409_p13 = pnand %p3407_p12, %p3404_p11 }
  0x43   : > { %3412 = shalt.err (!%p3409_p13)
}
  0x44   : > { %s3413_s22 = scalar_lea.vmem %s3779_s26, 8192  ;;  %p3421_p7 = scmp.lt.s32.totalorder %s3779_s26, %s3779_s26 }
  0x45   : > { %p3414_p0 = scmp.ne.s32.totalorder %s3779_s26, %s3413_s22  ;;  %p3422_p9 = scmp.lt.s32.totalorder %s3413_s22, %s3413_s22 }
  0x47   : > { %p3416_p2 = pnand %p3414_p0, %p3791_p8  ;;  %p3423_p4 = por %p3422_p9, %p3421_p7 }
  0x49   : > { %p3417_p5 = pneg %p3416_p2 }
  0x4b   : > { %p3424_p10 = pnand %p3423_p4, %p3417_p5 }
  0x4d   : > { %3427 = shalt.err (!%p3424_p10)
}
  0x4e   : > { %3165 = dma.hbm_to_vmem [thread:$0]  (!%p3775_p6), %s4309_s4, 8192, %s3779_s26, [#allocation9], %s4296_s30, %s4296_s30, %s3664_s12  }
  0x4f   : > { %s4310_s6 = sld [smem:[#allocation26_spill]] }
  0x55   : > { %s3428_s14 = scalar_lea.hbm %s4310_s6, 4096 }
  0x56   : > { %p3429_p11 = scmp.ne.s32.totalorder %s4310_s6, %s3428_s14  ;;  %p3435_p0 = scmp.lt.u32.totalorder %s3428_s14, %s4310_s6 }
  0x58   : > { %p3431_p12 = pnand %p3429_p11, %p3791_p8 }
  0x5a   : > { %p3432_p13 = pneg %p3431_p12 }
  0x5c   : > { %p3437_p2 = pnand %p3435_p0, %p3432_p13 }
  0x5e   : > { %3440 = shalt.err (!%p3437_p2)
}
  0x5f   : > { %s3441_s26 = scalar_lea.vmem %s3781_s29, 4096  ;;  %p3449_p4 = scmp.lt.s32.totalorder %s3781_s29, %s3781_s29 }
  0x60   : > { %p3442_p5 = scmp.ne.s32.totalorder %s3781_s29, %s3441_s26  ;;  %p3450_p10 = scmp.lt.s32.totalorder %s3441_s26, %s3441_s26 }
  0x62   : > { %p3444_p7 = pnand %p3442_p5, %p3791_p8  ;;  %p3451_p11 = por %p3450_p10, %p3449_p4 }
  0x64   : > { %p3445_p9 = pneg %p3444_p7 }
  0x66   : > { %p3452_p12 = pnand %p3451_p11, %p3445_p9 }
  0x68   : > { %3455 = shalt.err (!%p3452_p12)
}
  0x69   : > { %3168 = dma.hbm_to_vmem [thread:$0]  (!%p3775_p6), %s4310_s6, 4096, %s3781_s29, [#allocation9], %s4296_s30, %s4296_s30, %s3664_s12  }
  0x6a   : > { %s3665_s10 = smov [#allocation11]   ;;  %s3456_s15 = scalar_lea.hbm %s4288_s8, 32768 }
  0x6b   : > { %s373_s11 = sshll.u32 %s3665_s10, 4  ;;  %p3457_p13 = scmp.ne.s32.totalorder %s4288_s8, %s3456_s15  ;;  %s374_s11 = int_to_ptr.vmem [resolvable:$true] %s373_s11 }
  0x6c   : > { %p3463_p5 = scmp.lt.u32.totalorder %s3456_s15, %s4288_s8 }
  0x6d   : > { %p3459_p0 = pnand %p3457_p13, %p3791_p8 }
  0x6f   : > { %p3460_p2 = pneg %p3459_p0 }
  0x71   : > { %p3465_p7 = pnand %p3463_p5, %p3460_p2 }
  0x73   : > { %3468 = shalt.err (!%p3465_p7)
}
  0x74   : > { %s3469_s29 = scalar_lea.vmem %s374_s11, 32768  ;;  %p3477_p11 = scmp.lt.s32.totalorder %s374_s11, %s374_s11 }
  0x75   : > { %p3470_p9 = scmp.ne.s32.totalorder %s374_s11, %s3469_s29  ;;  %p3478_p12 = scmp.lt.s32.totalorder %s3469_s29, %s3469_s29 }
  0x77   : > { %p3472_p4 = pnand %p3470_p9, %p3791_p8  ;;  %p3479_p1 = por %p3478_p12, %p3477_p11 }
  0x79   : > { %p3473_p10 = pneg %p3472_p4 }
  0x7b   : > { %p3480_p3 = pnand %p3479_p1, %p3473_p10 }
  0x7d   : > { %3483 = shalt.err (!%p3480_p3)
}
  0x7e   : > { %s3666_s12 = smov 1024   ;;  %s3667_s16 = smov 64  }
  0x7f   : > { %3171 = dma.hbm_to_vmem [thread:$0]  (!%p3775_p6), %s4288_s8, 32768, %s374_s11, [#allocation12], %s3666_s12, %s3666_s12, %s3667_s16  }
  0x80   : > { %s2455_s10 = sadd.s32 4294967294, %s3658_s20   ;;  %s3887_s13 = sadd.s32 1, %s3658_s20  }
  0x81   : > { %s40_s14 = ssub.s32 %s3658_s20, %s3887_s13  ;;  %s43_s15 = sadd.s32 1, %s3654_s19 }
  0x82   : > { %p41_p1 = scmp.eq.s32.totalorder %s40_s14, 0  ;;  %p50_p3 = scmp.ne.s32.totalorder %s3654_s19, %s3650_s18 }
  0x83   : > { %p51_p8 = scmp.eq.s32.totalorder %s3658_s20, 0  ;;  %p56_p13 = scmp.ne.s32.totalorder %s3650_s18, %s3646_s17 }
  0x84   : > { %s3898_s21 = scalar_select %p41_p1, %s3654_s19, %s43_s15  }
  0x85   : > { %p3900_p0 = por %p51_p8, %p50_p3  ;;  %p4312_p2 = scmp.eq.s32.totalorder %s3759_s23, 0 }
  0x86   : > { %p274_p5 = scmp.eq.s32.totalorder %s3759_s23, 1  ;;  %p280_p7 = scmp.eq.s32.totalorder %s2455_s10, 1 }
  0x87   : > { %p3906_p6 = por %p4312_p2, %p56_p13  ;;  %p3190_p9 = scmp.lt.s32.totalorder %s3658_s20, 2 }
  0x88   : > { %s3913_s25 = sand.u32 1, %s3654_s19   ;;  %p3915_p4 = por %p274_p5, %p50_p3 }
  0x89   : > { %p3919_p10 = por %p280_p7, %p56_p13  ;;  %s2462_s29 = sshll.u32 %s3913_s25, 6 }
  0x8a   : > { %s4314_s28 = scalar_select %p3915_p4, 1, 0 }
  0x8b   : > { %s4315_s26 = scalar_select %p3919_p10, 1, 0 }
  0x8c   : > { %s2516_s12 = sshll.u32 %s3658_s20, 10  ;;  %s4316_s0 = sld [smem:[#allocation23_spill]] }
  0x8d   : > { %s394_s10 = scalar_lea.vmem [#allocation2], %s2462_s29  ;;  %p3934_p11 = pnand %p3190_p9, %p3900_p0 }
  0x8e   : > { %s402_s14 = sshll.u32 %s394_s10, 4  ;;  %s2465_s30 = sshll.u32 %s3913_s25, 5  ;;  %s3930_s14 = int_to_ptr.vmem [resolvable:$true] %s402_s14 }
  0x8f   : > { %s391_s16 = scalar_lea.sflag [#allocation3], %s3913_s25  ;;  %p3486_p1 = pneg %p3934_p11 }
  0x92   : > { %s3928_s9 = scalar_lea.hbm %s4316_s0, %s2516_s12  ;;  %s3489_s27 = scalar_lea.hbm %s4316_s0, 2048 }
  0x93   : > { %s3484_s12 = scalar_lea.hbm %s3928_s9, 1024  ;;  %p3490_p13 = scmp.lt.u32.totalorder %s3928_s9, %s4316_s0 }
  0x94   : > { %p3485_p12 = scmp.ne.s32.totalorder %s3928_s9, %s3484_s12  ;;  %p3491_p0 = scmp.lt.u32.totalorder %s3489_s27, %s3484_s12 }
  0x95   : > { %p3493_p5 = scmp.lt.u32.totalorder %s3484_s12, %s3928_s9 }
  0x96   : > { %p3487_p3 = pnand %p3486_p1, %p3485_p12  ;;  %p3492_p2 = por %p3491_p0, %p3490_p13 }
  0x98   : > { %p3488_p8 = pneg %p3487_p3  ;;  %p3494_p7 = por %p3493_p5, %p3492_p2 }
  0x9a   : > { %p3495_p9 = pnand %p3494_p7, %p3488_p8 }
  0x9c   : > { %3498 = shalt.err (!%p3495_p9)
}
  0x9d   : > { %s3499_s2 = scalar_lea.vmem %s3930_s14, 1024  ;;  %s3668_s29 = smov [#allocation2]  }
  0x9e   : > { %p3500_p12 = scmp.ne.s32.totalorder %s3930_s14, %s3499_s2  ;;  %s3504_s22 = sshll.u32 %s3668_s29, 4  ;;  %s3505_s22 = int_to_ptr.vmem [resolvable:$false] %s3504_s22 }
  0x9f   : > { %s3506_s4 = scalar_lea.vmem %s3505_s22, 2048  ;;  %p3507_p4 = scmp.lt.s32.totalorder %s3930_s14, %s3505_s22 }
  0xa0   : > { %p3502_p3 = pnand %p3500_p12, %p3486_p1  ;;  %p3508_p13 = scmp.lt.s32.totalorder %s3506_s4, %s3499_s2 }
  0xa2   : > { %p3503_p10 = pneg %p3502_p3  ;;  %p3509_p0 = por %p3508_p13, %p3507_p4 }
  0xa4   : > { %p3510_p2 = pnand %p3509_p0, %p3503_p10 }
  0xa6   : > { %3513 = shalt.err (!%p3510_p2)
}
  0xa7   : > { %3175 = dma.hbm_to_vmem [thread:$0]  (!%p3934_p11), %s3928_s9, 1024, %s3930_s14, %s391_s16  }
  0xa8   : > { %s413_s12 = scalar_lea.vmem [#allocation5], %s2465_s30  ;;  %s2466_s10 = sshll.u32 %s3658_s20, 7 }
  0xa9   : > { %s419_s27 = sshll.u32 %s413_s12, 4  ;;  %s3974_s22 = scalar_lea.hbm %s4281_s1, %s2466_s10  ;;  %s3968_s27 = int_to_ptr.vmem [resolvable:$true] %s419_s27 }
  0xaa   : > { %s4318_s4 = sand.u32 1, %s3658_s20   ;;  %s3514_s6 = scalar_lea.hbm %s3974_s22, 512 }
  0xab   : > { %s3978_s0 = scalar_lea.sflag [#allocation6], %s4318_s4  ;;  %p3515_p4 = scmp.ne.s32.totalorder %s3974_s22, %s3514_s6 }
  0xac   : > { %s3519_s9 = scalar_lea.hbm %s4281_s1, 1024  ;;  %p3520_p5 = scmp.lt.u32.totalorder %s3974_s22, %s4281_s1 }
  0xad   : > { %p3517_p10 = pnand %p3515_p4, %p3486_p1  ;;  %p3521_p7 = scmp.lt.u32.totalorder %s3519_s9, %s3514_s6 }
  0xae   : > { %p3523_p12 = scmp.lt.u32.totalorder %s3514_s6, %s3974_s22 }
  0xaf   : > { %p3518_p8 = pneg %p3517_p10  ;;  %p3522_p9 = por %p3521_p7, %p3520_p5 }
  0xb1   : > { %p3524_p3 = por %p3523_p12, %p3522_p9 }
  0xb3   : > { %p3525_p13 = pnand %p3524_p3, %p3518_p8 }
  0xb5   : > { %3528 = shalt.err (!%p3525_p13)
}
  0xb6   : > { %s3529_s12 = scalar_lea.vmem %s3968_s27, 512  ;;  %s3669_s10 = smov [#allocation5]  }
  0xb7   : > { %p3530_p0 = scmp.ne.s32.totalorder %s3968_s27, %s3529_s12  ;;  %s3534_s29 = sshll.u32 %s3669_s10, 4  ;;  %s3535_s29 = int_to_ptr.vmem [resolvable:$false] %s3534_s29 }
  0xb8   : > { %s3536_s2 = scalar_lea.vmem %s3535_s29, 1024  ;;  %p3537_p10 = scmp.lt.s32.totalorder %s3968_s27, %s3535_s29 }
  0xb9   : > { %p3532_p2 = pnand %p3530_p0, %p3486_p1  ;;  %p3538_p5 = scmp.lt.s32.totalorder %s3536_s2, %s3529_s12 }
  0xbb   : > { %p3533_p4 = pneg %p3532_p2  ;;  %p3539_p7 = por %p3538_p5, %p3537_p10 }
  0xbd   : > { %p3540_p9 = pnand %p3539_p7, %p3533_p4 }
  0xbf   : > { %3543 = shalt.err (!%p3540_p9)
}
  0xc0   : > { %s3670_s6 = smov 128   ;;  %s3671_s4 = smov 8  }
  0xc1   : > { %s4319_s30 = smov 256   ;;  %p4320_p1 = scmp.ne.s32.totalorder %s4305_s24, 0 }
  0xc2   : > { %3178 = dma.hbm_to_vmem [thread:$0]  (!%p3934_p11), %s3974_s22, 512, %s3968_s27, %s3978_s0, %s4319_s30, %s3670_s6, %s3671_s4  }
  0xc3   : > { %431 = sbr.rel (%p4320_p1) target bundleno = 1544 (0x608), region = 60  ;;  %s4008_s25 = sand.u32 (!%p4320_p1), 1, %s3650_s18  }
  0xc4   : > { %s2468_s9 = sshll.u32 (!%p4320_p1), %s4008_s25, 6  ;;  %s434_s14 = scalar_lea.sflag (!%p4320_p1), [#allocation3], %s4008_s25 }
  0xc5   : > { %s4012_s16 = scalar_lea.vmem (!%p4320_p1), [#allocation2], %s2468_s9 }
  0xca   : > { %3617 = dma.done.wait (%p3906_p6), %s434_s14, 1024  }
  0xcb   : > { %3619 = vsyncadd (%p3906_p6), %s434_s14, 4294966272  ;;  %s442_s0 = sand.u32 1, %s3759_s23   ;;  %s2469_s24 = sshll.u32 %s4008_s25, 5 }
  0xcc   : > { %s443_s15 = scalar_lea.sflag [#allocation6], %s442_s0  ;;  %s4020_s27 = scalar_lea.vmem [#allocation5], %s2469_s24 }
  0xcd   : > { %3621 = dma.done.wait (%p3906_p6), %s443_s15, 512  }
  0xce   : > { %3623 = vsyncadd (%p3906_p6), %s443_s15, 4294966784  ;;  %p4321_p11 = scmp.eq.s32.totalorder %s3759_s23, 0 }
  0xd0   : > { %3625 = dma.done.wait (%p4321_p11), [#allocation6], 32768   ;;  %p4322_p8 = pmov %p4321_p11 }
  0xd2   : > { %3627 = vsyncadd (%p4322_p8), [#allocation6], 4294934528  ;;  %p4323_p12 = pmov %p4322_p8 }
  0xd3   : > { %p4324_p3 = pmov %p4322_p8 }
  0xd4   : > { %3629 = dma.done.wait (%p4323_p12), [#allocation9], 12288  }
  0xd5   : > { %3631 = vsyncadd (%p4324_p3), [#allocation9], 4294955008  ;;  %p4325_p13 = pmov %p4324_p3 }
  0xd6   : > { %p4326_p0 = pmov %p4324_p3 }
  0xd7   : > { %3633 = dma.done.wait (%p4325_p13), [#allocation12], 32768  }
  0xd8   : > { %3635 = vsyncadd (%p4326_p0), [#allocation12], 4294934528  ;;  %v520_v0 = vld [vmem:[#allocation7 + $0x8] sm:$0xff]  ;;  %v522_v1 = vld [vmem:[#allocation7 + $0x18] sm:$0xff]  ;;  %s2475_s29 = sshll.u32 %s4008_s25, 4  ;;  %s4327_s14 = sld [smem:[#allocation27_spill]] }
  0xd9   : > { %v519_v2 = vld [vmem:[#allocation7] sm:$0xff]  ;;  %v2519_v3 = vpack.c.bf16 %v522_v1, %v520_v0  ;;  %v521_v4 = vld [vmem:[#allocation7 + $0x10] sm:$0xff]  ;;  %v524_v5 = vld [vmem:[#allocation7 + $0x28] sm:$0xff]  ;;  %s4066_s2 = scalar_lea.vmem [#allocation14], %s2475_s29  ;;  %s2518_s24 = sshll.u32 %s3759_s23, 8 }
  0xda   : > { %v526_v6 = vld [vmem:[#allocation7 + $0x38] sm:$0xff]  ;;  %v2521_v7 = vpack.c.bf16 %v521_v4, %v519_v2  ;;  %v523_v9 = vld [vmem:[#allocation7 + $0x20] sm:$0xff]  ;;  %v525_v10 = vld [vmem:[#allocation7 + $0x30] sm:$0xff]  ;;  %s4328_s11 = sld [smem:[#allocation29_spill]]  ;;  %s2292_s12 = sshll.u32 %s4066_s2, 4  ;;  %s2293_s12 = int_to_ptr.vmem [resolvable:$true] %s2292_s12 }
  0xdb   : > { %v2523_v8 = vpack.c.bf16 %v526_v6, %v524_v5  ;;  %v528_v11 = vld [vmem:[#allocation7 + $0x48] sm:$0xff]  ;;  %2520 = vmatprep.subr.bf16.mxu0 %v2519_v3  ;;  %v530_v12 = vld [vmem:[#allocation7 + $0x58] sm:$0xff]  ;;  %v2525_v13 = vpack.c.bf16 %v525_v10, %v523_v9  ;;  %v527_v15 = vld [vmem:[#allocation7 + $0x40] sm:$0xff]  ;;  %s2262_s10 = scalar_lea.sflag [#allocation15], %s4008_s25  ;;  %s3544_s29 = scalar_lea.vmem %s2293_s12, 256 }
  0xdc   : > { %2522 = vmatpush1.bf16.msra.mxu0 %v2521_v7  ;;  %v2527_v14 = vpack.c.bf16 %v530_v12, %v528_v11  ;;  %v529_v16 = vld [vmem:[#allocation7 + $0x50] sm:$0xff]  ;;  %v532_v17 = vld [vmem:[#allocation7 + $0x68] sm:$0xff]  ;;  %v534_v18 = vld [vmem:[#allocation7 + $0x78] sm:$0xff]  ;;  %p3545_p6 = scmp.ne.s32.totalorder %s2293_s12, %s3544_s29  ;;  %p4329_p2 = scmp.ne.s32.totalorder %s4314_s28, 0 }
  0xdd   : > { %2524 = vmatprep.subr.bf16.mxu0 %v2523_v8  ;;  %v2529_v19 = vpack.c.bf16 %v529_v16, %v527_v15  ;;  %v2531_v20 = vpack.c.bf16 %v534_v18, %v532_v17  ;;  %v531_v21 = vld [vmem:[#allocation7 + $0x60] sm:$0xff]  ;;  %v533_v22 = vld [vmem:[#allocation7 + $0x70] sm:$0xff]  ;;  %v536_v23 = vld [vmem:[#allocation7 + $0x88] sm:$0xff]  ;;  %s3673_s6 = smov [#allocation14]  }
  0xde   : > { %v538_v24 = vld [vmem:[#allocation7 + $0x98] sm:$0xff]  ;;  %v2533_v25 = vpack.c.bf16 %v533_v22, %v531_v21  ;;  %v535_v27 = vld [vmem:[#allocation7 + $0x80] sm:$0xff]  ;;  %v537_v28 = vld [vmem:[#allocation7 + $0x90] sm:$0xff]  ;;  %p3546_p4 = pnand %p3545_p6, %p4329_p2  ;;  %s3548_s4 = sshll.u32 %s3673_s6, 4  ;;  %s3549_s4 = int_to_ptr.vmem [resolvable:$false] %s3548_s4 }
  0xdf   : > { %v2535_v26 = vpack.c.bf16 %v538_v24, %v536_v23  ;;  %v540_v29 = vld [vmem:[#allocation7 + $0xa8] sm:$0xff]  ;;  %v542_v30 = vld [vmem:[#allocation7 + $0xb8] sm:$0xff]  ;;  %v2537_v31 = vpack.c.bf16 %v537_v28, %v535_v27  ;;  %v539_v33 = vld [vmem:[#allocation7 + $0xa0] sm:$0xff]  ;;  %s3550_s30 = scalar_lea.vmem %s3549_s4, 512  ;;  %p3551_p5 = scmp.lt.s32.totalorder %s2293_s12, %s3549_s4 }
  0xe0   : > { %2526 = vmatpush1.bf16.msra.mxu0 %v2525_v13  ;;  %v2539_v32 = vpack.c.bf16 %v542_v30, %v540_v29  ;;  %v541_v34 = vld [vmem:[#allocation7 + $0xb0] sm:$0xff]  ;;  %v544_v35 = vld [vmem:[#allocation7 + $0xc8] sm:$0xff]  ;;  %v546_v36 = vld [vmem:[#allocation7 + $0xd8] sm:$0xff]  ;;  %s4181_s22 = scalar_lea.hbm %s4328_s11, %s2518_s24  ;;  %p3547_p10 = pneg %p3546_p4 }
  0xe1   : > { %2528 = vmatprep.subr.bf16.mxu0 %v2527_v14  ;;  %v2541_v37 = vpack.c.bf16 %v541_v34, %v539_v33  ;;  %v2543_v38 = vpack.c.bf16 %v546_v36, %v544_v35  ;;  %v543_v39 = vld [vmem:[#allocation7 + $0xc0] sm:$0xff]  ;;  %v545_v40 = vld [vmem:[#allocation7 + $0xd0] sm:$0xff]  ;;  %v512_v41 = vld [vmem:[%s4012_s16 + $0x8] sm:$0xff]  ;;  %p3552_p7 = scmp.lt.s32.totalorder %s3550_s30, %s3544_s29 }
  0xe2   : > { %v548_v42 = vld [vmem:[#allocation7 + $0xe8] sm:$0xff]  ;;  %v550_v43 = vld [vmem:[#allocation7 + $0xf8] sm:$0xff]  ;;  %851 = vmatprep.mubr.f32.mxu0 %v512_v41  ;;  %v2545_v44 = vpack.c.bf16 %v545_v40, %v543_v39  ;;  %v547_v46 = vld [vmem:[#allocation7 + $0xe0] sm:$0xff] }
  0xe3   : > { %v2547_v45 = vpack.c.bf16 %v550_v43, %v548_v42  ;;  %v549_v47 = vld [vmem:[#allocation7 + $0xf0] sm:$0xff]  ;;  %v552_v48 = vld [vmem:[#allocation7 + $0x108] sm:$0xff]  ;;  %v554_v49 = vld [vmem:[#allocation7 + $0x118] sm:$0xff]  ;;  %p3553_p9 = por %p3552_p7, %p3551_p5 }
  0xe4   : > { %2530 = vmatpush1.bf16.msra.mxu0 %v2529_v19  ;;  %v2549_v50 = vpack.c.bf16 %v549_v47, %v547_v46  ;;  %v2551_v51 = vpack.c.bf16 %v554_v49, %v552_v48  ;;  %v551_v52 = vld [vmem:[#allocation7 + $0x100] sm:$0xff]  ;;  %v553_v53 = vld [vmem:[#allocation7 + $0x110] sm:$0xff]  ;;  %v556_v54 = vld [vmem:[#allocation7 + $0x128] sm:$0xff] }
  0xe5   : > { %2532 = vmatprep.subr.bf16.mxu0 %v2531_v20  ;;  %v558_v55 = vld [vmem:[#allocation7 + $0x138] sm:$0xff]  ;;  %v2553_v56 = vpack.c.bf16 %v553_v53, %v551_v52  ;;  %v555_v58 = vld [vmem:[#allocation7 + $0x120] sm:$0xff]  ;;  %v557_v59 = vld [vmem:[#allocation7 + $0x130] sm:$0xff]  ;;  %p3554_p1 = pnand %p3553_p9, %p3547_p10 }
  0xe6   : > { %v2555_v57 = vpack.c.bf16 %v558_v55, %v556_v54  ;;  %v560_v60 = vld [vmem:[#allocation7 + $0x148] sm:$0xff]  ;;  %v562_v61 = vld [vmem:[#allocation7 + $0x158] sm:$0xff]  ;;  %v2557_v62 = vpack.c.bf16 %v557_v59, %v555_v58  ;;  %v559_v0 = vld [vmem:[#allocation7 + $0x140] sm:$0xff] }
  0xe7   : > { %v2559_v63 = vpack.c.bf16 %v562_v61, %v560_v60  ;;  %v561_v1 = vld [vmem:[#allocation7 + $0x150] sm:$0xff]  ;;  %v564_v2 = vld [vmem:[#allocation7 + $0x168] sm:$0xff]  ;;  %v566_v3 = vld [vmem:[#allocation7 + $0x178] sm:$0xff] }
  0xe8   : > { %2534 = vmatpush1.bf16.msra.mxu0 %v2533_v25  ;;  %v2561_v4 = vpack.c.bf16 %v561_v1, %v559_v0  ;;  %v2563_v5 = vpack.c.bf16 %v566_v3, %v564_v2  ;;  %v563_v6 = vld [vmem:[#allocation7 + $0x160] sm:$0xff]  ;;  %v565_v7 = vld [vmem:[#allocation7 + $0x170] sm:$0xff]  ;;  %v568_v8 = vld [vmem:[#allocation7 + $0x188] sm:$0xff] }
  0xe9   : > { %2536 = vmatprep.subr.bf16.mxu0 %v2535_v26  ;;  %v570_v9 = vld [vmem:[#allocation7 + $0x198] sm:$0xff]  ;;  %v2565_v10 = vpack.c.bf16 %v565_v7, %v563_v6  ;;  %v567_v12 = vld [vmem:[#allocation7 + $0x180] sm:$0xff]  ;;  %v569_v13 = vld [vmem:[#allocation7 + $0x190] sm:$0xff] }
  0xea   : > { %v2567_v11 = vpack.c.bf16 %v570_v9, %v568_v8  ;;  %v572_v14 = vld [vmem:[#allocation7 + $0x1a8] sm:$0xff]  ;;  %v574_v15 = vld [vmem:[#allocation7 + $0x1b8] sm:$0xff]  ;;  %v2569_v16 = vpack.c.bf16 %v569_v13, %v567_v12  ;;  %v571_v18 = vld [vmem:[#allocation7 + $0x1a0] sm:$0xff] }
  0xeb   : > { %v2571_v17 = vpack.c.bf16 %v574_v15, %v572_v14  ;;  %v573_v19 = vld [vmem:[#allocation7 + $0x1b0] sm:$0xff]  ;;  %v576_v20 = vld [vmem:[#allocation7 + $0x1c8] sm:$0xff]  ;;  %v578_v21 = vld [vmem:[#allocation7 + $0x1d8] sm:$0xff] }
  0xec   : > { %2538 = vmatpush1.bf16.msra.mxu0 %v2537_v31  ;;  %v2573_v22 = vpack.c.bf16 %v573_v19, %v571_v18  ;;  %v2575_v23 = vpack.c.bf16 %v578_v21, %v576_v20  ;;  %v575_v24 = vld [vmem:[#allocation7 + $0x1c0] sm:$0xff]  ;;  %v577_v25 = vld [vmem:[#allocation7 + $0x1d0] sm:$0xff]  ;;  %v580_v26 = vld [vmem:[#allocation7 + $0x1e8] sm:$0xff] }
  0xed   : > { %2540 = vmatprep.subr.bf16.mxu0 %v2539_v32  ;;  %v582_v27 = vld [vmem:[#allocation7 + $0x1f8] sm:$0xff]  ;;  %v2577_v28 = vpack.c.bf16 %v577_v25, %v575_v24  ;;  %v579_v30 = vld [vmem:[#allocation7 + $0x1e0] sm:$0xff]  ;;  %v581_v31 = vld [vmem:[#allocation7 + $0x1f0] sm:$0xff] }
  0xee   : > { %v2579_v29 = vpack.c.bf16 %v582_v27, %v580_v26  ;;  %v584_v32 = vld [vmem:[#allocation7 + $0x208] sm:$0xff]  ;;  %v586_v33 = vld [vmem:[#allocation7 + $0x218] sm:$0xff]  ;;  %v2581_v34 = vpack.c.bf16 %v581_v31, %v579_v30  ;;  %v583_v36 = vld [vmem:[#allocation7 + $0x200] sm:$0xff] }
  0xef   : > { %v2583_v35 = vpack.c.bf16 %v586_v33, %v584_v32  ;;  %v590_v39 = vld [vmem:[#allocation7 + $0x238] sm:$0xff]  ;;  %v511_v40 = vld [vmem:[%s4012_s16] sm:$0xff]  ;;  %v592_v46 = vld [vmem:[#allocation7 + $0x248] sm:$0xff] }
  0xf0   : > { %2542 = vmatpush1.bf16.msra.mxu0 %v2541_v37  ;;  %v585_v37 = vld [vmem:[#allocation7 + $0x210] sm:$0xff]  ;;  %v587_v43 = vld [vmem:[#allocation7 + $0x220] sm:$0xff]  ;;  %v594_v47 = vld [vmem:[#allocation7 + $0x258] sm:$0xff] }
  0xf1   : > { %2544 = vmatprep.subr.bf16.mxu0 %v2543_v38  ;;  %v588_v38 = vld [vmem:[#allocation7 + $0x228] sm:$0xff]  ;;  %v2585_v41 = vpack.c.bf16 %v585_v37, %v583_v36  ;;  %v2591_v49 = vpack.c.bf16 %v594_v47, %v592_v46  ;;  %v598_v53 = vld [vmem:[#allocation7 + $0x278] sm:$0xff]  ;;  %v631_v46 = vld [vmem:[#allocation7 + $0x380] sm:$0xff] }
  0xf2   : > { %v2587_v42 = vpack.c.bf16 %v590_v39, %v588_v38  ;;  %v596_v52 = vld [vmem:[#allocation7 + $0x268] sm:$0xff]  ;;  %v602_v59 = vld [vmem:[#allocation7 + $0x298] sm:$0xff]  ;;  %v633_v47 = vld [vmem:[#allocation7 + $0x390] sm:$0xff] }
  0xf3   : > { %v2595_v55 = vpack.c.bf16 %v598_v53, %v596_v52  ;;  %v600_v58 = vld [vmem:[#allocation7 + $0x288] sm:$0xff]  ;;  %v606_v1 = vld [vmem:[#allocation7 + $0x2b8] sm:$0xff]  ;;  %v635_v52 = vld [vmem:[#allocation7 + $0x3a0] sm:$0xff] }
  0xf4   : > { %2546 = vmatpush1.bf16.msra.mxu0 %v2545_v44  ;;  %v589_v44 = vld [vmem:[#allocation7 + $0x230] sm:$0xff]  ;;  %v2599_v61 = vpack.c.bf16 %v602_v59, %v600_v58  ;;  %v604_v0 = vld [vmem:[#allocation7 + $0x2a8] sm:$0xff]  ;;  %v610_v7 = vld [vmem:[#allocation7 + $0x2d8] sm:$0xff] }
  0xf5   : > { %2548 = vmatprep.subr.bf16.mxu0 %v2547_v45  ;;  %v514_v45 = vld [vmem:[%s4012_s16 + $0x18] sm:$0xff]  ;;  %v2589_v48 = vpack.c.bf16 %v589_v44, %v587_v43  ;;  %v2603_v3 = vpack.c.bf16 %v606_v1, %v604_v0  ;;  %v608_v6 = vld [vmem:[#allocation7 + $0x2c8] sm:$0xff]  ;;  %v637_v53 = vld [vmem:[#allocation7 + $0x3b0] sm:$0xff] }
  0xf6   : > { %v2607_v9 = vpack.c.bf16 %v610_v7, %v608_v6  ;;  %v612_v12 = vld [vmem:[#allocation7 + $0x2e8] sm:$0xff]  ;;  %v614_v13 = vld [vmem:[#allocation7 + $0x2f8] sm:$0xff]  ;;  %v639_v58 = vld [vmem:[#allocation7 + $0x3c0] sm:$0xff] }
  0xf7   : > { %v2611_v15 = vpack.c.bf16 %v614_v13, %v612_v12  ;;  %v616_v18 = vld [vmem:[#allocation7 + $0x308] sm:$0xff]  ;;  %v618_v19 = vld [vmem:[#allocation7 + $0x318] sm:$0xff]  ;;  %v641_v59 = vld [vmem:[#allocation7 + $0x3d0] sm:$0xff] }
  0xf8   : > { %2550 = vmatpush1.bf16.msra.mxu0 %v2549_v50  ;;  %v591_v50 = vld [vmem:[#allocation7 + $0x240] sm:$0xff]  ;;  %v2615_v21 = vpack.c.bf16 %v618_v19, %v616_v18  ;;  %v620_v24 = vld [vmem:[#allocation7 + $0x328] sm:$0xff]  ;;  %v622_v25 = vld [vmem:[#allocation7 + $0x338] sm:$0xff] }
  0xf9   : > { %2552 = vmatprep.subr.bf16.mxu0 %v2551_v51  ;;  %v593_v51 = vld [vmem:[#allocation7 + $0x250] sm:$0xff]  ;;  %v2619_v27 = vpack.c.bf16 %v622_v25, %v620_v24  ;;  %v624_v30 = vld [vmem:[#allocation7 + $0x348] sm:$0xff]  ;;  %v626_v31 = vld [vmem:[#allocation7 + $0x358] sm:$0xff] }
  0xfa   : > { %v2593_v54 = vpack.c.bf16 %v593_v51, %v591_v50  ;;  %v2623_v33 = vpack.c.bf16 %v626_v31, %v624_v30  ;;  %v628_v36 = vld [vmem:[#allocation7 + $0x368] sm:$0xff]  ;;  %v630_v37 = vld [vmem:[#allocation7 + $0x378] sm:$0xff]  ;;  %v2633_v50 = vpack.c.bf16 %v633_v47, %v631_v46  ;;  %v643_v0 = vld [vmem:[#allocation7 + $0x3e0] sm:$0xff] }
  0xfb   : > { %v2627_v39 = vpack.c.bf16 %v630_v37, %v628_v36  ;;  %v634_v43 = vld [vmem:[#allocation7 + $0x398] sm:$0xff]  ;;  %v645_v1 = vld [vmem:[#allocation7 + $0x3f0] sm:$0xff]  ;;  %v647_v6 = vld [vmem:[#allocation7 + $0x400] sm:$0xff] }
  0xfc   : > { %2554 = vmatpush1.bf16.msra.mxu0 %v2553_v56  ;;  %v595_v56 = vld [vmem:[#allocation7 + $0x260] sm:$0xff]  ;;  %v649_v7 = vld [vmem:[#allocation7 + $0x410] sm:$0xff]  ;;  %v1084_v36 = vld [vmem:[#allocation8 + $0x58] sm:$0xff] }
  0xfd   : > { %2556 = vmatprep.subr.bf16.mxu0 %v2555_v57  ;;  %v597_v57 = vld [vmem:[#allocation7 + $0x270] sm:$0xff]  ;;  %v651_v13 = vld [vmem:[#allocation7 + $0x420] sm:$0xff]  ;;  %v1088_v46 = vld [vmem:[#allocation8 + $0x78] sm:$0xff] }
  0xfe   : > { %v2597_v60 = vpack.c.bf16 %v597_v57, %v595_v56  ;;  %v2637_v56 = vpack.c.bf16 %v637_v53, %v635_v52  ;;  %v655_v18 = vld [vmem:[#allocation7 + $0x440] sm:$0xff]  ;;  %v657_v19 = vld [vmem:[#allocation7 + $0x450] sm:$0xff]  ;;  %v664_v47 = vld [vmem:[#allocation7 + $0x488] sm:$0xff] }
  0xff   : > { %v1075_v25 = vld [vmem:[#allocation8 + $0x10] sm:$0xff]  ;;  %v1077_v31 = vld [vmem:[#allocation8 + $0x20] sm:$0xff] }
 0x100   : > { %2558 = vmatpush1.bf16.msra.mxu0 %v2557_v62  ;;  %v599_v62 = vld [vmem:[#allocation7 + $0x280] sm:$0xff] }
 0x101   : > { %2560 = vmatprep.subr.bf16.mxu0 %v2559_v63  ;;  %v601_v63 = vld [vmem:[#allocation7 + $0x290] sm:$0xff]  ;;  %v1085_v53 = vld [vmem:[#allocation8 + $0x60] sm:$0xff] }
 0x102   : > { %v2601_v2 = vpack.c.bf16 %v601_v63, %v599_v62  ;;  %v2641_v62 = vpack.c.bf16 %v641_v59, %v639_v58  ;;  %v1092_v58 = vld [vmem:[#allocation8 + $0x98] sm:$0xff]  ;;  %v668_v59 = vld [vmem:[#allocation7 + $0x4a8] sm:$0xff] }
 0x104   : > { %2562 = vmatpush1.bf16.msra.mxu0 %v2561_v4  ;;  %v603_v4 = vld [vmem:[#allocation7 + $0x2a0] sm:$0xff] }
 0x105   : > { %2564 = vmatprep.subr.bf16.mxu0 %v2563_v5  ;;  %v605_v5 = vld [vmem:[#allocation7 + $0x2b0] sm:$0xff] }
 0x106   : > { %v2605_v8 = vpack.c.bf16 %v605_v5, %v603_v4  ;;  %v2645_v4 = vpack.c.bf16 %v645_v1, %v643_v0  ;;  %v1089_v1 = vld [vmem:[#allocation8 + $0x80] sm:$0xff] }
 0x108   : > { %2566 = vmatpush1.bf16.msra.mxu0 %v2565_v10  ;;  %v607_v10 = vld [vmem:[#allocation7 + $0x2c0] sm:$0xff] }
 0x109   : > { %2568 = vmatprep.subr.bf16.mxu0 %v2567_v11  ;;  %v609_v11 = vld [vmem:[#allocation7 + $0x2d0] sm:$0xff] }
 0x10a   : > { %v2609_v14 = vpack.c.bf16 %v609_v11, %v607_v10  ;;  %v513_v10 = vld [vmem:[%s4012_s16 + $0x10] sm:$0xff]  ;;  %v2649_v11 = vpack.c.bf16 %v649_v7, %v647_v6  ;;  %v1096_v6 = vld [vmem:[#allocation8 + $0xb8] sm:$0xff]  ;;  %v672_v7 = vld [vmem:[#allocation7 + $0x4c8] sm:$0xff] }
 0x10c   : > { %2570 = vmatpush1.bf16.msra.mxu0 %v2569_v16  ;;  %v611_v16 = vld [vmem:[#allocation7 + $0x2e0] sm:$0xff] }
 0x10d   : > { %2572 = vmatprep.subr.bf16.mxu0 %v2571_v17  ;;  %v613_v17 = vld [vmem:[#allocation7 + $0x2f0] sm:$0xff] }
 0x10e   : > { %v2613_v20 = vpack.c.bf16 %v613_v17, %v611_v16  ;;  %v656_v16 = vld [vmem:[#allocation7 + $0x448] sm:$0xff]  ;;  %v658_v17 = vld [vmem:[#allocation7 + $0x458] sm:$0xff] }
 0x110   : > { %2574 = vmatpush1.bf16.msra.mxu0 %v2573_v22  ;;  %v615_v22 = vld [vmem:[#allocation7 + $0x300] sm:$0xff] }
 0x111   : > { %2576 = vmatprep.subr.bf16.mxu0 %v2575_v23  ;;  %v617_v23 = vld [vmem:[#allocation7 + $0x310] sm:$0xff] }
 0x112   : > { %v2617_v26 = vpack.c.bf16 %v617_v23, %v615_v22  ;;  %v1073_v22 = vld [vmem:[#allocation8] sm:$0xff] }
 0x114   : > { %2578 = vmatpush1.bf16.msra.mxu0 %v2577_v28  ;;  %v619_v28 = vld [vmem:[#allocation7 + $0x320] sm:$0xff] }
 0x115   : > { %2580 = vmatprep.subr.bf16.mxu0 %v2579_v29  ;;  %v621_v29 = vld [vmem:[#allocation7 + $0x330] sm:$0xff] }
 0x116   : > { %v2621_v32 = vpack.c.bf16 %v621_v29, %v619_v28  ;;  %v2655_v28 = vpack.c.bf16 %v658_v17, %v656_v16  ;;  %v2777_v29 = vpack.c.bf16 %v1075_v25, %v1073_v22  ;;  %v673_v16 = vld [vmem:[#allocation7 + $0x4d0] sm:$0xff]  ;;  %v1098_v17 = vld [vmem:[#allocation8 + $0xc8] sm:$0xff]  ;;  %v1097_v25 = vld [vmem:[#allocation8 + $0xc0] sm:$0xff] }
 0x118   : > { %2582 = vmatpush1.bf16.msra.mxu0 %v2581_v34  ;;  %v623_v34 = vld [vmem:[#allocation7 + $0x340] sm:$0xff] }
 0x119   : > { %2584 = vmatprep.subr.bf16.mxu0 %v2583_v35  ;;  %v625_v35 = vld [vmem:[#allocation7 + $0x350] sm:$0xff] }
 0x11a   : > { %v2625_v38 = vpack.c.bf16 %v625_v35, %v623_v34  ;;  %v660_v34 = vld [vmem:[#allocation7 + $0x468] sm:$0xff]  ;;  %v662_v35 = vld [vmem:[#allocation7 + $0x478] sm:$0xff] }
 0x11b   : > { %852 = vmatmul.mubr.f32.vlgmr.msra.gmra.mrb[0].mxu0 %v511_v40  ;;  %v627_v40 = vld [vmem:[#allocation7 + $0x360] sm:$0xff] }
 0x11c   : > { %2586 = vmatpush1.bf16.msra.mxu0 %v2585_v41  ;;  %922 = vmatprep.mubr.f32.mxu0 %v514_v45  ;;  %v629_v41 = vld [vmem:[#allocation7 + $0x370] sm:$0xff] }
 0x11d   : > { %2588 = vmatprep.subr.bf16.mxu0 %v2587_v42  ;;  %v632_v42 = vld [vmem:[#allocation7 + $0x388] sm:$0xff]  ;;  %v2629_v44 = vpack.c.bf16 %v629_v41, %v627_v40  ;;  %v1081_v41 = vld [vmem:[#allocation8 + $0x40] sm:$0xff] }
 0x11e   : > { %v2631_v45 = vpack.c.bf16 %v634_v43, %v632_v42  ;;  %v1083_v42 = vld [vmem:[#allocation8 + $0x50] sm:$0xff]  ;;  %v2659_v43 = vpack.c.bf16 %v662_v35, %v660_v34  ;;  %v679_v35 = vld [vmem:[#allocation7 + $0x500] sm:$0xff] }
 0x120   : > { %2590 = vmatpush1.bf16.msra.mxu0 %v2589_v48  ;;  %v636_v48 = vld [vmem:[#allocation7 + $0x3a8] sm:$0xff] }
 0x121   : > { %2592 = vmatprep.subr.bf16.mxu0 %v2591_v49  ;;  %v638_v49 = vld [vmem:[#allocation7 + $0x3b8] sm:$0xff] }
 0x122   : > { %v2635_v51 = vpack.c.bf16 %v638_v49, %v636_v48  ;;  %v666_v48 = vld [vmem:[#allocation7 + $0x498] sm:$0xff]  ;;  %v2785_v49 = vpack.c.bf16 %v1083_v42, %v1081_v41  ;;  %v1106_v41 = vld [vmem:[#allocation8 + $0x108] sm:$0xff] }
 0x123   : > { %v1108_v42 = vld [vmem:[#allocation8 + $0x118] sm:$0xff] }
 0x124   : > { %2594 = vmatpush1.bf16.msra.mxu0 %v2593_v54  ;;  %v640_v54 = vld [vmem:[#allocation7 + $0x3c8] sm:$0xff] }
 0x125   : > { %2596 = vmatprep.subr.bf16.mxu0 %v2595_v55  ;;  %v642_v55 = vld [vmem:[#allocation7 + $0x3d8] sm:$0xff] }
 0x126   : > { %v2639_v57 = vpack.c.bf16 %v642_v55, %v640_v54  ;;  %v1087_v54 = vld [vmem:[#allocation8 + $0x70] sm:$0xff]  ;;  %v2663_v55 = vpack.c.bf16 %v666_v48, %v664_v47  ;;  %v683_v47 = vld [vmem:[#allocation7 + $0x520] sm:$0xff]  ;;  %v2807_v48 = vpack.c.bf16 %v1108_v42, %v1106_v41 }
 0x128   : > { %2598 = vmatpush1.bf16.msra.mxu0 %v2597_v60  ;;  %v644_v60 = vld [vmem:[#allocation7 + $0x3e8] sm:$0xff] }
 0x129   : > { %2600 = vmatprep.subr.bf16.mxu0 %v2599_v61  ;;  %v646_v61 = vld [vmem:[#allocation7 + $0x3f8] sm:$0xff] }
 0x12a   : > { %v2643_v63 = vpack.c.bf16 %v646_v61, %v644_v60  ;;  %v670_v60 = vld [vmem:[#allocation7 + $0x4b8] sm:$0xff]  ;;  %v2789_v61 = vpack.c.bf16 %v1087_v54, %v1085_v53  ;;  %v1110_v53 = vld [vmem:[#allocation8 + $0x128] sm:$0xff] }
 0x12b   : > { %v1112_v54 = vld [vmem:[#allocation8 + $0x138] sm:$0xff] }
 0x12c   : > { %2602 = vmatpush1.bf16.msra.mxu0 %v2601_v2  ;;  %v648_v2 = vld [vmem:[#allocation7 + $0x408] sm:$0xff] }
 0x12d   : > { %2604 = vmatprep.subr.bf16.mxu0 %v2603_v3  ;;  %v650_v3 = vld [vmem:[#allocation7 + $0x418] sm:$0xff] }
 0x12e   : > { %v2647_v5 = vpack.c.bf16 %v650_v3, %v648_v2  ;;  %v1091_v2 = vld [vmem:[#allocation8 + $0x90] sm:$0xff]  ;;  %v2667_v3 = vpack.c.bf16 %v670_v60, %v668_v59  ;;  %v687_v59 = vld [vmem:[#allocation7 + $0x540] sm:$0xff]  ;;  %v2811_v60 = vpack.c.bf16 %v1112_v54, %v1110_v53 }
 0x130   : > { %2606 = vmatpush1.bf16.msra.mxu0 %v2605_v8  ;;  %v652_v8 = vld [vmem:[#allocation7 + $0x428] sm:$0xff] }
 0x131   : > { %2608 = vmatprep.subr.bf16.mxu0 %v2607_v9  ;;  %v654_v9 = vld [vmem:[#allocation7 + $0x438] sm:$0xff] }
 0x132   : > { %v2651_v12 = vpack.c.bf16 %v654_v9, %v652_v8  ;;  %v674_v8 = vld [vmem:[#allocation7 + $0x4d8] sm:$0xff]  ;;  %v2793_v9 = vpack.c.bf16 %v1091_v2, %v1089_v1  ;;  %v1114_v1 = vld [vmem:[#allocation8 + $0x148] sm:$0xff] }
 0x133   : > { %v1116_v2 = vld [vmem:[#allocation8 + $0x158] sm:$0xff] }
 0x134   : > { %2610 = vmatpush1.bf16.msra.mxu0 %v2609_v14  ;;  %v653_v14 = vld [vmem:[#allocation7 + $0x430] sm:$0xff] }
 0x135   : > { %2612 = vmatprep.subr.bf16.mxu0 %v2611_v15  ;;  %v516_v15 = vld [vmem:[%s4012_s16 + $0x28] sm:$0xff]  ;;  %v2653_v23 = vpack.c.bf16 %v653_v14, %v651_v13  ;;  %v1093_v13 = vld [vmem:[#allocation8 + $0xa0] sm:$0xff]  ;;  %v1095_v14 = vld [vmem:[#allocation8 + $0xb0] sm:$0xff] }
 0x138   : > { %2614 = vmatpush1.bf16.msra.mxu0 %v2613_v20  ;;  %v1074_v20 = vld [vmem:[#allocation8 + $0x8] sm:$0xff] }
 0x139   : > { %2616 = vmatprep.subr.bf16.mxu0 %v2615_v21  ;;  %v1076_v21 = vld [vmem:[#allocation8 + $0x18] sm:$0xff] }
 0x13a   : > { %v2775_v24 = vpack.c.bf16 %v1076_v21, %v1074_v20  ;;  %v678_v20 = vld [vmem:[#allocation7 + $0x4f8] sm:$0xff]  ;;  %v2797_v21 = vpack.c.bf16 %v1095_v14, %v1093_v13  ;;  %v1118_v13 = vld [vmem:[#allocation8 + $0x168] sm:$0xff] }
 0x13b   : > { %v1120_v14 = vld [vmem:[#allocation8 + $0x178] sm:$0xff] }
 0x13c   : > { %2618 = vmatpush1.bf16.msra.mxu0 %v2617_v26  ;;  %v1078_v26 = vld [vmem:[#allocation8 + $0x28] sm:$0xff]  ;;  %2776 = vmatprep.subr.bf16.mxu1 %v2775_v24 }
 0x13d   : > { %2620 = vmatprep.subr.bf16.mxu0 %v2619_v27  ;;  %v1080_v27 = vld [vmem:[#allocation8 + $0x38] sm:$0xff]  ;;  %2778 = vmatpush1.bf16.msra.mxu1 %v2777_v29  ;;  %v1102_v29 = vld [vmem:[#allocation8 + $0xe8] sm:$0xff] }
 0x13e   : > { %v2779_v30 = vpack.c.bf16 %v1080_v27, %v1078_v26  ;;  %v1099_v26 = vld [vmem:[#allocation8 + $0xd0] sm:$0xff] }
 0x140   : > { %2622 = vmatpush1.bf16.msra.mxu0 %v2621_v32  ;;  %v1079_v32 = vld [vmem:[#allocation8 + $0x30] sm:$0xff]  ;;  %2780 = vmatprep.subr.bf16.mxu1 %v2779_v30  ;;  %v1104_v30 = vld [vmem:[#allocation8 + $0xf8] sm:$0xff] }
 0x141   : > { %2624 = vmatprep.subr.bf16.mxu0 %v2623_v33  ;;  %v1082_v33 = vld [vmem:[#allocation8 + $0x48] sm:$0xff]  ;;  %v2781_v37 = vpack.c.bf16 %v1079_v32, %v1077_v31  ;;  %v682_v32 = vld [vmem:[#allocation7 + $0x518] sm:$0xff] }
 0x142   : > { %v2783_v40 = vpack.c.bf16 %v1084_v36, %v1082_v33  ;;  %v680_v31 = vld [vmem:[#allocation7 + $0x508] sm:$0xff]  ;;  %v2801_v33 = vpack.c.bf16 %v1099_v26, %v1097_v25  ;;  %v2803_v36 = vpack.c.bf16 %v1104_v30, %v1102_v29  ;;  %v1124_v26 = vld [vmem:[#allocation8 + $0x198] sm:$0xff] }
 0x143   : > { %2782 = vmatpush1.bf16.msra.mxu1 %v2781_v37  ;;  %v1101_v37 = vld [vmem:[#allocation8 + $0xe0] sm:$0xff]  ;;  %v1122_v25 = vld [vmem:[#allocation8 + $0x188] sm:$0xff] }
 0x144   : > { %2626 = vmatpush1.bf16.msra.mxu0 %v2625_v38  ;;  %v2657_v38 = vpack.c.bf16 %v657_v19, %v655_v18  ;;  %2784 = vmatprep.subr.bf16.mxu1 %v2783_v40  ;;  %v1100_v18 = vld [vmem:[#allocation8 + $0xd8] sm:$0xff]  ;;  %v676_v19 = vld [vmem:[#allocation7 + $0x4e8] sm:$0xff]  ;;  %v681_v40 = vld [vmem:[#allocation7 + $0x510] sm:$0xff] }
 0x145   : > { %2628 = vmatprep.subr.bf16.mxu0 %v2627_v39  ;;  %v659_v39 = vld [vmem:[#allocation7 + $0x460] sm:$0xff]  ;;  %v2799_v24 = vpack.c.bf16 %v1100_v18, %v1098_v17  ;;  %v2675_v27 = vpack.c.bf16 %v678_v20, %v676_v19  ;;  %v2819_v20 = vpack.c.bf16 %v1120_v14, %v1118_v13  ;;  %v721_v14 = vld [vmem:[#allocation7 + $0x650] sm:$0xff] }
 0x146   : > { %v695_v19 = vld [vmem:[#allocation7 + $0x580] sm:$0xff] }
 0x147   : > { %2786 = vmatpush1.bf16.msra.mxu1 %v2785_v49  ;;  %v1105_v49 = vld [vmem:[#allocation8 + $0x100] sm:$0xff] }
 0x148   : > { %2630 = vmatpush1.bf16.msra.mxu0 %v2629_v44  ;;  %v661_v44 = vld [vmem:[#allocation7 + $0x470] sm:$0xff]  ;;  %v719_v13 = vld [vmem:[#allocation7 + $0x640] sm:$0xff] }
 0x149   : > { %2632 = vmatprep.subr.bf16.mxu0 %v2631_v45  ;;  %v1086_v45 = vld [vmem:[#allocation8 + $0x68] sm:$0xff] }
 0x14a   : > { %v2787_v52 = vpack.c.bf16 %v1088_v46, %v1086_v45  ;;  %v2681_v46 = vpack.c.bf16 %v681_v40, %v679_v35  ;;  %v706_v40 = vld [vmem:[#allocation7 + $0x5d8] sm:$0xff] }
 0x14c   : > { %2634 = vmatpush1.bf16.msra.mxu0 %v2633_v50  ;;  %v2661_v50 = vpack.c.bf16 %v661_v44, %v659_v39  ;;  %2788 = vmatprep.subr.bf16.mxu1 %v2787_v52  ;;  %v2679_v39 = vpack.c.bf16 %v682_v32, %v680_v31  ;;  %v686_v44 = vld [vmem:[#allocation7 + $0x538] sm:$0xff]  ;;  %v685_v52 = vld [vmem:[#allocation7 + $0x530] sm:$0xff]  ;;  %v699_v31 = vld [vmem:[#allocation7 + $0x5a0] sm:$0xff]  ;;  %v2823_v32 = vpack.c.bf16 %v1124_v26, %v1122_v25 }
 0x14d   : > { %2636 = vmatprep.subr.bf16.mxu0 %v2635_v51  ;;  %v663_v51 = vld [vmem:[#allocation7 + $0x480] sm:$0xff]  ;;  %2790 = vmatpush1.bf16.msra.mxu1 %v2789_v61  ;;  %v729_v26 = vld [vmem:[#allocation7 + $0x690] sm:$0xff] }
 0x14e   : > { %v1109_v61 = vld [vmem:[#allocation8 + $0x120] sm:$0xff] }
 0x14f   : > { %v727_v25 = vld [vmem:[#allocation7 + $0x680] sm:$0xff] }
 0x150   : > { %2638 = vmatpush1.bf16.msra.mxu0 %v2637_v56  ;;  %v665_v56 = vld [vmem:[#allocation7 + $0x490] sm:$0xff] }
 0x151   : > { %2640 = vmatprep.subr.bf16.mxu0 %v2639_v57  ;;  %v1090_v57 = vld [vmem:[#allocation8 + $0x88] sm:$0xff] }
 0x152   : > { %v2791_v0 = vpack.c.bf16 %v1092_v58, %v1090_v57  ;;  %v2685_v58 = vpack.c.bf16 %v685_v52, %v683_v47  ;;  %v710_v52 = vld [vmem:[#allocation7 + $0x5f8] sm:$0xff] }
 0x154   : > { %2642 = vmatpush1.bf16.msra.mxu0 %v2641_v62  ;;  %v2665_v62 = vpack.c.bf16 %v665_v56, %v663_v51  ;;  %2792 = vmatprep.subr.bf16.mxu1 %v2791_v0  ;;  %v690_v56 = vld [vmem:[#allocation7 + $0x558] sm:$0xff]  ;;  %v689_v0 = vld [vmem:[#allocation7 + $0x550] sm:$0xff] }
 0x155   : > { %2644 = vmatprep.subr.bf16.mxu0 %v2643_v63  ;;  %v667_v63 = vld [vmem:[#allocation7 + $0x4a0] sm:$0xff]  ;;  %2794 = vmatpush1.bf16.msra.mxu1 %v2793_v9 }
 0x156   : > { %v1113_v9 = vld [vmem:[#allocation8 + $0x140] sm:$0xff] }
 0x158   : > { %2646 = vmatpush1.bf16.msra.mxu0 %v2645_v4  ;;  %v669_v4 = vld [vmem:[#allocation7 + $0x4b0] sm:$0xff] }
 0x159   : > { %2648 = vmatprep.subr.bf16.mxu0 %v2647_v5  ;;  %v1094_v5 = vld [vmem:[#allocation8 + $0xa8] sm:$0xff] }
 0x15b   : > { %923 = vmatmul.mubr.f32.vlgmr.msra.gmra.mrb[0].mxu0 %v513_v10  ;;  %v2669_v10 = vpack.c.bf16 %v669_v4, %v667_v63  ;;  %v694_v4 = vld [vmem:[#allocation7 + $0x578] sm:$0xff] }
 0x15c   : > { %2650 = vmatpush1.bf16.msra.mxu0 %v2649_v11  ;;  %993 = vmatprep.mubr.f32.mxu0 %v516_v15  ;;  %v671_v11 = vld [vmem:[#allocation7 + $0x4c0] sm:$0xff]  ;;  %v2671_v15 = vpack.c.bf16 %v674_v8, %v672_v7  ;;  %v2815_v8 = vpack.c.bf16 %v1116_v2, %v1114_v1  ;;  %v716_v1 = vld [vmem:[#allocation7 + $0x628] sm:$0xff]  ;;  %v718_v2 = vld [vmem:[#allocation7 + $0x638] sm:$0xff] }
 0x15d   : > { %2652 = vmatprep.subr.bf16.mxu0 %v2651_v12  ;;  %v2795_v12 = vpack.c.bf16 %v1096_v6, %v1094_v5  ;;  %v2673_v22 = vpack.c.bf16 %v673_v16, %v671_v11  ;;  %v2689_v6 = vpack.c.bf16 %v689_v0, %v687_v59  ;;  %v691_v7 = vld [vmem:[#allocation7 + $0x560] sm:$0xff]  ;;  %v698_v16 = vld [vmem:[#allocation7 + $0x598] sm:$0xff]  ;;  %v712_v59 = vld [vmem:[#allocation7 + $0x608] sm:$0xff] }
 0x15e   : > { %v713_v0 = vld [vmem:[#allocation7 + $0x610] sm:$0xff] }
 0x15f   : > { %2796 = vmatprep.subr.bf16.mxu1 %v2795_v12  ;;  %v693_v12 = vld [vmem:[#allocation7 + $0x570] sm:$0xff] }
 0x160   : > { %2654 = vmatpush1.bf16.msra.mxu0 %v2653_v23  ;;  %v675_v23 = vld [vmem:[#allocation7 + $0x4e0] sm:$0xff]  ;;  %2798 = vmatpush1.bf16.msra.mxu1 %v2797_v21  ;;  %v2693_v18 = vpack.c.bf16 %v693_v12, %v691_v7  ;;  %v717_v7 = vld [vmem:[#allocation7 + $0x630] sm:$0xff] }
 0x161   : > { %2656 = vmatprep.subr.bf16.mxu0 %v2655_v28  ;;  %v677_v28 = vld [vmem:[#allocation7 + $0x4f0] sm:$0xff]  ;;  %2800 = vmatprep.subr.bf16.mxu1 %v2799_v24  ;;  %v1117_v21 = vld [vmem:[#allocation8 + $0x160] sm:$0xff] }
 0x162   : > { %v2677_v34 = vpack.c.bf16 %v677_v28, %v675_v23  ;;  %v697_v24 = vld [vmem:[#allocation7 + $0x590] sm:$0xff]  ;;  %v702_v28 = vld [vmem:[#allocation7 + $0x5b8] sm:$0xff] }
 0x163   : > { %v2697_v30 = vpack.c.bf16 %v697_v24, %v695_v19  ;;  %v723_v19 = vld [vmem:[#allocation7 + $0x660] sm:$0xff] }
 0x164   : > { %2658 = vmatpush1.bf16.msra.mxu0 %v2657_v38  ;;  %v1103_v38 = vld [vmem:[#allocation8 + $0xf0] sm:$0xff]  ;;  %2802 = vmatpush1.bf16.msra.mxu1 %v2801_v33  ;;  %v1121_v33 = vld [vmem:[#allocation8 + $0x180] sm:$0xff] }
 0x165   : > { %2660 = vmatprep.subr.bf16.mxu0 %v2659_v43  ;;  %v684_v43 = vld [vmem:[#allocation7 + $0x528] sm:$0xff]  ;;  %v2805_v45 = vpack.c.bf16 %v1103_v38, %v1101_v37  ;;  %2804 = vmatprep.subr.bf16.mxu1 %v2803_v36  ;;  %v701_v36 = vld [vmem:[#allocation7 + $0x5b0] sm:$0xff]  ;;  %v1128_v38 = vld [vmem:[#allocation8 + $0x1b8] sm:$0xff] }
 0x166   : > { %v2683_v51 = vpack.c.bf16 %v686_v44, %v684_v43  ;;  %v1126_v37 = vld [vmem:[#allocation8 + $0x1a8] sm:$0xff]  ;;  %v2701_v42 = vpack.c.bf16 %v701_v36, %v699_v31  ;;  %v703_v43 = vld [vmem:[#allocation7 + $0x5c0] sm:$0xff] }
 0x167   : > { %v2827_v44 = vpack.c.bf16 %v1128_v38, %v1126_v37  ;;  %v731_v31 = vld [vmem:[#allocation7 + $0x6a0] sm:$0xff]  ;;  %v737_v38 = vld [vmem:[#allocation7 + $0x6d0] sm:$0xff] }
 0x168   : > { %2662 = vmatpush1.bf16.msra.mxu0 %v2661_v50  ;;  %v1107_v50 = vld [vmem:[#allocation8 + $0x110] sm:$0xff]  ;;  %2806 = vmatpush1.bf16.msra.mxu1 %v2805_v45  ;;  %v1125_v45 = vld [vmem:[#allocation8 + $0x1a0] sm:$0xff] }
 0x169   : > { %2664 = vmatprep.subr.bf16.mxu0 %v2663_v55  ;;  %v688_v55 = vld [vmem:[#allocation7 + $0x548] sm:$0xff]  ;;  %v2809_v57 = vpack.c.bf16 %v1107_v50, %v1105_v49  ;;  %2808 = vmatprep.subr.bf16.mxu1 %v2807_v48  ;;  %v705_v48 = vld [vmem:[#allocation7 + $0x5d0] sm:$0xff]  ;;  %v1132_v50 = vld [vmem:[#allocation8 + $0x1d8] sm:$0xff] }
 0x16a   : > { %v2687_v63 = vpack.c.bf16 %v690_v56, %v688_v55  ;;  %v1130_v49 = vld [vmem:[#allocation8 + $0x1c8] sm:$0xff]  ;;  %v2705_v54 = vpack.c.bf16 %v705_v48, %v703_v43  ;;  %v735_v37 = vld [vmem:[#allocation7 + $0x6c0] sm:$0xff] }
 0x16b   : > { %v2831_v55 = vpack.c.bf16 %v1132_v50, %v1130_v49  ;;  %v739_v43 = vld [vmem:[#allocation7 + $0x6e0] sm:$0xff]  ;;  %v745_v50 = vld [vmem:[#allocation7 + $0x710] sm:$0xff] }
 0x16c   : > { %2666 = vmatpush1.bf16.msra.mxu0 %v2665_v62  ;;  %v1111_v62 = vld [vmem:[#allocation8 + $0x130] sm:$0xff]  ;;  %2810 = vmatpush1.bf16.msra.mxu1 %v2809_v57  ;;  %v707_v57 = vld [vmem:[#allocation7 + $0x5e0] sm:$0xff] }
 0x16d   : > { %2668 = vmatprep.subr.bf16.mxu0 %v2667_v3  ;;  %v692_v3 = vld [vmem:[#allocation7 + $0x568] sm:$0xff]  ;;  %v2813_v5 = vpack.c.bf16 %v1111_v62, %v1109_v61  ;;  %2812 = vmatprep.subr.bf16.mxu1 %v2811_v60  ;;  %v714_v60 = vld [vmem:[#allocation7 + $0x618] sm:$0xff]  ;;  %v743_v49 = vld [vmem:[#allocation7 + $0x700] sm:$0xff] }
 0x16e   : > { %v2691_v11 = vpack.c.bf16 %v694_v4, %v692_v3  ;;  %v2711_v62 = vpack.c.bf16 %v714_v60, %v712_v59  ;;  %v515_v3 = vld [vmem:[%s4012_s16 + $0x20] sm:$0xff] }
 0x170   : > { %2670 = vmatpush1.bf16.msra.mxu0 %v2669_v10  ;;  %v1115_v10 = vld [vmem:[#allocation8 + $0x150] sm:$0xff]  ;;  %2814 = vmatpush1.bf16.msra.mxu1 %v2813_v5  ;;  %v2715_v5 = vpack.c.bf16 %v718_v2, %v716_v1 }
 0x171   : > { %2672 = vmatprep.subr.bf16.mxu0 %v2671_v15  ;;  %v696_v15 = vld [vmem:[#allocation7 + $0x588] sm:$0xff]  ;;  %v2817_v17 = vpack.c.bf16 %v1115_v10, %v1113_v9  ;;  %2816 = vmatprep.subr.bf16.mxu1 %v2815_v8  ;;  %v518_v8 = vld [vmem:[%s4012_s16 + $0x38] sm:$0xff] }
 0x172   : > { %v2695_v23 = vpack.c.bf16 %v698_v16, %v696_v15  ;;  %v720_v9 = vld [vmem:[#allocation7 + $0x648] sm:$0xff]  ;;  %v722_v10 = vld [vmem:[#allocation7 + $0x658] sm:$0xff] }
 0x173   : > { %v2719_v12 = vpack.c.bf16 %v722_v10, %v720_v9  ;;  %v724_v15 = vld [vmem:[#allocation7 + $0x668] sm:$0xff]  ;;  %v726_v16 = vld [vmem:[#allocation7 + $0x678] sm:$0xff]  ;;  %v759_v9 = vld [vmem:[#allocation7 + $0x780] sm:$0xff] }
 0x174   : > { %2674 = vmatpush1.bf16.msra.mxu0 %v2673_v22  ;;  %v1119_v22 = vld [vmem:[#allocation8 + $0x170] sm:$0xff]  ;;  %2818 = vmatpush1.bf16.msra.mxu1 %v2817_v17  ;;  %v2721_v17 = vpack.c.bf16 %v721_v14, %v719_v13 }
 0x175   : > { %2676 = vmatprep.subr.bf16.mxu0 %v2675_v27  ;;  %v700_v27 = vld [vmem:[#allocation7 + $0x5a8] sm:$0xff]  ;;  %v2821_v29 = vpack.c.bf16 %v1119_v22, %v1117_v21  ;;  %2820 = vmatprep.subr.bf16.mxu1 %v2819_v20  ;;  %v725_v20 = vld [vmem:[#allocation7 + $0x670] sm:$0xff]  ;;  %v730_v22 = vld [vmem:[#allocation7 + $0x698] sm:$0xff] }
 0x176   : > { %v2699_v35 = vpack.c.bf16 %v702_v28, %v700_v27  ;;  %v728_v21 = vld [vmem:[#allocation7 + $0x688] sm:$0xff]  ;;  %v734_v28 = vld [vmem:[#allocation7 + $0x6b8] sm:$0xff]  ;;  %v761_v10 = vld [vmem:[#allocation7 + $0x790] sm:$0xff] }
 0x177   : > { %v2727_v24 = vpack.c.bf16 %v730_v22, %v728_v21  ;;  %v732_v27 = vld [vmem:[#allocation7 + $0x6a8] sm:$0xff]  ;;  %v2761_v13 = vpack.c.bf16 %v761_v10, %v759_v9  ;;  %v767_v21 = vld [vmem:[#allocation7 + $0x7c0] sm:$0xff]  ;;  %v769_v22 = vld [vmem:[#allocation7 + $0x7d0] sm:$0xff] }
 0x178   : > { %2678 = vmatpush1.bf16.msra.mxu0 %v2677_v34  ;;  %v1123_v34 = vld [vmem:[#allocation8 + $0x190] sm:$0xff]  ;;  %2822 = vmatpush1.bf16.msra.mxu1 %v2821_v29  ;;  %v2729_v29 = vpack.c.bf16 %v729_v26, %v727_v25  ;;  %v2769_v25 = vpack.c.bf16 %v769_v22, %v767_v21  ;;  %v1249_v10 = vld [vmem:[#allocation10 + $0x60] sm:$0xff] }
 0x179   : > { %2680 = vmatprep.subr.bf16.mxu0 %v2679_v39  ;;  %v704_v39 = vld [vmem:[#allocation7 + $0x5c8] sm:$0xff]  ;;  %v2825_v41 = vpack.c.bf16 %v1123_v34, %v1121_v33  ;;  %2824 = vmatprep.subr.bf16.mxu1 %v2823_v32  ;;  %v733_v32 = vld [vmem:[#allocation7 + $0x6b0] sm:$0xff]  ;;  %v738_v34 = vld [vmem:[#allocation7 + $0x6d8] sm:$0xff] }
 0x17a   : > { %v2703_v47 = vpack.c.bf16 %v706_v40, %v704_v39  ;;  %v736_v33 = vld [vmem:[#allocation7 + $0x6c8] sm:$0xff]  ;;  %v742_v40 = vld [vmem:[#allocation7 + $0x6f8] sm:$0xff]  ;;  %v1257_v21 = vld [vmem:[#allocation10 + $0xa0] sm:$0xff] }
 0x17b   : > { %v2735_v36 = vpack.c.bf16 %v738_v34, %v736_v33  ;;  %v740_v39 = vld [vmem:[#allocation7 + $0x6e8] sm:$0xff] }
 0x17c   : > { %2682 = vmatpush1.bf16.msra.mxu0 %v2681_v46  ;;  %v1127_v46 = vld [vmem:[#allocation8 + $0x1b0] sm:$0xff]  ;;  %2826 = vmatpush1.bf16.msra.mxu1 %v2825_v41  ;;  %v2737_v41 = vpack.c.bf16 %v737_v38, %v735_v37  ;;  %v1134_v34 = vld [vmem:[#allocation8 + $0x1e8] sm:$0xff]  ;;  %v1133_v37 = vld [vmem:[#allocation8 + $0x1e0] sm:$0xff] }
 0x17d   : > { %2684 = vmatprep.subr.bf16.mxu0 %v2683_v51  ;;  %v708_v51 = vld [vmem:[#allocation7 + $0x5e8] sm:$0xff]  ;;  %v2829_v53 = vpack.c.bf16 %v1127_v46, %v1125_v45  ;;  %2828 = vmatprep.subr.bf16.mxu1 %v2827_v44  ;;  %v741_v44 = vld [vmem:[#allocation7 + $0x6f0] sm:$0xff]  ;;  %v746_v46 = vld [vmem:[#allocation7 + $0x718] sm:$0xff] }
 0x17e   : > { %v2707_v56 = vpack.c.bf16 %v710_v52, %v708_v51  ;;  %v744_v45 = vld [vmem:[#allocation7 + $0x708] sm:$0xff]  ;;  %v750_v52 = vld [vmem:[#allocation7 + $0x738] sm:$0xff]  ;;  %v1135_v38 = vld [vmem:[#allocation8 + $0x1f0] sm:$0xff] }
 0x17f   : > { %v2743_v48 = vpack.c.bf16 %v746_v46, %v744_v45  ;;  %v748_v51 = vld [vmem:[#allocation7 + $0x728] sm:$0xff]  ;;  %v775_v46 = vld [vmem:[%s4283_s3] sm:$0x3] }
 0x180   : > { %2686 = vmatpush1.bf16.msra.mxu0 %v2685_v58  ;;  %v709_v58 = vld [vmem:[#allocation7 + $0x5f0] sm:$0xff]  ;;  %2830 = vmatpush1.bf16.msra.mxu1 %v2829_v53  ;;  %v2745_v53 = vpack.c.bf16 %v745_v50, %v743_v49 }
 0x181   : > { %2688 = vmatprep.subr.bf16.mxu0 %v2687_v63  ;;  %v2709_v61 = vpack.c.bf16 %v709_v58, %v707_v57  ;;  %2832 = vmatprep.subr.bf16.mxu1 %v2831_v55  ;;  %v711_v63 = vld [vmem:[#allocation7 + $0x600] sm:$0xff]  ;;  %v752_v57 = vld [vmem:[#allocation7 + $0x748] sm:$0xff]  ;;  %v754_v58 = vld [vmem:[#allocation7 + $0x758] sm:$0xff] }
 0x182   : > { %v2713_v4 = vpack.c.bf16 %v713_v0, %v711_v63  ;;  %v747_v55 = vld [vmem:[#allocation7 + $0x720] sm:$0xff]  ;;  %v2751_v60 = vpack.c.bf16 %v754_v58, %v752_v57  ;;  %v756_v63 = vld [vmem:[#allocation7 + $0x768] sm:$0xff]  ;;  %v758_v0 = vld [vmem:[#allocation7 + $0x778] sm:$0xff] }
 0x183   : > { %v2755_v2 = vpack.c.bf16 %v758_v0, %v756_v63  ;;  %v1244_v57 = vld [vmem:[#allocation10 + $0x38] sm:$0xff]  ;;  %v1243_v63 = vld [vmem:[#allocation10 + $0x30] sm:$0xff]  ;;  %v1246_v0 = vld [vmem:[#allocation10 + $0x48] sm:$0xff] }
 0x184   : > { %2690 = vmatpush1.bf16.msra.mxu0 %v2689_v6  ;;  %v715_v6 = vld [vmem:[#allocation7 + $0x620] sm:$0xff] }
 0x185   : > { %2692 = vmatprep.subr.bf16.mxu0 %v2691_v11  ;;  %v2717_v11 = vpack.c.bf16 %v717_v7, %v715_v6  ;;  %v762_v6 = vld [vmem:[#allocation7 + $0x798] sm:$0xff] }
 0x188   : > { %2694 = vmatpush1.bf16.msra.mxu0 %v2693_v18  ;;  %v2723_v18 = vpack.c.bf16 %v726_v16, %v724_v15  ;;  %v763_v15 = vld [vmem:[#allocation7 + $0x7a0] sm:$0xff]  ;;  %v765_v16 = vld [vmem:[#allocation7 + $0x7b0] sm:$0xff] }
 0x189   : > { %2696 = vmatprep.subr.bf16.mxu0 %v2695_v23  ;;  %v2725_v23 = vpack.c.bf16 %v725_v20, %v723_v19  ;;  %v2765_v19 = vpack.c.bf16 %v765_v16, %v763_v15  ;;  %v1253_v16 = vld [vmem:[#allocation10 + $0x80] sm:$0xff] }
 0x18c   : > { %2698 = vmatpush1.bf16.msra.mxu0 %v2697_v30  ;;  %v2731_v30 = vpack.c.bf16 %v734_v28, %v732_v27  ;;  %v771_v27 = vld [vmem:[#allocation7 + $0x7e0] sm:$0xff]  ;;  %v773_v28 = vld [vmem:[#allocation7 + $0x7f0] sm:$0xff] }
 0x18d   : > { %2700 = vmatprep.subr.bf16.mxu0 %v2699_v35  ;;  %v2733_v35 = vpack.c.bf16 %v733_v32, %v731_v31  ;;  %v1129_v31 = vld [vmem:[#allocation8 + $0x1c0] sm:$0xff]  ;;  %v1131_v32 = vld [vmem:[#allocation8 + $0x1d0] sm:$0xff] }
 0x18e   : > { %v2833_v33 = vpack.c.bf16 %v1131_v32, %v1129_v31  ;;  %v1266_v31 = vld [vmem:[#allocation10 + $0xe8] sm:$0xff]  ;;  %v1268_v32 = vld [vmem:[#allocation10 + $0xf8] sm:$0xff] }
 0x190   : > { %2702 = vmatpush1.bf16.msra.mxu0 %v2701_v42  ;;  %v2739_v42 = vpack.c.bf16 %v742_v40, %v740_v39  ;;  %2834 = vmatpush1.bf16.msra.mxu1 %v2833_v33  ;;  %v2837_v39 = vpack.c.bf16 %v1135_v38, %v1133_v37  ;;  %v1238_v40 = vld [vmem:[#allocation10 + $0x8] sm:$0xff] }
 0x191   : > { %2704 = vmatprep.subr.bf16.mxu0 %v2703_v47  ;;  %v2741_v47 = vpack.c.bf16 %v741_v44, %v739_v43  ;;  %v777_v43 = vlaneseq  ;;  %v1379_v38 = vld [vmem:[#allocation11 + $0x8] sm:$0xff] }
 0x193   : > { %v4046_v44 = vshrl.u32 %v777_v43, 7 }
 0x194   : > { %2706 = vmatpush1.bf16.msra.mxu0 %v2705_v54  ;;  %v2747_v54 = vpack.c.bf16 %v750_v52, %v748_v51 }
 0x195   : > { %2708 = vmatprep.subr.bf16.mxu0 %v2707_v56  ;;  %v749_v56 = vld [vmem:[#allocation7 + $0x730] sm:$0xff]  ;;  %v4049_v45 = vsub.s32 0, %v4046_v44 }
 0x196   : > { %v2749_v59 = vpack.c.bf16 %v749_v56, %v747_v55  ;;  %v1242_v56 = vld [vmem:[#allocation10 + $0x28] sm:$0xff] }
 0x198   : > { %2710 = vmatpush1.bf16.msra.mxu0 %v2709_v61  ;;  %v751_v61 = vld [vmem:[#allocation7 + $0x740] sm:$0xff] }
 0x199   : > { %2712 = vmatprep.subr.bf16.mxu0 %v2711_v62  ;;  %v753_v62 = vld [vmem:[#allocation7 + $0x750] sm:$0xff] }
 0x19a   : > { %v2753_v1 = vpack.c.bf16 %v753_v62, %v751_v61  ;;  %v2843_v61 = vpack.c.bf16 %v1244_v57, %v1242_v56  ;;  %v1241_v62 = vld [vmem:[#allocation10 + $0x20] sm:$0xff]  ;;  %v1417_v56 = vld [vmem:[#allocation11 + $0x138] sm:$0xff] }
 0x19b   : > { %994 = vmatmul.mubr.f32.vlgmr.msra.gmra.mrb[0].mxu0 %v515_v3  ;;  %v755_v3 = vld [vmem:[#allocation7 + $0x760] sm:$0xff]  ;;  %v1425_v57 = vld [vmem:[#allocation11 + $0x178] sm:$0xff] }
 0x19c   : > { %2714 = vmatpush1.bf16.msra.mxu0 %v2713_v4  ;;  %1064 = vmatprep.mubr.f32.mxu0 %v518_v8  ;;  %v757_v4 = vld [vmem:[#allocation7 + $0x770] sm:$0xff] }
 0x19d   : > { %2716 = vmatprep.subr.bf16.mxu0 %v2715_v5  ;;  %v760_v5 = vld [vmem:[#allocation7 + $0x788] sm:$0xff]  ;;  %v2757_v7 = vpack.c.bf16 %v757_v4, %v755_v3  ;;  %v1245_v4 = vld [vmem:[#allocation10 + $0x40] sm:$0xff] }
 0x19e   : > { %v2759_v8 = vpack.c.bf16 %v762_v6, %v760_v5  ;;  %v1247_v5 = vld [vmem:[#allocation10 + $0x50] sm:$0xff] }
 0x19f   : > { %v2849_v6 = vpack.c.bf16 %v1247_v5, %v1245_v4  ;;  %v1457_v4 = vld [vmem:[#allocation11 + $0x278] sm:$0xff] }
 0x1a0   : > { %2718 = vmatpush1.bf16.msra.mxu0 %v2717_v11  ;;  %v764_v11 = vld [vmem:[#allocation7 + $0x7a8] sm:$0xff] }
 0x1a1   : > { %2720 = vmatprep.subr.bf16.mxu0 %v2719_v12  ;;  %v766_v12 = vld [vmem:[#allocation7 + $0x7b8] sm:$0xff] }
 0x1a2   : > { %v2763_v14 = vpack.c.bf16 %v766_v12, %v764_v11  ;;  %v1251_v11 = vld [vmem:[#allocation10 + $0x70] sm:$0xff] }
 0x1a3   : > { %v2853_v12 = vpack.c.bf16 %v1251_v11, %v1249_v10  ;;  %v1473_v10 = vld [vmem:[#allocation11 + $0x2f8] sm:$0xff] }
 0x1a4   : > { %2722 = vmatpush1.bf16.msra.mxu0 %v2721_v17  ;;  %v768_v17 = vld [vmem:[#allocation7 + $0x7c8] sm:$0xff] }
 0x1a5   : > { %2724 = vmatprep.subr.bf16.mxu0 %v2723_v18  ;;  %v770_v18 = vld [vmem:[#allocation7 + $0x7d8] sm:$0xff] }
 0x1a6   : > { %v2767_v20 = vpack.c.bf16 %v770_v18, %v768_v17  ;;  %v1255_v17 = vld [vmem:[#allocation10 + $0x90] sm:$0xff] }
 0x1a7   : > { %v2857_v18 = vpack.c.bf16 %v1255_v17, %v1253_v16  ;;  %v1489_v16 = vld [vmem:[#allocation11 + $0x378] sm:$0xff] }
 0x1a8   : > { %2726 = vmatpush1.bf16.msra.mxu0 %v2725_v23  ;;  %v772_v23 = vld [vmem:[#allocation7 + $0x7e8] sm:$0xff] }
 0x1a9   : > { %2728 = vmatprep.subr.bf16.mxu0 %v2727_v24  ;;  %v774_v24 = vld [vmem:[#allocation7 + $0x7f8] sm:$0xff] }
 0x1aa   : > { %v2771_v26 = vpack.c.bf16 %v774_v24, %v772_v23  ;;  %v1259_v23 = vld [vmem:[#allocation10 + $0xb0] sm:$0xff]  ;;  %v1262_v24 = vld [vmem:[#allocation10 + $0xc8] sm:$0xff] }
 0x1ac   : > { %2730 = vmatpush1.bf16.msra.mxu0 %v2729_v29  ;;  %v2773_v29 = vpack.c.bf16 %v773_v28, %v771_v27  ;;  %v2861_v27 = vpack.c.bf16 %v1259_v23, %v1257_v21  ;;  %v1497_v21 = vld [vmem:[#allocation11 + $0x3b8] sm:$0xff] }
 0x1ad   : > { %2732 = vmatprep.subr.bf16.mxu0 %v2731_v30  ;;  %v517_v30 = vld [vmem:[%s4012_s16 + $0x30] sm:$0xff]  ;;  %s2474_s16 = sshll.u32 %s4008_s25, 8 }
 0x1ae   : > { %s4162_s0 = scalar_lea.vmem [#allocation13], %s2474_s16 }
 0x1b0   : > { %2734 = vmatpush1.bf16.msra.mxu0 %v2733_v35  ;;  %v1136_v35 = vld [vmem:[#allocation8 + $0x1f8] sm:$0xff] }
 0x1b1   : > { %2736 = vmatprep.subr.bf16.mxu0 %v2735_v36  ;;  %v2835_v36 = vpack.c.bf16 %v1136_v35, %v1134_v34  ;;  %v2867_v34 = vpack.c.bf16 %v1268_v32, %v1266_v31  ;;  %v1265_v35 = vld [vmem:[#allocation10 + $0xe0] sm:$0xff]  ;;  %v1512_v32 = vld [vmem:[#allocation11 + $0x430] sm:$0xff] }
 0x1b3   : > { %2836 = vmatprep.subr.bf16.mxu1 %v2835_v36  ;;  %v1267_v36 = vld [vmem:[#allocation10 + $0xf0] sm:$0xff] }
 0x1b4   : > { %2738 = vmatpush1.bf16.msra.mxu0 %v2737_v41  ;;  %2838 = vmatpush1.bf16.msra.mxu1 %v2837_v39  ;;  %v1240_v41 = vld [vmem:[#allocation10 + $0x18] sm:$0xff]  ;;  %v2869_v37 = vpack.c.bf16 %v1267_v36, %v1265_v35  ;;  %v1387_v39 = vld [vmem:[#allocation11 + $0x48] sm:$0xff] }
 0x1b5   : > { %2740 = vmatprep.subr.bf16.mxu0 %v2739_v42  ;;  %v2839_v42 = vpack.c.bf16 %v1240_v41, %v1238_v40  ;;  %v2871_v40 = vpack.c.bf16 %v1387_v39, %v1379_v38  ;;  %v1385_v41 = vld [vmem:[#allocation11 + $0x38] sm:$0xff]  ;;  %v1528_v38 = vld [vmem:[#allocation11 + $0x4b0] sm:$0xff] }
 0x1b6   : > { %v1537_v35 = vld [vmem:[#allocation11 + $0x4f8] sm:$0xff]  ;;  %v1536_v39 = vld [vmem:[#allocation11 + $0x4f0] sm:$0xff] }
 0x1b7   : > { %2840 = vmatprep.subr.bf16.mxu1 %v2839_v42  ;;  %v1393_v42 = vld [vmem:[#allocation11 + $0x78] sm:$0xff] }
 0x1b8   : > { %2742 = vmatpush1.bf16.msra.mxu0 %v2741_v47  ;;  %v4055_v47 = vsub.s32 1, %v4046_v44  ;;  %v3063_v43 = vpack.c.bf16 %v1393_v42, %v1385_v41  ;;  %v1553_v41 = vld [vmem:[#allocation11 + $0x578] sm:$0xff]  ;;  %v3101_v42 = vpack.c.bf16 %v1536_v39, %v1528_v38  ;;  %v1411_v38 = vld [vmem:[#allocation11 + $0x108] sm:$0xff] }
 0x1b9   : > { %2744 = vmatprep.subr.bf16.mxu0 %v2743_v48  ;;  %v780_v48 = vrot.slane %v775_v46, %v4049_v45  ;;  %v1419_v39 = vld [vmem:[#allocation11 + $0x148] sm:$0xff] }
 0x1ba   : > { %v784_v49 = vrot.slane %v775_v46, %v4055_v47  ;;  %v1384_v46 = vld [vmem:[#allocation11 + $0x30] sm:$0xff] }
 0x1bc   : > { %2746 = vmatpush1.bf16.msra.mxu0 %v2745_v53  ;;  %v1237_v53 = vld [vmem:[#allocation10] sm:$0xff] }
 0x1bd   : > { %2748 = vmatprep.subr.bf16.mxu0 %v2747_v54  ;;  %v1239_v54 = vld [vmem:[#allocation10 + $0x10] sm:$0xff] }
 0x1c0   : > { %2750 = vmatpush1.bf16.msra.mxu0 %v2749_v59  ;;  %v2841_v59 = vpack.c.bf16 %v1239_v54, %v1237_v53  ;;  %v1408_v54 = vld [vmem:[#allocation11 + $0xf0] sm:$0xff] }
 0x1c1   : > { %2752 = vmatprep.subr.bf16.mxu0 %v2751_v60 }
 0x1c4   : > { %2754 = vmatpush1.bf16.msra.mxu0 %v2753_v1  ;;  %v1248_v1 = vld [vmem:[#allocation10 + $0x58] sm:$0xff] }
 0x1c5   : > { %2756 = vmatprep.subr.bf16.mxu0 %v2755_v2  ;;  %v2845_v2 = vpack.c.bf16 %v1243_v63, %v1241_v62  ;;  %v2847_v3 = vpack.c.bf16 %v1248_v1, %v1246_v0  ;;  %v1433_v62 = vld [vmem:[#allocation11 + $0x1b8] sm:$0xff]  ;;  %v1432_v1 = vld [vmem:[#allocation11 + $0x1b0] sm:$0xff] }
 0x1c6   : > { %v1441_v63 = vld [vmem:[#allocation11 + $0x1f8] sm:$0xff] }
 0x1c7   : > { %v3075_v0 = vpack.c.bf16 %v1441_v63, %v1433_v62  ;;  %v1601_v62 = vld [vmem:[#allocation11 + $0x6f8] sm:$0xff] }
 0x1c8   : > { %2758 = vmatpush1.bf16.msra.mxu0 %v2757_v7  ;;  %v1250_v7 = vld [vmem:[#allocation10 + $0x68] sm:$0xff] }
 0x1c9   : > { %2760 = vmatprep.subr.bf16.mxu0 %v2759_v8  ;;  %v1252_v8 = vld [vmem:[#allocation10 + $0x78] sm:$0xff] }
 0x1ca   : > { %v2851_v9 = vpack.c.bf16 %v1252_v8, %v1250_v7  ;;  %v1448_v7 = vld [vmem:[#allocation11 + $0x230] sm:$0xff] }
 0x1cb   : > { %v1456_v8 = vld [vmem:[#allocation11 + $0x270] sm:$0xff] }
 0x1cc   : > { %2762 = vmatpush1.bf16.msra.mxu0 %v2761_v13  ;;  %v1254_v13 = vld [vmem:[#allocation10 + $0x88] sm:$0xff]  ;;  %v3081_v11 = vpack.c.bf16 %v1456_v8, %v1448_v7  ;;  %v1137_v7 = vld [vmem:[%s4285_s5] sm:$0x3] }
 0x1cd   : > { %2764 = vmatprep.subr.bf16.mxu0 %v2763_v14  ;;  %v1256_v14 = vld [vmem:[#allocation10 + $0x98] sm:$0xff]  ;;  %v1142_v8 = vrot.slane %v1137_v7, %v4049_v45 }
 0x1ce   : > { %v2855_v15 = vpack.c.bf16 %v1256_v14, %v1254_v13  ;;  %v1464_v13 = vld [vmem:[#allocation11 + $0x2b0] sm:$0xff] }
 0x1cf   : > { %v1472_v14 = vld [vmem:[#allocation11 + $0x2f0] sm:$0xff] }
 0x1d0   : > { %2766 = vmatpush1.bf16.msra.mxu0 %v2765_v19  ;;  %v1258_v19 = vld [vmem:[#allocation10 + $0xa8] sm:$0xff]  ;;  %v3085_v17 = vpack.c.bf16 %v1472_v14, %v1464_v13 }
 0x1d1   : > { %2768 = vmatprep.subr.bf16.mxu0 %v2767_v20  ;;  %v1260_v20 = vld [vmem:[#allocation10 + $0xb8] sm:$0xff] }
 0x1d2   : > { %v2859_v22 = vpack.c.bf16 %v1260_v20, %v1258_v19  ;;  %v1480_v19 = vld [vmem:[#allocation11 + $0x330] sm:$0xff] }
 0x1d3   : > { %v1488_v20 = vld [vmem:[#allocation11 + $0x370] sm:$0xff] }
 0x1d4   : > { %2770 = vmatpush1.bf16.msra.mxu0 %v2769_v25  ;;  %v1264_v25 = vld [vmem:[#allocation10 + $0xd8] sm:$0xff]  ;;  %v3089_v23 = vpack.c.bf16 %v1488_v20, %v1480_v19  ;;  %v1378_v20 = vld [vmem:[#allocation11] sm:$0xff] }
 0x1d5   : > { %2772 = vmatprep.subr.bf16.mxu0 %v2771_v26  ;;  %v3672_v26 = vmov 0.0   ;;  %v2863_v28 = vpack.c.bf16 %v1264_v25, %v1262_v24  ;;  %v1496_v25 = vld [vmem:[#allocation11 + $0x3b0] sm:$0xff]  ;;  %v1228_v19 = vld [vmem:[%s4020_s27 + $0x18] sm:$0xff] }
 0x1d8   : > { %2774 = vmatpush1.bf16.msra.mxu0 %v2773_v29  ;;  %v1261_v29 = vld [vmem:[#allocation10 + $0xc0] sm:$0xff] }
 0x1d9   : > { %3064 = vmatprep.subr.bf16.mxu0 %v3063_v43 }
 0x1db   : > { %1065 = vmatmul.mubr.f32.vlgmr.msra.gmra.mrb[0].mxu0 %v517_v30  ;;  %v1263_v30 = vld [vmem:[#allocation10 + $0xd0] sm:$0xff] }
 0x1dc   : > { %v2865_v33 = vpack.c.bf16 %v1263_v30, %v1261_v29  ;;  %v1521_v29 = vld [vmem:[#allocation11 + $0x478] sm:$0xff] }
 0x2ae   : > { %v1066_v50 = vpop.f32.mrb[0].mxu0 }
 0x2af   : > { %v3127_v51 = vadd.f32 %v1066_v50, %v780_v48  ;;  %v1068_v52 = vpop.f32.mrb[1].mxu0  ;;  %v1392_v48 = vld [vmem:[#allocation11 + $0x70] sm:$0xff]  ;;  %v1401_v50 = vld [vmem:[#allocation11 + $0xb8] sm:$0xff] }
 0x2b0   : > { %v3128_v55 = vadd.f32 %v1068_v52, %v784_v49  ;;  %v3065_v49 = vpack.c.bf16 %v1392_v48, %v1384_v46  ;;  %v1400_v52 = vld [vmem:[#allocation11 + $0xb0] sm:$0xff] }
 0x2b1   : > { %v1071_v60 = vmax.f32 %v3127_v51, 0.0  ;;  %v1409_v51 = vld [vmem:[#allocation11 + $0xf8] sm:$0xff]  ;;  %v1544_v46 = vld [vmem:[#allocation11 + $0x530] sm:$0xff] }
 0x2b2   : > { %v1072_v58 = vmax.f32 %v3128_v55, 0.0  ;;  %3066 = vmatpush1.bf16.msra.mxu0 %v3065_v49  ;;  %v3067_v53 = vpack.c.bf16 %v1409_v51, %v1401_v50  ;;  %v3069_v55 = vpack.c.bf16 %v1408_v54, %v1400_v52  ;;  %v1552_v48 = vld [vmem:[#allocation11 + $0x570] sm:$0xff]  ;;  %v1561_v49 = vld [vmem:[#allocation11 + $0x5b8] sm:$0xff] }
 0x2b3   : > { %v1569_v50 = vld [vmem:[#allocation11 + $0x5f8] sm:$0xff]  ;;  %v3105_v51 = vpack.c.bf16 %v1552_v48, %v1544_v46  ;;  %v1568_v54 = vld [vmem:[#allocation11 + $0x5f0] sm:$0xff]  ;;  %v1427_v46 = vld [vmem:[#allocation11 + $0x188] sm:$0xff] }
 0x2b4   : > { %1213 = vmatprep.mubr.f32.mxu1 %v1072_v58  ;;  %3068 = vmatprep.subr.bf16.mxu0 %v3067_v53  ;;  %v1416_v58 = vld [vmem:[#allocation11 + $0x130] sm:$0xff]  ;;  %v3107_v52 = vpack.c.bf16 %v1569_v50, %v1561_v49  ;;  %v1435_v48 = vld [vmem:[#allocation11 + $0x1c8] sm:$0xff] }
 0x2b5   : > { %1214 = vmatmul.mubr.f32.vlgmr.msra.gmra.mrb[0].mxu1 %v1071_v60  ;;  %v3071_v60 = vpack.c.bf16 %v1425_v57, %v1417_v56  ;;  %v1560_v53 = vld [vmem:[#allocation11 + $0x5b0] sm:$0xff]  ;;  %v1585_v56 = vld [vmem:[#allocation11 + $0x678] sm:$0xff]  ;;  %v2883_v50 = vpack.c.bf16 %v1435_v48, %v1427_v46  ;;  %v1595_v46 = vld [vmem:[#allocation11 + $0x6c8] sm:$0xff] }
 0x2b6   : > { %2842 = vmatpush1.bf16.msra.mxu1 %v2841_v59  ;;  %1345 = vmatprep.mubr.f32.mxu1 %v3672_v26  ;;  %v1424_v59 = vld [vmem:[#allocation11 + $0x170] sm:$0xff]  ;;  %v3109_v57 = vpack.c.bf16 %v1568_v54, %v1560_v53  ;;  %v1443_v53 = vld [vmem:[#allocation11 + $0x208] sm:$0xff] }
 0x2b7   : > { %2844 = vmatprep.subr.bf16.mxu1 %v2843_v61  ;;  %3070 = vmatpush1.bf16.msra.mxu0 %v3069_v55  ;;  %v3073_v61 = vpack.c.bf16 %v1424_v59, %v1416_v58  ;;  %v1577_v55 = vld [vmem:[#allocation11 + $0x638] sm:$0xff]  ;;  %v1576_v59 = vld [vmem:[#allocation11 + $0x630] sm:$0xff]  ;;  %v1451_v54 = vld [vmem:[#allocation11 + $0x248] sm:$0xff] }
 0x2b8   : > { %3072 = vmatprep.subr.bf16.mxu0 %v3071_v60  ;;  %v3111_v58 = vpack.c.bf16 %v1585_v56, %v1577_v55  ;;  %v1584_v60 = vld [vmem:[#allocation11 + $0x670] sm:$0xff]  ;;  %v2887_v56 = vpack.c.bf16 %v1451_v54, %v1443_v53  ;;  %v1611_v53 = vld [vmem:[#allocation11 + $0x748] sm:$0xff] }
 0x2b9   : > { %v3113_v63 = vpack.c.bf16 %v1584_v60, %v1576_v59  ;;  %v1459_v59 = vld [vmem:[#allocation11 + $0x288] sm:$0xff] }
 0x2ba   : > { %2846 = vmatpush1.bf16.msra.mxu1 %v2845_v2  ;;  %v1440_v2 = vld [vmem:[#allocation11 + $0x1f0] sm:$0xff]  ;;  %v1467_v60 = vld [vmem:[#allocation11 + $0x2c8] sm:$0xff] }
 0x2bb   : > { %2848 = vmatprep.subr.bf16.mxu1 %v2847_v3  ;;  %v1449_v3 = vld [vmem:[#allocation11 + $0x238] sm:$0xff]  ;;  %3074 = vmatpush1.bf16.msra.mxu0 %v3073_v61  ;;  %v3077_v5 = vpack.c.bf16 %v1440_v2, %v1432_v1  ;;  %v1592_v1 = vld [vmem:[#allocation11 + $0x6b0] sm:$0xff] }
 0x2bc   : > { %3076 = vmatprep.subr.bf16.mxu0 %v3075_v0  ;;  %v1593_v61 = vld [vmem:[#allocation11 + $0x6b8] sm:$0xff]  ;;  %v1600_v2 = vld [vmem:[#allocation11 + $0x6f0] sm:$0xff] }
 0x2bd   : > { %v3115_v0 = vpack.c.bf16 %v1601_v62, %v1593_v61  ;;  %v2891_v62 = vpack.c.bf16 %v1467_v60, %v1459_v59  ;;  %v1608_v59 = vld [vmem:[#allocation11 + $0x730] sm:$0xff] }
 0x2be   : > { %2850 = vmatpush1.bf16.msra.mxu1 %v2849_v6  ;;  %v3079_v6 = vpack.c.bf16 %v1457_v4, %v1449_v3  ;;  %v1609_v3 = vld [vmem:[#allocation11 + $0x738] sm:$0xff]  ;;  %v1616_v60 = vld [vmem:[#allocation11 + $0x770] sm:$0xff] }
 0x2bf   : > { %2852 = vmatprep.subr.bf16.mxu1 %v2851_v9  ;;  %v1465_v9 = vld [vmem:[#allocation11 + $0x2b8] sm:$0xff]  ;;  %3078 = vmatpush1.bf16.msra.mxu0 %v3077_v5  ;;  %v3117_v5 = vpack.c.bf16 %v1600_v2, %v1592_v1  ;;  %v1475_v1 = vld [vmem:[#allocation11 + $0x308] sm:$0xff] }
 0x2c0   : > { %3080 = vmatprep.subr.bf16.mxu0 %v3079_v6  ;;  %v1617_v4 = vld [vmem:[#allocation11 + $0x778] sm:$0xff]  ;;  %v1483_v2 = vld [vmem:[#allocation11 + $0x348] sm:$0xff] }
 0x2c1   : > { %v3119_v6 = vpack.c.bf16 %v1617_v4, %v1609_v3  ;;  %v1474_v4 = vld [vmem:[#allocation11 + $0x300] sm:$0xff] }
 0x2c2   : > { %2854 = vmatpush1.bf16.msra.mxu1 %v2853_v12  ;;  %v3083_v12 = vpack.c.bf16 %v1473_v10, %v1465_v9  ;;  %v1146_v9 = vrot.slane %v1137_v7, %v4055_v47  ;;  %v1499_v7 = vld [vmem:[#allocation11 + $0x3c8] sm:$0xff] }
 0x2c3   : > { %2856 = vmatprep.subr.bf16.mxu1 %v2855_v15  ;;  %v1481_v15 = vld [vmem:[#allocation11 + $0x338] sm:$0xff]  ;;  %3082 = vmatpush1.bf16.msra.mxu0 %v3081_v11 }
 0x2c4   : > { %3084 = vmatprep.subr.bf16.mxu0 %v3083_v12 }
 0x2c6   : > { %2858 = vmatpush1.bf16.msra.mxu1 %v2857_v18  ;;  %v3087_v18 = vpack.c.bf16 %v1489_v16, %v1481_v15  ;;  %v1225_v16 = vld [vmem:[%s4020_s27] sm:$0xff] }
 0x2c7   : > { %2860 = vmatprep.subr.bf16.mxu1 %v2859_v22  ;;  %v1505_v22 = vld [vmem:[#allocation11 + $0x3f8] sm:$0xff]  ;;  %3086 = vmatpush1.bf16.msra.mxu0 %v3085_v17  ;;  %v1226_v17 = vld [vmem:[%s4020_s27 + $0x8] sm:$0xff] }
 0x2c8   : > { %3088 = vmatprep.subr.bf16.mxu0 %v3087_v18  ;;  %v3091_v24 = vpack.c.bf16 %v1505_v22, %v1497_v21  ;;  %v1227_v18 = vld [vmem:[%s4020_s27 + $0x10] sm:$0xff]  ;;  %v1386_v21 = vld [vmem:[#allocation11 + $0x40] sm:$0xff]  ;;  %v1395_v22 = vld [vmem:[#allocation11 + $0x88] sm:$0xff] }
 0x2ca   : > { %2862 = vmatpush1.bf16.msra.mxu1 %v2861_v27  ;;  %v1504_v27 = vld [vmem:[#allocation11 + $0x3f0] sm:$0xff] }
 0x2cb   : > { %2864 = vmatprep.subr.bf16.mxu1 %v2863_v28  ;;  %v1513_v28 = vld [vmem:[#allocation11 + $0x438] sm:$0xff]  ;;  %3090 = vmatpush1.bf16.msra.mxu0 %v3089_v23  ;;  %v3093_v30 = vpack.c.bf16 %v1504_v27, %v1496_v25  ;;  %v1403_v23 = vld [vmem:[#allocation11 + $0xc8] sm:$0xff] }
 0x2cc   : > { %3092 = vmatprep.subr.bf16.mxu0 %v3091_v24  ;;  %v3095_v31 = vpack.c.bf16 %v1521_v29, %v1513_v28 }
 0x2ce   : > { %2866 = vmatpush1.bf16.msra.mxu1 %v2865_v33  ;;  %v1520_v33 = vld [vmem:[#allocation11 + $0x470] sm:$0xff] }
 0x2cf   : > { %2868 = vmatprep.subr.bf16.mxu1 %v2867_v34  ;;  %v1529_v34 = vld [vmem:[#allocation11 + $0x4b8] sm:$0xff]  ;;  %3094 = vmatpush1.bf16.msra.mxu0 %v3093_v30  ;;  %v3097_v36 = vpack.c.bf16 %v1520_v33, %v1512_v32  ;;  %v2873_v30 = vpack.c.bf16 %v1386_v21, %v1378_v20 }
 0x2d0   : > { %3096 = vmatprep.subr.bf16.mxu0 %v3095_v31  ;;  %v2875_v31 = vpack.c.bf16 %v1403_v23, %v1395_v22  ;;  %v1522_v22 = vld [vmem:[#allocation11 + $0x480] sm:$0xff] }
 0x2d1   : > { %v1530_v23 = vld [vmem:[#allocation11 + $0x4c0] sm:$0xff] }
 0x2d2   : > { %2870 = vmatpush1.bf16.msra.mxu1 %v2869_v37  ;;  %v3099_v37 = vpack.c.bf16 %v1537_v35, %v1529_v34 }
 0x2d3   : > { %2872 = vmatprep.subr.bf16.mxu1 %v2871_v40  ;;  %v1545_v40 = vld [vmem:[#allocation11 + $0x538] sm:$0xff]  ;;  %3098 = vmatpush1.bf16.msra.mxu0 %v3097_v36  ;;  %v1394_v36 = vld [vmem:[#allocation11 + $0x80] sm:$0xff] }
 0x2d4   : > { %3100 = vmatprep.subr.bf16.mxu0 %v3099_v37  ;;  %v3103_v43 = vpack.c.bf16 %v1553_v41, %v1545_v40  ;;  %v1402_v37 = vld [vmem:[#allocation11 + $0xc0] sm:$0xff]  ;;  %v2879_v41 = vpack.c.bf16 %v1419_v39, %v1411_v38  ;;  %v1579_v38 = vld [vmem:[#allocation11 + $0x648] sm:$0xff] }
 0x2d5   : > { %v2877_v40 = vpack.c.bf16 %v1402_v37, %v1394_v36  ;;  %v1562_v36 = vld [vmem:[#allocation11 + $0x5c0] sm:$0xff]  ;;  %v1571_v37 = vld [vmem:[#allocation11 + $0x608] sm:$0xff] }
 0x2d7   : > { %3102 = vmatpush1.bf16.msra.mxu0 %v3101_v42  ;;  %v1410_v42 = vld [vmem:[#allocation11 + $0x100] sm:$0xff] }
 0x2d8   : > { %3104 = vmatprep.subr.bf16.mxu0 %v3103_v43  ;;  %v1418_v43 = vld [vmem:[#allocation11 + $0x140] sm:$0xff] }
 0x2d9   : > { %v2881_v49 = vpack.c.bf16 %v1418_v43, %v1410_v42  ;;  %v1578_v42 = vld [vmem:[#allocation11 + $0x640] sm:$0xff]  ;;  %v1587_v43 = vld [vmem:[#allocation11 + $0x688] sm:$0xff] }
 0x2db   : > { %3106 = vmatpush1.bf16.msra.mxu0 %v3105_v51  ;;  %v1426_v51 = vld [vmem:[#allocation11 + $0x180] sm:$0xff] }
 0x2dc   : > { %3108 = vmatprep.subr.bf16.mxu0 %v3107_v52  ;;  %v1434_v52 = vld [vmem:[#allocation11 + $0x1c0] sm:$0xff] }
 0x2dd   : > { %v2885_v55 = vpack.c.bf16 %v1434_v52, %v1426_v51  ;;  %v1594_v51 = vld [vmem:[#allocation11 + $0x6c0] sm:$0xff]  ;;  %v1603_v52 = vld [vmem:[#allocation11 + $0x708] sm:$0xff] }
 0x2df   : > { %3110 = vmatpush1.bf16.msra.mxu0 %v3109_v57  ;;  %v1442_v57 = vld [vmem:[#allocation11 + $0x200] sm:$0xff] }
 0x2e0   : > { %3112 = vmatprep.subr.bf16.mxu0 %v3111_v58  ;;  %v1450_v58 = vld [vmem:[#allocation11 + $0x240] sm:$0xff] }
 0x2e1   : > { %v2889_v61 = vpack.c.bf16 %v1450_v58, %v1442_v57  ;;  %v1610_v57 = vld [vmem:[#allocation11 + $0x740] sm:$0xff] }
 0x2e3   : > { %3114 = vmatpush1.bf16.msra.mxu0 %v3113_v63  ;;  %v1458_v63 = vld [vmem:[#allocation11 + $0x280] sm:$0xff] }
 0x2e4   : > { %3116 = vmatprep.subr.bf16.mxu0 %v3115_v0  ;;  %v1466_v0 = vld [vmem:[#allocation11 + $0x2c0] sm:$0xff] }
 0x2e5   : > { %v2893_v3 = vpack.c.bf16 %v1466_v0, %v1458_v63  ;;  %v1627_v63 = vld [vmem:[#allocation11 + $0x7c8] sm:$0xff] }
 0x2e7   : > { %3118 = vmatpush1.bf16.msra.mxu0 %v3117_v5  ;;  %v1482_v5 = vld [vmem:[#allocation11 + $0x340] sm:$0xff] }
 0x2e8   : > { %3120 = vmatprep.subr.bf16.mxu0 %v3119_v6  ;;  %v1491_v6 = vld [vmem:[#allocation11 + $0x388] sm:$0xff] }
 0x388   : > { %v1215_v10 = vpop.f32.mrb[0].mxu1 }
 0x389   : > { %v1216_v11 = vadd.f32 %v1215_v10, %v1142_v8  ;;  %v1217_v12 = vpop.f32.mrb[1].mxu1  ;;  %v2897_v8 = vpack.c.bf16 %v1482_v5, %v1474_v4  ;;  %v1490_v10 = vld [vmem:[#allocation11 + $0x380] sm:$0xff]  ;;  %v1633_v4 = vld [vmem:[#allocation11 + $0x7f8] sm:$0xff]  ;;  %v1624_v5 = vld [vmem:[#allocation11 + $0x7b0] sm:$0xff] }
 0x38a   : > { %v1218_v13 = vadd.f32 %v1217_v12, %v1146_v9  ;;  %v2899_v9 = vpack.c.bf16 %v1499_v7, %v1491_v6  ;;  %v1507_v12 = vld [vmem:[#allocation11 + $0x408] sm:$0xff]  ;;  %v1632_v6 = vld [vmem:[#allocation11 + $0x7f0] sm:$0xff] }
 0x38b   : > { %1220 = vst [vmem:[%s4066_s2] sm:$0xff] %v1216_v11 }
 0x38c   : > { %1221 = vst [vmem:[%s4066_s2 + $0x8] sm:$0xff] %v1218_v13  ;;  %v1222_v14 = vmul.f32 0.5, %v1218_v13  ;;  %v1515_v13 = vld [vmem:[#allocation11 + $0x448] sm:$0xff] }
 0x38e   : > { %v1223_v15 = vmul.f32 1.442695, %v1222_v14 }
 0x390   : > { %3242 = vpow2.f32 %v1223_v15  ;;  %v2903_v15 = vpack.c.bf16 %v1515_v13, %v1507_v12  ;;  %v1269_v12 = vld [vmem:[%s4287_s7] sm:$0x3] }
 0x391   : > { %v1274_v13 = vrot.slane %v1269_v12, %v4049_v45 }
 0x39a   : > { %v3243_v24 = vpop.eup %3242 }
 0x39b   : > { %v1229_v25 = vmul.f32 %v3243_v24, %v1225_v16  ;;  %v1230_v27 = vmul.f32 %v3243_v24, %v1226_v17  ;;  %v1231_v28 = vmul.f32 %v3243_v24, %v1227_v18  ;;  %v1232_v29 = vmul.f32 %v3243_v24, %v1228_v19  ;;  %v1506_v16 = vld [vmem:[#allocation11 + $0x400] sm:$0xff]  ;;  %v1523_v18 = vld [vmem:[#allocation11 + $0x488] sm:$0xff] }
 0x39c   : > { %v1514_v17 = vld [vmem:[#allocation11 + $0x440] sm:$0xff]  ;;  %v1531_v19 = vld [vmem:[#allocation11 + $0x4c8] sm:$0xff] }
 0x39d   : > { %v1233_v32 = vadd.f32 %v1229_v25, %v1216_v11  ;;  %v1234_v33 = vadd.f32 %v1230_v27, %v1216_v11  ;;  %v1235_v34 = vadd.f32 %v1231_v28, %v1216_v11  ;;  %v1236_v35 = vadd.f32 %v1232_v29, %v1216_v11  ;;  %v1498_v11 = vld [vmem:[#allocation11 + $0x3c0] sm:$0xff]  ;;  %v1539_v24 = vld [vmem:[#allocation11 + $0x508] sm:$0xff] }
 0x39e   : > { %v2901_v14 = vpack.c.bf16 %v1498_v11, %v1490_v10  ;;  %v2905_v20 = vpack.c.bf16 %v1514_v17, %v1506_v16  ;;  %v2907_v21 = vpack.c.bf16 %v1531_v19, %v1523_v18  ;;  %v1547_v25 = vld [vmem:[#allocation11 + $0x548] sm:$0xff]  ;;  %v2909_v27 = vpack.c.bf16 %v1530_v23, %v1522_v22  ;;  %v1538_v29 = vld [vmem:[#allocation11 + $0x500] sm:$0xff]  ;;  %v1389_v10 = vld [vmem:[#allocation11 + $0x58] sm:$0xff] }
 0x39f   : > { %1346 = vmatmul.mubr.f32.vlgmr.msra.gmra.mrb[2].mxu1 %v1233_v32  ;;  %v2911_v28 = vpack.c.bf16 %v1547_v25, %v1539_v24  ;;  %v1563_v32 = vld [vmem:[#allocation11 + $0x5c8] sm:$0xff]  ;;  %v1380_v18 = vld [vmem:[#allocation11 + $0x10] sm:$0xff]  ;;  %v1405_v22 = vld [vmem:[#allocation11 + $0xd8] sm:$0xff] }
 0x3a0   : > { %1351 = vmatprep.mubr.f32.mxu1 %v3672_v26  ;;  %2874 = vmatpush1.bf16.msra.mxu1 %v2873_v30  ;;  %v1546_v30 = vld [vmem:[#allocation11 + $0x540] sm:$0xff]  ;;  %v1388_v19 = vld [vmem:[#allocation11 + $0x50] sm:$0xff] }
 0x3a1   : > { %2876 = vmatprep.subr.bf16.mxu1 %v2875_v31  ;;  %v1555_v31 = vld [vmem:[#allocation11 + $0x588] sm:$0xff]  ;;  %v2937_v25 = vpack.c.bf16 %v1388_v19, %v1380_v18 }
 0x3a3   : > { %1352 = vmatmul.mubr.f32.gmra.mrb[4].mxu1 %v1234_v33  ;;  %v2913_v33 = vpack.c.bf16 %v1546_v30, %v1538_v29 }
 0x3a4   : > { %1357 = vmatprep.mubr.f32.mxu1 %v3672_v26  ;;  %2878 = vmatpush1.bf16.msra.mxu1 %v2877_v40  ;;  %v2919_v40 = vpack.c.bf16 %v1579_v38, %v1571_v37 }
 0x3a5   : > { %2880 = vmatprep.subr.bf16.mxu1 %v2879_v41  ;;  %v1570_v41 = vld [vmem:[#allocation11 + $0x600] sm:$0xff] }
 0x3a6   : > { %v2921_v48 = vpack.c.bf16 %v1578_v42, %v1570_v41 }
 0x3a7   : > { %1358 = vmatmul.mubr.f32.gmra.mrb[6].mxu1 %v1235_v34  ;;  %v2915_v34 = vpack.c.bf16 %v1563_v32, %v1555_v31  ;;  %v1396_v31 = vld [vmem:[#allocation11 + $0x90] sm:$0xff] }
 0x3a8   : > { %1363 = vmatprep.mubr.f32.mxu1 %v3672_v26  ;;  %2882 = vmatpush1.bf16.msra.mxu1 %v2881_v49  ;;  %v2895_v26 = vpack.c.bf16 %v1483_v2, %v1475_v1  ;;  %v2923_v49 = vpack.c.bf16 %v1595_v46, %v1587_v43  ;;  %v1618_v1 = vld [vmem:[#allocation11 + $0x780] sm:$0xff]  ;;  %v1404_v32 = vld [vmem:[#allocation11 + $0xd0] sm:$0xff] }
 0x3a9   : > { %2884 = vmatprep.subr.bf16.mxu1 %v2883_v50  ;;  %v1586_v50 = vld [vmem:[#allocation11 + $0x680] sm:$0xff]  ;;  %v2941_v38 = vpack.c.bf16 %v1404_v32, %v1396_v31  ;;  %v1412_v43 = vld [vmem:[#allocation11 + $0x110] sm:$0xff]  ;;  %v1525_v31 = vld [vmem:[#allocation11 + $0x498] sm:$0xff] }
 0x3aa   : > { %v2925_v54 = vpack.c.bf16 %v1594_v51, %v1586_v50  ;;  %v1626_v2 = vld [vmem:[#allocation11 + $0x7c0] sm:$0xff]  ;;  %v1420_v46 = vld [vmem:[#allocation11 + $0x150] sm:$0xff]  ;;  %v1437_v50 = vld [vmem:[#allocation11 + $0x1d8] sm:$0xff] }
 0x3ab   : > { %1364 = vmatmul.mubr.f32.gmra.mrb[8].mxu1 %v1236_v35  ;;  %v1554_v35 = vld [vmem:[#allocation11 + $0x580] sm:$0xff]  ;;  %v1533_v32 = vld [vmem:[#allocation11 + $0x4d8] sm:$0xff] }
 0x3ac   : > { %2886 = vmatpush1.bf16.msra.mxu1 %v2885_v55  ;;  %v2917_v39 = vpack.c.bf16 %v1562_v36, %v1554_v35  ;;  %v2927_v55 = vpack.c.bf16 %v1611_v53, %v1603_v52  ;;  %v1421_v35 = vld [vmem:[#allocation11 + $0x158] sm:$0xff]  ;;  %v2945_v53 = vpack.c.bf16 %v1420_v46, %v1412_v43  ;;  %v1540_v43 = vld [vmem:[#allocation11 + $0x510] sm:$0xff] }
 0x3ad   : > { %2888 = vmatprep.subr.bf16.mxu1 %v2887_v56  ;;  %v1602_v56 = vld [vmem:[#allocation11 + $0x700] sm:$0xff]  ;;  %v1548_v46 = vld [vmem:[#allocation11 + $0x550] sm:$0xff] }
 0x3ae   : > { %v2929_v58 = vpack.c.bf16 %v1610_v57, %v1602_v56 }
 0x3b0   : > { %2890 = vmatpush1.bf16.msra.mxu1 %v2889_v61  ;;  %v3121_v61 = vpack.c.bf16 %v1616_v60, %v1608_v59  ;;  %v1436_v59 = vld [vmem:[#allocation11 + $0x1d0] sm:$0xff] }
 0x3b1   : > { %2892 = vmatprep.subr.bf16.mxu1 %v2891_v62  ;;  %v1619_v62 = vld [vmem:[#allocation11 + $0x788] sm:$0xff] }
 0x3b2   : > { %3122 = vmatpush1.bf16.msra.mxu0 %v3121_v61  ;;  %v2931_v0 = vpack.c.bf16 %v1627_v63, %v1619_v62  ;;  %v1445_v61 = vld [vmem:[#allocation11 + $0x218] sm:$0xff] }
 0x3b3   : > { %v1453_v62 = vld [vmem:[#allocation11 + $0x258] sm:$0xff] }
 0x3b4   : > { %2894 = vmatpush1.bf16.msra.mxu1 %v2893_v3  ;;  %v1625_v3 = vld [vmem:[#allocation11 + $0x7b8] sm:$0xff] }
 0x3b5   : > { %2896 = vmatprep.subr.bf16.mxu1 %v2895_v26  ;;  %v2933_v26 = vpack.c.bf16 %v1626_v2, %v1618_v1  ;;  %v3123_v7 = vpack.c.bf16 %v1633_v4, %v1625_v3  ;;  %v2951_v2 = vpack.c.bf16 %v1453_v62, %v1445_v61  ;;  %v1444_v3 = vld [vmem:[#allocation11 + $0x210] sm:$0xff]  ;;  %v1461_v4 = vld [vmem:[#allocation11 + $0x298] sm:$0xff] }
 0x3b6   : > { %v1580_v61 = vld [vmem:[#allocation11 + $0x650] sm:$0xff]  ;;  %v1589_v62 = vld [vmem:[#allocation11 + $0x698] sm:$0xff] }
 0x3b7   : > { %3124 = vmatprep.subr.bf16.mxu0 %v3123_v7 }
 0x3b8   : > { %2898 = vmatpush1.bf16.msra.mxu1 %v2897_v8  ;;  %v3125_v8 = vpack.c.bf16 %v1632_v6, %v1624_v5  ;;  %v1469_v5 = vld [vmem:[#allocation11 + $0x2d8] sm:$0xff] }
 0x3b9   : > { %2900 = vmatprep.subr.bf16.mxu1 %v2899_v9  ;;  %v1381_v9 = vld [vmem:[#allocation11 + $0x18] sm:$0xff]  ;;  %v2955_v7 = vpack.c.bf16 %v1469_v5, %v1461_v4  ;;  %v1596_v4 = vld [vmem:[#allocation11 + $0x6d0] sm:$0xff] }
 0x3ba   : > { %v2935_v11 = vpack.c.bf16 %v1389_v10, %v1381_v9  ;;  %3126 = vmatpush1.bf16.msra.mxu0 %v3125_v8  ;;  %v1460_v8 = vld [vmem:[#allocation11 + $0x290] sm:$0xff]  ;;  %v1477_v10 = vld [vmem:[#allocation11 + $0x318] sm:$0xff] }
 0x3bb   : > { %v1468_v9 = vld [vmem:[#allocation11 + $0x2d0] sm:$0xff]  ;;  %v1605_v5 = vld [vmem:[#allocation11 + $0x718] sm:$0xff] }
 0x3bc   : > { %2902 = vmatpush1.bf16.msra.mxu1 %v2901_v14  ;;  %v1278_v14 = vrot.slane %v1269_v12, %v4055_v47  ;;  %v2957_v12 = vpack.c.bf16 %v1468_v9, %v1460_v8  ;;  %v1604_v9 = vld [vmem:[#allocation11 + $0x710] sm:$0xff] }
 0x3bd   : > { %2904 = vmatprep.subr.bf16.mxu1 %v2903_v15 }
 0x3c0   : > { %2906 = vmatpush1.bf16.msra.mxu1 %v2905_v20 }
 0x3c1   : > { %2908 = vmatprep.subr.bf16.mxu1 %v2907_v21  ;;  %v1397_v21 = vld [vmem:[#allocation11 + $0x98] sm:$0xff] }
 0x3c2   : > { %v2939_v30 = vpack.c.bf16 %v1405_v22, %v1397_v21  ;;  %v1500_v21 = vld [vmem:[#allocation11 + $0x3d0] sm:$0xff]  ;;  %v1509_v22 = vld [vmem:[#allocation11 + $0x418] sm:$0xff] }
 0x3c4   : > { %2910 = vmatpush1.bf16.msra.mxu1 %v2909_v27 }
 0x3c5   : > { %2912 = vmatprep.subr.bf16.mxu1 %v2911_v28 }
 0x3c8   : > { %2914 = vmatpush1.bf16.msra.mxu1 %v2913_v33 }
 0x3c9   : > { %2916 = vmatprep.subr.bf16.mxu1 %v2915_v34  ;;  %v1413_v34 = vld [vmem:[#allocation11 + $0x118] sm:$0xff] }
 0x3ca   : > { %v2943_v42 = vpack.c.bf16 %v1421_v35, %v1413_v34  ;;  %v2971_v34 = vpack.c.bf16 %v1533_v32, %v1525_v31  ;;  %v1524_v35 = vld [vmem:[#allocation11 + $0x490] sm:$0xff]  ;;  %v1406_v31 = vld [vmem:[#allocation11 + $0xe0] sm:$0xff]  ;;  %v1415_v32 = vld [vmem:[#allocation11 + $0x128] sm:$0xff] }
 0x3cc   : > { %2918 = vmatpush1.bf16.msra.mxu1 %v2917_v39 }
 0x3cd   : > { %2920 = vmatprep.subr.bf16.mxu1 %v2919_v40 }
 0x3d0   : > { %2922 = vmatpush1.bf16.msra.mxu1 %v2921_v48 }
 0x3d1   : > { %2924 = vmatprep.subr.bf16.mxu1 %v2923_v49  ;;  %v1429_v49 = vld [vmem:[#allocation11 + $0x198] sm:$0xff] }
 0x3d2   : > { %v2947_v57 = vpack.c.bf16 %v1437_v50, %v1429_v49  ;;  %v1565_v49 = vld [vmem:[#allocation11 + $0x5d8] sm:$0xff]  ;;  %v2977_v50 = vpack.c.bf16 %v1548_v46, %v1540_v43  ;;  %v1430_v46 = vld [vmem:[#allocation11 + $0x1a0] sm:$0xff] }
 0x3d4   : > { %2926 = vmatpush1.bf16.msra.mxu1 %v2925_v54 }
 0x3d5   : > { %2928 = vmatprep.subr.bf16.mxu1 %v2927_v55 }
 0x3d8   : > { %2930 = vmatpush1.bf16.msra.mxu1 %v2929_v58  ;;  %v1428_v58 = vld [vmem:[#allocation11 + $0x190] sm:$0xff] }
 0x3d9   : > { %2932 = vmatprep.subr.bf16.mxu1 %v2931_v0  ;;  %v2949_v0 = vpack.c.bf16 %v1436_v59, %v1428_v58 }
 0x3dc   : > { %2934 = vmatpush1.bf16.msra.mxu1 %v2933_v26  ;;  %v1452_v26 = vld [vmem:[#allocation11 + $0x250] sm:$0xff] }
 0x3dd   : > { %2936 = vmatprep.subr.bf16.mxu1 %v2935_v11  ;;  %v2953_v6 = vpack.c.bf16 %v1452_v26, %v1444_v3  ;;  %v1485_v11 = vld [vmem:[#allocation11 + $0x358] sm:$0xff]  ;;  %v1588_v26 = vld [vmem:[#allocation11 + $0x690] sm:$0xff] }
 0x472   : > { %v1347_v15 = vpop.f32.mrb[2].mxu1 }
 0x473   : > { %v1348_v16 = vadd.f32 %v1347_v15, %v1274_v13  ;;  %v1349_v17 = vpop.f32.mrb[3].mxu1  ;;  %v1484_v15 = vld [vmem:[#allocation11 + $0x350] sm:$0xff] }
 0x474   : > { %v1350_v20 = vadd.f32 %v1349_v17, %v1278_v14  ;;  %v1501_v17 = vld [vmem:[#allocation11 + $0x3d8] sm:$0xff] }
 0x475   : > { %v4084_v27 = vmax.f32 %v1348_v16, 0.0  ;;  %v1493_v16 = vld [vmem:[#allocation11 + $0x398] sm:$0xff] }
 0x476   : > { %v4082_v23 = vmax.f32 %v1350_v20, 0.0  ;;  %v1353_v24 = vpop.f32.mrb[4].mxu1  ;;  %v2963_v19 = vpack.c.bf16 %v1501_v17, %v1493_v16  ;;  %v1492_v20 = vld [vmem:[#allocation11 + $0x390] sm:$0xff]  ;;  %v1383_v17 = vld [vmem:[#allocation11 + $0x28] sm:$0xff] }
 0x477   : > { %v1354_v28 = vadd.f32 %v1353_v24, %v1274_v13  ;;  %v1355_v29 = vpop.f32.mrb[5].mxu1  ;;  %v1517_v24 = vld [vmem:[#allocation11 + $0x458] sm:$0xff]  ;;  %v1628_v16 = vld [vmem:[#allocation11 + $0x7d0] sm:$0xff] }
 0x478   : > { %v1356_v33 = vadd.f32 %v1355_v29, %v1278_v14  ;;  %1740 = vmatprep.mubr.f32.mxu1 %v4082_v23  ;;  %2007 = vmatprep.mubr.f32.mxu0 %v4082_v23  ;;  %v1508_v29 = vld [vmem:[#allocation11 + $0x410] sm:$0xff] }
 0x479   : > { %1741 = vmatmul.mubr.f32.vlgmr.msra.gmra.mrb[10].mxu1 %v4084_v27  ;;  %2008 = vmatmul.mubr.f32.vlgmr.msra.gmra.mrb[2].mxu0 %v4084_v27  ;;  %v4092_v39 = vmax.f32 %v1354_v28, 0.0  ;;  %v2967_v28 = vpack.c.bf16 %v1517_v24, %v1509_v22  ;;  %v1390_v22 = vld [vmem:[#allocation11 + $0x60] sm:$0xff]  ;;  %v1399_v24 = vld [vmem:[#allocation11 + $0xa8] sm:$0xff] }
 0x47a   : > { %v4090_v36 = vmax.f32 %v1356_v33, 0.0  ;;  %2938 = vmatpush1.bf16.msra.mxu1 %v2937_v25  ;;  %v1359_v37 = vpop.f32.mrb[6].mxu1  ;;  %v2965_v25 = vpack.c.bf16 %v1500_v21, %v1492_v20  ;;  %v1382_v21 = vld [vmem:[#allocation11 + $0x20] sm:$0xff] }
 0x47b   : > { %v1360_v40 = vadd.f32 %v1359_v37, %v1274_v13  ;;  %v1361_v41 = vpop.f32.mrb[7].mxu1  ;;  %2940 = vmatprep.subr.bf16.mxu1 %v2939_v30  ;;  %v1516_v30 = vld [vmem:[#allocation11 + $0x450] sm:$0xff] }
 0x47c   : > { %v1362_v48 = vadd.f32 %v1361_v41, %v1278_v14  ;;  %1746 = vmatprep.mubr.f32.mxu1 %v4090_v36  ;;  %2013 = vmatprep.mubr.f32.mxu0 %v4090_v36  ;;  %v2969_v33 = vpack.c.bf16 %v1516_v30, %v1508_v29  ;;  %v1532_v37 = vld [vmem:[#allocation11 + $0x4d0] sm:$0xff]  ;;  %v1398_v30 = vld [vmem:[#allocation11 + $0xa0] sm:$0xff] }
 0x47d   : > { %1747 = vmatmul.mubr.f32.gmra.mrb[12].mxu1 %v4092_v39  ;;  %2014 = vmatmul.mubr.f32.gmra.mrb[4].mxu0 %v4092_v39  ;;  %v4100_v54 = vmax.f32 %v1360_v40, 0.0  ;;  %v1549_v40 = vld [vmem:[#allocation11 + $0x558] sm:$0xff]  ;;  %v2973_v41 = vpack.c.bf16 %v1532_v37, %v1524_v35  ;;  %v1414_v37 = vld [vmem:[#allocation11 + $0x120] sm:$0xff] }
 0x47e   : > { %v4098_v51 = vmax.f32 %v1362_v48, 0.0  ;;  %2942 = vmatpush1.bf16.msra.mxu1 %v2941_v38  ;;  %v1365_v52 = vpop.f32.mrb[8].mxu1  ;;  %v1541_v38 = vld [vmem:[#allocation11 + $0x518] sm:$0xff] }
 0x47f   : > { %v1366_v55 = vadd.f32 %v1365_v52, %v1274_v13  ;;  %v1367_v56 = vpop.f32.mrb[9].mxu1  ;;  %2944 = vmatprep.subr.bf16.mxu1 %v2943_v42  ;;  %v2959_v13 = vpack.c.bf16 %v1485_v11, %v1477_v10  ;;  %v2975_v42 = vpack.c.bf16 %v1549_v40, %v1541_v38  ;;  %v1557_v48 = vld [vmem:[#allocation11 + $0x598] sm:$0xff]  ;;  %v1612_v10 = vld [vmem:[#allocation11 + $0x750] sm:$0xff]  ;;  %v1422_v38 = vld [vmem:[#allocation11 + $0x160] sm:$0xff] }
 0x480   : > { %v1368_v60 = vadd.f32 %v1367_v56, %v1278_v14  ;;  %1752 = vmatprep.mubr.f32.mxu1 %v4098_v51  ;;  %2019 = vmatprep.mubr.f32.mxu0 %v4098_v51  ;;  %v1476_v14 = vld [vmem:[#allocation11 + $0x310] sm:$0xff]  ;;  %v2979_v52 = vpack.c.bf16 %v1565_v49, %v1557_v48  ;;  %v1573_v56 = vld [vmem:[#allocation11 + $0x618] sm:$0xff]  ;;  %v1431_v40 = vld [vmem:[#allocation11 + $0x1a8] sm:$0xff] }
 0x481   : > { %1753 = vmatmul.mubr.f32.gmra.mrb[14].mxu1 %v4100_v54  ;;  %2020 = vmatmul.mubr.f32.gmra.mrb[6].mxu0 %v4100_v54  ;;  %v4108_v1 = vmax.f32 %v1366_v55, 0.0  ;;  %v2961_v18 = vpack.c.bf16 %v1484_v15, %v1476_v14  ;;  %v1564_v55 = vld [vmem:[#allocation11 + $0x5d0] sm:$0xff]  ;;  %v1621_v11 = vld [vmem:[#allocation11 + $0x798] sm:$0xff]  ;;  %v1438_v48 = vld [vmem:[#allocation11 + $0x1e0] sm:$0xff] }
 0x482   : > { %v4106_v63 = vmax.f32 %v1368_v60, 0.0  ;;  %2946 = vmatpush1.bf16.msra.mxu1 %v2945_v53  ;;  %v1556_v53 = vld [vmem:[#allocation11 + $0x590] sm:$0xff]  ;;  %v1447_v49 = vld [vmem:[#allocation11 + $0x228] sm:$0xff] }
 0x483   : > { %2948 = vmatprep.subr.bf16.mxu1 %v2947_v57  ;;  %v1581_v57 = vld [vmem:[#allocation11 + $0x658] sm:$0xff]  ;;  %v2981_v58 = vpack.c.bf16 %v1564_v55, %v1556_v53  ;;  %v1572_v60 = vld [vmem:[#allocation11 + $0x610] sm:$0xff]  ;;  %v1446_v55 = vld [vmem:[#allocation11 + $0x220] sm:$0xff] }
 0x484   : > { %1758 = vmatprep.mubr.f32.mxu1 %v4106_v63  ;;  %2025 = vmatprep.mubr.f32.mxu0 %v4106_v63  ;;  %v2983_v59 = vpack.c.bf16 %v1581_v57, %v1573_v56  ;;  %v1620_v15 = vld [vmem:[#allocation11 + $0x790] sm:$0xff]  ;;  %v1454_v56 = vld [vmem:[#allocation11 + $0x260] sm:$0xff]  ;;  %v1463_v57 = vld [vmem:[#allocation11 + $0x2a8] sm:$0xff] }
 0x485   : > { %1759 = vmatmul.mubr.f32.gmra.mrb[16].mxu1 %v4108_v1  ;;  %2026 = vmatmul.mubr.f32.gmra.mrb[8].mxu0 %v4108_v1 }
 0x486   : > { %2950 = vmatpush1.bf16.msra.mxu1 %v2949_v0  ;;  %1829 = vmatprep.mubr.f32.mxu1 %v4082_v23  ;;  %v1597_v0 = vld [vmem:[#allocation11 + $0x6d8] sm:$0xff] }
 0x487   : > { %2952 = vmatprep.subr.bf16.mxu1 %v2951_v2  ;;  %v2985_v2 = vpack.c.bf16 %v1580_v61, %v1572_v60  ;;  %v2987_v3 = vpack.c.bf16 %v1597_v0, %v1589_v62  ;;  %v1462_v61 = vld [vmem:[#allocation11 + $0x2a0] sm:$0xff]  ;;  %v1479_v0 = vld [vmem:[#allocation11 + $0x328] sm:$0xff] }
 0x488   : > { %v1470_v62 = vld [vmem:[#allocation11 + $0x2e0] sm:$0xff] }
 0x48a   : > { %2954 = vmatpush1.bf16.msra.mxu1 %v2953_v6  ;;  %v1613_v6 = vld [vmem:[#allocation11 + $0x758] sm:$0xff] }
 0x48b   : > { %2956 = vmatprep.subr.bf16.mxu1 %v2955_v7  ;;  %v2989_v7 = vpack.c.bf16 %v1596_v4, %v1588_v26  ;;  %v2991_v8 = vpack.c.bf16 %v1613_v6, %v1605_v5  ;;  %v1478_v4 = vld [vmem:[#allocation11 + $0x320] sm:$0xff]  ;;  %v1495_v6 = vld [vmem:[#allocation11 + $0x3a8] sm:$0xff] }
 0x48c   : > { %v1486_v5 = vld [vmem:[#allocation11 + $0x360] sm:$0xff] }
 0x48e   : > { %2958 = vmatpush1.bf16.msra.mxu1 %v2957_v12  ;;  %v1629_v12 = vld [vmem:[#allocation11 + $0x7d8] sm:$0xff] }
 0x48f   : > { %2960 = vmatprep.subr.bf16.mxu1 %v2959_v13  ;;  %v2993_v13 = vpack.c.bf16 %v1612_v10, %v1604_v9  ;;  %v2995_v14 = vpack.c.bf16 %v1629_v12, %v1621_v11  ;;  %v1502_v10 = vld [vmem:[#allocation11 + $0x3e0] sm:$0xff]  ;;  %v1511_v11 = vld [vmem:[#allocation11 + $0x428] sm:$0xff] }
 0x490   : > { %v1519_v12 = vld [vmem:[#allocation11 + $0x468] sm:$0xff] }
 0x492   : > { %2962 = vmatpush1.bf16.msra.mxu1 %v2961_v18  ;;  %v1391_v18 = vld [vmem:[#allocation11 + $0x68] sm:$0xff] }
 0x493   : > { %2964 = vmatprep.subr.bf16.mxu1 %v2963_v19  ;;  %v2997_v19 = vpack.c.bf16 %v1628_v16, %v1620_v15  ;;  %v2999_v20 = vpack.c.bf16 %v1391_v18, %v1383_v17  ;;  %v1510_v15 = vld [vmem:[#allocation11 + $0x420] sm:$0xff]  ;;  %v1527_v17 = vld [vmem:[#allocation11 + $0x4a8] sm:$0xff] }
 0x494   : > { %v1518_v16 = vld [vmem:[#allocation11 + $0x460] sm:$0xff]  ;;  %v1535_v18 = vld [vmem:[#allocation11 + $0x4e8] sm:$0xff] }
 0x496   : > { %2966 = vmatpush1.bf16.msra.mxu1 %v2965_v25  ;;  %v1407_v25 = vld [vmem:[#allocation11 + $0xe8] sm:$0xff] }
 0x497   : > { %2968 = vmatprep.subr.bf16.mxu1 %v2967_v28  ;;  %v3001_v28 = vpack.c.bf16 %v1390_v22, %v1382_v21  ;;  %v3003_v29 = vpack.c.bf16 %v1407_v25, %v1399_v24  ;;  %v1526_v21 = vld [vmem:[#allocation11 + $0x4a0] sm:$0xff]  ;;  %v1543_v24 = vld [vmem:[#allocation11 + $0x528] sm:$0xff] }
 0x498   : > { %v1534_v22 = vld [vmem:[#allocation11 + $0x4e0] sm:$0xff]  ;;  %v1551_v25 = vld [vmem:[#allocation11 + $0x568] sm:$0xff] }
 0x49a   : > { %2970 = vmatpush1.bf16.msra.mxu1 %v2969_v33  ;;  %v1423_v33 = vld [vmem:[#allocation11 + $0x168] sm:$0xff] }
 0x49b   : > { %2972 = vmatprep.subr.bf16.mxu1 %v2971_v34  ;;  %v3005_v34 = vpack.c.bf16 %v1406_v31, %v1398_v30  ;;  %v3007_v35 = vpack.c.bf16 %v1423_v33, %v1415_v32  ;;  %v1542_v30 = vld [vmem:[#allocation11 + $0x520] sm:$0xff]  ;;  %v1559_v32 = vld [vmem:[#allocation11 + $0x5a8] sm:$0xff] }
 0x49c   : > { %v1550_v31 = vld [vmem:[#allocation11 + $0x560] sm:$0xff]  ;;  %v1567_v33 = vld [vmem:[#allocation11 + $0x5e8] sm:$0xff] }
 0x49e   : > { %2974 = vmatpush1.bf16.msra.mxu1 %v2973_v41  ;;  %v1439_v41 = vld [vmem:[#allocation11 + $0x1e8] sm:$0xff] }
 0x49f   : > { %2976 = vmatprep.subr.bf16.mxu1 %v2975_v42  ;;  %v3009_v42 = vpack.c.bf16 %v1422_v38, %v1414_v37  ;;  %v3011_v43 = vpack.c.bf16 %v1439_v41, %v1431_v40  ;;  %v1558_v37 = vld [vmem:[#allocation11 + $0x5a0] sm:$0xff]  ;;  %v1575_v40 = vld [vmem:[#allocation11 + $0x628] sm:$0xff] }
 0x4a0   : > { %v1566_v38 = vld [vmem:[#allocation11 + $0x5e0] sm:$0xff]  ;;  %v1583_v41 = vld [vmem:[#allocation11 + $0x668] sm:$0xff] }
 0x4a2   : > { %2978 = vmatpush1.bf16.msra.mxu1 %v2977_v50  ;;  %v1455_v50 = vld [vmem:[#allocation11 + $0x268] sm:$0xff] }
 0x4a3   : > { %2980 = vmatprep.subr.bf16.mxu1 %v2979_v52  ;;  %v3013_v52 = vpack.c.bf16 %v1438_v48, %v1430_v46  ;;  %v3015_v53 = vpack.c.bf16 %v1455_v50, %v1447_v49  ;;  %v1574_v46 = vld [vmem:[#allocation11 + $0x620] sm:$0xff]  ;;  %v1591_v49 = vld [vmem:[#allocation11 + $0x6a8] sm:$0xff] }
 0x4a4   : > { %v1582_v48 = vld [vmem:[#allocation11 + $0x660] sm:$0xff]  ;;  %v1599_v50 = vld [vmem:[#allocation11 + $0x6e8] sm:$0xff] }
 0x4a6   : > { %2982 = vmatpush1.bf16.msra.mxu1 %v2981_v58  ;;  %v1471_v58 = vld [vmem:[#allocation11 + $0x2e8] sm:$0xff] }
 0x4a7   : > { %2984 = vmatprep.subr.bf16.mxu1 %v2983_v59  ;;  %v3017_v59 = vpack.c.bf16 %v1454_v56, %v1446_v55  ;;  %v3019_v60 = vpack.c.bf16 %v1471_v58, %v1463_v57  ;;  %v1590_v55 = vld [vmem:[#allocation11 + $0x6a0] sm:$0xff]  ;;  %v1607_v57 = vld [vmem:[#allocation11 + $0x728] sm:$0xff] }
 0x4a8   : > { %v1598_v56 = vld [vmem:[#allocation11 + $0x6e0] sm:$0xff]  ;;  %v1615_v58 = vld [vmem:[#allocation11 + $0x768] sm:$0xff] }
 0x4aa   : > { %2986 = vmatpush1.bf16.msra.mxu1 %v2985_v2  ;;  %v1487_v2 = vld [vmem:[#allocation11 + $0x368] sm:$0xff] }
 0x4ab   : > { %2988 = vmatprep.subr.bf16.mxu1 %v2987_v3  ;;  %v3021_v3 = vpack.c.bf16 %v1470_v62, %v1462_v61  ;;  %v3023_v26 = vpack.c.bf16 %v1487_v2, %v1479_v0  ;;  %v1606_v61 = vld [vmem:[#allocation11 + $0x720] sm:$0xff]  ;;  %v1623_v0 = vld [vmem:[#allocation11 + $0x7a8] sm:$0xff] }
 0x4ac   : > { %v1614_v62 = vld [vmem:[#allocation11 + $0x760] sm:$0xff]  ;;  %v1631_v2 = vld [vmem:[#allocation11 + $0x7e8] sm:$0xff] }
 0x4ae   : > { %2990 = vmatpush1.bf16.msra.mxu1 %v2989_v7  ;;  %v1503_v7 = vld [vmem:[#allocation11 + $0x3e8] sm:$0xff] }
 0x4af   : > { %2992 = vmatprep.subr.bf16.mxu1 %v2991_v8  ;;  %v3025_v8 = vpack.c.bf16 %v1486_v5, %v1478_v4  ;;  %v3027_v9 = vpack.c.bf16 %v1503_v7, %v1495_v6  ;;  %v1622_v4 = vld [vmem:[#allocation11 + $0x7a0] sm:$0xff]  ;;  %v1662_v7 = vsub.s32 6, %v4046_v44 }
 0x4b0   : > { %v1630_v5 = vld [vmem:[#allocation11 + $0x7e0] sm:$0xff] }
 0x4b1   : > { %v3061_v6 = vpack.c.bf16 %v1630_v5, %v1622_v4 }
 0x4b2   : > { %2994 = vmatpush1.bf16.msra.mxu1 %v2993_v13 }
 0x4b3   : > { %2996 = vmatprep.subr.bf16.mxu1 %v2995_v14  ;;  %v3031_v14 = vpack.c.bf16 %v1519_v12, %v1511_v11 }
 0x4b6   : > { %2998 = vmatpush1.bf16.msra.mxu1 %v2997_v19  ;;  %v3033_v19 = vpack.c.bf16 %v1518_v16, %v1510_v15 }
 0x4b7   : > { %3000 = vmatprep.subr.bf16.mxu1 %v2999_v20  ;;  %v3035_v20 = vpack.c.bf16 %v1535_v18, %v1527_v17 }
 0x4b9   : > { %1830 = vmatmul.mubr.f32.vlgmr.msra.gmra.mrb[18].mxu1 %v4084_v27 }
 0x4ba   : > { %1835 = vmatprep.mubr.f32.mxu1 %v4090_v36  ;;  %3002 = vmatpush1.bf16.msra.mxu1 %v3001_v28  ;;  %v3037_v28 = vpack.c.bf16 %v1534_v22, %v1526_v21 }
 0x4bb   : > { %3004 = vmatprep.subr.bf16.mxu1 %v3003_v29  ;;  %v3039_v29 = vpack.c.bf16 %v1551_v25, %v1543_v24 }
 0x4bd   : > { %1836 = vmatmul.mubr.f32.gmra.mrb[20].mxu1 %v4092_v39 }
 0x4be   : > { %1841 = vmatprep.mubr.f32.mxu1 %v4098_v51  ;;  %3006 = vmatpush1.bf16.msra.mxu1 %v3005_v34  ;;  %v3041_v34 = vpack.c.bf16 %v1550_v31, %v1542_v30 }
 0x4bf   : > { %3008 = vmatprep.subr.bf16.mxu1 %v3007_v35  ;;  %v3043_v35 = vpack.c.bf16 %v1567_v33, %v1559_v32 }
 0x4c1   : > { %1842 = vmatmul.mubr.f32.gmra.mrb[22].mxu1 %v4100_v54 }
 0x4c2   : > { %1847 = vmatprep.mubr.f32.mxu1 %v4106_v63  ;;  %3010 = vmatpush1.bf16.msra.mxu1 %v3009_v42  ;;  %v3045_v42 = vpack.c.bf16 %v1566_v38, %v1558_v37 }
 0x4c3   : > { %3012 = vmatprep.subr.bf16.mxu1 %v3011_v43  ;;  %v3047_v43 = vpack.c.bf16 %v1583_v41, %v1575_v40 }
 0x4c5   : > { %1848 = vmatmul.mubr.f32.gmra.mrb[24].mxu1 %v4108_v1 }
 0x4c6   : > { %3014 = vmatpush1.bf16.msra.mxu1 %v3013_v52  ;;  %1918 = vmatprep.mubr.f32.mxu1 %v4082_v23  ;;  %v1494_v23 = vld [vmem:[#allocation11 + $0x3a0] sm:$0xff]  ;;  %v3049_v52 = vpack.c.bf16 %v1582_v48, %v1574_v46 }
 0x4c7   : > { %3016 = vmatprep.subr.bf16.mxu1 %v3015_v53  ;;  %v3029_v13 = vpack.c.bf16 %v1502_v10, %v1494_v23  ;;  %v3051_v53 = vpack.c.bf16 %v1599_v50, %v1591_v49 }
 0x4ca   : > { %3018 = vmatpush1.bf16.msra.mxu1 %v3017_v59  ;;  %v3053_v59 = vpack.c.bf16 %v1598_v56, %v1590_v55 }
 0x4cb   : > { %3020 = vmatprep.subr.bf16.mxu1 %v3019_v60  ;;  %v3055_v60 = vpack.c.bf16 %v1615_v58, %v1607_v57 }
 0x4ce   : > { %3022 = vmatpush1.bf16.msra.mxu1 %v3021_v3  ;;  %v3057_v3 = vpack.c.bf16 %v1614_v62, %v1606_v61 }
 0x4cf   : > { %3024 = vmatprep.subr.bf16.mxu1 %v3023_v26  ;;  %v3059_v26 = vpack.c.bf16 %v1631_v2, %v1623_v0 }
 0x4d2   : > { %3026 = vmatpush1.bf16.msra.mxu1 %v3025_v8  ;;  %v4134_v8 = vld [vmem:[%s4327_s14] sm:$0xff] }
 0x4d3   : > { %3028 = vmatprep.subr.bf16.mxu1 %v3027_v9 }
 0x4d6   : > { %3030 = vmatpush1.bf16.msra.mxu1 %v3029_v13 }
 0x4d7   : > { %3032 = vmatprep.subr.bf16.mxu1 %v3031_v14 }
 0x4da   : > { %3034 = vmatpush1.bf16.msra.mxu1 %v3033_v19 }
 0x4db   : > { %3036 = vmatprep.subr.bf16.mxu1 %v3035_v20 }
 0x4de   : > { %3038 = vmatpush1.bf16.msra.mxu1 %v3037_v28 }
 0x4df   : > { %3040 = vmatprep.subr.bf16.mxu1 %v3039_v29 }
 0x4e2   : > { %3042 = vmatpush1.bf16.msra.mxu1 %v3041_v34 }
 0x4e3   : > { %3044 = vmatprep.subr.bf16.mxu1 %v3043_v35 }
 0x4e6   : > { %3046 = vmatpush1.bf16.msra.mxu1 %v3045_v42 }
 0x4e7   : > { %3048 = vmatprep.subr.bf16.mxu1 %v3047_v43 }
 0x4ea   : > { %3050 = vmatpush1.bf16.msra.mxu1 %v3049_v52 }
 0x4eb   : > { %3052 = vmatprep.subr.bf16.mxu1 %v3051_v53 }
 0x4ee   : > { %3054 = vmatpush1.bf16.msra.mxu1 %v3053_v59 }
 0x4ef   : > { %3056 = vmatprep.subr.bf16.mxu1 %v3055_v60 }
 0x4f2   : > { %3058 = vmatpush1.bf16.msra.mxu1 %v3057_v3 }
 0x4f3   : > { %3060 = vmatprep.subr.bf16.mxu1 %v3059_v26 }
 0x4f6   : > { %3062 = vmatpush1.bf16.msra.mxu1 %v3061_v6 }
 0x4f9   : > { %1919 = vmatmul.mubr.f32.vlgmr.msra.gmra.mrb[26].mxu1 %v4084_v27  ;;  %v1666_v27 = vsub.s32 7, %v4046_v44 }
 0x4fa   : > { %1924 = vmatprep.mubr.f32.mxu1 %v4090_v36  ;;  %v1639_v36 = vrot.slane %v4134_v8, %v4049_v45 }
 0x4fd   : > { %1925 = vmatmul.mubr.f32.gmra.mrb[28].mxu1 %v4092_v39  ;;  %v4140_v39 = vrot.slane %v4134_v8, %v1662_v7 }
 0x4fe   : > { %1930 = vmatprep.mubr.f32.mxu1 %v4098_v51  ;;  %v4144_v51 = vrot.slane %v4134_v8, %v4055_v47 }
 0x501   : > { %1931 = vmatmul.mubr.f32.gmra.mrb[30].mxu1 %v4100_v54  ;;  %v4147_v54 = vrot.slane %v4134_v8, %v1666_v27 }
 0x502   : > { %1936 = vmatprep.mubr.f32.mxu1 %v4106_v63 }
 0x505   : > { %1937 = vmatmul.mubr.f32.gmra.mrb[32].mxu1 %v4108_v1 }
 0x54c   : > { %v1742_v63 = vpop.f32.mrb[10].mxu1  ;;  %v2009_v1 = vpop.f32.mrb[2].mxu0 }
 0x54d   : > { %v1743_v9 = vadd.f32 %v1742_v63, %v1639_v36  ;;  %v2010_v23 = vadd.f32 %v2009_v1, %v4140_v39  ;;  %v1744_v10 = vpop.f32.mrb[11].mxu1  ;;  %v2011_v11 = vpop.f32.mrb[3].mxu0 }
 0x54e   : > { %v1745_v12 = vadd.f32 %v1744_v10, %v4144_v51  ;;  %v2012_v45 = vadd.f32 %v2011_v11, %v4147_v54 }
 0x54f   : > { %v2476_v13 = vmul.f32 -1.442695, %v1743_v9  ;;  %v2482_v14 = vmul.f32 -1.442695, %v2010_v23 }
 0x550   : > { %v2477_v15 = vmul.f32 -1.442695, %v1745_v12  ;;  %v2483_v16 = vmul.f32 -1.442695, %v2012_v45  ;;  %v1748_v47 = vpop.f32.mrb[12].mxu1  ;;  %v2015_v17 = vpop.f32.mrb[4].mxu0 }
 0x551   : > { %3244 = vpow2.f32 %v2476_v13  ;;  %v1749_v18 = vadd.f32 %v1748_v47, %v1639_v36  ;;  %v2016_v19 = vadd.f32 %v2015_v17, %v4140_v39  ;;  %v1750_v20 = vpop.f32.mrb[13].mxu1  ;;  %v2017_v21 = vpop.f32.mrb[5].mxu0 }
 0x552   : > { %3246 = vpow2.f32 %v2482_v14  ;;  %v1751_v22 = vadd.f32 %v1750_v20, %v4144_v51  ;;  %v2018_v24 = vadd.f32 %v2017_v21, %v4147_v54 }
 0x553   : > { %3248 = vpow2.f32 %v2477_v15  ;;  %v2484_v25 = vmul.f32 -1.442695, %v1749_v18  ;;  %v2490_v28 = vmul.f32 -1.442695, %v2016_v19 }
 0x554   : > { %3250 = vpow2.f32 %v2483_v16  ;;  %v2485_v29 = vmul.f32 -1.442695, %v1751_v22  ;;  %v2491_v30 = vmul.f32 -1.442695, %v2018_v24  ;;  %v1754_v31 = vpop.f32.mrb[14].mxu1  ;;  %v2021_v32 = vpop.f32.mrb[6].mxu0 }
 0x555   : > { %3252 = vpow2.f32 %v2484_v25  ;;  %v1755_v33 = vadd.f32 %v1754_v31, %v1639_v36  ;;  %v2022_v34 = vadd.f32 %v2021_v32, %v4140_v39  ;;  %v1756_v35 = vpop.f32.mrb[15].mxu1  ;;  %v2023_v37 = vpop.f32.mrb[7].mxu0 }
 0x556   : > { %3254 = vpow2.f32 %v2490_v28  ;;  %v1757_v38 = vadd.f32 %v1756_v35, %v4144_v51  ;;  %v2024_v40 = vadd.f32 %v2023_v37, %v4147_v54 }
 0x557   : > { %3256 = vpow2.f32 %v2485_v29  ;;  %v2492_v41 = vmul.f32 -1.442695, %v1755_v33  ;;  %v2498_v42 = vmul.f32 -1.442695, %v2022_v34 }
 0x558   : > { %3258 = vpow2.f32 %v2491_v30  ;;  %v2493_v43 = vmul.f32 -1.442695, %v1757_v38  ;;  %v2499_v46 = vmul.f32 -1.442695, %v2024_v40  ;;  %v1760_v48 = vpop.f32.mrb[16].mxu1  ;;  %v2027_v49 = vpop.f32.mrb[8].mxu0 }
 0x559   : > { %3260 = vpow2.f32 %v2492_v41  ;;  %v1761_v50 = vadd.f32 %v1760_v48, %v1639_v36  ;;  %v1762_v52 = vpop.f32.mrb[17].mxu1  ;;  %v2029_v53 = vpop.f32.mrb[9].mxu0  ;;  %v2028_v63 = vadd.f32 %v2027_v49, %v4140_v39 }
 0x55a   : > { %3262 = vpow2.f32 %v2498_v42  ;;  %v1763_v23 = vadd.f32 %v1762_v52, %v4144_v51  ;;  %v2030_v12 = vadd.f32 %v2029_v53, %v4147_v54 }
 0x55b   : > { %v3245_v55 = vpop.eup %3244  ;;  %3264 = vpow2.f32 %v2493_v43  ;;  %v2500_v56 = vmul.f32 -1.442695, %v1761_v50  ;;  %v2506_v16 = vmul.f32 -1.442695, %v2028_v63 }
 0x55c   : > { %v3247_v57 = vpop.eup %3246  ;;  %v2128_v58 = vadd.f32 1.0, %v3245_v55  ;;  %3266 = vpow2.f32 %v2499_v46  ;;  %v2501_v17 = vmul.f32 -1.442695, %v1763_v23  ;;  %v2507_v51 = vmul.f32 -1.442695, %v2030_v12 }
 0x55d   : > { %v3249_v59 = vpop.eup %3248  ;;  %v2134_v60 = vadd.f32 1.0, %v3247_v57  ;;  %3268 = vpow2.f32 %v2500_v56 }
 0x55e   : > { %v3251_v61 = vpop.eup %3250  ;;  %3270 = vrcp.f32 %v2128_v58  ;;  %v2129_v62 = vadd.f32 1.0, %v3249_v59 }
 0x55f   : > { %v3253_v0 = vpop.eup %3252  ;;  %3272 = vrcp.f32 %v2134_v60  ;;  %v2135_v2 = vadd.f32 1.0, %v3251_v61 }
 0x560   : > { %v3255_v3 = vpop.eup %3254  ;;  %3274 = vrcp.f32 %v2129_v62  ;;  %v2136_v26 = vadd.f32 1.0, %v3253_v0 }
 0x561   : > { %v3257_v4 = vpop.eup %3256  ;;  %3276 = vrcp.f32 %v2135_v2  ;;  %v2142_v5 = vadd.f32 1.0, %v3255_v3 }
 0x562   : > { %v3259_v6 = vpop.eup %3258  ;;  %3278 = vrcp.f32 %v2136_v26  ;;  %v2137_v7 = vadd.f32 1.0, %v3257_v4 }
 0x563   : > { %v3261_v27 = vpop.eup %3260  ;;  %3280 = vrcp.f32 %v2142_v5  ;;  %v2143_v36 = vadd.f32 1.0, %v3259_v6 }
 0x564   : > { %v3263_v1 = vpop.eup %3262  ;;  %3282 = vrcp.f32 %v2137_v7  ;;  %v2144_v9 = vadd.f32 1.0, %v3261_v27 }
 0x565   : > { %v3265_v10 = vpop.eup %3264  ;;  %3284 = vrcp.f32 %v2143_v36  ;;  %v2150_v11 = vadd.f32 1.0, %v3263_v1 }
 0x566   : > { %v3267_v45 = vpop.eup %3266  ;;  %3286 = vrcp.f32 %v2144_v9  ;;  %v2145_v13 = vadd.f32 1.0, %v3265_v10 }
 0x567   : > { %v3269_v14 = vpop.eup %3268  ;;  %3288 = vrcp.f32 %v2150_v11  ;;  %v2151_v15 = vadd.f32 1.0, %v3267_v45 }
 0x568   : > { %v3271_v47 = vpop.eup %3270  ;;  %3290 = vrcp.f32 %v2145_v13  ;;  %v2152_v39 = vadd.f32 1.0, %v3269_v14 }
 0x569   : > { %v3273_v18 = vpop.eup %3272  ;;  %2224 = vst [vmem:[%s4162_s0] sm:$0xff] %v3271_v47  ;;  %3292 = vrcp.f32 %v2151_v15 }
 0x56a   : > { %v3275_v54 = vpop.eup %3274  ;;  %2230 = vst [vmem:[%s4162_s0 + $0x30] sm:$0xff] %v3273_v18  ;;  %3294 = vrcp.f32 %v2152_v39 }
 0x56b   : > { %v3277_v19 = vpop.eup %3276  ;;  %2225 = vst [vmem:[%s4162_s0 + $0x8] sm:$0xff] %v3275_v54  ;;  %3296 = vpow2.f32 %v2506_v16 }
 0x56c   : > { %v3279_v20 = vpop.eup %3278  ;;  %2231 = vst [vmem:[%s4162_s0 + $0x38] sm:$0xff] %v3277_v19  ;;  %3298 = vpow2.f32 %v2501_v17 }
 0x56d   : > { %v3281_v21 = vpop.eup %3280  ;;  %2232 = vst [vmem:[%s4162_s0 + $0x40] sm:$0xff] %v3279_v20  ;;  %3300 = vpow2.f32 %v2507_v51 }
 0x56e   : > { %v3283_v22 = vpop.eup %3282  ;;  %2238 = vst [vmem:[%s4162_s0 + $0x70] sm:$0xff] %v3281_v21 }
 0x56f   : > { %v3285_v24 = vpop.eup %3284  ;;  %2233 = vst [vmem:[%s4162_s0 + $0x48] sm:$0xff] %v3283_v22 }
 0x570   : > { %v3287_v25 = vpop.eup %3286  ;;  %2239 = vst [vmem:[%s4162_s0 + $0x78] sm:$0xff] %v3285_v24 }
 0x571   : > { %v3289_v28 = vpop.eup %3288  ;;  %2240 = vst [vmem:[%s4162_s0 + $0x80] sm:$0xff] %v3287_v25 }
 0x572   : > { %v3291_v29 = vpop.eup %3290  ;;  %2246 = vst [vmem:[%s4162_s0 + $0xb0] sm:$0xff] %v3289_v28 }
 0x573   : > { %v3293_v30 = vpop.eup %3292  ;;  %2241 = vst [vmem:[%s4162_s0 + $0x88] sm:$0xff] %v3291_v29 }
 0x574   : > { %v3295_v31 = vpop.eup %3294  ;;  %2247 = vst [vmem:[%s4162_s0 + $0xb8] sm:$0xff] %v3293_v30 }
 0x575   : > { %v3297_v32 = vpop.eup %3296  ;;  %2248 = vst [vmem:[%s4162_s0 + $0xc0] sm:$0xff] %v3295_v31 }
 0x576   : > { %v3299_v33 = vpop.eup %3298  ;;  %v2158_v34 = vadd.f32 1.0, %v3297_v32 }
 0x577   : > { %v3301_v35 = vpop.eup %3300  ;;  %v2153_v37 = vadd.f32 1.0, %v3299_v33 }
 0x578   : > { %3302 = vrcp.f32 %v2158_v34  ;;  %v2159_v38 = vadd.f32 1.0, %v3301_v35 }
 0x579   : > { %3304 = vrcp.f32 %v2153_v37 }
 0x57a   : > { %3306 = vrcp.f32 %v2159_v38 }
 0x57b   : > { %3557 = shalt.err (!%p3554_p1)
}
 0x57c   : > { %s3558_s2 = scalar_lea.hbm %s4181_s22, 256  ;;  %s3562_s16 = scalar_lea.hbm %s4328_s11, 512 }
 0x57d   : > { %p3559_p11 = scmp.ne.s32.totalorder %s4181_s22, %s3558_s2  ;;  %p3563_p3 = scmp.lt.u32.totalorder %s4181_s22, %s4328_s11 }
 0x57e   : > { %p3564_p13 = scmp.lt.u32.totalorder %s3562_s16, %s3558_s2  ;;  %p3566_p6 = scmp.lt.u32.totalorder %s3558_s2, %s4181_s22 }
 0x57f   : > { %p3560_p8 = pnand %p3559_p11, %p4329_p2 }
 0x580   : > { %p3565_p0 = por %p3564_p13, %p3563_p3 }
 0x581   : > { %p3561_p12 = pneg %p3560_p8 }
 0x582   : > { %p3567_p4 = por %p3566_p6, %p3565_p0 }
 0x584   : > { %p3568_p10 = pnand %p3567_p4, %p3561_p12 }
 0x586   : > { %3571 = shalt.err (!%p3568_p10)
}
 0x587   : > { %3156 = dma.vmem_to_hbm [thread:$0]  (%p4329_p2), %s2293_s12, 256, %s4181_s22, %s2262_s10   ;;  %v3303_v40 = vpop.eup %3302  ;;  %v1646_v43 = vsub.s32 2, %v4046_v44  ;;  %v1650_v46 = vsub.s32 3, %v4046_v44  ;;  %v1654_v31 = vsub.s32 4, %v4046_v44  ;;  %v1658_v32 = vsub.s32 5, %v4046_v44 }
 0x588   : > { %v3305_v41 = vpop.eup %3304  ;;  %2254 = vst [vmem:[%s4162_s0 + $0xf0] sm:$0xff] %v3303_v40  ;;  %s2517_s27 = sshll.u32 %s3759_s23, 10  ;;  %s2275_s22 = sshll.u32 %s4162_s0, 4  ;;  %s4235_s22 = int_to_ptr.vmem [resolvable:$true] %s2275_s22 }
 0x589   : > { %v3307_v42 = vpop.eup %3306  ;;  %2249 = vst [vmem:[%s4162_s0 + $0xc8] sm:$0xff] %v3305_v41  ;;  %v1647_v48 = vrot.slane %v4134_v8, %v1646_v43  ;;  %v1651_v49 = vrot.slane %v4134_v8, %v1650_v46  ;;  %v1655_v33 = vrot.slane %v4134_v8, %v1654_v31  ;;  %v1659_v34 = vrot.slane %v4134_v8, %v1658_v32  ;;  %s4330_s29 = sld [smem:[#allocation28_spill]]  ;;  %s2257_s4 = scalar_lea.sflag [#allocation4], %s4008_s25 }
 0x58a   : > { %2255 = vst [vmem:[%s4162_s0 + $0xf8] sm:$0xff] %v3307_v42  ;;  %s3572_s30 = scalar_lea.vmem %s4235_s22, 4096  ;;  %s3674_s23 = smov [#allocation13]  }
 0x58b   : > { %p3573_p5 = scmp.ne.s32.totalorder %s4235_s22, %s3572_s30  ;;  %s3576_s2 = sshll.u32 %s3674_s23, 4  ;;  %s3577_s2 = int_to_ptr.vmem [resolvable:$false] %s3576_s2 }
 0x58c   : > { %v1831_v50 = vpop.f32.mrb[18].mxu1  ;;  %s3578_s9 = scalar_lea.vmem %s3577_s2, 8192  ;;  %p3579_p1 = scmp.lt.s32.totalorder %s4235_s22, %s3577_s2 }
 0x58d   : > { %v1832_v52 = vadd.f32 %v1831_v50, %v1647_v48  ;;  %v1833_v53 = vpop.f32.mrb[19].mxu1  ;;  %p3574_p7 = pnand %p3573_p5, %p4329_p2  ;;  %p3580_p11 = scmp.lt.s32.totalorder %s3578_s9, %s3572_s30 }
 0x58e   : > { %v1834_v55 = vadd.f32 %v1833_v53, %v1651_v49 }
 0x58f   : > { %v2478_v56 = vmul.f32 -1.442695, %v1832_v52  ;;  %s4232_s6 = scalar_lea.hbm %s4330_s29, %s2517_s27  ;;  %p3575_p9 = pneg %p3574_p7 }
 0x590   : > { %v2479_v57 = vmul.f32 -1.442695, %v1834_v55  ;;  %v1837_v58 = vpop.f32.mrb[20].mxu1  ;;  %p3581_p8 = por %p3580_p11, %p3579_p1 }
 0x591   : > { %3308 = vpow2.f32 %v2478_v56  ;;  %v1838_v59 = vadd.f32 %v1837_v58, %v1647_v48  ;;  %v1839_v60 = vpop.f32.mrb[21].mxu1 }
 0x592   : > { %3310 = vpow2.f32 %v2479_v57  ;;  %v1840_v61 = vadd.f32 %v1839_v60, %v1651_v49  ;;  %p3582_p12 = pnand %p3581_p8, %p3575_p9 }
 0x593   : > { %v2486_v62 = vmul.f32 -1.442695, %v1838_v59 }
 0x594   : > { %v2487_v0 = vmul.f32 -1.442695, %v1840_v61  ;;  %v1843_v2 = vpop.f32.mrb[22].mxu1 }
 0x595   : > { %3312 = vpow2.f32 %v2486_v62  ;;  %v1844_v3 = vadd.f32 %v1843_v2, %v1647_v48  ;;  %v1845_v26 = vpop.f32.mrb[23].mxu1 }
 0x596   : > { %3314 = vpow2.f32 %v2487_v0  ;;  %v1846_v4 = vadd.f32 %v1845_v26, %v1651_v49 }
 0x597   : > { %v2494_v5 = vmul.f32 -1.442695, %v1844_v3 }
 0x598   : > { %v2495_v6 = vmul.f32 -1.442695, %v1846_v4  ;;  %v1849_v7 = vpop.f32.mrb[24].mxu1 }
 0x599   : > { %3316 = vpow2.f32 %v2494_v5  ;;  %v1850_v27 = vadd.f32 %v1849_v7, %v1647_v48  ;;  %v1851_v36 = vpop.f32.mrb[25].mxu1 }
 0x59a   : > { %3318 = vpow2.f32 %v2495_v6  ;;  %v1852_v63 = vadd.f32 %v1851_v36, %v1651_v49 }
 0x59b   : > { %v3309_v1 = vpop.eup %3308  ;;  %v2502_v9 = vmul.f32 -1.442695, %v1850_v27 }
 0x59c   : > { %v3311_v23 = vpop.eup %3310  ;;  %v2130_v10 = vadd.f32 1.0, %v3309_v1  ;;  %v2503_v11 = vmul.f32 -1.442695, %v1852_v63 }
 0x59d   : > { %v2131_v12 = vadd.f32 1.0, %v3311_v23  ;;  %3320 = vpow2.f32 %v2502_v9 }
 0x59e   : > { %3322 = vrcp.f32 %v2130_v10 }
 0x59f   : > { %v3313_v45 = vpop.eup %3312  ;;  %3324 = vrcp.f32 %v2131_v12 }
 0x5a0   : > { %v3315_v13 = vpop.eup %3314  ;;  %v2138_v14 = vadd.f32 1.0, %v3313_v45  ;;  %3326 = vpow2.f32 %v2503_v11 }
 0x5a1   : > { %v2139_v15 = vadd.f32 1.0, %v3315_v13 }
 0x5a2   : > { %3328 = vrcp.f32 %v2138_v14 }
 0x5a3   : > { %v3317_v16 = vpop.eup %3316  ;;  %3330 = vrcp.f32 %v2139_v15 }
 0x5a4   : > { %v3319_v47 = vpop.eup %3318  ;;  %v2146_v39 = vadd.f32 1.0, %v3317_v16 }
 0x5a5   : > { %v2147_v17 = vadd.f32 1.0, %v3319_v47 }
 0x5a6   : > { %3332 = vrcp.f32 %v2146_v39 }
 0x5a7   : > { %v3321_v18 = vpop.eup %3320  ;;  %3334 = vrcp.f32 %v2147_v17 }
 0x5a8   : > { %v3323_v51 = vpop.eup %3322  ;;  %v2154_v54 = vadd.f32 1.0, %v3321_v18 }
 0x5a9   : > { %v3325_v19 = vpop.eup %3324  ;;  %2226 = vst [vmem:[%s4162_s0 + $0x10] sm:$0xff] %v3323_v51 }
 0x5aa   : > { %v3327_v20 = vpop.eup %3326  ;;  %2227 = vst [vmem:[%s4162_s0 + $0x18] sm:$0xff] %v3325_v19  ;;  %3336 = vrcp.f32 %v2154_v54 }
 0x5ab   : > { %v2155_v21 = vadd.f32 1.0, %v3327_v20 }
 0x5ac   : > { %v3329_v22 = vpop.eup %3328 }
 0x5ad   : > { %v3331_v24 = vpop.eup %3330  ;;  %2234 = vst [vmem:[%s4162_s0 + $0x50] sm:$0xff] %v3329_v22  ;;  %3338 = vrcp.f32 %v2155_v21 }
 0x5ae   : > { %2235 = vst [vmem:[%s4162_s0 + $0x58] sm:$0xff] %v3331_v24 }
 0x5b0   : > { %v3333_v25 = vpop.eup %3332 }
 0x5b1   : > { %v3335_v28 = vpop.eup %3334  ;;  %2242 = vst [vmem:[%s4162_s0 + $0x90] sm:$0xff] %v3333_v25 }
 0x5b2   : > { %2243 = vst [vmem:[%s4162_s0 + $0x98] sm:$0xff] %v3335_v28 }
 0x5b4   : > { %v3337_v29 = vpop.eup %3336 }
 0x5b5   : > { %2250 = vst [vmem:[%s4162_s0 + $0xd0] sm:$0xff] %v3337_v29 }
 0x5b7   : > { %v3339_v30 = vpop.eup %3338 }
 0x5b8   : > { %2251 = vst [vmem:[%s4162_s0 + $0xd8] sm:$0xff] %v3339_v30 }
 0x5cc   : > { %v1920_v35 = vpop.f32.mrb[26].mxu1 }
 0x5cd   : > { %v1921_v37 = vadd.f32 %v1920_v35, %v1655_v33  ;;  %v1922_v38 = vpop.f32.mrb[27].mxu1 }
 0x5ce   : > { %v1923_v40 = vadd.f32 %v1922_v38, %v1659_v34 }
 0x5cf   : > { %v2480_v41 = vmul.f32 -1.442695, %v1921_v37 }
 0x5d0   : > { %v2481_v42 = vmul.f32 -1.442695, %v1923_v40  ;;  %v1926_v43 = vpop.f32.mrb[28].mxu1 }
 0x5d1   : > { %3340 = vpow2.f32 %v2480_v41  ;;  %v1927_v46 = vadd.f32 %v1926_v43, %v1655_v33  ;;  %v1928_v48 = vpop.f32.mrb[29].mxu1 }
 0x5d2   : > { %3342 = vpow2.f32 %v2481_v42  ;;  %v1929_v49 = vadd.f32 %v1928_v48, %v1659_v34 }
 0x5d3   : > { %v2488_v50 = vmul.f32 -1.442695, %v1927_v46 }
 0x5d4   : > { %v2489_v52 = vmul.f32 -1.442695, %v1929_v49  ;;  %v1932_v53 = vpop.f32.mrb[30].mxu1 }
 0x5d5   : > { %3344 = vpow2.f32 %v2488_v50  ;;  %v1933_v44 = vadd.f32 %v1932_v53, %v1655_v33  ;;  %v1934_v55 = vpop.f32.mrb[31].mxu1 }
 0x5d6   : > { %3346 = vpow2.f32 %v2489_v52  ;;  %v1935_v8 = vadd.f32 %v1934_v55, %v1659_v34 }
 0x5d7   : > { %v2496_v56 = vmul.f32 -1.442695, %v1933_v44 }
 0x5d8   : > { %v2497_v57 = vmul.f32 -1.442695, %v1935_v8  ;;  %v1938_v58 = vpop.f32.mrb[32].mxu1 }
 0x5d9   : > { %3348 = vpow2.f32 %v2496_v56  ;;  %v1939_v59 = vadd.f32 %v1938_v58, %v1655_v33  ;;  %v1940_v60 = vpop.f32.mrb[33].mxu1 }
 0x5da   : > { %3350 = vpow2.f32 %v2497_v57  ;;  %v1941_v61 = vadd.f32 %v1940_v60, %v1659_v34 }
 0x5db   : > { %v3341_v62 = vpop.eup %3340  ;;  %v2504_v0 = vmul.f32 -1.442695, %v1939_v59 }
 0x5dc   : > { %v3343_v2 = vpop.eup %3342  ;;  %v2132_v3 = vadd.f32 1.0, %v3341_v62  ;;  %v2505_v26 = vmul.f32 -1.442695, %v1941_v61 }
 0x5dd   : > { %v2133_v4 = vadd.f32 1.0, %v3343_v2  ;;  %3352 = vpow2.f32 %v2504_v0 }
 0x5de   : > { %3354 = vrcp.f32 %v2132_v3 }
 0x5df   : > { %v3345_v5 = vpop.eup %3344  ;;  %3356 = vrcp.f32 %v2133_v4 }
 0x5e0   : > { %v3347_v6 = vpop.eup %3346  ;;  %v2140_v7 = vadd.f32 1.0, %v3345_v5  ;;  %3358 = vpow2.f32 %v2505_v26 }
 0x5e1   : > { %v2141_v27 = vadd.f32 1.0, %v3347_v6 }
 0x5e2   : > { %3360 = vrcp.f32 %v2140_v7 }
 0x5e3   : > { %v3349_v36 = vpop.eup %3348  ;;  %3362 = vrcp.f32 %v2141_v27 }
 0x5e4   : > { %v3351_v63 = vpop.eup %3350  ;;  %v2148_v1 = vadd.f32 1.0, %v3349_v36 }
 0x5e5   : > { %v2149_v9 = vadd.f32 1.0, %v3351_v63 }
 0x5e6   : > { %3364 = vrcp.f32 %v2148_v1 }
 0x5e7   : > { %v3353_v23 = vpop.eup %3352  ;;  %3366 = vrcp.f32 %v2149_v9 }
 0x5e8   : > { %v3355_v10 = vpop.eup %3354  ;;  %v2156_v11 = vadd.f32 1.0, %v3353_v23 }
 0x5e9   : > { %v3357_v12 = vpop.eup %3356  ;;  %2228 = vst [vmem:[%s4162_s0 + $0x20] sm:$0xff] %v3355_v10 }
 0x5ea   : > { %v3359_v45 = vpop.eup %3358  ;;  %2229 = vst [vmem:[%s4162_s0 + $0x28] sm:$0xff] %v3357_v12  ;;  %3368 = vrcp.f32 %v2156_v11 }
 0x5eb   : > { %v2157_v13 = vadd.f32 1.0, %v3359_v45 }
 0x5ec   : > { %v3361_v14 = vpop.eup %3360 }
 0x5ed   : > { %v3363_v15 = vpop.eup %3362  ;;  %2236 = vst [vmem:[%s4162_s0 + $0x60] sm:$0xff] %v3361_v14  ;;  %3370 = vrcp.f32 %v2157_v13 }
 0x5ee   : > { %2237 = vst [vmem:[%s4162_s0 + $0x68] sm:$0xff] %v3363_v15 }
 0x5f0   : > { %v3365_v16 = vpop.eup %3364 }
 0x5f1   : > { %v3367_v47 = vpop.eup %3366  ;;  %2244 = vst [vmem:[%s4162_s0 + $0xa0] sm:$0xff] %v3365_v16 }
 0x5f2   : > { %2245 = vst [vmem:[%s4162_s0 + $0xa8] sm:$0xff] %v3367_v47 }
 0x5f4   : > { %v3369_v39 = vpop.eup %3368 }
 0x5f5   : > { %2252 = vst [vmem:[%s4162_s0 + $0xe0] sm:$0xff] %v3369_v39 }
 0x5f7   : > { %v3371_v17 = vpop.eup %3370 }
 0x5f8   : > { %2253 = vst [vmem:[%s4162_s0 + $0xe8] sm:$0xff] %v3371_v17 }
 0x5f9   : > { %3585 = shalt.err (!%p3582_p12)
}
 0x5fa   : > { %s3586_s0 = scalar_lea.hbm %s4232_s6, 4096  ;;  %s3590_s24 = scalar_lea.hbm %s4330_s29, 8192 }
 0x5fb   : > { %p3587_p3 = scmp.ne.s32.totalorder %s4232_s6, %s3586_s0  ;;  %p3591_p6 = scmp.lt.u32.totalorder %s4232_s6, %s4330_s29 }
 0x5fc   : > { %p3592_p4 = scmp.lt.u32.totalorder %s3590_s24, %s3586_s0  ;;  %p3594_p5 = scmp.lt.u32.totalorder %s3586_s0, %s4232_s6 }
 0x5fd   : > { %p3588_p13 = pnand %p3587_p3, %p4329_p2 }
 0x5fe   : > { %p3593_p10 = por %p3592_p4, %p3591_p6 }
 0x5ff   : > { %p3589_p0 = pneg %p3588_p13 }
 0x600   : > { %p3595_p7 = por %p3594_p5, %p3593_p10 }
 0x602   : > { %p3596_p9 = pnand %p3595_p7, %p3589_p0 }
 0x604   : > { %3599 = shalt.err (!%p3596_p9)
}
 0x605   : > { %s3675_s12 = smov 1024   ;;  %s3676_s10 = smov 2048  }
 0x606   : > { %s3677_s30 = smov 64  }
 0x607   : > { %3155 = dma.vmem_to_hbm [thread:$0]  (%p4329_p2), %s4235_s22, 4096, %s4232_s6, %s2257_s4, %s3675_s12, %s3676_s10, %s3677_s30  }
 0x608 PF: > { %s2304_s23 = sand.u32 1, %s3646_s17   ;;  %p4331_p1 = scmp.ne.s32.totalorder %s4315_s26, 0 }
 0x609   : > { %p4332_p11 = scmp.ge.s32.totalorder %s3658_s20, 2  ;;  %s2305_s2 = scalar_lea.sflag [#allocation4], %s2304_s23 }
 0x60b   : > { %p3180_p8 = pnand %p4332_p11, %p4331_p1 }
 0x60d   : > { %3637 = dma.done.wait (!%p3180_p8), %s2305_s2, 4096  }
 0x60e   : > { %3639 = vsyncadd (!%p3180_p8), %s2305_s2, 4294963200  ;;  %s2314_s9 = scalar_lea.sflag [#allocation15], %s2304_s23 }
 0x60f   : > { %3641 = dma.done.wait (!%p3180_p8), %s2314_s9, 256  }
 0x610   : > { %3643 = vsyncadd (!%p3180_p8), %s2314_s9, 4294967040  ;;  %p33_p2 = scmp.ge.s32.totalorder %s3887_s13, 4   ;;  %s4333_s17 = smov %s3650_s18 }
 0x611   : > { %s4334_s18 = smov %s3654_s19  ;;  %s4335_s19 = smov %s3898_s21 }
 0x612   : > { %s4336_s20 = smov %s3887_s13  ;;  %35 = sbr.rel (!%p33_p2) target bundleno = 19 (0x13), region = 151 }
 0x619   :  { %2319 = vsyncpa [#allocation3], 1 }
 0x61a   :  { %2321 = vsyncpa [#allocation3 + $0x1], 1 }
 0x61b   :  { %2322 = vsyncpa [#allocation6], 1 }
 0x61c   :  { %2324 = vsyncpa [#allocation6 + $0x1], 1 }
 0x61d   :  { %2325 = vsyncpa [#allocation9], 1 }
 0x61e   :  { %2326 = vsyncpa [#allocation12], 1 }
 0x61f   :  { %2327 = vsyncpa [#allocation4], 1 }
 0x620   :  { %2329 = vsyncpa [#allocation4 + $0x1], 1 }
 0x621   :  { %2330 = vsyncpa [#allocation15], 1 }
 0x622   :  { %2332 = vsyncpa [#allocation15 + $0x1], 1 }

// kernel: tpu_custom_call.1
= control target key start
LH: loop header
LB: loop body
LE: loop exit
PB: predicated region body
PF: predicated region fallthrough
CT: control target
= control target key end

     0   :  { %s4280_s0 = inlined_call_operand.hbm [shape: f32[16,1024], index: 0, kind: input, shape index: {}]   ;;  %s4281_s1 = inlined_call_operand.hbm [shape: f32[4,16,128], index: 1, kind: input, shape index: {}]   ;;  %s4282_s2 = inlined_call_operand.hbm [shape: f32[1024,256], index: 2, kind: input, shape index: {}]   ;;  %s4283_s3 = inlined_call_operand.vmem [shape: f32[1,256], index: 3, kind: input, shape index: {}]   ;;  %s4284_s4 = inlined_call_operand.hbm [shape: f32[256,256], index: 4, kind: input, shape index: {}]   ;;  %s4285_s5 = inlined_call_operand.vmem [shape: f32[1,256], index: 5, kind: input, shape index: {}]   ;;  %s4286_s6 = inlined_call_operand.hbm [shape: f32[128,256], index: 6, kind: input, shape index: {}]   ;;  %s4287_s7 = inlined_call_operand.vmem [shape: f32[1,256], index: 7, kind: input, shape index: {}]   ;;  %s4288_s8 = inlined_call_operand.hbm [shape: f32[256,1024], index: 8, kind: input, shape index: {}]   ;;  %s4289_s9 = inlined_call_operand.vmem [shape: f32[1,1024], index: 9, kind: input, shape index: {}]   ;;  %s4290_s10 = inlined_call_operand.hbm [shape: f32[4,16,1024], index: 10, kind: output, shape index: {0}]   ;;  %s4291_s11 = inlined_call_operand.hbm [shape: f32[16,256], index: 11, kind: output, shape index: {1}]  }
   0x1   :  { %4298 = sst [smem:[#allocation23_spill]] %s4280_s0 }
   0x2   :  { %4299 = sst [smem:[#allocation24_spill]] %s4282_s2 }
   0x3   :  { %4300 = sst [smem:[#allocation25_spill]] %s4284_s4 }
   0x4   :  { %4301 = sst [smem:[#allocation26_spill]] %s4286_s6 }
   0x5   :  { %4302 = sst [smem:[#allocation27_spill]] %s4289_s9 }
   0x6   :  { %4303 = sst [smem:[#allocation28_spill]] %s4290_s10 }
   0x7   :  { %4304 = sst [smem:[#allocation29_spill]] %s4291_s11 }
   0x8   :  { %17 = vsyncpa [#allocation3], 0 }
   0x9   :  { %19 = vsyncpa [#allocation3 + $0x1], 0 }
   0xa   :  { %20 = vsyncpa [#allocation6], 0 }
   0xb   :  { %22 = vsyncpa [#allocation6 + $0x1], 0 }
   0xc   :  { %23 = vsyncpa [#allocation9], 0 }
   0xd   :  { %24 = vsyncpa [#allocation12], 0 }
   0xe   :  { %25 = vsyncpa [#allocation4], 0 }
   0xf   :  { %27 = vsyncpa [#allocation4 + $0x1], 0 }
  0x10   :  { %28 = vsyncpa [#allocation15], 0 }
  0x11   :  { %30 = vsyncpa [#allocation15 + $0x1], 0  ;;  %s3738_s17 = smov 0   ;;  %s3740_s18 = smov 0  }
  0x12   :  { %s3742_s19 = smov 0   ;;  %s3744_s20 = smov 0  }
  0x13 LB: > { %s3660_s21 = smov [#allocation7]   ;;  %s3759_s23 = sadd.s32 4294967295, %s3658_s20   ;;  %s3658_s20 = sphi %s3744_s20, %s4336_s20   ;;  %s3654_s19 = sphi %s3742_s19, %s4335_s19   ;;  %s3650_s18 = sphi %s3740_s18, %s4334_s18   ;;  %s3646_s17 = sphi %s3738_s17, %s4333_s17  }
  0x14   : > { %s325_s22 = sshll.u32 %s3660_s21, 4  ;;  %p2456_p0 = scmp.ge.s32.totalorder %s3658_s20, 1  ;;  %s3764_s22 = int_to_ptr.vmem [resolvable:$true] %s325_s22 }
  0x15   : > { %p4294_p1 = scmp.eq.s32.totalorder %s3759_s23, 0  ;;  %p313_p2 = scmp.lt.s32.totalorder %s3658_s20, 3 }
  0x16   : > { %s3661_s25 = smov [#allocation8]   ;;  %s3662_s28 = smov [#allocation10]  }
  0x17   : > { %p3766_p3 = pnand %p2456_p0, %p313_p2  ;;  %s341_s26 = sshll.u32 %s3661_s25, 4  ;;  %s3779_s26 = int_to_ptr.vmem [resolvable:$true] %s341_s26 }
  0x18   : > { %s357_s29 = sshll.u32 %s3662_s28, 4  ;;  %s4307_s2 = sld [smem:[#allocation24_spill]]  ;;  %s3781_s29 = int_to_ptr.vmem [resolvable:$true] %s357_s29 }
  0x19   : > { %s4305_s24 = scalar_select %p3766_p3, 1, 0 }
  0x1a   : > { %p3159_p5 = pneg %p3766_p3 }
  0x1c   : > { %p3775_p6 = pnand %p3159_p5, %p4294_p1 }
  0x1e   : > { %s3372_s13 = scalar_lea.hbm %s4307_s2, 32768  ;;  %p3791_p8 = pneg %p3775_p6 }
  0x1f   : > { %p3373_p7 = scmp.ne.s32.totalorder %s4307_s2, %s3372_s13  ;;  %p3379_p11 = scmp.lt.u32.totalorder %s3372_s13, %s4307_s2 }
  0x21   : > { %p3375_p9 = pnand %p3791_p8, %p3373_p7 }
  0x23   : > { %p3376_p10 = pneg %p3375_p9 }
  0x25   : > { %p3381_p12 = pnand %p3379_p11, %p3376_p10 }
  0x27   : > { %3384 = shalt.err (!%p3381_p12)
}
  0x28   : > { %s3385_s28 = scalar_lea.vmem %s3764_s22, 32768  ;;  %p3393_p5 = scmp.lt.s32.totalorder %s3764_s22, %s3764_s22 }
  0x29   : > { %p3386_p13 = scmp.ne.s32.totalorder %s3764_s22, %s3385_s28  ;;  %p3394_p4 = scmp.lt.s32.totalorder %s3385_s28, %s3385_s28 }
  0x2b   : > { %p3388_p0 = pnand %p3386_p13, %p3791_p8  ;;  %p3395_p7 = por %p3394_p4, %p3393_p5 }
  0x2d   : > { %p3389_p2 = pneg %p3388_p0 }
  0x2f   : > { %p3396_p9 = pnand %p3395_p7, %p3389_p2 }
  0x31   : > { %3399 = shalt.err (!%p3396_p9)
}
  0x32   : > { %s4296_s30 = smov 256   ;;  %s3664_s12 = smov 16  }
  0x33   : > { %3162 = dma.hbm_to_vmem [thread:$0]  (!%p3775_p6), %s4307_s2, 32768, %s3764_s22, [#allocation6], %s4296_s30, %s4296_s30, %s3664_s12  }
  0x34   : > { %s4309_s4 = sld [smem:[#allocation25_spill]] }
  0x3a   : > { %s3400_s25 = scalar_lea.hbm %s4309_s4, 8192 }
  0x3b   : > { %p3401_p4 = scmp.ne.s32.totalorder %s4309_s4, %s3400_s25  ;;  %p3407_p12 = scmp.lt.u32.totalorder %s3400_s25, %s4309_s4 }
  0x3d   : > { %p3403_p10 = pnand %p3401_p4, %p3791_p8 }
  0x3f   : > { %p3404_p11 = pneg %p3403_p10 }
  0x41   : > { %p3409_p13 = pnand %p3407_p12, %p3404_p11 }
  0x43   : > { %3412 = shalt.err (!%p3409_p13)
}
  0x44   : > { %s3413_s22 = scalar_lea.vmem %s3779_s26, 8192  ;;  %p3421_p7 = scmp.lt.s32.totalorder %s3779_s26, %s3779_s26 }
  0x45   : > { %p3414_p0 = scmp.ne.s32.totalorder %s3779_s26, %s3413_s22  ;;  %p3422_p9 = scmp.lt.s32.totalorder %s3413_s22, %s3413_s22 }
  0x47   : > { %p3416_p2 = pnand %p3414_p0, %p3791_p8  ;;  %p3423_p4 = por %p3422_p9, %p3421_p7 }
  0x49   : > { %p3417_p5 = pneg %p3416_p2 }
  0x4b   : > { %p3424_p10 = pnand %p3423_p4, %p3417_p5 }
  0x4d   : > { %3427 = shalt.err (!%p3424_p10)
}
  0x4e   : > { %3165 = dma.hbm_to_vmem [thread:$0]  (!%p3775_p6), %s4309_s4, 8192, %s3779_s26, [#allocation9], %s4296_s30, %s4296_s30, %s3664_s12  }
  0x4f   : > { %s4310_s6 = sld [smem:[#allocation26_spill]] }
  0x55   : > { %s3428_s14 = scalar_lea.hbm %s4310_s6, 4096 }
  0x56   : > { %p3429_p11 = scmp.ne.s32.totalorder %s4310_s6, %s3428_s14  ;;  %p3435_p0 = scmp.lt.u32.totalorder %s3428_s14, %s4310_s6 }
  0x58   : > { %p3431_p12 = pnand %p3429_p11, %p3791_p8 }
  0x5a   : > { %p3432_p13 = pneg %p3431_p12 }
  0x5c   : > { %p3437_p2 = pnand %p3435_p0, %p3432_p13 }
  0x5e   : > { %3440 = shalt.err (!%p3437_p2)
}
  0x5f   : > { %s3441_s26 = scalar_lea.vmem %s3781_s29, 4096  ;;  %p3449_p4 = scmp.lt.s32.totalorder %s3781_s29, %s3781_s29 }
  0x60   : > { %p3442_p5 = scmp.ne.s32.totalorder %s3781_s29, %s3441_s26  ;;  %p3450_p10 = scmp.lt.s32.totalorder %s3441_s26, %s3441_s26 }
  0x62   : > { %p3444_p7 = pnand %p3442_p5, %p3791_p8  ;;  %p3451_p11 = por %p3450_p10, %p3449_p4 }
  0x64   : > { %p3445_p9 = pneg %p3444_p7 }
  0x66   : > { %p3452_p12 = pnand %p3451_p11, %p3445_p9 }
  0x68   : > { %3455 = shalt.err (!%p3452_p12)
}
  0x69   : > { %3168 = dma.hbm_to_vmem [thread:$0]  (!%p3775_p6), %s4310_s6, 4096, %s3781_s29, [#allocation9], %s4296_s30, %s4296_s30, %s3664_s12  }
  0x6a   : > { %s3665_s10 = smov [#allocation11]   ;;  %s3456_s15 = scalar_lea.hbm %s4288_s8, 32768 }
  0x6b   : > { %s373_s11 = sshll.u32 %s3665_s10, 4  ;;  %p3457_p13 = scmp.ne.s32.totalorder %s4288_s8, %s3456_s15  ;;  %s374_s11 = int_to_ptr.vmem [resolvable:$true] %s373_s11 }
  0x6c   : > { %p3463_p5 = scmp.lt.u32.totalorder %s3456_s15, %s4288_s8 }
  0x6d   : > { %p3459_p0 = pnand %p3457_p13, %p3791_p8 }
  0x6f   : > { %p3460_p2 = pneg %p3459_p0 }
  0x71   : > { %p3465_p7 = pnand %p3463_p5, %p3460_p2 }
  0x73   : > { %3468 = shalt.err (!%p3465_p7)
}
  0x74   : > { %s3469_s29 = scalar_lea.vmem %s374_s11, 32768  ;;  %p3477_p11 = scmp.lt.s32.totalorder %s374_s11, %s374_s11 }
  0x75   : > { %p3470_p9 = scmp.ne.s32.totalorder %s374_s11, %s3469_s29  ;;  %p3478_p12 = scmp.lt.s32.totalorder %s3469_s29, %s3469_s29 }
  0x77   : > { %p3472_p4 = pnand %p3470_p9, %p3791_p8  ;;  %p3479_p1 = por %p3478_p12, %p3477_p11 }
  0x79   : > { %p3473_p10 = pneg %p3472_p4 }
  0x7b   : > { %p3480_p3 = pnand %p3479_p1, %p3473_p10 }
  0x7d   : > { %3483 = shalt.err (!%p3480_p3)
}
  0x7e   : > { %s3666_s12 = smov 1024   ;;  %s3667_s16 = smov 64  }
  0x7f   : > { %3171 = dma.hbm_to_vmem [thread:$0]  (!%p3775_p6), %s4288_s8, 32768, %s374_s11, [#allocation12], %s3666_s12, %s3666_s12, %s3667_s16  }
  0x80   : > { %s2455_s10 = sadd.s32 4294967294, %s3658_s20   ;;  %s3887_s13 = sadd.s32 1, %s3658_s20  }
  0x81   : > { %s40_s14 = ssub.s32 %s3658_s20, %s3887_s13  ;;  %s43_s15 = sadd.s32 1, %s3654_s19 }
  0x82   : > { %p41_p1 = scmp.eq.s32.totalorder %s40_s14, 0  ;;  %p50_p3 = scmp.ne.s32.totalorder %s3654_s19, %s3650_s18 }
  0x83   : > { %p51_p8 = scmp.eq.s32.totalorder %s3658_s20, 0  ;;  %p56_p13 = scmp.ne.s32.totalorder %s3650_s18, %s3646_s17 }
  0x84   : > { %s3898_s21 = scalar_select %p41_p1, %s3654_s19, %s43_s15  }
  0x85   : > { %p3900_p0 = por %p51_p8, %p50_p3  ;;  %p4312_p2 = scmp.eq.s32.totalorder %s3759_s23, 0 }
  0x86   : > { %p274_p5 = scmp.eq.s32.totalorder %s3759_s23, 1  ;;  %p280_p7 = scmp.eq.s32.totalorder %s2455_s10, 1 }
  0x87   : > { %p3906_p6 = por %p4312_p2, %p56_p13  ;;  %p3190_p9 = scmp.lt.s32.totalorder %s3658_s20, 2 }
  0x88   : > { %s3913_s25 = sand.u32 1, %s3654_s19   ;;  %p3915_p4 = por %p274_p5, %p50_p3 }
  0x89   : > { %p3919_p10 = por %p280_p7, %p56_p13  ;;  %s2462_s29 = sshll.u32 %s3913_s25, 6 }
  0x8a   : > { %s4314_s28 = scalar_select %p3915_p4, 1, 0 }
  0x8b   : > { %s4315_s26 = scalar_select %p3919_p10, 1, 0 }
  0x8c   : > { %s2516_s12 = sshll.u32 %s3658_s20, 10  ;;  %s4316_s0 = sld [smem:[#allocation23_spill]] }
  0x8d   : > { %s394_s10 = scalar_lea.vmem [#allocation2], %s2462_s29  ;;  %p3934_p11 = pnand %p3190_p9, %p3900_p0 }
  0x8e   : > { %s402_s14 = sshll.u32 %s394_s10, 4  ;;  %s2465_s30 = sshll.u32 %s3913_s25, 5  ;;  %s3930_s14 = int_to_ptr.vmem [resolvable:$true] %s402_s14 }
  0x8f   : > { %s391_s16 = scalar_lea.sflag [#allocation3], %s3913_s25  ;;  %p3486_p1 = pneg %p3934_p11 }
  0x92   : > { %s3928_s9 = scalar_lea.hbm %s4316_s0, %s2516_s12  ;;  %s3489_s27 = scalar_lea.hbm %s4316_s0, 2048 }
  0x93   : > { %s3484_s12 = scalar_lea.hbm %s3928_s9, 1024  ;;  %p3490_p13 = scmp.lt.u32.totalorder %s3928_s9, %s4316_s0 }
  0x94   : > { %p3485_p12 = scmp.ne.s32.totalorder %s3928_s9, %s3484_s12  ;;  %p3491_p0 = scmp.lt.u32.totalorder %s3489_s27, %s3484_s12 }
  0x95   : > { %p3493_p5 = scmp.lt.u32.totalorder %s3484_s12, %s3928_s9 }
  0x96   : > { %p3487_p3 = pnand %p3486_p1, %p3485_p12  ;;  %p3492_p2 = por %p3491_p0, %p3490_p13 }
  0x98   : > { %p3488_p8 = pneg %p3487_p3  ;;  %p3494_p7 = por %p3493_p5, %p3492_p2 }
  0x9a   : > { %p3495_p9 = pnand %p3494_p7, %p3488_p8 }
  0x9c   : > { %3498 = shalt.err (!%p3495_p9)
}
  0x9d   : > { %s3499_s2 = scalar_lea.vmem %s3930_s14, 1024  ;;  %s3668_s29 = smov [#allocation2]  }
  0x9e   : > { %p3500_p12 = scmp.ne.s32.totalorder %s3930_s14, %s3499_s2  ;;  %s3504_s22 = sshll.u32 %s3668_s29, 4  ;;  %s3505_s22 = int_to_ptr.vmem [resolvable:$false] %s3504_s22 }
  0x9f   : > { %s3506_s4 = scalar_lea.vmem %s3505_s22, 2048  ;;  %p3507_p4 = scmp.lt.s32.totalorder %s3930_s14, %s3505_s22 }
  0xa0   : > { %p3502_p3 = pnand %p3500_p12, %p3486_p1  ;;  %p3508_p13 = scmp.lt.s32.totalorder %s3506_s4, %s3499_s2 }
  0xa2   : > { %p3503_p10 = pneg %p3502_p3  ;;  %p3509_p0 = por %p3508_p13, %p3507_p4 }
  0xa4   : > { %p3510_p2 = pnand %p3509_p0, %p3503_p10 }
  0xa6   : > { %3513 = shalt.err (!%p3510_p2)
}
  0xa7   : > { %3175 = dma.hbm_to_vmem [thread:$0]  (!%p3934_p11), %s3928_s9, 1024, %s3930_s14, %s391_s16  }
  0xa8   : > { %s413_s12 = scalar_lea.vmem [#allocation5], %s2465_s30  ;;  %s2466_s10 = sshll.u32 %s3658_s20, 7 }
  0xa9   : > { %s419_s27 = sshll.u32 %s413_s12, 4  ;;  %s3974_s22 = scalar_lea.hbm %s4281_s1, %s2466_s10  ;;  %s3968_s27 = int_to_ptr.vmem [resolvable:$true] %s419_s27 }
  0xaa   : > { %s4318_s4 = sand.u32 1, %s3658_s20   ;;  %s3514_s6 = scalar_lea.hbm %s3974_s22, 512 }
  0xab   : > { %s3978_s0 = scalar_lea.sflag [#allocation6], %s4318_s4  ;;  %p3515_p4 = scmp.ne.s32.totalorder %s3974_s22, %s3514_s6 }
  0xac   : > { %s3519_s9 = scalar_lea.hbm %s4281_s1, 1024  ;;  %p3520_p5 = scmp.lt.u32.totalorder %s3974_s22, %s4281_s1 }
  0xad   : > { %p3517_p10 = pnand %p3515_p4, %p3486_p1  ;;  %p3521_p7 = scmp.lt.u32.totalorder %s3519_s9, %s3514_s6 }
  0xae   : > { %p3523_p12 = scmp.lt.u32.totalorder %s3514_s6, %s3974_s22 }
  0xaf   : > { %p3518_p8 = pneg %p3517_p10  ;;  %p3522_p9 = por %p3521_p7, %p3520_p5 }
  0xb1   : > { %p3524_p3 = por %p3523_p12, %p3522_p9 }
  0xb3   : > { %p3525_p13 = pnand %p3524_p3, %p3518_p8 }
  0xb5   : > { %3528 = shalt.err (!%p3525_p13)
}
  0xb6   : > { %s3529_s12 = scalar_lea.vmem %s3968_s27, 512  ;;  %s3669_s10 = smov [#allocation5]  }
  0xb7   : > { %p3530_p0 = scmp.ne.s32.totalorder %s3968_s27, %s3529_s12  ;;  %s3534_s29 = sshll.u32 %s3669_s10, 4  ;;  %s3535_s29 = int_to_ptr.vmem [resolvable:$false] %s3534_s29 }
  0xb8   : > { %s3536_s2 = scalar_lea.vmem %s3535_s29, 1024  ;;  %p3537_p10 = scmp.lt.s32.totalorder %s3968_s27, %s3535_s29 }
  0xb9   : > { %p3532_p2 = pnand %p3530_p0, %p3486_p1  ;;  %p3538_p5 = scmp.lt.s32.totalorder %s3536_s2, %s3529_s12 }
  0xbb   : > { %p3533_p4 = pneg %p3532_p2  ;;  %p3539_p7 = por %p3538_p5, %p3537_p10 }
  0xbd   : > { %p3540_p9 = pnand %p3539_p7, %p3533_p4 }
  0xbf   : > { %3543 = shalt.err (!%p3540_p9)
}
  0xc0   : > { %s3670_s6 = smov 128   ;;  %s3671_s4 = smov 8  }
  0xc1   : > { %s4319_s30 = smov 256   ;;  %p4320_p1 = scmp.ne.s32.totalorder %s4305_s24, 0 }
  0xc2   : > { %3178 = dma.hbm_to_vmem [thread:$0]  (!%p3934_p11), %s3974_s22, 512, %s3968_s27, %s3978_s0, %s4319_s30, %s3670_s6, %s3671_s4  }
  0xc3   : > { %431 = sbr.rel (%p4320_p1) target bundleno = 1544 (0x608), region = 60  ;;  %s4008_s25 = sand.u32 (!%p4320_p1), 1, %s3650_s18  }
  0xc4   : > { %s2468_s9 = sshll.u32 (!%p4320_p1), %s4008_s25, 6  ;;  %s434_s14 = scalar_lea.sflag (!%p4320_p1), [#allocation3], %s4008_s25 }
  0xc5   : > { %s4012_s16 = scalar_lea.vmem (!%p4320_p1), [#allocation2], %s2468_s9 }
  0xca   : > { %3617 = dma.done.wait (%p3906_p6), %s434_s14, 1024  }
  0xcb   : > { %3619 = vsyncadd (%p3906_p6), %s434_s14, 4294966272  ;;  %s442_s0 = sand.u32 1, %s3759_s23   ;;  %s2469_s24 = sshll.u32 %s4008_s25, 5 }
  0xcc   : > { %s443_s15 = scalar_lea.sflag [#allocation6], %s442_s0  ;;  %s4020_s27 = scalar_lea.vmem [#allocation5], %s2469_s24 }
  0xcd   : > { %3621 = dma.done.wait (%p3906_p6), %s443_s15, 512  }
  0xce   : > { %3623 = vsyncadd (%p3906_p6), %s443_s15, 4294966784  ;;  %p4321_p11 = scmp.eq.s32.totalorder %s3759_s23, 0 }
  0xd0   : > { %3625 = dma.done.wait (%p4321_p11), [#allocation6], 32768   ;;  %p4322_p8 = pmov %p4321_p11 }
  0xd2   : > { %3627 = vsyncadd (%p4322_p8), [#allocation6], 4294934528  ;;  %p4323_p12 = pmov %p4322_p8 }
  0xd3   : > { %p4324_p3 = pmov %p4322_p8 }
  0xd4   : > { %3629 = dma.done.wait (%p4323_p12), [#allocation9], 12288  }
  0xd5   : > { %3631 = vsyncadd (%p4324_p3), [#allocation9], 4294955008  ;;  %p4325_p13 = pmov %p4324_p3 }
  0xd6   : > { %p4326_p0 = pmov %p4324_p3 }
  0xd7   : > { %3633 = dma.done.wait (%p4325_p13), [#allocation12], 32768  }
  0xd8   : > { %3635 = vsyncadd (%p4326_p0), [#allocation12], 4294934528  ;;  %v520_v0 = vld [vmem:[#allocation7 + $0x8] sm:$0xff]  ;;  %v522_v1 = vld [vmem:[#allocation7 + $0x18] sm:$0xff]  ;;  %s2475_s29 = sshll.u32 %s4008_s25, 4  ;;  %s4327_s14 = sld [smem:[#allocation27_spill]] }
  0xd9   : > { %v519_v2 = vld [vmem:[#allocation7] sm:$0xff]  ;;  %v2519_v3 = vpack.c.bf16 %v522_v1, %v520_v0  ;;  %v521_v4 = vld [vmem:[#allocation7 + $0x10] sm:$0xff]  ;;  %v524_v5 = vld [vmem:[#allocation7 + $0x28] sm:$0xff]  ;;  %s4066_s2 = scalar_lea.vmem [#allocation14], %s2475_s29  ;;  %s2518_s24 = sshll.u32 %s3759_s23, 8 }
  0xda   : > { %v526_v6 = vld [vmem:[#allocation7 + $0x38] sm:$0xff]  ;;  %v2521_v7 = vpack.c.bf16 %v521_v4, %v519_v2  ;;  %v523_v9 = vld [vmem:[#allocation7 + $0x20] sm:$0xff]  ;;  %v525_v10 = vld [vmem:[#allocation7 + $0x30] sm:$0xff]  ;;  %s4328_s11 = sld [smem:[#allocation29_spill]]  ;;  %s2292_s12 = sshll.u32 %s4066_s2, 4  ;;  %s2293_s12 = int_to_ptr.vmem [resolvable:$true] %s2292_s12 }
  0xdb   : > { %v2523_v8 = vpack.c.bf16 %v526_v6, %v524_v5  ;;  %v528_v11 = vld [vmem:[#allocation7 + $0x48] sm:$0xff]  ;;  %2520 = vmatprep.subr.bf16.mxu0 %v2519_v3  ;;  %v530_v12 = vld [vmem:[#allocation7 + $0x58] sm:$0xff]  ;;  %v2525_v13 = vpack.c.bf16 %v525_v10, %v523_v9  ;;  %v527_v15 = vld [vmem:[#allocation7 + $0x40] sm:$0xff]  ;;  %s2262_s10 = scalar_lea.sflag [#allocation15], %s4008_s25  ;;  %s3544_s29 = scalar_lea.vmem %s2293_s12, 256 }
  0xdc   : > { %2522 = vmatpush1.bf16.msra.mxu0 %v2521_v7  ;;  %v2527_v14 = vpack.c.bf16 %v530_v12, %v528_v11  ;;  %v529_v16 = vld [vmem:[#allocation7 + $0x50] sm:$0xff]  ;;  %v532_v17 = vld [vmem:[#allocation7 + $0x68] sm:$0xff]  ;;  %v534_v18 = vld [vmem:[#allocation7 + $0x78] sm:$0xff]  ;;  %p3545_p6 = scmp.ne.s32.totalorder %s2293_s12, %s3544_s29  ;;  %p4329_p2 = scmp.ne.s32.totalorder %s4314_s28, 0 }
  0xdd   : > { %2524 = vmatprep.subr.bf16.mxu0 %v2523_v8  ;;  %v2529_v19 = vpack.c.bf16 %v529_v16, %v527_v15  ;;  %v2531_v20 = vpack.c.bf16 %v534_v18, %v532_v17  ;;  %v531_v21 = vld [vmem:[#allocation7 + $0x60] sm:$0xff]  ;;  %v533_v22 = vld [vmem:[#allocation7 + $0x70] sm:$0xff]  ;;  %v536_v23 = vld [vmem:[#allocation7 + $0x88] sm:$0xff]  ;;  %s3673_s6 = smov [#allocation14]  }
  0xde   : > { %v538_v24 = vld [vmem:[#allocation7 + $0x98] sm:$0xff]  ;;  %v2533_v25 = vpack.c.bf16 %v533_v22, %v531_v21  ;;  %v535_v27 = vld [vmem:[#allocation7 + $0x80] sm:$0xff]  ;;  %v537_v28 = vld [vmem:[#allocation7 + $0x90] sm:$0xff]  ;;  %p3546_p4 = pnand %p3545_p6, %p4329_p2  ;;  %s3548_s4 = sshll.u32 %s3673_s6, 4  ;;  %s3549_s4 = int_to_ptr.vmem [resolvable:$false] %s3548_s4 }
  0xdf   : > { %v2535_v26 = vpack.c.bf16 %v538_v24, %v536_v23  ;;  %v540_v29 = vld [vmem:[#allocation7 + $0xa8] sm:$0xff]  ;;  %v542_v30 = vld [vmem:[#allocation7 + $0xb8] sm:$0xff]  ;;  %v2537_v31 = vpack.c.bf16 %v537_v28, %v535_v27  ;;  %v539_v33 = vld [vmem:[#allocation7 + $0xa0] sm:$0xff]  ;;  %s3550_s30 = scalar_lea.vmem %s3549_s4, 512  ;;  %p3551_p5 = scmp.lt.s32.totalorder %s2293_s12, %s3549_s4 }
  0xe0   : > { %2526 = vmatpush1.bf16.msra.mxu0 %v2525_v13  ;;  %v2539_v32 = vpack.c.bf16 %v542_v30, %v540_v29  ;;  %v541_v34 = vld [vmem:[#allocation7 + $0xb0] sm:$0xff]  ;;  %v544_v35 = vld [vmem:[#allocation7 + $0xc8] sm:$0xff]  ;;  %v546_v36 = vld [vmem:[#allocation7 + $0xd8] sm:$0xff]  ;;  %s4181_s22 = scalar_lea.hbm %s4328_s11, %s2518_s24  ;;  %p3547_p10 = pneg %p3546_p4 }
  0xe1   : > { %2528 = vmatprep.subr.bf16.mxu0 %v2527_v14  ;;  %v2541_v37 = vpack.c.bf16 %v541_v34, %v539_v33  ;;  %v2543_v38 = vpack.c.bf16 %v546_v36, %v544_v35  ;;  %v543_v39 = vld [vmem:[#allocation7 + $0xc0] sm:$0xff]  ;;  %v545_v40 = vld [vmem:[#allocation7 + $0xd0] sm:$0xff]  ;;  %v512_v41 = vld [vmem:[%s4012_s16 + $0x8] sm:$0xff]  ;;  %p3552_p7 = scmp.lt.s32.totalorder %s3550_s30, %s3544_s29 }
  0xe2   : > { %v548_v42 = vld [vmem:[#allocation7 + $0xe8] sm:$0xff]  ;;  %v550_v43 = vld [vmem:[#allocation7 + $0xf8] sm:$0xff]  ;;  %851 = vmatprep.mubr.f32.mxu0 %v512_v41  ;;  %v2545_v44 = vpack.c.bf16 %v545_v40, %v543_v39  ;;  %v547_v46 = vld [vmem:[#allocation7 + $0xe0] sm:$0xff] }
  0xe3   : > { %v2547_v45 = vpack.c.bf16 %v550_v43, %v548_v42  ;;  %v549_v47 = vld [vmem:[#allocation7 + $0xf0] sm:$0xff]  ;;  %v552_v48 = vld [vmem:[#allocation7 + $0x108] sm:$0xff]  ;;  %v554_v49 = vld [vmem:[#allocation7 + $0x118] sm:$0xff]  ;;  %p3553_p9 = por %p3552_p7, %p3551_p5 }
  0xe4   : > { %2530 = vmatpush1.bf16.msra.mxu0 %v2529_v19  ;;  %v2549_v50 = vpack.c.bf16 %v549_v47, %v547_v46  ;;  %v2551_v51 = vpack.c.bf16 %v554_v49, %v552_v48  ;;  %v551_v52 = vld [vmem:[#allocation7 + $0x100] sm:$0xff]  ;;  %v553_v53 = vld [vmem:[#allocation7 + $0x110] sm:$0xff]  ;;  %v556_v54 = vld [vmem:[#allocation7 + $0x128] sm:$0xff] }
  0xe5   : > { %2532 = vmatprep.subr.bf16.mxu0 %v2531_v20  ;;  %v558_v55 = vld [vmem:[#allocation7 + $0x138] sm:$0xff]  ;;  %v2553_v56 = vpack.c.bf16 %v553_v53, %v551_v52  ;;  %v555_v58 = vld [vmem:[#allocation7 + $0x120] sm:$0xff]  ;;  %v557_v59 = vld [vmem:[#allocation7 + $0x130] sm:$0xff]  ;;  %p3554_p1 = pnand %p3553_p9, %p3547_p10 }
  0xe6   : > { %v2555_v57 = vpack.c.bf16 %v558_v55, %v556_v54  ;;  %v560_v60 = vld [vmem:[#allocation7 + $0x148] sm:$0xff]  ;;  %v562_v61 = vld [vmem:[#allocation7 + $0x158] sm:$0xff]  ;;  %v2557_v62 = vpack.c.bf16 %v557_v59, %v555_v58  ;;  %v559_v0 = vld [vmem:[#allocation7 + $0x140] sm:$0xff] }
  0xe7   : > { %v2559_v63 = vpack.c.bf16 %v562_v61, %v560_v60  ;;  %v561_v1 = vld [vmem:[#allocation7 + $0x150] sm:$0xff]  ;;  %v564_v2 = vld [vmem:[#allocation7 + $0x168] sm:$0xff]  ;;  %v566_v3 = vld [vmem:[#allocation7 + $0x178] sm:$0xff] }
  0xe8   : > { %2534 = vmatpush1.bf16.msra.mxu0 %v2533_v25  ;;  %v2561_v4 = vpack.c.bf16 %v561_v1, %v559_v0  ;;  %v2563_v5 = vpack.c.bf16 %v566_v3, %v564_v2  ;;  %v563_v6 = vld [vmem:[#allocation7 + $0x160] sm:$0xff]  ;;  %v565_v7 = vld [vmem:[#allocation7 + $0x170] sm:$0xff]  ;;  %v568_v8 = vld [vmem:[#allocation7 + $0x188] sm:$0xff] }
  0xe9   : > { %2536 = vmatprep.subr.bf16.mxu0 %v2535_v26  ;;  %v570_v9 = vld [vmem:[#allocation7 + $0x198] sm:$0xff]  ;;  %v2565_v10 = vpack.c.bf16 %v565_v7, %v563_v6  ;;  %v567_v12 = vld [vmem:[#allocation7 + $0x180] sm:$0xff]  ;;  %v569_v13 = vld [vmem:[#allocation7 + $0x190] sm:$0xff] }
  0xea   : > { %v2567_v11 = vpack.c.bf16 %v570_v9, %v568_v8  ;;  %v572_v14 = vld [vmem:[#allocation7 + $0x1a8] sm:$0xff]  ;;  %v574_v15 = vld [vmem:[#allocation7 + $0x1b8] sm:$0xff]  ;;  %v2569_v16 = vpack.c.bf16 %v569_v13, %v567_v12  ;;  %v571_v18 = vld [vmem:[#allocation7 + $0x1a0] sm:$0xff] }
  0xeb   : > { %v2571_v17 = vpack.c.bf16 %v574_v15, %v572_v14  ;;  %v573_v19 = vld [vmem:[#allocation7 + $0x1b0] sm:$0xff]  ;;  %v576_v20 = vld [vmem:[#allocation7 + $0x1c8] sm:$0xff]  ;;  %v578_v21 = vld [vmem:[#allocation7 + $0x1d8] sm:$0xff] }
  0xec   : > { %2538 = vmatpush1.bf16.msra.mxu0 %v2537_v31  ;;  %v2573_v22 = vpack.c.bf16 %v573_v19, %v571_v18  ;;  %v2575_v23 = vpack.c.bf16 %v578_v21, %v576_v20  ;;  %v575_v24 = vld [vmem:[#allocation7 + $0x1c0] sm:$0xff]  ;;  %v577_v25 = vld [vmem:[#allocation7 + $0x1d0] sm:$0xff]  ;;  %v580_v26 = vld [vmem:[#allocation7 + $0x1e8] sm:$0xff] }
  0xed   : > { %2540 = vmatprep.subr.bf16.mxu0 %v2539_v32  ;;  %v582_v27 = vld [vmem:[#allocation7 + $0x1f8] sm:$0xff]  ;;  %v2577_v28 = vpack.c.bf16 %v577_v25, %v575_v24  ;;  %v579_v30 = vld [vmem:[#allocation7 + $0x1e0] sm:$0xff]  ;;  %v581_v31 = vld [vmem:[#allocation7 + $0x1f0] sm:$0xff] }
  0xee   : > { %v2579_v29 = vpack.c.bf16 %v582_v27, %v580_v26  ;;  %v584_v32 = vld [vmem:[#allocation7 + $0x208] sm:$0xff]  ;;  %v586_v33 = vld [vmem:[#allocation7 + $0x218] sm:$0xff]  ;;  %v2581_v34 = vpack.c.bf16 %v581_v31, %v579_v30  ;;  %v583_v36 = vld [vmem:[#allocation7 + $0x200] sm:$0xff] }
  0xef   : > { %v2583_v35 = vpack.c.bf16 %v586_v33, %v584_v32  ;;  %v590_v39 = vld [vmem:[#allocation7 + $0x238] sm:$0xff]  ;;  %v511_v40 = vld [vmem:[%s4012_s16] sm:$0xff]  ;;  %v592_v46 = vld [vmem:[#allocation7 + $0x248] sm:$0xff] }
  0xf0   : > { %2542 = vmatpush1.bf16.msra.mxu0 %v2541_v37  ;;  %v585_v37 = vld [vmem:[#allocation7 + $0x210] sm:$0xff]  ;;  %v587_v43 = vld [vmem:[#allocation7 + $0x220] sm:$0xff]  ;;  %v594_v47 = vld [vmem:[#allocation7 + $0x258] sm:$0xff] }
  0xf1   : > { %2544 = vmatprep.subr.bf16.mxu0 %v2543_v38  ;;  %v588_v38 = vld [vmem:[#allocation7 + $0x228] sm:$0xff]  ;;  %v2585_v41 = vpack.c.bf16 %v585_v37, %v583_v36  ;;  %v2591_v49 = vpack.c.bf16 %v594_v47, %v592_v46  ;;  %v598_v53 = vld [vmem:[#allocation7 + $0x278] sm:$0xff]  ;;  %v631_v46 = vld [vmem:[#allocation7 + $0x380] sm:$0xff] }
  0xf2   : > { %v2587_v42 = vpack.c.bf16 %v590_v39, %v588_v38  ;;  %v596_v52 = vld [vmem:[#allocation7 + $0x268] sm:$0xff]  ;;  %v602_v59 = vld [vmem:[#allocation7 + $0x298] sm:$0xff]  ;;  %v633_v47 = vld [vmem:[#allocation7 + $0x390] sm:$0xff] }
  0xf3   : > { %v2595_v55 = vpack.c.bf16 %v598_v53, %v596_v52  ;;  %v600_v58 = vld [vmem:[#allocation7 + $0x288] sm:$0xff]  ;;  %v606_v1 = vld [vmem:[#allocation7 + $0x2b8] sm:$0xff]  ;;  %v635_v52 = vld [vmem:[#allocation7 + $0x3a0] sm:$0xff] }
  0xf4   : > { %2546 = vmatpush1.bf16.msra.mxu0 %v2545_v44  ;;  %v589_v44 = vld [vmem:[#allocation7 + $0x230] sm:$0xff]  ;;  %v2599_v61 = vpack.c.bf16 %v602_v59, %v600_v58  ;;  %v604_v0 = vld [vmem:[#allocation7 + $0x2a8] sm:$0xff]  ;;  %v610_v7 = vld [vmem:[#allocation7 + $0x2d8] sm:$0xff] }
  0xf5   : > { %2548 = vmatprep.subr.bf16.mxu0 %v2547_v45  ;;  %v514_v45 = vld [vmem:[%s4012_s16 + $0x18] sm:$0xff]  ;;  %v2589_v48 = vpack.c.bf16 %v589_v44, %v587_v43  ;;  %v2603_v3 = vpack.c.bf16 %v606_v1, %v604_v0  ;;  %v608_v6 = vld [vmem:[#allocation7 + $0x2c8] sm:$0xff]  ;;  %v637_v53 = vld [vmem:[#allocation7 + $0x3b0] sm:$0xff] }
  0xf6   : > { %v2607_v9 = vpack.c.bf16 %v610_v7, %v608_v6  ;;  %v612_v12 = vld [vmem:[#allocation7 + $0x2e8] sm:$0xff]  ;;  %v614_v13 = vld [vmem:[#allocation7 + $0x2f8] sm:$0xff]  ;;  %v639_v58 = vld [vmem:[#allocation7 + $0x3c0] sm:$0xff] }
  0xf7   : > { %v2611_v15 = vpack.c.bf16 %v614_v13, %v612_v12  ;;  %v616_v18 = vld [vmem:[#allocation7 + $0x308] sm:$0xff]  ;;  %v618_v19 = vld [vmem:[#allocation7 + $0x318] sm:$0xff]  ;;  %v641_v59 = vld [vmem:[#allocation7 + $0x3d0] sm:$0xff] }
  0xf8   : > { %2550 = vmatpush1.bf16.msra.mxu0 %v2549_v50  ;;  %v591_v50 = vld [vmem:[#allocation7 + $0x240] sm:$0xff]  ;;  %v2615_v21 = vpack.c.bf16 %v618_v19, %v616_v18  ;;  %v620_v24 = vld [vmem:[#allocation7 + $0x328] sm:$0xff]  ;;  %v622_v25 = vld [vmem:[#allocation7 + $0x338] sm:$0xff] }
  0xf9   : > { %2552 = vmatprep.subr.bf16.mxu0 %v2551_v51  ;;  %v593_v51 = vld [vmem:[#allocation7 + $0x250] sm:$0xff]  ;;  %v2619_v27 = vpack.c.bf16 %v622_v25, %v620_v24  ;;  %v624_v30 = vld [vmem:[#allocation7 + $0x348] sm:$0xff]  ;;  %v626_v31 = vld [vmem:[#allocation7 + $0x358] sm:$0xff] }
  0xfa   : > { %v2593_v54 = vpack.c.bf16 %v593_v51, %v591_v50  ;;  %v2623_v33 = vpack.c.bf16 %v626_v31, %v624_v30  ;;  %v628_v36 = vld [vmem:[#allocation7 + $0x368] sm:$0xff]  ;;  %v630_v37 = vld [vmem:[#allocation7 + $0x378] sm:$0xff]  ;;  %v2633_v50 = vpack.c.bf16 %v633_v47, %v631_v46  ;;  %v643_v0 = vld [vmem:[#allocation7 + $0x3e0] sm:$0xff] }
  0xfb   : > { %v2627_v39 = vpack.c.bf16 %v630_v37, %v628_v36  ;;  %v634_v43 = vld [vmem:[#allocation7 + $0x398] sm:$0xff]  ;;  %v645_v1 = vld [vmem:[#allocation7 + $0x3f0] sm:$0xff]  ;;  %v647_v6 = vld [vmem:[#allocation7 + $0x400] sm:$0xff] }
  0xfc   : > { %2554 = vmatpush1.bf16.msra.mxu0 %v2553_v56  ;;  %v595_v56 = vld [vmem:[#allocation7 + $0x260] sm:$0xff]  ;;  %v649_v7 = vld [vmem:[#allocation7 + $0x410] sm:$0xff]  ;;  %v1084_v36 = vld [vmem:[#allocation8 + $0x58] sm:$0xff] }
  0xfd   : > { %2556 = vmatprep.subr.bf16.mxu0 %v2555_v57  ;;  %v597_v57 = vld [vmem:[#allocation7 + $0x270] sm:$0xff]  ;;  %v651_v13 = vld [vmem:[#allocation7 + $0x420] sm:$0xff]  ;;  %v1088_v46 = vld [vmem:[#allocation8 + $0x78] sm:$0xff] }
  0xfe   : > { %v2597_v60 = vpack.c.bf16 %v597_v57, %v595_v56  ;;  %v2637_v56 = vpack.c.bf16 %v637_v53, %v635_v52  ;;  %v655_v18 = vld [vmem:[#allocation7 + $0x440] sm:$0xff]  ;;  %v657_v19 = vld [vmem:[#allocation7 + $0x450] sm:$0xff]  ;;  %v664_v47 = vld [vmem:[#allocation7 + $0x488] sm:$0xff] }
  0xff   : > { %v1075_v25 = vld [vmem:[#allocation8 + $0x10] sm:$0xff]  ;;  %v1077_v31 = vld [vmem:[#allocation8 + $0x20] sm:$0xff] }
 0x100   : > { %2558 = vmatpush1.bf16.msra.mxu0 %v2557_v62  ;;  %v599_v62 = vld [vmem:[#allocation7 + $0x280] sm:$0xff] }
 0x101   : > { %2560 = vmatprep.subr.bf16.mxu0 %v2559_v63  ;;  %v601_v63 = vld [vmem:[#allocation7 + $0x290] sm:$0xff]  ;;  %v1085_v53 = vld [vmem:[#allocation8 + $0x60] sm:$0xff] }
 0x102   : > { %v2601_v2 = vpack.c.bf16 %v601_v63, %v599_v62  ;;  %v2641_v62 = vpack.c.bf16 %v641_v59, %v639_v58  ;;  %v1092_v58 = vld [vmem:[#allocation8 + $0x98] sm:$0xff]  ;;  %v668_v59 = vld [vmem:[#allocation7 + $0x4a8] sm:$0xff] }
 0x104   : > { %2562 = vmatpush1.bf16.msra.mxu0 %v2561_v4  ;;  %v603_v4 = vld [vmem:[#allocation7 + $0x2a0] sm:$0xff] }
 0x105   : > { %2564 = vmatprep.subr.bf16.mxu0 %v2563_v5  ;;  %v605_v5 = vld [vmem:[#allocation7 + $0x2b0] sm:$0xff] }
 0x106   : > { %v2605_v8 = vpack.c.bf16 %v605_v5, %v603_v4  ;;  %v2645_v4 = vpack.c.bf16 %v645_v1, %v643_v0  ;;  %v1089_v1 = vld [vmem:[#allocation8 + $0x80] sm:$0xff] }
 0x108   : > { %2566 = vmatpush1.bf16.msra.mxu0 %v2565_v10  ;;  %v607_v10 = vld [vmem:[#allocation7 + $0x2c0] sm:$0xff] }
 0x109   : > { %2568 = vmatprep.subr.bf16.mxu0 %v2567_v11  ;;  %v609_v11 = vld [vmem:[#allocation7 + $0x2d0] sm:$0xff] }
 0x10a   : > { %v2609_v14 = vpack.c.bf16 %v609_v11, %v607_v10  ;;  %v513_v10 = vld [vmem:[%s4012_s16 + $0x10] sm:$0xff]  ;;  %v2649_v11 = vpack.c.bf16 %v649_v7, %v647_v6  ;;  %v1096_v6 = vld [vmem:[#allocation8 + $0xb8] sm:$0xff]  ;;  %v672_v7 = vld [vmem:[#allocation7 + $0x4c8] sm:$0xff] }
 0x10c   : > { %2570 = vmatpush1.bf16.msra.mxu0 %v2569_v16  ;;  %v611_v16 = vld [vmem:[#allocation7 + $0x2e0] sm:$0xff] }
 0x10d   : > { %2572 = vmatprep.subr.bf16.mxu0 %v2571_v17  ;;  %v613_v17 = vld [vmem:[#allocation7 + $0x2f0] sm:$0xff] }
 0x10e   : > { %v2613_v20 = vpack.c.bf16 %v613_v17, %v611_v16  ;;  %v656_v16 = vld [vmem:[#allocation7 + $0x448] sm:$0xff]  ;;  %v658_v17 = vld [vmem:[#allocation7 + $0x458] sm:$0xff] }
 0x110   : > { %2574 = vmatpush1.bf16.msra.mxu0 %v2573_v22  ;;  %v615_v22 = vld [vmem:[#allocation7 + $0x300] sm:$0xff] }
 0x111   : > { %2576 = vmatprep.subr.bf16.mxu0 %v2575_v23  ;;  %v617_v23 = vld [vmem:[#allocation7 + $0x310] sm:$0xff] }
 0x112   : > { %v2617_v26 = vpack.c.bf16 %v617_v23, %v615_v22  ;;  %v1073_v22 = vld [vmem:[#allocation8] sm:$0xff] }
 0x114   : > { %2578 = vmatpush1.bf16.msra.mxu0 %v2577_v28  ;;  %v619_v28 = vld [vmem:[#allocation7 + $0x320] sm:$0xff] }
 0x115   : > { %2580 = vmatprep.subr.bf16.mxu0 %v2579_v29  ;;  %v621_v29 = vld [vmem:[#allocation7 + $0x330] sm:$0xff] }
 0x116   : > { %v2621_v32 = vpack.c.bf16 %v621_v29, %v619_v28  ;;  %v2655_v28 = vpack.c.bf16 %v658_v17, %v656_v16  ;;  %v2777_v29 = vpack.c.bf16 %v1075_v25, %v1073_v22  ;;  %v673_v16 = vld [vmem:[#allocation7 + $0x4d0] sm:$0xff]  ;;  %v1098_v17 = vld [vmem:[#allocation8 + $0xc8] sm:$0xff]  ;;  %v1097_v25 = vld [vmem:[#allocation8 + $0xc0] sm:$0xff] }
 0x118   : > { %2582 = vmatpush1.bf16.msra.mxu0 %v2581_v34  ;;  %v623_v34 = vld [vmem:[#allocation7 + $0x340] sm:$0xff] }
 0x119   : > { %2584 = vmatprep.subr.bf16.mxu0 %v2583_v35  ;;  %v625_v35 = vld [vmem:[#allocation7 + $0x350] sm:$0xff] }
 0x11a   : > { %v2625_v38 = vpack.c.bf16 %v625_v35, %v623_v34  ;;  %v660_v34 = vld [vmem:[#allocation7 + $0x468] sm:$0xff]  ;;  %v662_v35 = vld [vmem:[#allocation7 + $0x478] sm:$0xff] }
 0x11b   : > { %852 = vmatmul.mubr.f32.vlgmr.msra.gmra.mrb[0].mxu0 %v511_v40  ;;  %v627_v40 = vld [vmem:[#allocation7 + $0x360] sm:$0xff] }
 0x11c   : > { %2586 = vmatpush1.bf16.msra.mxu0 %v2585_v41  ;;  %922 = vmatprep.mubr.f32.mxu0 %v514_v45  ;;  %v629_v41 = vld [vmem:[#allocation7 + $0x370] sm:$0xff] }
 0x11d   : > { %2588 = vmatprep.subr.bf16.mxu0 %v2587_v42  ;;  %v632_v42 = vld [vmem:[#allocation7 + $0x388] sm:$0xff]  ;;  %v2629_v44 = vpack.c.bf16 %v629_v41, %v627_v40  ;;  %v1081_v41 = vld [vmem:[#allocation8 + $0x40] sm:$0xff] }
 0x11e   : > { %v2631_v45 = vpack.c.bf16 %v634_v43, %v632_v42  ;;  %v1083_v42 = vld [vmem:[#allocation8 + $0x50] sm:$0xff]  ;;  %v2659_v43 = vpack.c.bf16 %v662_v35, %v660_v34  ;;  %v679_v35 = vld [vmem:[#allocation7 + $0x500] sm:$0xff] }
 0x120   : > { %2590 = vmatpush1.bf16.msra.mxu0 %v2589_v48  ;;  %v636_v48 = vld [vmem:[#allocation7 + $0x3a8] sm:$0xff] }
 0x121   : > { %2592 = vmatprep.subr.bf16.mxu0 %v2591_v49  ;;  %v638_v49 = vld [vmem:[#allocation7 + $0x3b8] sm:$0xff] }
 0x122   : > { %v2635_v51 = vpack.c.bf16 %v638_v49, %v636_v48  ;;  %v666_v48 = vld [vmem:[#allocation7 + $0x498] sm:$0xff]  ;;  %v2785_v49 = vpack.c.bf16 %v1083_v42, %v1081_v41  ;;  %v1106_v41 = vld [vmem:[#allocation8 + $0x108] sm:$0xff] }
 0x123   : > { %v1108_v42 = vld [vmem:[#allocation8 + $0x118] sm:$0xff] }
 0x124   : > { %2594 = vmatpush1.bf16.msra.mxu0 %v2593_v54  ;;  %v640_v54 = vld [vmem:[#allocation7 + $0x3c8] sm:$0xff] }
 0x125   : > { %2596 = vmatprep.subr.bf16.mxu0 %v2595_v55  ;;  %v642_v55 = vld [vmem:[#allocation7 + $0x3d8] sm:$0xff] }
 0x126   : > { %v2639_v57 = vpack.c.bf16 %v642_v55, %v640_v54  ;;  %v1087_v54 = vld [vmem:[#allocation8 + $0x70] sm:$0xff]  ;;  %v2663_v55 = vpack.c.bf16 %v666_v48, %v664_v47  ;;  %v683_v47 = vld [vmem:[#allocation7 + $0x520] sm:$0xff]  ;;  %v2807_v48 = vpack.c.bf16 %v1108_v42, %v1106_v41 }
 0x128   : > { %2598 = vmatpush1.bf16.msra.mxu0 %v2597_v60  ;;  %v644_v60 = vld [vmem:[#allocation7 + $0x3e8] sm:$0xff] }
 0x129   : > { %2600 = vmatprep.subr.bf16.mxu0 %v2599_v61  ;;  %v646_v61 = vld [vmem:[#allocation7 + $0x3f8] sm:$0xff] }
 0x12a   : > { %v2643_v63 = vpack.c.bf16 %v646_v61, %v644_v60  ;;  %v670_v60 = vld [vmem:[#allocation7 + $0x4b8] sm:$0xff]  ;;  %v2789_v61 = vpack.c.bf16 %v1087_v54, %v1085_v53  ;;  %v1110_v53 = vld [vmem:[#allocation8 + $0x128] sm:$0xff] }
 0x12b   : > { %v1112_v54 = vld [vmem:[#allocation8 + $0x138] sm:$0xff] }
 0x12c   : > { %2602 = vmatpush1.bf16.msra.mxu0 %v2601_v2  ;;  %v648_v2 = vld [vmem:[#allocation7 + $0x408] sm:$0xff] }
 0x12d   : > { %2604 = vmatprep.subr.bf16.mxu0 %v2603_v3  ;;  %v650_v3 = vld [vmem:[#allocation7 + $0x418] sm:$0xff] }
 0x12e   : > { %v2647_v5 = vpack.c.bf16 %v650_v3, %v648_v2  ;;  %v1091_v2 = vld [vmem:[#allocation8 + $0x90] sm:$0xff]  ;;  %v2667_v3 = vpack.c.bf16 %v670_v60, %v668_v59  ;;  %v687_v59 = vld [vmem:[#allocation7 + $0x540] sm:$0xff]  ;;  %v2811_v60 = vpack.c.bf16 %v1112_v54, %v1110_v53 }
 0x130   : > { %2606 = vmatpush1.bf16.msra.mxu0 %v2605_v8  ;;  %v652_v8 = vld [vmem:[#allocation7 + $0x428] sm:$0xff] }
 0x131   : > { %2608 = vmatprep.subr.bf16.mxu0 %v2607_v9  ;;  %v654_v9 = vld [vmem:[#allocation7 + $0x438] sm:$0xff] }
 0x132   : > { %v2651_v12 = vpack.c.bf16 %v654_v9, %v652_v8  ;;  %v674_v8 = vld [vmem:[#allocation7 + $0x4d8] sm:$0xff]  ;;  %v2793_v9 = vpack.c.bf16 %v1091_v2, %v1089_v1  ;;  %v1114_v1 = vld [vmem:[#allocation8 + $0x148] sm:$0xff] }
 0x133   : > { %v1116_v2 = vld [vmem:[#allocation8 + $0x158] sm:$0xff] }
 0x134   : > { %2610 = vmatpush1.bf16.msra.mxu0 %v2609_v14  ;;  %v653_v14 = vld [vmem:[#allocation7 + $0x430] sm:$0xff] }
 0x135   : > { %2612 = vmatprep.subr.bf16.mxu0 %v2611_v15  ;;  %v516_v15 = vld [vmem:[%s4012_s16 + $0x28] sm:$0xff]  ;;  %v2653_v23 = vpack.c.bf16 %v653_v14, %v651_v13  ;;  %v1093_v13 = vld [vmem:[#allocation8 + $0xa0] sm:$0xff]  ;;  %v1095_v14 = vld [vmem:[#allocation8 + $0xb0] sm:$0xff] }
 0x138   : > { %2614 = vmatpush1.bf16.msra.mxu0 %v2613_v20  ;;  %v1074_v20 = vld [vmem:[#allocation8 + $0x8] sm:$0xff] }
 0x139   : > { %2616 = vmatprep.subr.bf16.mxu0 %v2615_v21  ;;  %v1076_v21 = vld [vmem:[#allocation8 + $0x18] sm:$0xff] }
 0x13a   : > { %v2775_v24 = vpack.c.bf16 %v1076_v21, %v1074_v20  ;;  %v678_v20 = vld [vmem:[#allocation7 + $0x4f8] sm:$0xff]  ;;  %v2797_v21 = vpack.c.bf16 %v1095_v14, %v1093_v13  ;;  %v1118_v13 = vld [vmem:[#allocation8 + $0x168] sm:$0xff] }
 0x13b   : > { %v1120_v14 = vld [vmem:[#allocation8 + $0x178] sm:$0xff] }
 0x13c   : > { %2618 = vmatpush1.bf16.msra.mxu0 %v2617_v26  ;;  %v1078_v26 = vld [vmem:[#allocation8 + $0x28] sm:$0xff]  ;;  %2776 = vmatprep.subr.bf16.mxu1 %v2775_v24 }
 0x13d   : > { %2620 = vmatprep.subr.bf16.mxu0 %v2619_v27  ;;  %v1080_v27 = vld [vmem:[#allocation8 + $0x38] sm:$0xff]  ;;  %2778 = vmatpush1.bf16.msra.mxu1 %v2777_v29  ;;  %v1102_v29 = vld [vmem:[#allocation8 + $0xe8] sm:$0xff] }
 0x13e   : > { %v2779_v30 = vpack.c.bf16 %v1080_v27, %v1078_v26  ;;  %v1099_v26 = vld [vmem:[#allocation8 + $0xd0] sm:$0xff] }
 0x140   : > { %2622 = vmatpush1.bf16.msra.mxu0 %v2621_v32  ;;  %v1079_v32 = vld [vmem:[#allocation8 + $0x30] sm:$0xff]  ;;  %2780 = vmatprep.subr.bf16.mxu1 %v2779_v30  ;;  %v1104_v30 = vld [vmem:[#allocation8 + $0xf8] sm:$0xff] }
 0x141   : > { %2624 = vmatprep.subr.bf16.mxu0 %v2623_v33  ;;  %v1082_v33 = vld [vmem:[#allocation8 + $0x48] sm:$0xff]  ;;  %v2781_v37 = vpack.c.bf16 %v1079_v32, %v1077_v31  ;;  %v682_v32 = vld [vmem:[#allocation7 + $0x518] sm:$0xff] }
 0x142   : > { %v2783_v40 = vpack.c.bf16 %v1084_v36, %v1082_v33  ;;  %v680_v31 = vld [vmem:[#allocation7 + $0x508] sm:$0xff]  ;;  %v2801_v33 = vpack.c.bf16 %v1099_v26, %v1097_v25  ;;  %v2803_v36 = vpack.c.bf16 %v1104_v30, %v1102_v29  ;;  %v1124_v26 = vld [vmem:[#allocation8 + $0x198] sm:$0xff] }
 0x143   : > { %2782 = vmatpush1.bf16.msra.mxu1 %v2781_v37  ;;  %v1101_v37 = vld [vmem:[#allocation8 + $0xe0] sm:$0xff]  ;;  %v1122_v25 = vld [vmem:[#allocation8 + $0x188] sm:$0xff] }
 0x144   : > { %2626 = vmatpush1.bf16.msra.mxu0 %v2625_v38  ;;  %v2657_v38 = vpack.c.bf16 %v657_v19, %v655_v18  ;;  %2784 = vmatprep.subr.bf16.mxu1 %v2783_v40  ;;  %v1100_v18 = vld [vmem:[#allocation8 + $0xd8] sm:$0xff]  ;;  %v676_v19 = vld [vmem:[#allocation7 + $0x4e8] sm:$0xff]  ;;  %v681_v40 = vld [vmem:[#allocation7 + $0x510] sm:$0xff] }
 0x145   : > { %2628 = vmatprep.subr.bf16.mxu0 %v2627_v39  ;;  %v659_v39 = vld [vmem:[#allocation7 + $0x460] sm:$0xff]  ;;  %v2799_v24 = vpack.c.bf16 %v1100_v18, %v1098_v17  ;;  %v2675_v27 = vpack.c.bf16 %v678_v20, %v676_v19  ;;  %v2819_v20 = vpack.c.bf16 %v1120_v14, %v1118_v13  ;;  %v721_v14 = vld [vmem:[#allocation7 + $0x650] sm:$0xff] }
 0x146   : > { %v695_v19 = vld [vmem:[#allocation7 + $0x580] sm:$0xff] }
 0x147   : > { %2786 = vmatpush1.bf16.msra.mxu1 %v2785_v49  ;;  %v1105_v49 = vld [vmem:[#allocation8 + $0x100] sm:$0xff] }
 0x148   : > { %2630 = vmatpush1.bf16.msra.mxu0 %v2629_v44  ;;  %v661_v44 = vld [vmem:[#allocation7 + $0x470] sm:$0xff]  ;;  %v719_v13 = vld [vmem:[#allocation7 + $0x640] sm:$0xff] }
 0x149   : > { %2632 = vmatprep.subr.bf16.mxu0 %v2631_v45  ;;  %v1086_v45 = vld [vmem:[#allocation8 + $0x68] sm:$0xff] }
 0x14a   : > { %v2787_v52 = vpack.c.bf16 %v1088_v46, %v1086_v45  ;;  %v2681_v46 = vpack.c.bf16 %v681_v40, %v679_v35  ;;  %v706_v40 = vld [vmem:[#allocation7 + $0x5d8] sm:$0xff] }
 0x14c   : > { %2634 = vmatpush1.bf16.msra.mxu0 %v2633_v50  ;;  %v2661_v50 = vpack.c.bf16 %v661_v44, %v659_v39  ;;  %2788 = vmatprep.subr.bf16.mxu1 %v2787_v52  ;;  %v2679_v39 = vpack.c.bf16 %v682_v32, %v680_v31  ;;  %v686_v44 = vld [vmem:[#allocation7 + $0x538] sm:$0xff]  ;;  %v685_v52 = vld [vmem:[#allocation7 + $0x530] sm:$0xff]  ;;  %v699_v31 = vld [vmem:[#allocation7 + $0x5a0] sm:$0xff]  ;;  %v2823_v32 = vpack.c.bf16 %v1124_v26, %v1122_v25 }
 0x14d   : > { %2636 = vmatprep.subr.bf16.mxu0 %v2635_v51  ;;  %v663_v51 = vld [vmem:[#allocation7 + $0x480] sm:$0xff]  ;;  %2790 = vmatpush1.bf16.msra.mxu1 %v2789_v61  ;;  %v729_v26 = vld [vmem:[#allocation7 + $0x690] sm:$0xff] }
 0x14e   : > { %v1109_v61 = vld [vmem:[#allocation8 + $0x120] sm:$0xff] }
 0x14f   : > { %v727_v25 = vld [vmem:[#allocation7 + $0x680] sm:$0xff] }
 0x150   : > { %2638 = vmatpush1.bf16.msra.mxu0 %v2637_v56  ;;  %v665_v56 = vld [vmem:[#allocation7 + $0x490] sm:$0xff] }
 0x151   : > { %2640 = vmatprep.subr.bf16.mxu0 %v2639_v57  ;;  %v1090_v57 = vld [vmem:[#allocation8 + $0x88] sm:$0xff] }
 0x152   : > { %v2791_v0 = vpack.c.bf16 %v1092_v58, %v1090_v57  ;;  %v2685_v58 = vpack.c.bf16 %v685_v52, %v683_v47  ;;  %v710_v52 = vld [vmem:[#allocation7 + $0x5f8] sm:$0xff] }
 0x154   : > { %2642 = vmatpush1.bf16.msra.mxu0 %v2641_v62  ;;  %v2665_v62 = vpack.c.bf16 %v665_v56, %v663_v51  ;;  %2792 = vmatprep.subr.bf16.mxu1 %v2791_v0  ;;  %v690_v56 = vld [vmem:[#allocation7 + $0x558] sm:$0xff]  ;;  %v689_v0 = vld [vmem:[#allocation7 + $0x550] sm:$0xff] }
 0x155   : > { %2644 = vmatprep.subr.bf16.mxu0 %v2643_v63  ;;  %v667_v63 = vld [vmem:[#allocation7 + $0x4a0] sm:$0xff]  ;;  %2794 = vmatpush1.bf16.msra.mxu1 %v2793_v9 }
 0x156   : > { %v1113_v9 = vld [vmem:[#allocation8 + $0x140] sm:$0xff] }
 0x158   : > { %2646 = vmatpush1.bf16.msra.mxu0 %v2645_v4  ;;  %v669_v4 = vld [vmem:[#allocation7 + $0x4b0] sm:$0xff] }
 0x159   : > { %2648 = vmatprep.subr.bf16.mxu0 %v2647_v5  ;;  %v1094_v5 = vld [vmem:[#allocation8 + $0xa8] sm:$0xff] }
 0x15b   : > { %923 = vmatmul.mubr.f32.vlgmr.msra.gmra.mrb[0].mxu0 %v513_v10  ;;  %v2669_v10 = vpack.c.bf16 %v669_v4, %v667_v63  ;;  %v694_v4 = vld [vmem:[#allocation7 + $0x578] sm:$0xff] }
 0x15c   : > { %2650 = vmatpush1.bf16.msra.mxu0 %v2649_v11  ;;  %993 = vmatprep.mubr.f32.mxu0 %v516_v15  ;;  %v671_v11 = vld [vmem:[#allocation7 + $0x4c0] sm:$0xff]  ;;  %v2671_v15 = vpack.c.bf16 %v674_v8, %v672_v7  ;;  %v2815_v8 = vpack.c.bf16 %v1116_v2, %v1114_v1  ;;  %v716_v1 = vld [vmem:[#allocation7 + $0x628] sm:$0xff]  ;;  %v718_v2 = vld [vmem:[#allocation7 + $0x638] sm:$0xff] }
 0x15d   : > { %2652 = vmatprep.subr.bf16.mxu0 %v2651_v12  ;;  %v2795_v12 = vpack.c.bf16 %v1096_v6, %v1094_v5  ;;  %v2673_v22 = vpack.c.bf16 %v673_v16, %v671_v11  ;;  %v2689_v6 = vpack.c.bf16 %v689_v0, %v687_v59  ;;  %v691_v7 = vld [vmem:[#allocation7 + $0x560] sm:$0xff]  ;;  %v698_v16 = vld [vmem:[#allocation7 + $0x598] sm:$0xff]  ;;  %v712_v59 = vld [vmem:[#allocation7 + $0x608] sm:$0xff] }
 0x15e   : > { %v713_v0 = vld [vmem:[#allocation7 + $0x610] sm:$0xff] }
 0x15f   : > { %2796 = vmatprep.subr.bf16.mxu1 %v2795_v12  ;;  %v693_v12 = vld [vmem:[#allocation7 + $0x570] sm:$0xff] }
 0x160   : > { %2654 = vmatpush1.bf16.msra.mxu0 %v2653_v23  ;;  %v675_v23 = vld [vmem:[#allocation7 + $0x4e0] sm:$0xff]  ;;  %2798 = vmatpush1.bf16.msra.mxu1 %v2797_v21  ;;  %v2693_v18 = vpack.c.bf16 %v693_v12, %v691_v7  ;;  %v717_v7 = vld [vmem:[#allocation7 + $0x630] sm:$0xff] }
 0x161   : > { %2656 = vmatprep.subr.bf16.mxu0 %v2655_v28  ;;  %v677_v28 = vld [vmem:[#allocation7 + $0x4f0] sm:$0xff]  ;;  %2800 = vmatprep.subr.bf16.mxu1 %v2799_v24  ;;  %v1117_v21 = vld [vmem:[#allocation8 + $0x160] sm:$0xff] }
 0x162   : > { %v2677_v34 = vpack.c.bf16 %v677_v28, %v675_v23  ;;  %v697_v24 = vld [vmem:[#allocation7 + $0x590] sm:$0xff]  ;;  %v702_v28 = vld [vmem:[#allocation7 + $0x5b8] sm:$0xff] }
 0x163   : > { %v2697_v30 = vpack.c.bf16 %v697_v24, %v695_v19  ;;  %v723_v19 = vld [vmem:[#allocation7 + $0x660] sm:$0xff] }
 0x164   : > { %2658 = vmatpush1.bf16.msra.mxu0 %v2657_v38  ;;  %v1103_v38 = vld [vmem:[#allocation8 + $0xf0] sm:$0xff]  ;;  %2802 = vmatpush1.bf16.msra.mxu1 %v2801_v33  ;;  %v1121_v33 = vld [vmem:[#allocation8 + $0x180] sm:$0xff] }
 0x165   : > { %2660 = vmatprep.subr.bf16.mxu0 %v2659_v43  ;;  %v684_v43 = vld [vmem:[#allocation7 + $0x528] sm:$0xff]  ;;  %v2805_v45 = vpack.c.bf16 %v1103_v38, %v1101_v37  ;;  %2804 = vmatprep.subr.bf16.mxu1 %v2803_v36  ;;  %v701_v36 = vld [vmem:[#allocation7 + $0x5b0] sm:$0xff]  ;;  %v1128_v38 = vld [vmem:[#allocation8 + $0x1b8] sm:$0xff] }
 0x166   : > { %v2683_v51 = vpack.c.bf16 %v686_v44, %v684_v43  ;;  %v1126_v37 = vld [vmem:[#allocation8 + $0x1a8] sm:$0xff]  ;;  %v2701_v42 = vpack.c.bf16 %v701_v36, %v699_v31  ;;  %v703_v43 = vld [vmem:[#allocation7 + $0x5c0] sm:$0xff] }
 0x167   : > { %v2827_v44 = vpack.c.bf16 %v1128_v38, %v1126_v37  ;;  %v731_v31 = vld [vmem:[#allocation7 + $0x6a0] sm:$0xff]  ;;  %v737_v38 = vld [vmem:[#allocation7 + $0x6d0] sm:$0xff] }
 0x168   : > { %2662 = vmatpush1.bf16.msra.mxu0 %v2661_v50  ;;  %v1107_v50 = vld [vmem:[#allocation8 + $0x110] sm:$0xff]  ;;  %2806 = vmatpush1.bf16.msra.mxu1 %v2805_v45  ;;  %v1125_v45 = vld [vmem:[#allocation8 + $0x1a0] sm:$0xff] }
 0x169   : > { %2664 = vmatprep.subr.bf16.mxu0 %v2663_v55  ;;  %v688_v55 = vld [vmem:[#allocation7 + $0x548] sm:$0xff]  ;;  %v2809_v57 = vpack.c.bf16 %v1107_v50, %v1105_v49  ;;  %2808 = vmatprep.subr.bf16.mxu1 %v2807_v48  ;;  %v705_v48 = vld [vmem:[#allocation7 + $0x5d0] sm:$0xff]  ;;  %v1132_v50 = vld [vmem:[#allocation8 + $0x1d8] sm:$0xff] }
 0x16a   : > { %v2687_v63 = vpack.c.bf16 %v690_v56, %v688_v55  ;;  %v1130_v49 = vld [vmem:[#allocation8 + $0x1c8] sm:$0xff]  ;;  %v2705_v54 = vpack.c.bf16 %v705_v48, %v703_v43  ;;  %v735_v37 = vld [vmem:[#allocation7 + $0x6c0] sm:$0xff] }
 0x16b   : > { %v2831_v55 = vpack.c.bf16 %v1132_v50, %v1130_v49  ;;  %v739_v43 = vld [vmem:[#allocation7 + $0x6e0] sm:$0xff]  ;;  %v745_v50 = vld [vmem:[#allocation7 + $0x710] sm:$0xff] }
 0x16c   : > { %2666 = vmatpush1.bf16.msra.mxu0 %v2665_v62  ;;  %v1111_v62 = vld [vmem:[#allocation8 + $0x130] sm:$0xff]  ;;  %2810 = vmatpush1.bf16.msra.mxu1 %v2809_v57  ;;  %v707_v57 = vld [vmem:[#allocation7 + $0x5e0] sm:$0xff] }
 0x16d   : > { %2668 = vmatprep.subr.bf16.mxu0 %v2667_v3  ;;  %v692_v3 = vld [vmem:[#allocation7 + $0x568] sm:$0xff]  ;;  %v2813_v5 = vpack.c.bf16 %v1111_v62, %v1109_v61  ;;  %2812 = vmatprep.subr.bf16.mxu1 %v2811_v60  ;;  %v714_v60 = vld [vmem:[#allocation7 + $0x618] sm:$0xff]  ;;  %v743_v49 = vld [vmem:[#allocation7 + $0x700] sm:$0xff] }
 0x16e   : > { %v2691_v11 = vpack.c.bf16 %v694_v4, %v692_v3  ;;  %v2711_v62 = vpack.c.bf16 %v714_v60, %v712_v59  ;;  %v515_v3 = vld [vmem:[%s4012_s16 + $0x20] sm:$0xff] }
 0x170   : > { %2670 = vmatpush1.bf16.msra.mxu0 %v2669_v10  ;;  %v1115_v10 = vld [vmem:[#allocation8 + $0x150] sm:$0xff]  ;;  %2814 = vmatpush1.bf16.msra.mxu1 %v2813_v5  ;;  %v2715_v5 = vpack.c.bf16 %v718_v2, %v716_v1 }
 0x171   : > { %2672 = vmatprep.subr.bf16.mxu0 %v2671_v15  ;;  %v696_v15 = vld [vmem:[#allocation7 + $0x588] sm:$0xff]  ;;  %v2817_v17 = vpack.c.bf16 %v1115_v10, %v1113_v9  ;;  %2816 = vmatprep.subr.bf16.mxu1 %v2815_v8  ;;  %v518_v8 = vld [vmem:[%s4012_s16 + $0x38] sm:$0xff] }
 0x172   : > { %v2695_v23 = vpack.c.bf16 %v698_v16, %v696_v15  ;;  %v720_v9 = vld [vmem:[#allocation7 + $0x648] sm:$0xff]  ;;  %v722_v10 = vld [vmem:[#allocation7 + $0x658] sm:$0xff] }
 0x173   : > { %v2719_v12 = vpack.c.bf16 %v722_v10, %v720_v9  ;;  %v724_v15 = vld [vmem:[#allocation7 + $0x668] sm:$0xff]  ;;  %v726_v16 = vld [vmem:[#allocation7 + $0x678] sm:$0xff]  ;;  %v759_v9 = vld [vmem:[#allocation7 + $0x780] sm:$0xff] }
 0x174   : > { %2674 = vmatpush1.bf16.msra.mxu0 %v2673_v22  ;;  %v1119_v22 = vld [vmem:[#allocation8 + $0x170] sm:$0xff]  ;;  %2818 = vmatpush1.bf16.msra.mxu1 %v2817_v17  ;;  %v2721_v17 = vpack.c.bf16 %v721_v14, %v719_v13 }
 0x175   : > { %2676 = vmatprep.subr.bf16.mxu0 %v2675_v27  ;;  %v700_v27 = vld [vmem:[#allocation7 + $0x5a8] sm:$0xff]  ;;  %v2821_v29 = vpack.c.bf16 %v1119_v22, %v1117_v21  ;;  %2820 = vmatprep.subr.bf16.mxu1 %v2819_v20  ;;  %v725_v20 = vld [vmem:[#allocation7 + $0x670] sm:$0xff]  ;;  %v730_v22 = vld [vmem:[#allocation7 + $0x698] sm:$0xff] }
 0x176   : > { %v2699_v35 = vpack.c.bf16 %v702_v28, %v700_v27  ;;  %v728_v21 = vld [vmem:[#allocation7 + $0x688] sm:$0xff]  ;;  %v734_v28 = vld [vmem:[#allocation7 + $0x6b8] sm:$0xff]  ;;  %v761_v10 = vld [vmem:[#allocation7 + $0x790] sm:$0xff] }
 0x177   : > { %v2727_v24 = vpack.c.bf16 %v730_v22, %v728_v21  ;;  %v732_v27 = vld [vmem:[#allocation7 + $0x6a8] sm:$0xff]  ;;  %v2761_v13 = vpack.c.bf16 %v761_v10, %v759_v9  ;;  %v767_v21 = vld [vmem:[#allocation7 + $0x7c0] sm:$0xff]  ;;  %v769_v22 = vld [vmem:[#allocation7 + $0x7d0] sm:$0xff] }
 0x178   : > { %2678 = vmatpush1.bf16.msra.mxu0 %v2677_v34  ;;  %v1123_v34 = vld [vmem:[#allocation8 + $0x190] sm:$0xff]  ;;  %2822 = vmatpush1.bf16.msra.mxu1 %v2821_v29  ;;  %v2729_v29 = vpack.c.bf16 %v729_v26, %v727_v25  ;;  %v2769_v25 = vpack.c.bf16 %v769_v22, %v767_v21  ;;  %v1249_v10 = vld [vmem:[#allocation10 + $0x60] sm:$0xff] }
 0x179   : > { %2680 = vmatprep.subr.bf16.mxu0 %v2679_v39  ;;  %v704_v39 = vld [vmem:[#allocation7 + $0x5c8] sm:$0xff]  ;;  %v2825_v41 = vpack.c.bf16 %v1123_v34, %v1121_v33  ;;  %2824 = vmatprep.subr.bf16.mxu1 %v2823_v32  ;;  %v733_v32 = vld [vmem:[#allocation7 + $0x6b0] sm:$0xff]  ;;  %v738_v34 = vld [vmem:[#allocation7 + $0x6d8] sm:$0xff] }
 0x17a   : > { %v2703_v47 = vpack.c.bf16 %v706_v40, %v704_v39  ;;  %v736_v33 = vld [vmem:[#allocation7 + $0x6c8] sm:$0xff]  ;;  %v742_v40 = vld [vmem:[#allocation7 + $0x6f8] sm:$0xff]  ;;  %v1257_v21 = vld [vmem:[#allocation10 + $0xa0] sm:$0xff] }
 0x17b   : > { %v2735_v36 = vpack.c.bf16 %v738_v34, %v736_v33  ;;  %v740_v39 = vld [vmem:[#allocation7 + $0x6e8] sm:$0xff] }
 0x17c   : > { %2682 = vmatpush1.bf16.msra.mxu0 %v2681_v46  ;;  %v1127_v46 = vld [vmem:[#allocation8 + $0x1b0] sm:$0xff]  ;;  %2826 = vmatpush1.bf16.msra.mxu1 %v2825_v41  ;;  %v2737_v41 = vpack.c.bf16 %v737_v38, %v735_v37  ;;  %v1134_v34 = vld [vmem:[#allocation8 + $0x1e8] sm:$0xff]  ;;  %v1133_v37 = vld [vmem:[#allocation8 + $0x1e0] sm:$0xff] }
 0x17d   : > { %2684 = vmatprep.subr.bf16.mxu0 %v2683_v51  ;;  %v708_v51 = vld [vmem:[#allocation7 + $0x5e8] sm:$0xff]  ;;  %v2829_v53 = vpack.c.bf16 %v1127_v46, %v1125_v45  ;;  %2828 = vmatprep.subr.bf16.mxu1 %v2827_v44  ;;  %v741_v44 = vld [vmem:[#allocation7 + $0x6f0] sm:$0xff]  ;;  %v746_v46 = vld [vmem:[#allocation7 + $0x718] sm:$0xff] }
 0x17e   : > { %v2707_v56 = vpack.c.bf16 %v710_v52, %v708_v51  ;;  %v744_v45 = vld [vmem:[#allocation7 + $0x708] sm:$0xff]  ;;  %v750_v52 = vld [vmem:[#allocation7 + $0x738] sm:$0xff]  ;;  %v1135_v38 = vld [vmem:[#allocation8 + $0x1f0] sm:$0xff] }
 0x17f   : > { %v2743_v48 = vpack.c.bf16 %v746_v46, %v744_v45  ;;  %v748_v51 = vld [vmem:[#allocation7 + $0x728] sm:$0xff]  ;;  %v775_v46 = vld [vmem:[%s4283_s3] sm:$0x3] }
 0x180   : > { %2686 = vmatpush1.bf16.msra.mxu0 %v2685_v58  ;;  %v709_v58 = vld [vmem:[#allocation7 + $0x5f0] sm:$0xff]  ;;  %2830 = vmatpush1.bf16.msra.mxu1 %v2829_v53  ;;  %v2745_v53 = vpack.c.bf16 %v745_v50, %v743_v49 }
 0x181   : > { %2688 = vmatprep.subr.bf16.mxu0 %v2687_v63  ;;  %v2709_v61 = vpack.c.bf16 %v709_v58, %v707_v57  ;;  %2832 = vmatprep.subr.bf16.mxu1 %v2831_v55  ;;  %v711_v63 = vld [vmem:[#allocation7 + $0x600] sm:$0xff]  ;;  %v752_v57 = vld [vmem:[#allocation7 + $0x748] sm:$0xff]  ;;  %v754_v58 = vld [vmem:[#allocation7 + $0x758] sm:$0xff] }
 0x182   : > { %v2713_v4 = vpack.c.bf16 %v713_v0, %v711_v63  ;;  %v747_v55 = vld [vmem:[#allocation7 + $0x720] sm:$0xff]  ;;  %v2751_v60 = vpack.c.bf16 %v754_v58, %v752_v57  ;;  %v756_v63 = vld [vmem:[#allocation7 + $0x768] sm:$0xff]  ;;  %v758_v0 = vld [vmem:[#allocation7 + $0x778] sm:$0xff] }
 0x183   : > { %v2755_v2 = vpack.c.bf16 %v758_v0, %v756_v63  ;;  %v1244_v57 = vld [vmem:[#allocation10 + $0x38] sm:$0xff]  ;;  %v1243_v63 = vld [vmem:[#allocation10 + $0x30] sm:$0xff]  ;;  %v1246_v0 = vld [vmem:[#allocation10 + $0x48] sm:$0xff] }
 0x184   : > { %2690 = vmatpush1.bf16.msra.mxu0 %v2689_v6  ;;  %v715_v6 = vld [vmem:[#allocation7 + $0x620] sm:$0xff] }
 0x185   : > { %2692 = vmatprep.subr.bf16.mxu0 %v2691_v11  ;;  %v2717_v11 = vpack.c.bf16 %v717_v7, %v715_v6  ;;  %v762_v6 = vld [vmem:[#allocation7 + $0x798] sm:$0xff] }
 0x188   : > { %2694 = vmatpush1.bf16.msra.mxu0 %v2693_v18  ;;  %v2723_v18 = vpack.c.bf16 %v726_v16, %v724_v15  ;;  %v763_v15 = vld [vmem:[#allocation7 + $0x7a0] sm:$0xff]  ;;  %v765_v16 = vld [vmem:[#allocation7 + $0x7b0] sm:$0xff] }
 0x189   : > { %2696 = vmatprep.subr.bf16.mxu0 %v2695_v23  ;;  %v2725_v23 = vpack.c.bf16 %v725_v20, %v723_v19  ;;  %v2765_v19 = vpack.c.bf16 %v765_v16, %v763_v15  ;;  %v1253_v16 = vld [vmem:[#allocation10 + $0x80] sm:$0xff] }
 0x18c   : > { %2698 = vmatpush1.bf16.msra.mxu0 %v2697_v30  ;;  %v2731_v30 = vpack.c.bf16 %v734_v28, %v732_v27  ;;  %v771_v27 = vld [vmem:[#allocation7 + $0x7e0] sm:$0xff]  ;;  %v773_v28 = vld [vmem:[#allocation7 + $0x7f0] sm:$0xff] }
 0x18d   : > { %2700 = vmatprep.subr.bf16.mxu0 %v2699_v35  ;;  %v2733_v35 = vpack.c.bf16 %v733_v32, %v731_v31  ;;  %v1129_v31 = vld [vmem:[#allocation8 + $0x1c0] sm:$0xff]  ;;  %v1131_v32 = vld [vmem:[#allocation8 + $0x1d0] sm:$0xff] }
 0x18e   : > { %v2833_v33 = vpack.c.bf16 %v1131_v32, %v1129_v31  ;;  %v1266_v31 = vld [vmem:[#allocation10 + $0xe8] sm:$0xff]  ;;  %v1268_v32 = vld [vmem:[#allocation10 + $0xf8] sm:$0xff] }
 0x190   : > { %2702 = vmatpush1.bf16.msra.mxu0 %v2701_v42  ;;  %v2739_v42 = vpack.c.bf16 %v742_v40, %v740_v39  ;;  %2834 = vmatpush1.bf16.msra.mxu1 %v2833_v33  ;;  %v2837_v39 = vpack.c.bf16 %v1135_v38, %v1133_v37  ;;  %v1238_v40 = vld [vmem:[#allocation10 + $0x8] sm:$0xff] }
 0x191   : > { %2704 = vmatprep.subr.bf16.mxu0 %v2703_v47  ;;  %v2741_v47 = vpack.c.bf16 %v741_v44, %v739_v43  ;;  %v777_v43 = vlaneseq  ;;  %v1379_v38 = vld [vmem:[#allocation11 + $0x8] sm:$0xff] }
 0x193   : > { %v4046_v44 = vshrl.u32 %v777_v43, 7 }
 0x194   : > { %2706 = vmatpush1.bf16.msra.mxu0 %v2705_v54  ;;  %v2747_v54 = vpack.c.bf16 %v750_v52, %v748_v51 }
 0x195   : > { %2708 = vmatprep.subr.bf16.mxu0 %v2707_v56  ;;  %v749_v56 = vld [vmem:[#allocation7 + $0x730] sm:$0xff]  ;;  %v4049_v45 = vsub.s32 0, %v4046_v44 }
 0x196   : > { %v2749_v59 = vpack.c.bf16 %v749_v56, %v747_v55  ;;  %v1242_v56 = vld [vmem:[#allocation10 + $0x28] sm:$0xff] }
 0x198   : > { %2710 = vmatpush1.bf16.msra.mxu0 %v2709_v61  ;;  %v751_v61 = vld [vmem:[#allocation7 + $0x740] sm:$0xff] }
 0x199   : > { %2712 = vmatprep.subr.bf16.mxu0 %v2711_v62  ;;  %v753_v62 = vld [vmem:[#allocation7 + $0x750] sm:$0xff] }
 0x19a   : > { %v2753_v1 = vpack.c.bf16 %v753_v62, %v751_v61  ;;  %v2843_v61 = vpack.c.bf16 %v1244_v57, %v1242_v56  ;;  %v1241_v62 = vld [vmem:[#allocation10 + $0x20] sm:$0xff]  ;;  %v1417_v56 = vld [vmem:[#allocation11 + $0x138] sm:$0xff] }
 0x19b   : > { %994 = vmatmul.mubr.f32.vlgmr.msra.gmra.mrb[0].mxu0 %v515_v3  ;;  %v755_v3 = vld [vmem:[#allocation7 + $0x760] sm:$0xff]  ;;  %v1425_v57 = vld [vmem:[#allocation11 + $0x178] sm:$0xff] }
 0x19c   : > { %2714 = vmatpush1.bf16.msra.mxu0 %v2713_v4  ;;  %1064 = vmatprep.mubr.f32.mxu0 %v518_v8  ;;  %v757_v4 = vld [vmem:[#allocation7 + $0x770] sm:$0xff] }
 0x19d   : > { %2716 = vmatprep.subr.bf16.mxu0 %v2715_v5  ;;  %v760_v5 = vld [vmem:[#allocation7 + $0x788] sm:$0xff]  ;;  %v2757_v7 = vpack.c.bf16 %v757_v4, %v755_v3  ;;  %v1245_v4 = vld [vmem:[#allocation10 + $0x40] sm:$0xff] }
 0x19e   : > { %v2759_v8 = vpack.c.bf16 %v762_v6, %v760_v5  ;;  %v1247_v5 = vld [vmem:[#allocation10 + $0x50] sm:$0xff] }
 0x19f   : > { %v2849_v6 = vpack.c.bf16 %v1247_v5, %v1245_v4  ;;  %v1457_v4 = vld [vmem:[#allocation11 + $0x278] sm:$0xff] }
 0x1a0   : > { %2718 = vmatpush1.bf16.msra.mxu0 %v2717_v11  ;;  %v764_v11 = vld [vmem:[#allocation7 + $0x7a8] sm:$0xff] }
 0x1a1   : > { %2720 = vmatprep.subr.bf16.mxu0 %v2719_v12  ;;  %v766_v12 = vld [vmem:[#allocation7 + $0x7b8] sm:$0xff] }
 0x1a2   : > { %v2763_v14 = vpack.c.bf16 %v766_v12, %v764_v11  ;;  %v1251_v11 = vld [vmem:[#allocation10 + $0x70] sm:$0xff] }
 0x1a3   : > { %v2853_v12 = vpack.c.bf16 %v1251_v11, %v1249_v10  ;;  %v1473_v10 = vld [vmem:[#allocation11 + $0x2f8] sm:$0xff] }
 0x1a4   : > { %2722 = vmatpush1.bf16.msra.mxu0 %v2721_v17  ;;  %v768_v17 = vld [vmem:[#allocation7 + $0x7c8] sm:$0xff] }
 0x1a5   : > { %2724 = vmatprep.subr.bf16.mxu0 %v2723_v18  ;;  %v770_v18 = vld [vmem:[#allocation7 + $0x7d8] sm:$0xff] }
 0x1a6   : > { %v2767_v20 = vpack.c.bf16 %v770_v18, %v768_v17  ;;  %v1255_v17 = vld [vmem:[#allocation10 + $0x90] sm:$0xff] }
 0x1a7   : > { %v2857_v18 = vpack.c.bf16 %v1255_v17, %v1253_v16  ;;  %v1489_v16 = vld [vmem:[#allocation11 + $0x378] sm:$0xff] }
 0x1a8   : > { %2726 = vmatpush1.bf16.msra.mxu0 %v2725_v23  ;;  %v772_v23 = vld [vmem:[#allocation7 + $0x7e8] sm:$0xff] }
 0x1a9   : > { %2728 = vmatprep.subr.bf16.mxu0 %v2727_v24  ;;  %v774_v24 = vld [vmem:[#allocation7 + $0x7f8] sm:$0xff] }
 0x1aa   : > { %v2771_v26 = vpack.c.bf16 %v774_v24, %v772_v23  ;;  %v1259_v23 = vld [vmem:[#allocation10 + $0xb0] sm:$0xff]  ;;  %v1262_v24 = vld [vmem:[#allocation10 + $0xc8] sm:$0xff] }
 0x1ac   : > { %2730 = vmatpush1.bf16.msra.mxu0 %v2729_v29  ;;  %v2773_v29 = vpack.c.bf16 %v773_v28, %v771_v27  ;;  %v2861_v27 = vpack.c.bf16 %v1259_v23, %v1257_v21  ;;  %v1497_v21 = vld [vmem:[#allocation11 + $0x3b8] sm:$0xff] }
 0x1ad   : > { %2732 = vmatprep.subr.bf16.mxu0 %v2731_v30  ;;  %v517_v30 = vld [vmem:[%s4012_s16 + $0x30] sm:$0xff]  ;;  %s2474_s16 = sshll.u32 %s4008_s25, 8 }
 0x1ae   : > { %s4162_s0 = scalar_lea.vmem [#allocation13], %s2474_s16 }
 0x1b0   : > { %2734 = vmatpush1.bf16.msra.mxu0 %v2733_v35  ;;  %v1136_v35 = vld [vmem:[#allocation8 + $0x1f8] sm:$0xff] }
 0x1b1   : > { %2736 = vmatprep.subr.bf16.mxu0 %v2735_v36  ;;  %v2835_v36 = vpack.c.bf16 %v1136_v35, %v1134_v34  ;;  %v2867_v34 = vpack.c.bf16 %v1268_v32, %v1266_v31  ;;  %v1265_v35 = vld [vmem:[#allocation10 + $0xe0] sm:$0xff]  ;;  %v1512_v32 = vld [vmem:[#allocation11 + $0x430] sm:$0xff] }
 0x1b3   : > { %2836 = vmatprep.subr.bf16.mxu1 %v2835_v36  ;;  %v1267_v36 = vld [vmem:[#allocation10 + $0xf0] sm:$0xff] }
 0x1b4   : > { %2738 = vmatpush1.bf16.msra.mxu0 %v2737_v41  ;;  %2838 = vmatpush1.bf16.msra.mxu1 %v2837_v39  ;;  %v1240_v41 = vld [vmem:[#allocation10 + $0x18] sm:$0xff]  ;;  %v2869_v37 = vpack.c.bf16 %v1267_v36, %v1265_v35  ;;  %v1387_v39 = vld [vmem:[#allocation11 + $0x48] sm:$0xff] }
 0x1b5   : > { %2740 = vmatprep.subr.bf16.mxu0 %v2739_v42  ;;  %v2839_v42 = vpack.c.bf16 %v1240_v41, %v1238_v40  ;;  %v2871_v40 = vpack.c.bf16 %v1387_v39, %v1379_v38  ;;  %v1385_v41 = vld [vmem:[#allocation11 + $0x38] sm:$0xff]  ;;  %v1528_v38 = vld [vmem:[#allocation11 + $0x4b0] sm:$0xff] }
 0x1b6   : > { %v1537_v35 = vld [vmem:[#allocation11 + $0x4f8] sm:$0xff]  ;;  %v1536_v39 = vld [vmem:[#allocation11 + $0x4f0] sm:$0xff] }
 0x1b7   : > { %2840 = vmatprep.subr.bf16.mxu1 %v2839_v42  ;;  %v1393_v42 = vld [vmem:[#allocation11 + $0x78] sm:$0xff] }
 0x1b8   : > { %2742 = vmatpush1.bf16.msra.mxu0 %v2741_v47  ;;  %v4055_v47 = vsub.s32 1, %v4046_v44  ;;  %v3063_v43 = vpack.c.bf16 %v1393_v42, %v1385_v41  ;;  %v1553_v41 = vld [vmem:[#allocation11 + $0x578] sm:$0xff]  ;;  %v3101_v42 = vpack.c.bf16 %v1536_v39, %v1528_v38  ;;  %v1411_v38 = vld [vmem:[#allocation11 + $0x108] sm:$0xff] }
 0x1b9   : > { %2744 = vmatprep.subr.bf16.mxu0 %v2743_v48  ;;  %v780_v48 = vrot.slane %v775_v46, %v4049_v45  ;;  %v1419_v39 = vld [vmem:[#allocation11 + $0x148] sm:$0xff] }
 0x1ba   : > { %v784_v49 = vrot.slane %v775_v46, %v4055_v47  ;;  %v1384_v46 = vld [vmem:[#allocation11 + $0x30] sm:$0xff] }
 0x1bc   : > { %2746 = vmatpush1.bf16.msra.mxu0 %v2745_v53  ;;  %v1237_v53 = vld [vmem:[#allocation10] sm:$0xff] }
 0x1bd   : > { %2748 = vmatprep.subr.bf16.mxu0 %v2747_v54  ;;  %v1239_v54 = vld [vmem:[#allocation10 + $0x10] sm:$0xff] }
 0x1c0   : > { %2750 = vmatpush1.bf16.msra.mxu0 %v2749_v59  ;;  %v2841_v59 = vpack.c.bf16 %v1239_v54, %v1237_v53  ;;  %v1408_v54 = vld [vmem:[#allocation11 + $0xf0] sm:$0xff] }
 0x1c1   : > { %2752 = vmatprep.subr.bf16.mxu0 %v2751_v60 }
 0x1c4   : > { %2754 = vmatpush1.bf16.msra.mxu0 %v2753_v1  ;;  %v1248_v1 = vld [vmem:[#allocation10 + $0x58] sm:$0xff] }
 0x1c5   : > { %2756 = vmatprep.subr.bf16.mxu0 %v2755_v2  ;;  %v2845_v2 = vpack.c.bf16 %v1243_v63, %v1241_v62  ;;  %v2847_v3 = vpack.c.bf16 %v1248_v1, %v1246_v0  ;;  %v1433_v62 = vld [vmem:[#allocation11 + $0x1b8] sm:$0xff]  ;;  %v1432_v1 = vld [vmem:[#allocation11 + $0x1b0] sm:$0xff] }
 0x1c6   : > { %v1441_v63 = vld [vmem:[#allocation11 + $0x1f8] sm:$0xff] }
 0x1c7   : > { %v3075_v0 = vpack.c.bf16 %v1441_v63, %v1433_v62  ;;  %v1601_v62 = vld [vmem:[#allocation11 + $0x6f8] sm:$0xff] }
 0x1c8   : > { %2758 = vmatpush1.bf16.msra.mxu0 %v2757_v7  ;;  %v1250_v7 = vld [vmem:[#allocation10 + $0x68] sm:$0xff] }
 0x1c9   : > { %2760 = vmatprep.subr.bf16.mxu0 %v2759_v8  ;;  %v1252_v8 = vld [vmem:[#allocation10 + $0x78] sm:$0xff] }
 0x1ca   : > { %v2851_v9 = vpack.c.bf16 %v1252_v8, %v1250_v7  ;;  %v1448_v7 = vld [vmem:[#allocation11 + $0x230] sm:$0xff] }
 0x1cb   : > { %v1456_v8 = vld [vmem:[#allocation11 + $0x270] sm:$0xff] }
 0x1cc   : > { %2762 = vmatpush1.bf16.msra.mxu0 %v2761_v13  ;;  %v1254_v13 = vld [vmem:[#allocation10 + $0x88] sm:$0xff]  ;;  %v3081_v11 = vpack.c.bf16 %v1456_v8, %v1448_v7  ;;  %v1137_v7 = vld [vmem:[%s4285_s5] sm:$0x3] }
 0x1cd   : > { %2764 = vmatprep.subr.bf16.mxu0 %v2763_v14  ;;  %v1256_v14 = vld [vmem:[#allocation10 + $0x98] sm:$0xff]  ;;  %v1142_v8 = vrot.slane %v1137_v7, %v4049_v45 }
 0x1ce   : > { %v2855_v15 = vpack.c.bf16 %v1256_v14, %v1254_v13  ;;  %v1464_v13 = vld [vmem:[#allocation11 + $0x2b0] sm:$0xff] }
 0x1cf   : > { %v1472_v14 = vld [vmem:[#allocation11 + $0x2f0] sm:$0xff] }
 0x1d0   : > { %2766 = vmatpush1.bf16.msra.mxu0 %v2765_v19  ;;  %v1258_v19 = vld [vmem:[#allocation10 + $0xa8] sm:$0xff]  ;;  %v3085_v17 = vpack.c.bf16 %v1472_v14, %v1464_v13 }
 0x1d1   : > { %2768 = vmatprep.subr.bf16.mxu0 %v2767_v20  ;;  %v1260_v20 = vld [vmem:[#allocation10 + $0xb8] sm:$0xff] }
 0x1d2   : > { %v2859_v22 = vpack.c.bf16 %v1260_v20, %v1258_v19  ;;  %v1480_v19 = vld [vmem:[#allocation11 + $0x330] sm:$0xff] }
 0x1d3   : > { %v1488_v20 = vld [vmem:[#allocation11 + $0x370] sm:$0xff] }
 0x1d4   : > { %2770 = vmatpush1.bf16.msra.mxu0 %v2769_v25  ;;  %v1264_v25 = vld [vmem:[#allocation10 + $0xd8] sm:$0xff]  ;;  %v3089_v23 = vpack.c.bf16 %v1488_v20, %v1480_v19  ;;  %v1378_v20 = vld [vmem:[#allocation11] sm:$0xff] }
 0x1d5   : > { %2772 = vmatprep.subr.bf16.mxu0 %v2771_v26  ;;  %v3672_v26 = vmov 0.0   ;;  %v2863_v28 = vpack.c.bf16 %v1264_v25, %v1262_v24  ;;  %v1496_v25 = vld [vmem:[#allocation11 + $0x3b0] sm:$0xff]  ;;  %v1228_v19 = vld [vmem:[%s4020_s27 + $0x18] sm:$0xff] }
 0x1d8   : > { %2774 = vmatpush1.bf16.msra.mxu0 %v2773_v29  ;;  %v1261_v29 = vld [vmem:[#allocation10 + $0xc0] sm:$0xff] }
 0x1d9   : > { %3064 = vmatprep.subr.bf16.mxu0 %v3063_v43 }
 0x1db   : > { %1065 = vmatmul.mubr.f32.vlgmr.msra.gmra.mrb[0].mxu0 %v517_v30  ;;  %v1263_v30 = vld [vmem:[#allocation10 + $0xd0] sm:$0xff] }
 0x1dc   : > { %v2865_v33 = vpack.c.bf16 %v1263_v30, %v1261_v29  ;;  %v1521_v29 = vld [vmem:[#allocation11 + $0x478] sm:$0xff] }
 0x2ae   : > { %v1066_v50 = vpop.f32.mrb[0].mxu0 }
 0x2af   : > { %v3127_v51 = vadd.f32 %v1066_v50, %v780_v48  ;;  %v1068_v52 = vpop.f32.mrb[1].mxu0  ;;  %v1392_v48 = vld [vmem:[#allocation11 + $0x70] sm:$0xff]  ;;  %v1401_v50 = vld [vmem:[#allocation11 + $0xb8] sm:$0xff] }
 0x2b0   : > { %v3128_v55 = vadd.f32 %v1068_v52, %v784_v49  ;;  %v3065_v49 = vpack.c.bf16 %v1392_v48, %v1384_v46  ;;  %v1400_v52 = vld [vmem:[#allocation11 + $0xb0] sm:$0xff] }
 0x2b1   : > { %v1071_v60 = vmax.f32 %v3127_v51, 0.0  ;;  %v1409_v51 = vld [vmem:[#allocation11 + $0xf8] sm:$0xff]  ;;  %v1544_v46 = vld [vmem:[#allocation11 + $0x530] sm:$0xff] }
 0x2b2   : > { %v1072_v58 = vmax.f32 %v3128_v55, 0.0  ;;  %3066 = vmatpush1.bf16.msra.mxu0 %v3065_v49  ;;  %v3067_v53 = vpack.c.bf16 %v1409_v51, %v1401_v50  ;;  %v3069_v55 = vpack.c.bf16 %v1408_v54, %v1400_v52  ;;  %v1552_v48 = vld [vmem:[#allocation11 + $0x570] sm:$0xff]  ;;  %v1561_v49 = vld [vmem:[#allocation11 + $0x5b8] sm:$0xff] }
 0x2b3   : > { %v1569_v50 = vld [vmem:[#allocation11 + $0x5f8] sm:$0xff]  ;;  %v3105_v51 = vpack.c.bf16 %v1552_v48, %v1544_v46  ;;  %v1568_v54 = vld [vmem:[#allocation11 + $0x5f0] sm:$0xff]  ;;  %v1427_v46 = vld [vmem:[#allocation11 + $0x188] sm:$0xff] }
 0x2b4   : > { %1213 = vmatprep.mubr.f32.mxu1 %v1072_v58  ;;  %3068 = vmatprep.subr.bf16.mxu0 %v3067_v53  ;;  %v1416_v58 = vld [vmem:[#allocation11 + $0x130] sm:$0xff]  ;;  %v3107_v52 = vpack.c.bf16 %v1569_v50, %v1561_v49  ;;  %v1435_v48 = vld [vmem:[#allocation11 + $0x1c8] sm:$0xff] }
 0x2b5   : > { %1214 = vmatmul.mubr.f32.vlgmr.msra.gmra.mrb[0].mxu1 %v1071_v60  ;;  %v3071_v60 = vpack.c.bf16 %v1425_v57, %v1417_v56  ;;  %v1560_v53 = vld [vmem:[#allocation11 + $0x5b0] sm:$0xff]  ;;  %v1585_v56 = vld [vmem:[#allocation11 + $0x678] sm:$0xff]  ;;  %v2883_v50 = vpack.c.bf16 %v1435_v48, %v1427_v46  ;;  %v1595_v46 = vld [vmem:[#allocation11 + $0x6c8] sm:$0xff] }
 0x2b6   : > { %2842 = vmatpush1.bf16.msra.mxu1 %v2841_v59  ;;  %1345 = vmatprep.mubr.f32.mxu1 %v3672_v26  ;;  %v1424_v59 = vld [vmem:[#allocation11 + $0x170] sm:$0xff]  ;;  %v3109_v57 = vpack.c.bf16 %v1568_v54, %v1560_v53  ;;  %v1443_v53 = vld [vmem:[#allocation11 + $0x208] sm:$0xff] }
 0x2b7   : > { %2844 = vmatprep.subr.bf16.mxu1 %v2843_v61  ;;  %3070 = vmatpush1.bf16.msra.mxu0 %v3069_v55  ;;  %v3073_v61 = vpack.c.bf16 %v1424_v59, %v1416_v58  ;;  %v1577_v55 = vld [vmem:[#allocation11 + $0x638] sm:$0xff]  ;;  %v1576_v59 = vld [vmem:[#allocation11 + $0x630] sm:$0xff]  ;;  %v1451_v54 = vld [vmem:[#allocation11 + $0x248] sm:$0xff] }
 0x2b8   : > { %3072 = vmatprep.subr.bf16.mxu0 %v3071_v60  ;;  %v3111_v58 = vpack.c.bf16 %v1585_v56, %v1577_v55  ;;  %v1584_v60 = vld [vmem:[#allocation11 + $0x670] sm:$0xff]  ;;  %v2887_v56 = vpack.c.bf16 %v1451_v54, %v1443_v53  ;;  %v1611_v53 = vld [vmem:[#allocation11 + $0x748] sm:$0xff] }
 0x2b9   : > { %v3113_v63 = vpack.c.bf16 %v1584_v60, %v1576_v59  ;;  %v1459_v59 = vld [vmem:[#allocation11 + $0x288] sm:$0xff] }
 0x2ba   : > { %2846 = vmatpush1.bf16.msra.mxu1 %v2845_v2  ;;  %v1440_v2 = vld [vmem:[#allocation11 + $0x1f0] sm:$0xff]  ;;  %v1467_v60 = vld [vmem:[#allocation11 + $0x2c8] sm:$0xff] }
 0x2bb   : > { %2848 = vmatprep.subr.bf16.mxu1 %v2847_v3  ;;  %v1449_v3 = vld [vmem:[#allocation11 + $0x238] sm:$0xff]  ;;  %3074 = vmatpush1.bf16.msra.mxu0 %v3073_v61  ;;  %v3077_v5 = vpack.c.bf16 %v1440_v2, %v1432_v1  ;;  %v1592_v1 = vld [vmem:[#allocation11 + $0x6b0] sm:$0xff] }
 0x2bc   : > { %3076 = vmatprep.subr.bf16.mxu0 %v3075_v0  ;;  %v1593_v61 = vld [vmem:[#allocation11 + $0x6b8] sm:$0xff]  ;;  %v1600_v2 = vld [vmem:[#allocation11 + $0x6f0] sm:$0xff] }
 0x2bd   : > { %v3115_v0 = vpack.c.bf16 %v1601_v62, %v1593_v61  ;;  %v2891_v62 = vpack.c.bf16 %v1467_v60, %v1459_v59  ;;  %v1608_v59 = vld [vmem:[#allocation11 + $0x730] sm:$0xff] }
 0x2be   : > { %2850 = vmatpush1.bf16.msra.mxu1 %v2849_v6  ;;  %v3079_v6 = vpack.c.bf16 %v1457_v4, %v1449_v3  ;;  %v1609_v3 = vld [vmem:[#allocation11 + $0x738] sm:$0xff]  ;;  %v1616_v60 = vld [vmem:[#allocation11 + $0x770] sm:$0xff] }
 0x2bf   : > { %2852 = vmatprep.subr.bf16.mxu1 %v2851_v9  ;;  %v1465_v9 = vld [vmem:[#allocation11 + $0x2b8] sm:$0xff]  ;;  %3078 = vmatpush1.bf16.msra.mxu0 %v3077_v5  ;;  %v3117_v5 = vpack.c.bf16 %v1600_v2, %v1592_v1  ;;  %v1475_v1 = vld [vmem:[#allocation11 + $0x308] sm:$0xff] }
 0x2c0   : > { %3080 = vmatprep.subr.bf16.mxu0 %v3079_v6  ;;  %v1617_v4 = vld [vmem:[#allocation11 + $0x778] sm:$0xff]  ;;  %v1483_v2 = vld [vmem:[#allocation11 + $0x348] sm:$0xff] }
 0x2c1   : > { %v3119_v6 = vpack.c.bf16 %v1617_v4, %v1609_v3  ;;  %v1474_v4 = vld [vmem:[#allocation11 + $0x300] sm:$0xff] }
 0x2c2   : > { %2854 = vmatpush1.bf16.msra.mxu1 %v2853_v12  ;;  %v3083_v12 = vpack.c.bf16 %v1473_v10, %v1465_v9  ;;  %v1146_v9 = vrot.slane %v1137_v7, %v4055_v47  ;;  %v1499_v7 = vld [vmem:[#allocation11 + $0x3c8] sm:$0xff] }
 0x2c3   : > { %2856 = vmatprep.subr.bf16.mxu1 %v2855_v15  ;;  %v1481_v15 = vld [vmem:[#allocation11 + $0x338] sm:$0xff]  ;;  %3082 = vmatpush1.bf16.msra.mxu0 %v3081_v11 }
 0x2c4   : > { %3084 = vmatprep.subr.bf16.mxu0 %v3083_v12 }
 0x2c6   : > { %2858 = vmatpush1.bf16.msra.mxu1 %v2857_v18  ;;  %v3087_v18 = vpack.c.bf16 %v1489_v16, %v1481_v15  ;;  %v1225_v16 = vld [vmem:[%s4020_s27] sm:$0xff] }
 0x2c7   : > { %2860 = vmatprep.subr.bf16.mxu1 %v2859_v22  ;;  %v1505_v22 = vld [vmem:[#allocation11 + $0x3f8] sm:$0xff]  ;;  %3086 = vmatpush1.bf16.msra.mxu0 %v3085_v17  ;;  %v1226_v17 = vld [vmem:[%s4020_s27 + $0x8] sm:$0xff] }
 0x2c8   : > { %3088 = vmatprep.subr.bf16.mxu0 %v3087_v18  ;;  %v3091_v24 = vpack.c.bf16 %v1505_v22, %v1497_v21  ;;  %v1227_v18 = vld [vmem:[%s4020_s27 + $0x10] sm:$0xff]  ;;  %v1386_v21 = vld [vmem:[#allocation11 + $0x40] sm:$0xff]  ;;  %v1395_v22 = vld [vmem:[#allocation11 + $0x88] sm:$0xff] }
 0x2ca   : > { %2862 = vmatpush1.bf16.msra.mxu1 %v2861_v27  ;;  %v1504_v27 = vld [vmem:[#allocation11 + $0x3f0] sm:$0xff] }
 0x2cb   : > { %2864 = vmatprep.subr.bf16.mxu1 %v2863_v28  ;;  %v1513_v28 = vld [vmem:[#allocation11 + $0x438] sm:$0xff]  ;;  %3090 = vmatpush1.bf16.msra.mxu0 %v3089_v23  ;;  %v3093_v30 = vpack.c.bf16 %v1504_v27, %v1496_v25  ;;  %v1403_v23 = vld [vmem:[#allocation11 + $0xc8] sm:$0xff] }
 0x2cc   : > { %3092 = vmatprep.subr.bf16.mxu0 %v3091_v24  ;;  %v3095_v31 = vpack.c.bf16 %v1521_v29, %v1513_v28 }
 0x2ce   : > { %2866 = vmatpush1.bf16.msra.mxu1 %v2865_v33  ;;  %v1520_v33 = vld [vmem:[#allocation11 + $0x470] sm:$0xff] }
 0x2cf   : > { %2868 = vmatprep.subr.bf16.mxu1 %v2867_v34  ;;  %v1529_v34 = vld [vmem:[#allocation11 + $0x4b8] sm:$0xff]  ;;  %3094 = vmatpush1.bf16.msra.mxu0 %v3093_v30  ;;  %v3097_v36 = vpack.c.bf16 %v1520_v33, %v1512_v32  ;;  %v2873_v30 = vpack.c.bf16 %v1386_v21, %v1378_v20 }
 0x2d0   : > { %3096 = vmatprep.subr.bf16.mxu0 %v3095_v31  ;;  %v2875_v31 = vpack.c.bf16 %v1403_v23, %v1395_v22  ;;  %v1522_v22 = vld [vmem:[#allocation11 + $0x480] sm:$0xff] }
 0x2d1   : > { %v1530_v23 = vld [vmem:[#allocation11 + $0x4c0] sm:$0xff] }
 0x2d2   : > { %2870 = vmatpush1.bf16.msra.mxu1 %v2869_v37  ;;  %v3099_v37 = vpack.c.bf16 %v1537_v35, %v1529_v34 }
 0x2d3   : > { %2872 = vmatprep.subr.bf16.mxu1 %v2871_v40  ;;  %v1545_v40 = vld [vmem:[#allocation11 + $0x538] sm:$0xff]  ;;  %3098 = vmatpush1.bf16.msra.mxu0 %v3097_v36  ;;  %v1394_v36 = vld [vmem:[#allocation11 + $0x80] sm:$0xff] }
 0x2d4   : > { %3100 = vmatprep.subr.bf16.mxu0 %v3099_v37  ;;  %v3103_v43 = vpack.c.bf16 %v1553_v41, %v1545_v40  ;;  %v1402_v37 = vld [vmem:[#allocation11 + $0xc0] sm:$0xff]  ;;  %v2879_v41 = vpack.c.bf16 %v1419_v39, %v1411_v38  ;;  %v1579_v38 = vld [vmem:[#allocation11 + $0x648] sm:$0xff] }
 0x2d5   : > { %v2877_v40 = vpack.c.bf16 %v1402_v37, %v1394_v36  ;;  %v1562_v36 = vld [vmem:[#allocation11 + $0x5c0] sm:$0xff]  ;;  %v1571_v37 = vld [vmem:[#allocation11 + $0x608] sm:$0xff] }
 0x2d7   : > { %3102 = vmatpush1.bf16.msra.mxu0 %v3101_v42  ;;  %v1410_v42 = vld [vmem:[#allocation11 + $0x100] sm:$0xff] }
 0x2d8   : > { %3104 = vmatprep.subr.bf16.mxu0 %v3103_v43  ;;  %v1418_v43 = vld [vmem:[#allocation11 + $0x140] sm:$0xff] }
 0x2d9   : > { %v2881_v49 = vpack.c.bf16 %v1418_v43, %v1410_v42  ;;  %v1578_v42 = vld [vmem:[#allocation11 + $0x640] sm:$0xff]  ;;  %v1587_v43 = vld [vmem:[#allocation11 + $0x688] sm:$0xff] }
 0x2db   : > { %3106 = vmatpush1.bf16.msra.mxu0 %v3105_v51  ;;  %v1426_v51 = vld [vmem:[#allocation11 + $0x180] sm:$0xff] }
 0x2dc   : > { %3108 = vmatprep.subr.bf16.mxu0 %v3107_v52  ;;  %v1434_v52 = vld [vmem:[#allocation11 + $0x1c0] sm:$0xff] }
 0x2dd   : > { %v2885_v55 = vpack.c.bf16 %v1434_v52, %v1426_v51  ;;  %v1594_v51 = vld [vmem:[#allocation11 + $0x6c0] sm:$0xff]  ;;  %v1603_v52 = vld [vmem:[#allocation11 + $0x708] sm:$0xff] }
 0x2df   : > { %3110 = vmatpush1.bf16.msra.mxu0 %v3109_v57  ;;  %v1442_v57 = vld [vmem:[#allocation11 + $0x200] sm:$0xff] }
 0x2e0   : > { %3112 = vmatprep.subr.bf16.mxu0 %v3111_v58  ;;  %v1450_v58 = vld [vmem:[#allocation11 + $0x240] sm:$0xff] }
 0x2e1   : > { %v2889_v61 = vpack.c.bf16 %v1450_v58, %v1442_v57  ;;  %v1610_v57 = vld [vmem:[#allocation11 + $0x740] sm:$0xff] }
 0x2e3   : > { %3114 = vmatpush1.bf16.msra.mxu0 %v3113_v63  ;;  %v1458_v63 = vld [vmem:[#allocation11 + $0x280] sm:$0xff] }
 0x2e4   : > { %3116 = vmatprep.subr.bf16.mxu0 %v3115_v0  ;;  %v1466_v0 = vld [vmem:[#allocation11 + $0x2c0] sm:$0xff] }
 0x2e5   : > { %v2893_v3 = vpack.c.bf16 %v1466_v0, %v1458_v63  ;;  %v1627_v63 = vld [vmem:[#allocation11 + $0x7c8] sm:$0xff] }
 0x2e7   : > { %3118 = vmatpush1.bf16.msra.mxu0 %v3117_v5  ;;  %v1482_v5 = vld [vmem:[#allocation11 + $0x340] sm:$0xff] }
 0x2e8   : > { %3120 = vmatprep.subr.bf16.mxu0 %v3119_v6  ;;  %v1491_v6 = vld [vmem:[#allocation11 + $0x388] sm:$0xff] }
 0x388   : > { %v1215_v10 = vpop.f32.mrb[0].mxu1 }
 0x389   : > { %v1216_v11 = vadd.f32 %v1215_v10, %v1142_v8  ;;  %v1217_v12 = vpop.f32.mrb[1].mxu1  ;;  %v2897_v8 = vpack.c.bf16 %v1482_v5, %v1474_v4  ;;  %v1490_v10 = vld [vmem:[#allocation11 + $0x380] sm:$0xff]  ;;  %v1633_v4 = vld [vmem:[#allocation11 + $0x7f8] sm:$0xff]  ;;  %v1624_v5 = vld [vmem:[#allocation11 + $0x7b0] sm:$0xff] }
 0x38a   : > { %v1218_v13 = vadd.f32 %v1217_v12, %v1146_v9  ;;  %v2899_v9 = vpack.c.bf16 %v1499_v7, %v1491_v6  ;;  %v1507_v12 = vld [vmem:[#allocation11 + $0x408] sm:$0xff]  ;;  %v1632_v6 = vld [vmem:[#allocation11 + $0x7f0] sm:$0xff] }
 0x38b   : > { %1220 = vst [vmem:[%s4066_s2] sm:$0xff] %v1216_v11 }
 0x38c   : > { %1221 = vst [vmem:[%s4066_s2 + $0x8] sm:$0xff] %v1218_v13  ;;  %v1222_v14 = vmul.f32 0.5, %v1218_v13  ;;  %v1515_v13 = vld [vmem:[#allocation11 + $0x448] sm:$0xff] }
 0x38e   : > { %v1223_v15 = vmul.f32 1.442695, %v1222_v14 }
 0x390   : > { %3242 = vpow2.f32 %v1223_v15  ;;  %v2903_v15 = vpack.c.bf16 %v1515_v13, %v1507_v12  ;;  %v1269_v12 = vld [vmem:[%s4287_s7] sm:$0x3] }
 0x391   : > { %v1274_v13 = vrot.slane %v1269_v12, %v4049_v45 }
 0x39a   : > { %v3243_v24 = vpop.eup %3242 }
 0x39b   : > { %v1229_v25 = vmul.f32 %v3243_v24, %v1225_v16  ;;  %v1230_v27 = vmul.f32 %v3243_v24, %v1226_v17  ;;  %v1231_v28 = vmul.f32 %v3243_v24, %v1227_v18  ;;  %v1232_v29 = vmul.f32 %v3243_v24, %v1228_v19  ;;  %v1506_v16 = vld [vmem:[#allocation11 + $0x400] sm:$0xff]  ;;  %v1523_v18 = vld [vmem:[#allocation11 + $0x488] sm:$0xff] }
 0x39c   : > { %v1514_v17 = vld [vmem:[#allocation11 + $0x440] sm:$0xff]  ;;  %v1531_v19 = vld [vmem:[#allocation11 + $0x4c8] sm:$0xff] }
 0x39d   : > { %v1233_v32 = vadd.f32 %v1229_v25, %v1216_v11  ;;  %v1234_v33 = vadd.f32 %v1230_v27, %v1216_v11  ;;  %v1235_v34 = vadd.f32 %v1231_v28, %v1216_v11  ;;  %v1236_v35 = vadd.f32 %v1232_v29, %v1216_v11  ;;  %v1498_v11 = vld [vmem:[#allocation11 + $0x3c0] sm:$0xff]  ;;  %v1539_v24 = vld [vmem:[#allocation11 + $0x508] sm:$0xff] }
 0x39e   : > { %v2901_v14 = vpack.c.bf16 %v1498_v11, %v1490_v10  ;;  %v2905_v20 = vpack.c.bf16 %v1514_v17, %v1506_v16  ;;  %v2907_v21 = vpack.c.bf16 %v1531_v19, %v1523_v18  ;;  %v1547_v25 = vld [vmem:[#allocation11 + $0x548] sm:$0xff]  ;;  %v2909_v27 = vpack.c.bf16 %v1530_v23, %v1522_v22  ;;  %v1538_v29 = vld [vmem:[#allocation11 + $0x500] sm:$0xff]  ;;  %v1389_v10 = vld [vmem:[#allocation11 + $0x58] sm:$0xff] }
 0x39f   : > { %1346 = vmatmul.mubr.f32.vlgmr.msra.gmra.mrb[2].mxu1 %v1233_v32  ;;  %v2911_v28 = vpack.c.bf16 %v1547_v25, %v1539_v24  ;;  %v1563_v32 = vld [vmem:[#allocation11 + $0x5c8] sm:$0xff]  ;;  %v1380_v18 = vld [vmem:[#allocation11 + $0x10] sm:$0xff]  ;;  %v1405_v22 = vld [vmem:[#allocation11 + $0xd8] sm:$0xff] }
 0x3a0   : > { %1351 = vmatprep.mubr.f32.mxu1 %v3672_v26  ;;  %2874 = vmatpush1.bf16.msra.mxu1 %v2873_v30  ;;  %v1546_v30 = vld [vmem:[#allocation11 + $0x540] sm:$0xff]  ;;  %v1388_v19 = vld [vmem:[#allocation11 + $0x50] sm:$0xff] }
 0x3a1   : > { %2876 = vmatprep.subr.bf16.mxu1 %v2875_v31  ;;  %v1555_v31 = vld [vmem:[#allocation11 + $0x588] sm:$0xff]  ;;  %v2937_v25 = vpack.c.bf16 %v1388_v19, %v1380_v18 }
 0x3a3   : > { %1352 = vmatmul.mubr.f32.gmra.mrb[4].mxu1 %v1234_v33  ;;  %v2913_v33 = vpack.c.bf16 %v1546_v30, %v1538_v29 }
 0x3a4   : > { %1357 = vmatprep.mubr.f32.mxu1 %v3672_v26  ;;  %2878 = vmatpush1.bf16.msra.mxu1 %v2877_v40  ;;  %v2919_v40 = vpack.c.bf16 %v1579_v38, %v1571_v37 }
 0x3a5   : > { %2880 = vmatprep.subr.bf16.mxu1 %v2879_v41  ;;  %v1570_v41 = vld [vmem:[#allocation11 + $0x600] sm:$0xff] }
 0x3a6   : > { %v2921_v48 = vpack.c.bf16 %v1578_v42, %v1570_v41 }
 0x3a7   : > { %1358 = vmatmul.mubr.f32.gmra.mrb[6].mxu1 %v1235_v34  ;;  %v2915_v34 = vpack.c.bf16 %v1563_v32, %v1555_v31  ;;  %v1396_v31 = vld [vmem:[#allocation11 + $0x90] sm:$0xff] }
 0x3a8   : > { %1363 = vmatprep.mubr.f32.mxu1 %v3672_v26  ;;  %2882 = vmatpush1.bf16.msra.mxu1 %v2881_v49  ;;  %v2895_v26 = vpack.c.bf16 %v1483_v2, %v1475_v1  ;;  %v2923_v49 = vpack.c.bf16 %v1595_v46, %v1587_v43  ;;  %v1618_v1 = vld [vmem:[#allocation11 + $0x780] sm:$0xff]  ;;  %v1404_v32 = vld [vmem:[#allocation11 + $0xd0] sm:$0xff] }
 0x3a9   : > { %2884 = vmatprep.subr.bf16.mxu1 %v2883_v50  ;;  %v1586_v50 = vld [vmem:[#allocation11 + $0x680] sm:$0xff]  ;;  %v2941_v38 = vpack.c.bf16 %v1404_v32, %v1396_v31  ;;  %v1412_v43 = vld [vmem:[#allocation11 + $0x110] sm:$0xff]  ;;  %v1525_v31 = vld [vmem:[#allocation11 + $0x498] sm:$0xff] }
 0x3aa   : > { %v2925_v54 = vpack.c.bf16 %v1594_v51, %v1586_v50  ;;  %v1626_v2 = vld [vmem:[#allocation11 + $0x7c0] sm:$0xff]  ;;  %v1420_v46 = vld [vmem:[#allocation11 + $0x150] sm:$0xff]  ;;  %v1437_v50 = vld [vmem:[#allocation11 + $0x1d8] sm:$0xff] }
 0x3ab   : > { %1364 = vmatmul.mubr.f32.gmra.mrb[8].mxu1 %v1236_v35  ;;  %v1554_v35 = vld [vmem:[#allocation11 + $0x580] sm:$0xff]  ;;  %v1533_v32 = vld [vmem:[#allocation11 + $0x4d8] sm:$0xff] }
 0x3ac   : > { %2886 = vmatpush1.bf16.msra.mxu1 %v2885_v55  ;;  %v2917_v39 = vpack.c.bf16 %v1562_v36, %v1554_v35  ;;  %v2927_v55 = vpack.c.bf16 %v1611_v53, %v1603_v52  ;;  %v1421_v35 = vld [vmem:[#allocation11 + $0x158] sm:$0xff]  ;;  %v2945_v53 = vpack.c.bf16 %v1420_v46, %v1412_v43  ;;  %v1540_v43 = vld [vmem:[#allocation11 + $0x510] sm:$0xff] }
 0x3ad   : > { %2888 = vmatprep.subr.bf16.mxu1 %v2887_v56  ;;  %v1602_v56 = vld [vmem:[#allocation11 + $0x700] sm:$0xff]  ;;  %v1548_v46 = vld [vmem:[#allocation11 + $0x550] sm:$0xff] }
 0x3ae   : > { %v2929_v58 = vpack.c.bf16 %v1610_v57, %v1602_v56 }
 0x3b0   : > { %2890 = vmatpush1.bf16.msra.mxu1 %v2889_v61  ;;  %v3121_v61 = vpack.c.bf16 %v1616_v60, %v1608_v59  ;;  %v1436_v59 = vld [vmem:[#allocation11 + $0x1d0] sm:$0xff] }
 0x3b1   : > { %2892 = vmatprep.subr.bf16.mxu1 %v2891_v62  ;;  %v1619_v62 = vld [vmem:[#allocation11 + $0x788] sm:$0xff] }
 0x3b2   : > { %3122 = vmatpush1.bf16.msra.mxu0 %v3121_v61  ;;  %v2931_v0 = vpack.c.bf16 %v1627_v63, %v1619_v62  ;;  %v1445_v61 = vld [vmem:[#allocation11 + $0x218] sm:$0xff] }
 0x3b3   : > { %v1453_v62 = vld [vmem:[#allocation11 + $0x258] sm:$0xff] }
 0x3b4   : > { %2894 = vmatpush1.bf16.msra.mxu1 %v2893_v3  ;;  %v1625_v3 = vld [vmem:[#allocation11 + $0x7b8] sm:$0xff] }
 0x3b5   : > { %2896 = vmatprep.subr.bf16.mxu1 %v2895_v26  ;;  %v2933_v26 = vpack.c.bf16 %v1626_v2, %v1618_v1  ;;  %v3123_v7 = vpack.c.bf16 %v1633_v4, %v1625_v3  ;;  %v2951_v2 = vpack.c.bf16 %v1453_v62, %v1445_v61  ;;  %v1444_v3 = vld [vmem:[#allocation11 + $0x210] sm:$0xff]  ;;  %v1461_v4 = vld [vmem:[#allocation11 + $0x298] sm:$0xff] }
 0x3b6   : > { %v1580_v61 = vld [vmem:[#allocation11 + $0x650] sm:$0xff]  ;;  %v1589_v62 = vld [vmem:[#allocation11 + $0x698] sm:$0xff] }
 0x3b7   : > { %3124 = vmatprep.subr.bf16.mxu0 %v3123_v7 }
 0x3b8   : > { %2898 = vmatpush1.bf16.msra.mxu1 %v2897_v8  ;;  %v3125_v8 = vpack.c.bf16 %v1632_v6, %v1624_v5  ;;  %v1469_v5 = vld [vmem:[#allocation11 + $0x2d8] sm:$0xff] }
 0x3b9   : > { %2900 = vmatprep.subr.bf16.mxu1 %v2899_v9  ;;  %v1381_v9 = vld [vmem:[#allocation11 + $0x18] sm:$0xff]  ;;  %v2955_v7 = vpack.c.bf16 %v1469_v5, %v1461_v4  ;;  %v1596_v4 = vld [vmem:[#allocation11 + $0x6d0] sm:$0xff] }
 0x3ba   : > { %v2935_v11 = vpack.c.bf16 %v1389_v10, %v1381_v9  ;;  %3126 = vmatpush1.bf16.msra.mxu0 %v3125_v8  ;;  %v1460_v8 = vld [vmem:[#allocation11 + $0x290] sm:$0xff]  ;;  %v1477_v10 = vld [vmem:[#allocation11 + $0x318] sm:$0xff] }
 0x3bb   : > { %v1468_v9 = vld [vmem:[#allocation11 + $0x2d0] sm:$0xff]  ;;  %v1605_v5 = vld [vmem:[#allocation11 + $0x718] sm:$0xff] }
 0x3bc   : > { %2902 = vmatpush1.bf16.msra.mxu1 %v2901_v14  ;;  %v1278_v14 = vrot.slane %v1269_v12, %v4055_v47  ;;  %v2957_v12 = vpack.c.bf16 %v1468_v9, %v1460_v8  ;;  %v1604_v9 = vld [vmem:[#allocation11 + $0x710] sm:$0xff] }
 0x3bd   : > { %2904 = vmatprep.subr.bf16.mxu1 %v2903_v15 }
 0x3c0   : > { %2906 = vmatpush1.bf16.msra.mxu1 %v2905_v20 }
 0x3c1   : > { %2908 = vmatprep.subr.bf16.mxu1 %v2907_v21  ;;  %v1397_v21 = vld [vmem:[#allocation11 + $0x98] sm:$0xff] }
 0x3c2   : > { %v2939_v30 = vpack.c.bf16 %v1405_v22, %v1397_v21  ;;  %v1500_v21 = vld [vmem:[#allocation11 + $0x3d0] sm:$0xff]  ;;  %v1509_v22 = vld [vmem:[#allocation11 + $0x418] sm:$0xff] }
 0x3c4   : > { %2910 = vmatpush1.bf16.msra.mxu1 %v2909_v27 }
 0x3c5   : > { %2912 = vmatprep.subr.bf16.mxu1 %v2911_v28 }
 0x3c8   : > { %2914 = vmatpush1.bf16.msra.mxu1 %v2913_v33 }
 0x3c9   : > { %2916 = vmatprep.subr.bf16.mxu1 %v2915_v34  ;;  %v1413_v34 = vld [vmem:[#allocation11 + $0x118] sm:$0xff] }
 0x3ca   : > { %v2943_v42 = vpack.c.bf16 %v1421_v35, %v1413_v34  ;;  %v2971_v34 = vpack.c.bf16 %v1533_v32, %v1525_v31  ;;  %v1524_v35 = vld [vmem:[#allocation11 + $0x490] sm:$0xff]  ;;  %v1406_v31 = vld [vmem:[#allocation11 + $0xe0] sm:$0xff]  ;;  %v1415_v32 = vld [vmem:[#allocation11 + $0x128] sm:$0xff] }
 0x3cc   : > { %2918 = vmatpush1.bf16.msra.mxu1 %v2917_v39 }
 0x3cd   : > { %2920 = vmatprep.subr.bf16.mxu1 %v2919_v40 }
 0x3d0   : > { %2922 = vmatpush1.bf16.msra.mxu1 %v2921_v48 }
 0x3d1   : > { %2924 = vmatprep.subr.bf16.mxu1 %v2923_v49  ;;  %v1429_v49 = vld [vmem:[#allocation11 + $0x198] sm:$0xff] }
 0x3d2   : > { %v2947_v57 = vpack.c.bf16 %v1437_v50, %v1429_v49  ;;  %v1565_v49 = vld [vmem:[#allocation11 + $0x5d8] sm:$0xff]  ;;  %v2977_v50 = vpack.c.bf16 %v1548_v46, %v1540_v43  ;;  %v1430_v46 = vld [vmem:[#allocation11 + $0x1a0] sm:$0xff] }
 0x3d4   : > { %2926 = vmatpush1.bf16.msra.mxu1 %v2925_v54 }
 0x3d5   : > { %2928 = vmatprep.subr.bf16.mxu1 %v2927_v55 }
 0x3d8   : > { %2930 = vmatpush1.bf16.msra.mxu1 %v2929_v58  ;;  %v1428_v58 = vld [vmem:[#allocation11 + $0x190] sm:$0xff] }
 0x3d9   : > { %2932 = vmatprep.subr.bf16.mxu1 %v2931_v0  ;;  %v2949_v0 = vpack.c.bf16 %v1436_v59, %v1428_v58 }
 0x3dc   : > { %2934 = vmatpush1.bf16.msra.mxu1 %v2933_v26  ;;  %v1452_v26 = vld [vmem:[#allocation11 + $0x250] sm:$0xff] }
 0x3dd   : > { %2936 = vmatprep.subr.bf16.mxu1 %v2935_v11  ;;  %v2953_v6 = vpack.c.bf16 %v1452_v26, %v1444_v3  ;;  %v1485_v11 = vld [vmem:[#allocation11 + $0x358] sm:$0xff]  ;;  %v1588_v26 = vld [vmem:[#allocation11 + $0x690] sm:$0xff] }
 0x472   : > { %v1347_v15 = vpop.f32.mrb[2].mxu1 }
 0x473   : > { %v1348_v16 = vadd.f32 %v1347_v15, %v1274_v13  ;;  %v1349_v17 = vpop.f32.mrb[3].mxu1  ;;  %v1484_v15 = vld [vmem:[#allocation11 + $0x350] sm:$0xff] }
 0x474   : > { %v1350_v20 = vadd.f32 %v1349_v17, %v1278_v14  ;;  %v1501_v17 = vld [vmem:[#allocation11 + $0x3d8] sm:$0xff] }
 0x475   : > { %v4084_v27 = vmax.f32 %v1348_v16, 0.0  ;;  %v1493_v16 = vld [vmem:[#allocation11 + $0x398] sm:$0xff] }
 0x476   : > { %v4082_v23 = vmax.f32 %v1350_v20, 0.0  ;;  %v1353_v24 = vpop.f32.mrb[4].mxu1  ;;  %v2963_v19 = vpack.c.bf16 %v1501_v17, %v1493_v16  ;;  %v1492_v20 = vld [vmem:[#allocation11 + $0x390] sm:$0xff]  ;;  %v1383_v17 = vld [vmem:[#allocation11 + $0x28] sm:$0xff] }
 0x477   : > { %v1354_v28 = vadd.f32 %v1353_v24, %v1274_v13  ;;  %v1355_v29 = vpop.f32.mrb[5].mxu1  ;;  %v1517_v24 = vld [vmem:[#allocation11 + $0x458] sm:$0xff]  ;;  %v1628_v16 = vld [vmem:[#allocation11 + $0x7d0] sm:$0xff] }
 0x478   : > { %v1356_v33 = vadd.f32 %v1355_v29, %v1278_v14  ;;  %1740 = vmatprep.mubr.f32.mxu1 %v4082_v23  ;;  %2007 = vmatprep.mubr.f32.mxu0 %v4082_v23  ;;  %v1508_v29 = vld [vmem:[#allocation11 + $0x410] sm:$0xff] }
 0x479   : > { %1741 = vmatmul.mubr.f32.vlgmr.msra.gmra.mrb[10].mxu1 %v4084_v27  ;;  %2008 = vmatmul.mubr.f32.vlgmr.msra.gmra.mrb[2].mxu0 %v4084_v27  ;;  %v4092_v39 = vmax.f32 %v1354_v28, 0.0  ;;  %v2967_v28 = vpack.c.bf16 %v1517_v24, %v1509_v22  ;;  %v1390_v22 = vld [vmem:[#allocation11 + $0x60] sm:$0xff]  ;;  %v1399_v24 = vld [vmem:[#allocation11 + $0xa8] sm:$0xff] }
 0x47a   : > { %v4090_v36 = vmax.f32 %v1356_v33, 0.0  ;;  %2938 = vmatpush1.bf16.msra.mxu1 %v2937_v25  ;;  %v1359_v37 = vpop.f32.mrb[6].mxu1  ;;  %v2965_v25 = vpack.c.bf16 %v1500_v21, %v1492_v20  ;;  %v1382_v21 = vld [vmem:[#allocation11 + $0x20] sm:$0xff] }
 0x47b   : > { %v1360_v40 = vadd.f32 %v1359_v37, %v1274_v13  ;;  %v1361_v41 = vpop.f32.mrb[7].mxu1  ;;  %2940 = vmatprep.subr.bf16.mxu1 %v2939_v30  ;;  %v1516_v30 = vld [vmem:[#allocation11 + $0x450] sm:$0xff] }
 0x47c   : > { %v1362_v48 = vadd.f32 %v1361_v41, %v1278_v14  ;;  %1746 = vmatprep.mubr.f32.mxu1 %v4090_v36  ;;  %2013 = vmatprep.mubr.f32.mxu0 %v4090_v36  ;;  %v2969_v33 = vpack.c.bf16 %v1516_v30, %v1508_v29  ;;  %v1532_v37 = vld [vmem:[#allocation11 + $0x4d0] sm:$0xff]  ;;  %v1398_v30 = vld [vmem:[#allocation11 + $0xa0] sm:$0xff] }
 0x47d   : > { %1747 = vmatmul.mubr.f32.gmra.mrb[12].mxu1 %v4092_v39  ;;  %2014 = vmatmul.mubr.f32.gmra.mrb[4].mxu0 %v4092_v39  ;;  %v4100_v54 = vmax.f32 %v1360_v40, 0.0  ;;  %v1549_v40 = vld [vmem:[#allocation11 + $0x558] sm:$0xff]  ;;  %v2973_v41 = vpack.c.bf16 %v1532_v37, %v1524_v35  ;;  %v1414_v37 = vld [vmem:[#allocation11 + $0x120] sm:$0xff] }
 0x47e   : > { %v4098_v51 = vmax.f32 %v1362_v48, 0.0  ;;  %2942 = vmatpush1.bf16.msra.mxu1 %v2941_v38  ;;  %v1365_v52 = vpop.f32.mrb[8].mxu1  ;;  %v1541_v38 = vld [vmem:[#allocation11 + $0x518] sm:$0xff] }
 0x47f   : > { %v1366_v55 = vadd.f32 %v1365_v52, %v1274_v13  ;;  %v1367_v56 = vpop.f32.mrb[9].mxu1  ;;  %2944 = vmatprep.subr.bf16.mxu1 %v2943_v42  ;;  %v2959_v13 = vpack.c.bf16 %v1485_v11, %v1477_v10  ;;  %v2975_v42 = vpack.c.bf16 %v1549_v40, %v1541_v38  ;;  %v1557_v48 = vld [vmem:[#allocation11 + $0x598] sm:$0xff]  ;;  %v1612_v10 = vld [vmem:[#allocation11 + $0x750] sm:$0xff]  ;;  %v1422_v38 = vld [vmem:[#allocation11 + $0x160] sm:$0xff] }
 0x480   : > { %v1368_v60 = vadd.f32 %v1367_v56, %v1278_v14  ;;  %1752 = vmatprep.mubr.f32.mxu1 %v4098_v51  ;;  %2019 = vmatprep.mubr.f32.mxu0 %v4098_v51  ;;  %v1476_v14 = vld [vmem:[#allocation11 + $0x310] sm:$0xff]  ;;  %v2979_v52 = vpack.c.bf16 %v1565_v49, %v1557_v48  ;;  %v1573_v56 = vld [vmem:[#allocation11 + $0x618] sm:$0xff]  ;;  %v1431_v40 = vld [vmem:[#allocation11 + $0x1a8] sm:$0xff] }
 0x481   : > { %1753 = vmatmul.mubr.f32.gmra.mrb[14].mxu1 %v4100_v54  ;;  %2020 = vmatmul.mubr.f32.gmra.mrb[6].mxu0 %v4100_v54  ;;  %v4108_v1 = vmax.f32 %v1366_v55, 0.0  ;;  %v2961_v18 = vpack.c.bf16 %v1484_v15, %v1476_v14  ;;  %v1564_v55 = vld [vmem:[#allocation11 + $0x5d0] sm:$0xff]  ;;  %v1621_v11 = vld [vmem:[#allocation11 + $0x798] sm:$0xff]  ;;  %v1438_v48 = vld [vmem:[#allocation11 + $0x1e0] sm:$0xff] }
 0x482   : > { %v4106_v63 = vmax.f32 %v1368_v60, 0.0  ;;  %2946 = vmatpush1.bf16.msra.mxu1 %v2945_v53  ;;  %v1556_v53 = vld [vmem:[#allocation11 + $0x590] sm:$0xff]  ;;  %v1447_v49 = vld [vmem:[#allocation11 + $0x228] sm:$0xff] }
 0x483   : > { %2948 = vmatprep.subr.bf16.mxu1 %v2947_v57  ;;  %v1581_v57 = vld [vmem:[#allocation11 + $0x658] sm:$0xff]  ;;  %v2981_v58 = vpack.c.bf16 %v1564_v55, %v1556_v53  ;;  %v1572_v60 = vld [vmem:[#allocation11 + $0x610] sm:$0xff]  ;;  %v1446_v55 = vld [vmem:[#allocation11 + $0x220] sm:$0xff] }
 0x484   : > { %1758 = vmatprep.mubr.f32.mxu1 %v4106_v63  ;;  %2025 = vmatprep.mubr.f32.mxu0 %v4106_v63  ;;  %v2983_v59 = vpack.c.bf16 %v1581_v57, %v1573_v56  ;;  %v1620_v15 = vld [vmem:[#allocation11 + $0x790] sm:$0xff]  ;;  %v1454_v56 = vld [vmem:[#allocation11 + $0x260] sm:$0xff]  ;;  %v1463_v57 = vld [vmem:[#allocation11 + $0x2a8] sm:$0xff] }
 0x485   : > { %1759 = vmatmul.mubr.f32.gmra.mrb[16].mxu1 %v4108_v1  ;;  %2026 = vmatmul.mubr.f32.gmra.mrb[8].mxu0 %v4108_v1 }
 0x486   : > { %2950 = vmatpush1.bf16.msra.mxu1 %v2949_v0  ;;  %1829 = vmatprep.mubr.f32.mxu1 %v4082_v23  ;;  %v1597_v0 = vld [vmem:[#allocation11 + $0x6d8] sm:$0xff] }
 0x487   : > { %2952 = vmatprep.subr.bf16.mxu1 %v2951_v2  ;;  %v2985_v2 = vpack.c.bf16 %v1580_v61, %v1572_v60  ;;  %v2987_v3 = vpack.c.bf16 %v1597_v0, %v1589_v62  ;;  %v1462_v61 = vld [vmem:[#allocation11 + $0x2a0] sm:$0xff]  ;;  %v1479_v0 = vld [vmem:[#allocation11 + $0x328] sm:$0xff] }
 0x488   : > { %v1470_v62 = vld [vmem:[#allocation11 + $0x2e0] sm:$0xff] }
 0x48a   : > { %2954 = vmatpush1.bf16.msra.mxu1 %v2953_v6  ;;  %v1613_v6 = vld [vmem:[#allocation11 + $0x758] sm:$0xff] }
 0x48b   : > { %2956 = vmatprep.subr.bf16.mxu1 %v2955_v7  ;;  %v2989_v7 = vpack.c.bf16 %v1596_v4, %v1588_v26  ;;  %v2991_v8 = vpack.c.bf16 %v1613_v6, %v1605_v5  ;;  %v1478_v4 = vld [vmem:[#allocation11 + $0x320] sm:$0xff]  ;;  %v1495_v6 = vld [vmem:[#allocation11 + $0x3a8] sm:$0xff] }
 0x48c   : > { %v1486_v5 = vld [vmem:[#allocation11 + $0x360] sm:$0xff] }
 0x48e   : > { %2958 = vmatpush1.bf16.msra.mxu1 %v2957_v12  ;;  %v1629_v12 = vld [vmem:[#allocation11 + $0x7d8] sm:$0xff] }
 0x48f   : > { %2960 = vmatprep.subr.bf16.mxu1 %v2959_v13  ;;  %v2993_v13 = vpack.c.bf16 %v1612_v10, %v1604_v9  ;;  %v2995_v14 = vpack.c.bf16 %v1629_v12, %v1621_v11  ;;  %v1502_v10 = vld [vmem:[#allocation11 + $0x3e0] sm:$0xff]  ;;  %v1511_v11 = vld [vmem:[#allocation11 + $0x428] sm:$0xff] }
 0x490   : > { %v1519_v12 = vld [vmem:[#allocation11 + $0x468] sm:$0xff] }
 0x492   : > { %2962 = vmatpush1.bf16.msra.mxu1 %v2961_v18  ;;  %v1391_v18 = vld [vmem:[#allocation11 + $0x68] sm:$0xff] }
 0x493   : > { %2964 = vmatprep.subr.bf16.mxu1 %v2963_v19  ;;  %v2997_v19 = vpack.c.bf16 %v1628_v16, %v1620_v15  ;;  %v2999_v20 = vpack.c.bf16 %v1391_v18, %v1383_v17  ;;  %v1510_v15 = vld [vmem:[#allocation11 + $0x420] sm:$0xff]  ;;  %v1527_v17 = vld [vmem:[#allocation11 + $0x4a8] sm:$0xff] }
 0x494   : > { %v1518_v16 = vld [vmem:[#allocation11 + $0x460] sm:$0xff]  ;;  %v1535_v18 = vld [vmem:[#allocation11 + $0x4e8] sm:$0xff] }
 0x496   : > { %2966 = vmatpush1.bf16.msra.mxu1 %v2965_v25  ;;  %v1407_v25 = vld [vmem:[#allocation11 + $0xe8] sm:$0xff] }
 0x497   : > { %2968 = vmatprep.subr.bf16.mxu1 %v2967_v28  ;;  %v3001_v28 = vpack.c.bf16 %v1390_v22, %v1382_v21  ;;  %v3003_v29 = vpack.c.bf16 %v1407_v25, %v1399_v24  ;;  %v1526_v21 = vld [vmem:[#allocation11 + $0x4a0] sm:$0xff]  ;;  %v1543_v24 = vld [vmem:[#allocation11 + $0x528] sm:$0xff] }
 0x498   : > { %v1534_v22 = vld [vmem:[#allocation11 + $0x4e0] sm:$0xff]  ;;  %v1551_v25 = vld [vmem:[#allocation11 + $0x568] sm:$0xff] }
 0x49a   : > { %2970 = vmatpush1.bf16.msra.mxu1 %v2969_v33  ;;  %v1423_v33 = vld [vmem:[#allocation11 + $0x168] sm:$0xff] }
 0x49b   : > { %2972 = vmatprep.subr.bf16.mxu1 %v2971_v34  ;;  %v3005_v34 = vpack.c.bf16 %v1406_v31, %v1398_v30  ;;  %v3007_v35 = vpack.c.bf16 %v1423_v33, %v1415_v32  ;;  %v1542_v30 = vld [vmem:[#allocation11 + $0x520] sm:$0xff]  ;;  %v1559_v32 = vld [vmem:[#allocation11 + $0x5a8] sm:$0xff] }
 0x49c   : > { %v1550_v31 = vld [vmem:[#allocation11 + $0x560] sm:$0xff]  ;;  %v1567_v33 = vld [vmem:[#allocation11 + $0x5e8] sm:$0xff] }
 0x49e   : > { %2974 = vmatpush1.bf16.msra.mxu1 %v2973_v41  ;;  %v1439_v41 = vld [vmem:[#allocation11 + $0x1e8] sm:$0xff] }
 0x49f   : > { %2976 = vmatprep.subr.bf16.mxu1 %v2975_v42  ;;  %v3009_v42 = vpack.c.bf16 %v1422_v38, %v1414_v37  ;;  %v3011_v43 = vpack.c.bf16 %v1439_v41, %v1431_v40  ;;  %v1558_v37 = vld [vmem:[#allocation11 + $0x5a0] sm:$0xff]  ;;  %v1575_v40 = vld [vmem:[#allocation11 + $0x628] sm:$0xff] }
 0x4a0   : > { %v1566_v38 = vld [vmem:[#allocation11 + $0x5e0] sm:$0xff]  ;;  %v1583_v41 = vld [vmem:[#allocation11 + $0x668] sm:$0xff] }
 0x4a2   : > { %2978 = vmatpush1.bf16.msra.mxu1 %v2977_v50  ;;  %v1455_v50 = vld [vmem:[#allocation11 + $0x268] sm:$0xff] }
 0x4a3   : > { %2980 = vmatprep.subr.bf16.mxu1 %v2979_v52  ;;  %v3013_v52 = vpack.c.bf16 %v1438_v48, %v1430_v46  ;;  %v3015_v53 = vpack.c.bf16 %v1455_v50, %v1447_v49  ;;  %v1574_v46 = vld [vmem:[#allocation11 + $0x620] sm:$0xff]  ;;  %v1591_v49 = vld [vmem:[#allocation11 + $0x6a8] sm:$0xff] }
 0x4a4   : > { %v1582_v48 = vld [vmem:[#allocation11 + $0x660] sm:$0xff]  ;;  %v1599_v50 = vld [vmem:[#allocation11 + $0x6e8] sm:$0xff] }
 0x4a6   : > { %2982 = vmatpush1.bf16.msra.mxu1 %v2981_v58  ;;  %v1471_v58 = vld [vmem:[#allocation11 + $0x2e8] sm:$0xff] }
 0x4a7   : > { %2984 = vmatprep.subr.bf16.mxu1 %v2983_v59  ;;  %v3017_v59 = vpack.c.bf16 %v1454_v56, %v1446_v55  ;;  %v3019_v60 = vpack.c.bf16 %v1471_v58, %v1463_v57  ;;  %v1590_v55 = vld [vmem:[#allocation11 + $0x6a0] sm:$0xff]  ;;  %v1607_v57 = vld [vmem:[#allocation11 + $0x728] sm:$0xff] }
 0x4a8   : > { %v1598_v56 = vld [vmem:[#allocation11 + $0x6e0] sm:$0xff]  ;;  %v1615_v58 = vld [vmem:[#allocation11 + $0x768] sm:$0xff] }
 0x4aa   : > { %2986 = vmatpush1.bf16.msra.mxu1 %v2985_v2  ;;  %v1487_v2 = vld [vmem:[#allocation11 + $0x368] sm:$0xff] }
 0x4ab   : > { %2988 = vmatprep.subr.bf16.mxu1 %v2987_v3  ;;  %v3021_v3 = vpack.c.bf16 %v1470_v62, %v1462_v61  ;;  %v3023_v26 = vpack.c.bf16 %v1487_v2, %v1479_v0  ;;  %v1606_v61 = vld [vmem:[#allocation11 + $0x720] sm:$0xff]  ;;  %v1623_v0 = vld [vmem:[#allocation11 + $0x7a8] sm:$0xff] }
 0x4ac   : > { %v1614_v62 = vld [vmem:[#allocation11 + $0x760] sm:$0xff]  ;;  %v1631_v2 = vld [vmem:[#allocation11 + $0x7e8] sm:$0xff] }
 0x4ae   : > { %2990 = vmatpush1.bf16.msra.mxu1 %v2989_v7  ;;  %v1503_v7 = vld [vmem:[#allocation11 + $0x3e8] sm:$0xff] }
 0x4af   : > { %2992 = vmatprep.subr.bf16.mxu1 %v2991_v8  ;;  %v3025_v8 = vpack.c.bf16 %v1486_v5, %v1478_v4  ;;  %v3027_v9 = vpack.c.bf16 %v1503_v7, %v1495_v6  ;;  %v1622_v4 = vld [vmem:[#allocation11 + $0x7a0] sm:$0xff]  ;;  %v1662_v7 = vsub.s32 6, %v4046_v44 }
 0x4b0   : > { %v1630_v5 = vld [vmem:[#allocation11 + $0x7e0] sm:$0xff] }
 0x4b1   : > { %v3061_v6 = vpack.c.bf16 %v1630_v5, %v1622_v4 }
 0x4b2   : > { %2994 = vmatpush1.bf16.msra.mxu1 %v2993_v13 }
 0x4b3   : > { %2996 = vmatprep.subr.bf16.mxu1 %v2995_v14  ;;  %v3031_v14 = vpack.c.bf16 %v1519_v12, %v1511_v11 }
 0x4b6   : > { %2998 = vmatpush1.bf16.msra.mxu1 %v2997_v19  ;;  %v3033_v19 = vpack.c.bf16 %v1518_v16, %v1510_v15 }
 0x4b7   : > { %3000 = vmatprep.subr.bf16.mxu1 %v2999_v20  ;;  %v3035_v20 = vpack.c.bf16 %v1535_v18, %v1527_v17 }
 0x4b9   : > { %1830 = vmatmul.mubr.f32.vlgmr.msra.gmra.mrb[18].mxu1 %v4084_v27 }
 0x4ba   : > { %1835 = vmatprep.mubr.f32.mxu1 %v4090_v36  ;;  %3002 = vmatpush1.bf16.msra.mxu1 %v3001_v28  ;;  %v3037_v28 = vpack.c.bf16 %v1534_v22, %v1526_v21 }
 0x4bb   : > { %3004 = vmatprep.subr.bf16.mxu1 %v3003_v29  ;;  %v3039_v29 = vpack.c.bf16 %v1551_v25, %v1543_v24 }
 0x4bd   : > { %1836 = vmatmul.mubr.f32.gmra.mrb[20].mxu1 %v4092_v39 }
 0x4be   : > { %1841 = vmatprep.mubr.f32.mxu1 %v4098_v51  ;;  %3006 = vmatpush1.bf16.msra.mxu1 %v3005_v34  ;;  %v3041_v34 = vpack.c.bf16 %v1550_v31, %v1542_v30 }
 0x4bf   : > { %3008 = vmatprep.subr.bf16.mxu1 %v3007_v35  ;;  %v3043_v35 = vpack.c.bf16 %v1567_v33, %v1559_v32 }
 0x4c1   : > { %1842 = vmatmul.mubr.f32.gmra.mrb[22].mxu1 %v4100_v54 }
 0x4c2   : > { %1847 = vmatprep.mubr.f32.mxu1 %v4106_v63  ;;  %3010 = vmatpush1.bf16.msra.mxu1 %v3009_v42  ;;  %v3045_v42 = vpack.c.bf16 %v1566_v38, %v1558_v37 }
 0x4c3   : > { %3012 = vmatprep.subr.bf16.mxu1 %v3011_v43  ;;  %v3047_v43 = vpack.c.bf16 %v1583_v41, %v1575_v40 }
 0x4c5   : > { %1848 = vmatmul.mubr.f32.gmra.mrb[24].mxu1 %v4108_v1 }
 0x4c6   : > { %3014 = vmatpush1.bf16.msra.mxu1 %v3013_v52  ;;  %1918 = vmatprep.mubr.f32.mxu1 %v4082_v23  ;;  %v1494_v23 = vld [vmem:[#allocation11 + $0x3a0] sm:$0xff]  ;;  %v3049_v52 = vpack.c.bf16 %v1582_v48, %v1574_v46 }
 0x4c7   : > { %3016 = vmatprep.subr.bf16.mxu1 %v3015_v53  ;;  %v3029_v13 = vpack.c.bf16 %v1502_v10, %v1494_v23  ;;  %v3051_v53 = vpack.c.bf16 %v1599_v50, %v1591_v49 }
 0x4ca   : > { %3018 = vmatpush1.bf16.msra.mxu1 %v3017_v59  ;;  %v3053_v59 = vpack.c.bf16 %v1598_v56, %v1590_v55 }
 0x4cb   : > { %3020 = vmatprep.subr.bf16.mxu1 %v3019_v60  ;;  %v3055_v60 = vpack.c.bf16 %v1615_v58, %v1607_v57 }
 0x4ce   : > { %3022 = vmatpush1.bf16.msra.mxu1 %v3021_v3  ;;  %v3057_v3 = vpack.c.bf16 %v1614_v62, %v1606_v61 }
 0x4cf   : > { %3024 = vmatprep.subr.bf16.mxu1 %v3023_v26  ;;  %v3059_v26 = vpack.c.bf16 %v1631_v2, %v1623_v0 }
 0x4d2   : > { %3026 = vmatpush1.bf16.msra.mxu1 %v3025_v8  ;;  %v4134_v8 = vld [vmem:[%s4327_s14] sm:$0xff] }
 0x4d3   : > { %3028 = vmatprep.subr.bf16.mxu1 %v3027_v9 }
 0x4d6   : > { %3030 = vmatpush1.bf16.msra.mxu1 %v3029_v13 }
 0x4d7   : > { %3032 = vmatprep.subr.bf16.mxu1 %v3031_v14 }
 0x4da   : > { %3034 = vmatpush1.bf16.msra.mxu1 %v3033_v19 }
 0x4db   : > { %3036 = vmatprep.subr.bf16.mxu1 %v3035_v20 }
 0x4de   : > { %3038 = vmatpush1.bf16.msra.mxu1 %v3037_v28 }
 0x4df   : > { %3040 = vmatprep.subr.bf16.mxu1 %v3039_v29 }
 0x4e2   : > { %3042 = vmatpush1.bf16.msra.mxu1 %v3041_v34 }
 0x4e3   : > { %3044 = vmatprep.subr.bf16.mxu1 %v3043_v35 }
 0x4e6   : > { %3046 = vmatpush1.bf16.msra.mxu1 %v3045_v42 }
 0x4e7   : > { %3048 = vmatprep.subr.bf16.mxu1 %v3047_v43 }
 0x4ea   : > { %3050 = vmatpush1.bf16.msra.mxu1 %v3049_v52 }
 0x4eb   : > { %3052 = vmatprep.subr.bf16.mxu1 %v3051_v53 }
 0x4ee   : > { %3054 = vmatpush1.bf16.msra.mxu1 %v3053_v59 }
 0x4ef   : > { %3056 = vmatprep.subr.bf16.mxu1 %v3055_v60 }
 0x4f2   : > { %3058 = vmatpush1.bf16.msra.mxu1 %v3057_v3 }
 0x4f3   : > { %3060 = vmatprep.subr.bf16.mxu1 %v3059_v26 }
 0x4f6   : > { %3062 = vmatpush1.bf16.msra.mxu1 %v3061_v6 }
 0x4f9   : > { %1919 = vmatmul.mubr.f32.vlgmr.msra.gmra.mrb[26].mxu1 %v4084_v27  ;;  %v1666_v27 = vsub.s32 7, %v4046_v44 }
 0x4fa   : > { %1924 = vmatprep.mubr.f32.mxu1 %v4090_v36  ;;  %v1639_v36 = vrot.slane %v4134_v8, %v4049_v45 }
 0x4fd   : > { %1925 = vmatmul.mubr.f32.gmra.mrb[28].mxu1 %v4092_v39  ;;  %v4140_v39 = vrot.slane %v4134_v8, %v1662_v7 }
 0x4fe   : > { %1930 = vmatprep.mubr.f32.mxu1 %v4098_v51  ;;  %v4144_v51 = vrot.slane %v4134_v8, %v4055_v47 }
 0x501   : > { %1931 = vmatmul.mubr.f32.gmra.mrb[30].mxu1 %v4100_v54  ;;  %v4147_v54 = vrot.slane %v4134_v8, %v1666_v27 }
 0x502   : > { %1936 = vmatprep.mubr.f32.mxu1 %v4106_v63 }
 0x505   : > { %1937 = vmatmul.mubr.f32.gmra.mrb[32].mxu1 %v4108_v1 }
 0x54c   : > { %v1742_v63 = vpop.f32.mrb[10].mxu1  ;;  %v2009_v1 = vpop.f32.mrb[2].mxu0 }
 0x54d   : > { %v1743_v9 = vadd.f32 %v1742_v63, %v1639_v36  ;;  %v2010_v23 = vadd.f32 %v2009_v1, %v4140_v39  ;;  %v1744_v10 = vpop.f32.mrb[11].mxu1  ;;  %v2011_v11 = vpop.f32.mrb[3].mxu0 }
 0x54e   : > { %v1745_v12 = vadd.f32 %v1744_v10, %v4144_v51  ;;  %v2012_v45 = vadd.f32 %v2011_v11, %v4147_v54 }
 0x54f   : > { %v2476_v13 = vmul.f32 -1.442695, %v1743_v9  ;;  %v2482_v14 = vmul.f32 -1.442695, %v2010_v23 }
 0x550   : > { %v2477_v15 = vmul.f32 -1.442695, %v1745_v12  ;;  %v2483_v16 = vmul.f32 -1.442695, %v2012_v45  ;;  %v1748_v47 = vpop.f32.mrb[12].mxu1  ;;  %v2015_v17 = vpop.f32.mrb[4].mxu0 }
 0x551   : > { %3244 = vpow2.f32 %v2476_v13  ;;  %v1749_v18 = vadd.f32 %v1748_v47, %v1639_v36  ;;  %v2016_v19 = vadd.f32 %v2015_v17, %v4140_v39  ;;  %v1750_v20 = vpop.f32.mrb[13].mxu1  ;;  %v2017_v21 = vpop.f32.mrb[5].mxu0 }
 0x552   : > { %3246 = vpow2.f32 %v2482_v14  ;;  %v1751_v22 = vadd.f32 %v1750_v20, %v4144_v51  ;;  %v2018_v24 = vadd.f32 %v2017_v21, %v4147_v54 }
 0x553   : > { %3248 = vpow2.f32 %v2477_v15  ;;  %v2484_v25 = vmul.f32 -1.442695, %v1749_v18  ;;  %v2490_v28 = vmul.f32 -1.442695, %v2016_v19 }
 0x554   : > { %3250 = vpow2.f32 %v2483_v16  ;;  %v2485_v29 = vmul.f32 -1.442695, %v1751_v22  ;;  %v2491_v30 = vmul.f32 -1.442695, %v2018_v24  ;;  %v1754_v31 = vpop.f32.mrb[14].mxu1  ;;  %v2021_v32 = vpop.f32.mrb[6].mxu0 }
 0x555   : > { %3252 = vpow2.f32 %v2484_v25  ;;  %v1755_v33 = vadd.f32 %v1754_v31, %v1639_v36  ;;  %v2022_v34 = vadd.f32 %v2021_v32, %v4140_v39  ;;  %v1756_v35 = vpop.f32.mrb[15].mxu1  ;;  %v2023_v37 = vpop.f32.mrb[7].mxu0 }
 0x556   : > { %3254 = vpow2.f32 %v2490_v28  ;;  %v1757_v38 = vadd.f32 %v1756_v35, %v4144_v51  ;;  %v2024_v40 = vadd.f32 %v2023_v37, %v4147_v54 }
 0x557   : > { %3256 = vpow2.f32 %v2485_v29  ;;  %v2492_v41 = vmul.f32 -1.442695, %v1755_v33  ;;  %v2498_v42 = vmul.f32 -1.442695, %v2022_v34 }
 0x558   : > { %3258 = vpow2.f32 %v2491_v30  ;;  %v2493_v43 = vmul.f32 -1.442695, %v1757_v38  ;;  %v2499_v46 = vmul.f32 -1.442695, %v2024_v40  ;;  %v1760_v48 = vpop.f32.mrb[16].mxu1  ;;  %v2027_v49 = vpop.f32.mrb[8].mxu0 }
 0x559   : > { %3260 = vpow2.f32 %v2492_v41  ;;  %v1761_v50 = vadd.f32 %v1760_v48, %v1639_v36  ;;  %v1762_v52 = vpop.f32.mrb[17].mxu1  ;;  %v2029_v53 = vpop.f32.mrb[9].mxu0  ;;  %v2028_v63 = vadd.f32 %v2027_v49, %v4140_v39 }
 0x55a   : > { %3262 = vpow2.f32 %v2498_v42  ;;  %v1763_v23 = vadd.f32 %v1762_v52, %v4144_v51  ;;  %v2030_v12 = vadd.f32 %v2029_v53, %v4147_v54 }
 0x55b   : > { %v3245_v55 = vpop.eup %3244  ;;  %3264 = vpow2.f32 %v2493_v43  ;;  %v2500_v56 = vmul.f32 -1.442695, %v1761_v50  ;;  %v2506_v16 = vmul.f32 -1.442695, %v2028_v63 }
 0x55c   : > { %v3247_v57 = vpop.eup %3246  ;;  %v2128_v58 = vadd.f32 1.0, %v3245_v55  ;;  %3266 = vpow2.f32 %v2499_v46  ;;  %v2501_v17 = vmul.f32 -1.442695, %v1763_v23  ;;  %v2507_v51 = vmul.f32 -1.442695, %v2030_v12 }
 0x55d   : > { %v3249_v59 = vpop.eup %3248  ;;  %v2134_v60 = vadd.f32 1.0, %v3247_v57  ;;  %3268 = vpow2.f32 %v2500_v56 }
 0x55e   : > { %v3251_v61 = vpop.eup %3250  ;;  %3270 = vrcp.f32 %v2128_v58  ;;  %v2129_v62 = vadd.f32 1.0, %v3249_v59 }
 0x55f   : > { %v3253_v0 = vpop.eup %3252  ;;  %3272 = vrcp.f32 %v2134_v60  ;;  %v2135_v2 = vadd.f32 1.0, %v3251_v61 }
 0x560   : > { %v3255_v3 = vpop.eup %3254  ;;  %3274 = vrcp.f32 %v2129_v62  ;;  %v2136_v26 = vadd.f32 1.0, %v3253_v0 }
 0x561   : > { %v3257_v4 = vpop.eup %3256  ;;  %3276 = vrcp.f32 %v2135_v2  ;;  %v2142_v5 = vadd.f32 1.0, %v3255_v3 }
 0x562   : > { %v3259_v6 = vpop.eup %3258  ;;  %3278 = vrcp.f32 %v2136_v26  ;;  %v2137_v7 = vadd.f32 1.0, %v3257_v4 }
 0x563   : > { %v3261_v27 = vpop.eup %3260  ;;  %3280 = vrcp.f32 %v2142_v5  ;;  %v2143_v36 = vadd.f32 1.0, %v3259_v6 }
 0x564   : > { %v3263_v1 = vpop.eup %3262  ;;  %3282 = vrcp.f32 %v2137_v7  ;;  %v2144_v9 = vadd.f32 1.0, %v3261_v27 }
 0x565   : > { %v3265_v10 = vpop.eup %3264  ;;  %3284 = vrcp.f32 %v2143_v36  ;;  %v2150_v11 = vadd.f32 1.0, %v3263_v1 }
 0x566   : > { %v3267_v45 = vpop.eup %3266  ;;  %3286 = vrcp.f32 %v2144_v9  ;;  %v2145_v13 = vadd.f32 1.0, %v3265_v10 }
 0x567   : > { %v3269_v14 = vpop.eup %3268  ;;  %3288 = vrcp.f32 %v2150_v11  ;;  %v2151_v15 = vadd.f32 1.0, %v3267_v45 }
 0x568   : > { %v3271_v47 = vpop.eup %3270  ;;  %3290 = vrcp.f32 %v2145_v13  ;;  %v2152_v39 = vadd.f32 1.0, %v3269_v14 }
 0x569   : > { %v3273_v18 = vpop.eup %3272  ;;  %2224 = vst [vmem:[%s4162_s0] sm:$0xff] %v3271_v47  ;;  %3292 = vrcp.f32 %v2151_v15 }
 0x56a   : > { %v3275_v54 = vpop.eup %3274  ;;  %2230 = vst [vmem:[%s4162_s0 + $0x30] sm:$0xff] %v3273_v18  ;;  %3294 = vrcp.f32 %v2152_v39 }
 0x56b   : > { %v3277_v19 = vpop.eup %3276  ;;  %2225 = vst [vmem:[%s4162_s0 + $0x8] sm:$0xff] %v3275_v54  ;;  %3296 = vpow2.f32 %v2506_v16 }
 0x56c   : > { %v3279_v20 = vpop.eup %3278  ;;  %2231 = vst [vmem:[%s4162_s0 + $0x38] sm:$0xff] %v3277_v19  ;;  %3298 = vpow2.f32 %v2501_v17 }
 0x56d   : > { %v3281_v21 = vpop.eup %3280  ;;  %2232 = vst [vmem:[%s4162_s0 + $0x40] sm:$0xff] %v3279_v20  ;;  %3300 = vpow2.f32 %v2507_v51 }
 0x56e   : > { %v3283_v22 = vpop.eup %3282  ;;  %2238 = vst [vmem:[%s4162_s0 + $0x70] sm:$0xff] %v3281_v21 }
 0x56f   : > { %v3285_v24 = vpop.eup %3284  ;;  %2233 = vst [vmem:[%s4162_s0 + $0x48] sm:$0xff] %v3283_v22 }
 0x570   : > { %v3287_v25 = vpop.eup %3286  ;;  %2239 = vst [vmem:[%s4162_s0 + $0x78] sm:$0xff] %v3285_v24 }
 0x571   : > { %v3289_v28 = vpop.eup %3288  ;;  %2240 = vst [vmem:[%s4162_s0 + $0x80] sm:$0xff] %v3287_v25 }
 0x572   : > { %v3291_v29 = vpop.eup %3290  ;;  %2246 = vst [vmem:[%s4162_s0 + $0xb0] sm:$0xff] %v3289_v28 }
 0x573   : > { %v3293_v30 = vpop.eup %3292  ;;  %2241 = vst [vmem:[%s4162_s0 + $0x88] sm:$0xff] %v3291_v29 }
 0x574   : > { %v3295_v31 = vpop.eup %3294  ;;  %2247 = vst [vmem:[%s4162_s0 + $0xb8] sm:$0xff] %v3293_v30 }
 0x575   : > { %v3297_v32 = vpop.eup %3296  ;;  %2248 = vst [vmem:[%s4162_s0 + $0xc0] sm:$0xff] %v3295_v31 }
 0x576   : > { %v3299_v33 = vpop.eup %3298  ;;  %v2158_v34 = vadd.f32 1.0, %v3297_v32 }
 0x577   : > { %v3301_v35 = vpop.eup %3300  ;;  %v2153_v37 = vadd.f32 1.0, %v3299_v33 }
 0x578   : > { %3302 = vrcp.f32 %v2158_v34  ;;  %v2159_v38 = vadd.f32 1.0, %v3301_v35 }
 0x579   : > { %3304 = vrcp.f32 %v2153_v37 }
 0x57a   : > { %3306 = vrcp.f32 %v2159_v38 }
 0x57b   : > { %3557 = shalt.err (!%p3554_p1)
}
 0x57c   : > { %s3558_s2 = scalar_lea.hbm %s4181_s22, 256  ;;  %s3562_s16 = scalar_lea.hbm %s4328_s11, 512 }
 0x57d   : > { %p3559_p11 = scmp.ne.s32.totalorder %s4181_s22, %s3558_s2  ;;  %p3563_p3 = scmp.lt.u32.totalorder %s4181_s22, %s4328_s11 }
 0x57e   : > { %p3564_p13 = scmp.lt.u32.totalorder %s3562_s16, %s3558_s2  ;;  %p3566_p6 = scmp.lt.u32.totalorder %s3558_s2, %s4181_s22 }
 0x57f   : > { %p3560_p8 = pnand %p3559_p11, %p4329_p2 }
 0x580   : > { %p3565_p0 = por %p3564_p13, %p3563_p3 }
 0x581   : > { %p3561_p12 = pneg %p3560_p8 }
 0x582   : > { %p3567_p4 = por %p3566_p6, %p3565_p0 }
 0x584   : > { %p3568_p10 = pnand %p3567_p4, %p3561_p12 }
 0x586   : > { %3571 = shalt.err (!%p3568_p10)
}
 0x587   : > { %3156 = dma.vmem_to_hbm [thread:$0]  (%p4329_p2), %s2293_s12, 256, %s4181_s22, %s2262_s10   ;;  %v3303_v40 = vpop.eup %3302  ;;  %v1646_v43 = vsub.s32 2, %v4046_v44  ;;  %v1650_v46 = vsub.s32 3, %v4046_v44  ;;  %v1654_v31 = vsub.s32 4, %v4046_v44  ;;  %v1658_v32 = vsub.s32 5, %v4046_v44 }
 0x588   : > { %v3305_v41 = vpop.eup %3304  ;;  %2254 = vst [vmem:[%s4162_s0 + $0xf0] sm:$0xff] %v3303_v40  ;;  %s2517_s27 = sshll.u32 %s3759_s23, 10  ;;  %s2275_s22 = sshll.u32 %s4162_s0, 4  ;;  %s4235_s22 = int_to_ptr.vmem [resolvable:$true] %s2275_s22 }
 0x589   : > { %v3307_v42 = vpop.eup %3306  ;;  %2249 = vst [vmem:[%s4162_s0 + $0xc8] sm:$0xff] %v3305_v41  ;;  %v1647_v48 = vrot.slane %v4134_v8, %v1646_v43  ;;  %v1651_v49 = vrot.slane %v4134_v8, %v1650_v46  ;;  %v1655_v33 = vrot.slane %v4134_v8, %v1654_v31  ;;  %v1659_v34 = vrot.slane %v4134_v8, %v1658_v32  ;;  %s4330_s29 = sld [smem:[#allocation28_spill]]  ;;  %s2257_s4 = scalar_lea.sflag [#allocation4], %s4008_s25 }
 0x58a   : > { %2255 = vst [vmem:[%s4162_s0 + $0xf8] sm:$0xff] %v3307_v42  ;;  %s3572_s30 = scalar_lea.vmem %s4235_s22, 4096  ;;  %s3674_s23 = smov [#allocation13]  }
 0x58b   : > { %p3573_p5 = scmp.ne.s32.totalorder %s4235_s22, %s3572_s30  ;;  %s3576_s2 = sshll.u32 %s3674_s23, 4  ;;  %s3577_s2 = int_to_ptr.vmem [resolvable:$false] %s3576_s2 }
 0x58c   : > { %v1831_v50 = vpop.f32.mrb[18].mxu1  ;;  %s3578_s9 = scalar_lea.vmem %s3577_s2, 8192  ;;  %p3579_p1 = scmp.lt.s32.totalorder %s4235_s22, %s3577_s2 }
 0x58d   : > { %v1832_v52 = vadd.f32 %v1831_v50, %v1647_v48  ;;  %v1833_v53 = vpop.f32.mrb[19].mxu1  ;;  %p3574_p7 = pnand %p3573_p5, %p4329_p2  ;;  %p3580_p11 = scmp.lt.s32.totalorder %s3578_s9, %s3572_s30 }
 0x58e   : > { %v1834_v55 = vadd.f32 %v1833_v53, %v1651_v49 }
 0x58f   : > { %v2478_v56 = vmul.f32 -1.442695, %v1832_v52  ;;  %s4232_s6 = scalar_lea.hbm %s4330_s29, %s2517_s27  ;;  %p3575_p9 = pneg %p3574_p7 }
 0x590   : > { %v2479_v57 = vmul.f32 -1.442695, %v1834_v55  ;;  %v1837_v58 = vpop.f32.mrb[20].mxu1  ;;  %p3581_p8 = por %p3580_p11, %p3579_p1 }
 0x591   : > { %3308 = vpow2.f32 %v2478_v56  ;;  %v1838_v59 = vadd.f32 %v1837_v58, %v1647_v48  ;;  %v1839_v60 = vpop.f32.mrb[21].mxu1 }
 0x592   : > { %3310 = vpow2.f32 %v2479_v57  ;;  %v1840_v61 = vadd.f32 %v1839_v60, %v1651_v49  ;;  %p3582_p12 = pnand %p3581_p8, %p3575_p9 }
 0x593   : > { %v2486_v62 = vmul.f32 -1.442695, %v1838_v59 }
 0x594   : > { %v2487_v0 = vmul.f32 -1.442695, %v1840_v61  ;;  %v1843_v2 = vpop.f32.mrb[22].mxu1 }
 0x595   : > { %3312 = vpow2.f32 %v2486_v62  ;;  %v1844_v3 = vadd.f32 %v1843_v2, %v1647_v48  ;;  %v1845_v26 = vpop.f32.mrb[23].mxu1 }
 0x596   : > { %3314 = vpow2.f32 %v2487_v0  ;;  %v1846_v4 = vadd.f32 %v1845_v26, %v1651_v49 }
 0x597   : > { %v2494_v5 = vmul.f32 -1.442695, %v1844_v3 }
 0x598   : > { %v2495_v6 = vmul.f32 -1.442695, %v1846_v4  ;;  %v1849_v7 = vpop.f32.mrb[24].mxu1 }
 0x599   : > { %3316 = vpow2.f32 %v2494_v5  ;;  %v1850_v27 = vadd.f32 %v1849_v7, %v1647_v48  ;;  %v1851_v36 = vpop.f32.mrb[25].mxu1 }
 0x59a   : > { %3318 = vpow2.f32 %v2495_v6  ;;  %v1852_v63 = vadd.f32 %v1851_v36, %v1651_v49 }
 0x59b   : > { %v3309_v1 = vpop.eup %3308  ;;  %v2502_v9 = vmul.f32 -1.442695, %v1850_v27 }
 0x59c   : > { %v3311_v23 = vpop.eup %3310  ;;  %v2130_v10 = vadd.f32 1.0, %v3309_v1  ;;  %v2503_v11 = vmul.f32 -1.442695, %v1852_v63 }
 0x59d   : > { %v2131_v12 = vadd.f32 1.0, %v3311_v23  ;;  %3320 = vpow2.f32 %v2502_v9 }
 0x59e   : > { %3322 = vrcp.f32 %v2130_v10 }
 0x59f   : > { %v3313_v45 = vpop.eup %3312  ;;  %3324 = vrcp.f32 %v2131_v12 }
 0x5a0   : > { %v3315_v13 = vpop.eup %3314  ;;  %v2138_v14 = vadd.f32 1.0, %v3313_v45  ;;  %3326 = vpow2.f32 %v2503_v11 }
 0x5a1   : > { %v2139_v15 = vadd.f32 1.0, %v3315_v13 }
 0x5a2   : > { %3328 = vrcp.f32 %v2138_v14 }
 0x5a3   : > { %v3317_v16 = vpop.eup %3316  ;;  %3330 = vrcp.f32 %v2139_v15 }
 0x5a4   : > { %v3319_v47 = vpop.eup %3318  ;;  %v2146_v39 = vadd.f32 1.0, %v3317_v16 }
 0x5a5   : > { %v2147_v17 = vadd.f32 1.0, %v3319_v47 }
 0x5a6   : > { %3332 = vrcp.f32 %v2146_v39 }
 0x5a7   : > { %v3321_v18 = vpop.eup %3320  ;;  %3334 = vrcp.f32 %v2147_v17 }
 0x5a8   : > { %v3323_v51 = vpop.eup %3322  ;;  %v2154_v54 = vadd.f32 1.0, %v3321_v18 }
 0x5a9   : > { %v3325_v19 = vpop.eup %3324  ;;  %2226 = vst [vmem:[%s4162_s0 + $0x10] sm:$0xff] %v3323_v51 }
 0x5aa   : > { %v3327_v20 = vpop.eup %3326  ;;  %2227 = vst [vmem:[%s4162_s0 + $0x18] sm:$0xff] %v3325_v19  ;;  %3336 = vrcp.f32 %v2154_v54 }
 0x5ab   : > { %v2155_v21 = vadd.f32 1.0, %v3327_v20 }
 0x5ac   : > { %v3329_v22 = vpop.eup %3328 }
 0x5ad   : > { %v3331_v24 = vpop.eup %3330  ;;  %2234 = vst [vmem:[%s4162_s0 + $0x50] sm:$0xff] %v3329_v22  ;;  %3338 = vrcp.f32 %v2155_v21 }
 0x5ae   : > { %2235 = vst [vmem:[%s4162_s0 + $0x58] sm:$0xff] %v3331_v24 }
 0x5b0   : > { %v3333_v25 = vpop.eup %3332 }
 0x5b1   : > { %v3335_v28 = vpop.eup %3334  ;;  %2242 = vst [vmem:[%s4162_s0 + $0x90] sm:$0xff] %v3333_v25 }
 0x5b2   : > { %2243 = vst [vmem:[%s4162_s0 + $0x98] sm:$0xff] %v3335_v28 }
 0x5b4   : > { %v3337_v29 = vpop.eup %3336 }
 0x5b5   : > { %2250 = vst [vmem:[%s4162_s0 + $0xd0] sm:$0xff] %v3337_v29 }
 0x5b7   : > { %v3339_v30 = vpop.eup %3338 }
 0x5b8   : > { %2251 = vst [vmem:[%s4162_s0 + $0xd8] sm:$0xff] %v3339_v30 }
 0x5cc   : > { %v1920_v35 = vpop.f32.mrb[26].mxu1 }
 0x5cd   : > { %v1921_v37 = vadd.f32 %v1920_v35, %v1655_v33  ;;  %v1922_v38 = vpop.f32.mrb[27].mxu1 }
 0x5ce   : > { %v1923_v40 = vadd.f32 %v1922_v38, %v1659_v34 }
 0x5cf   : > { %v2480_v41 = vmul.f32 -1.442695, %v1921_v37 }
 0x5d0   : > { %v2481_v42 = vmul.f32 -1.442695, %v1923_v40  ;;  %v1926_v43 = vpop.f32.mrb[28].mxu1 }
 0x5d1   : > { %3340 = vpow2.f32 %v2480_v41  ;;  %v1927_v46 = vadd.f32 %v1926_v43, %v1655_v33  ;;  %v1928_v48 = vpop.f32.mrb[29].mxu1 }
 0x5d2   : > { %3342 = vpow2.f32 %v2481_v42  ;;  %v1929_v49 = vadd.f32 %v1928_v48, %v1659_v34 }
 0x5d3   : > { %v2488_v50 = vmul.f32 -1.442695, %v1927_v46 }
 0x5d4   : > { %v2489_v52 = vmul.f32 -1.442695, %v1929_v49  ;;  %v1932_v53 = vpop.f32.mrb[30].mxu1 }
 0x5d5   : > { %3344 = vpow2.f32 %v2488_v50  ;;  %v1933_v44 = vadd.f32 %v1932_v53, %v1655_v33  ;;  %v1934_v55 = vpop.f32.mrb[31].mxu1 }
 0x5d6   : > { %3346 = vpow2.f32 %v2489_v52  ;;  %v1935_v8 = vadd.f32 %v1934_v55, %v1659_v34 }
 0x5d7   : > { %v2496_v56 = vmul.f32 -1.442695, %v1933_v44 }
 0x5d8   : > { %v2497_v57 = vmul.f32 -1.442695, %v1935_v8  ;;  %v1938_v58 = vpop.f32.mrb[32].mxu1 }
 0x5d9   : > { %3348 = vpow2.f32 %v2496_v56  ;;  %v1939_v59 = vadd.f32 %v1938_v58, %v1655_v33  ;;  %v1940_v60 = vpop.f32.mrb[33].mxu1 }
 0x5da   : > { %3350 = vpow2.f32 %v2497_v57  ;;  %v1941_v61 = vadd.f32 %v1940_v60, %v1659_v34 }
 0x5db   : > { %v3341_v62 = vpop.eup %3340  ;;  %v2504_v0 = vmul.f32 -1.442695, %v1939_v59 }
 0x5dc   : > { %v3343_v2 = vpop.eup %3342  ;;  %v2132_v3 = vadd.f32 1.0, %v3341_v62  ;;  %v2505_v26 = vmul.f32 -1.442695, %v1941_v61 }
 0x5dd   : > { %v2133_v4 = vadd.f32 1.0, %v3343_v2  ;;  %3352 = vpow2.f32 %v2504_v0 }
 0x5de   : > { %3354 = vrcp.f32 %v2132_v3 }
 0x5df   : > { %v3345_v5 = vpop.eup %3344  ;;  %3356 = vrcp.f32 %v2133_v4 }
 0x5e0   : > { %v3347_v6 = vpop.eup %3346  ;;  %v2140_v7 = vadd.f32 1.0, %v3345_v5  ;;  %3358 = vpow2.f32 %v2505_v26 }
 0x5e1   : > { %v2141_v27 = vadd.f32 1.0, %v3347_v6 }
 0x5e2   : > { %3360 = vrcp.f32 %v2140_v7 }
 0x5e3   : > { %v3349_v36 = vpop.eup %3348  ;;  %3362 = vrcp.f32 %v2141_v27 }
 0x5e4   : > { %v3351_v63 = vpop.eup %3350  ;;  %v2148_v1 = vadd.f32 1.0, %v3349_v36 }
 0x5e5   : > { %v2149_v9 = vadd.f32 1.0, %v3351_v63 }
 0x5e6   : > { %3364 = vrcp.f32 %v2148_v1 }
 0x5e7   : > { %v3353_v23 = vpop.eup %3352  ;;  %3366 = vrcp.f32 %v2149_v9 }
 0x5e8   : > { %v3355_v10 = vpop.eup %3354  ;;  %v2156_v11 = vadd.f32 1.0, %v3353_v23 }
 0x5e9   : > { %v3357_v12 = vpop.eup %3356  ;;  %2228 = vst [vmem:[%s4162_s0 + $0x20] sm:$0xff] %v3355_v10 }
 0x5ea   : > { %v3359_v45 = vpop.eup %3358  ;;  %2229 = vst [vmem:[%s4162_s0 + $0x28] sm:$0xff] %v3357_v12  ;;  %3368 = vrcp.f32 %v2156_v11 }
 0x5eb   : > { %v2157_v13 = vadd.f32 1.0, %v3359_v45 }
 0x5ec   : > { %v3361_v14 = vpop.eup %3360 }
 0x5ed   : > { %v3363_v15 = vpop.eup %3362  ;;  %2236 = vst [vmem:[%s4162_s0 + $0x60] sm:$0xff] %v3361_v14  ;;  %3370 = vrcp.f32 %v2157_v13 }
 0x5ee   : > { %2237 = vst [vmem:[%s4162_s0 + $0x68] sm:$0xff] %v3363_v15 }
 0x5f0   : > { %v3365_v16 = vpop.eup %3364 }
 0x5f1   : > { %v3367_v47 = vpop.eup %3366  ;;  %2244 = vst [vmem:[%s4162_s0 + $0xa0] sm:$0xff] %v3365_v16 }
 0x5f2   : > { %2245 = vst [vmem:[%s4162_s0 + $0xa8] sm:$0xff] %v3367_v47 }
 0x5f4   : > { %v3369_v39 = vpop.eup %3368 }
 0x5f5   : > { %2252 = vst [vmem:[%s4162_s0 + $0xe0] sm:$0xff] %v3369_v39 }
 0x5f7   : > { %v3371_v17 = vpop.eup %3370 }
 0x5f8   : > { %2253 = vst [vmem:[%s4162_s0 + $0xe8] sm:$0xff] %v3371_v17 }
 0x5f9   : > { %3585 = shalt.err (!%p3582_p12)
}
 0x5fa   : > { %s3586_s0 = scalar_lea.hbm %s4232_s6, 4096  ;;  %s3590_s24 = scalar_lea.hbm %s4330_s29, 8192 }
 0x5fb   : > { %p3587_p3 = scmp.ne.s32.totalorder %s4232_s6, %s3586_s0  ;;  %p3591_p6 = scmp.lt.u32.totalorder %s4232_s6, %s4330_s29 }
 0x5fc   : > { %p3592_p4 = scmp.lt.u32.totalorder %s3590_s24, %s3586_s0  ;;  %p3594_p5 = scmp.lt.u32.totalorder %s3586_s0, %s4232_s6 }
 0x5fd   : > { %p3588_p13 = pnand %p3587_p3, %p4329_p2 }
 0x5fe   : > { %p3593_p10 = por %p3592_p4, %p3591_p6 }
 0x5ff   : > { %p3589_p0 = pneg %p3588_p13 }
 0x600   : > { %p3595_p7 = por %p3594_p5, %p3593_p10 }
 0x602   : > { %p3596_p9 = pnand %p3595_p7, %p3589_p0 }
 0x604   : > { %3599 = shalt.err (!%p3596_p9)
}
 0x605   : > { %s3675_s12 = smov 1024   ;;  %s3676_s10 = smov 2048  }
 0x606   : > { %s3677_s30 = smov 64  }
 0x607   : > { %3155 = dma.vmem_to_hbm [thread:$0]  (%p4329_p2), %s4235_s22, 4096, %s4232_s6, %s2257_s4, %s3675_s12, %s3676_s10, %s3677_s30  }
 0x608 PF: > { %s2304_s23 = sand.u32 1, %s3646_s17   ;;  %p4331_p1 = scmp.ne.s32.totalorder %s4315_s26, 0 }
 0x609   : > { %p4332_p11 = scmp.ge.s32.totalorder %s3658_s20, 2  ;;  %s2305_s2 = scalar_lea.sflag [#allocation4], %s2304_s23 }
 0x60b   : > { %p3180_p8 = pnand %p4332_p11, %p4331_p1 }
 0x60d   : > { %3637 = dma.done.wait (!%p3180_p8), %s2305_s2, 4096  }
 0x60e   : > { %3639 = vsyncadd (!%p3180_p8), %s2305_s2, 4294963200  ;;  %s2314_s9 = scalar_lea.sflag [#allocation15], %s2304_s23 }
 0x60f   : > { %3641 = dma.done.wait (!%p3180_p8), %s2314_s9, 256  }
 0x610   : > { %3643 = vsyncadd (!%p3180_p8), %s2314_s9, 4294967040  ;;  %p33_p2 = scmp.ge.s32.totalorder %s3887_s13, 4   ;;  %s4333_s17 = smov %s3650_s18 }
 0x611   : > { %s4334_s18 = smov %s3654_s19  ;;  %s4335_s19 = smov %s3898_s21 }
 0x612   : > { %s4336_s20 = smov %s3887_s13  ;;  %35 = sbr.rel (!%p33_p2) target bundleno = 19 (0x13), region = 151 }
 0x619   :  { %2319 = vsyncpa [#allocation3], 1 }
 0x61a   :  { %2321 = vsyncpa [#allocation3 + $0x1], 1 }
 0x61b   :  { %2322 = vsyncpa [#allocation6], 1 }
 0x61c   :  { %2324 = vsyncpa [#allocation6 + $0x1], 1 }
 0x61d   :  { %2325 = vsyncpa [#allocation9], 1 }
 0x61e   :  { %2326 = vsyncpa [#allocation12], 1 }
 0x61f   :  { %2327 = vsyncpa [#allocation4], 1 }
 0x620   :  { %2329 = vsyncpa [#allocation4 + $0x1], 1 }
 0x621   :  { %2330 = vsyncpa [#allocation15], 1 }
 0x622   :  { %2332 = vsyncpa [#allocation15 + $0x1], 1 }

</bundles_post_ra>
